<compile_context>
chip_gen: v7x
topology: tpu7x:2x2x1
jax: 0.10.0
libtpu: 0.0.40
codegen_flags: <defaults>
</compile_context>

<pallas_src>
import functools

import jax
import jax.numpy as jnp
from jax.experimental import pallas as pl
from jax.experimental.pallas import tpu as pltpu


# ----------------------------- Pallas kernel --------------------------------

def _conv_layer_kernel(p_ref, w_ref, b_ref, o_ref, *, p_real, do_norm, do_act,
                       eps=1e-5, slope=0.2):
    # p_ref: (1, P_pad, CK)   bf16 im2col patches for one sample
    # w_ref: (CK, TN)         bf16 weight tile (one Cout tile)
    # b_ref: (1, TN)          f32 bias tile (zeros when the conv has no bias)
    # o_ref: (1, P_pad, TN)   f32 output tile
    x = p_ref[0]                                                     # (P_pad, CK)
    y = jnp.dot(x, w_ref[...], preferred_element_type=jnp.float32)   # (P_pad, TN)
    y = y + b_ref[...]                                               # f32 epilogue
    if do_norm:
        # InstanceNorm2d(affine=False, eps=1e-5): per-(sample, channel) stats
        # over the spatial axis, biased variance.  Single-pass: sum and
        # sum-of-squares together.  Padded rows are exactly zero (norm layers
        # have no bias), so we just divide by the real spatial size.
        inv_p = 1.0 / p_real
        s1 = jnp.sum(y, axis=0, keepdims=True)
        s2 = jnp.sum(y * y, axis=0, keepdims=True)
        mean = s1 * inv_p
        var = jnp.maximum(s2 * inv_p - mean * mean, 0.0)
        y = (y - mean) * jax.lax.rsqrt(var + eps)
    if do_act:
        # LeakyReLU(0.2)
        y = jnp.where(y >= 0, y, slope * y)
    o_ref[0] = y.astype(o_ref.dtype)


def conv_layer_pallas(patches, w_mat, bias, *, p_real, do_norm, do_act):
    """patches: (N, P_pad, CK) f32, w_mat: (CK, Cout) f32, bias: (1, Cout) f32.
    Returns (N, P_pad, Cout) f32 (Cout padding already sliced off)."""
    N, P_pad, CK = patches.shape
    Cout = w_mat.shape[1]

    # Lane-dense output: pad Cout to a multiple of 128; prefer 256-wide tiles
    # (v6e/v7x MXU is 2x256x256) when the padded Cout is 256-aligned.
    cout_pad = max(128, -(-Cout // 128) * 128)
    tn = 256 if cout_pad % 256 == 0 else 128
    if cout_pad != Cout:
        w_mat = jnp.pad(w_mat, ((0, 0), (0, cout_pad - Cout)))
        bias = jnp.pad(bias, ((0, 0), (0, cout_pad - Cout)))

    kernel = functools.partial(_conv_layer_kernel, p_real=float(p_real),
                               do_norm=do_norm, do_act=do_act)

    out = pl.pallas_call(
        kernel,
        out_shape=jax.ShapeDtypeStruct((N, P_pad, cout_pad), jnp.float32),
        grid=(N, cout_pad // tn),
        in_specs=[
            # Patches block index is independent of j -> no redundant re-fetch
            # while sweeping the Cout tiles of one sample.
            pl.BlockSpec((1, P_pad, CK), lambda n, j: (n, 0, 0)),
            pl.BlockSpec((CK, tn), lambda n, j: (0, j)),
            pl.BlockSpec((1, tn), lambda n, j: (0, j)),
        ],
        out_specs=pl.BlockSpec((1, P_pad, tn), lambda n, j: (n, 0, j)),
        compiler_params=pltpu.CompilerParams(
            dimension_semantics=("parallel", "parallel"),
        ),
    )(patches.astype(jnp.bfloat16), w_mat.astype(jnp.bfloat16), bias)
    return out[:, :, :Cout]


# ------------------------------- JAX glue ------------------------------------

def im2col(x, k, stride, pad, p_pad_to=8):
    """x: (N, C, H, W) -> patches (N, P_pad, C*k*k), flatten order (c, i, j).
    P is zero-padded up to a multiple of `p_pad_to` (full sublane rows)."""
    N, C, H, W = x.shape
    xp = jnp.pad(x, ((0, 0), (0, 0), (pad, pad), (pad, pad)))
    Ho = (H + 2 * pad - k) // stride + 1
    Wo = (W + 2 * pad - k) // stride + 1
    cols = []
    for i in range(k):
        for j in range(k):
            cols.append(xp[:, :, i:i + stride * Ho:stride, j:j + stride * Wo:stride])
    p = jnp.stack(cols, axis=2)                 # (N, C, k*k, Ho, Wo)
    p = p.reshape(N, C * k * k, Ho * Wo)        # flatten order (c, i, j)
    p = jnp.transpose(p, (0, 2, 1))             # (N, P, C*k*k)
    P = Ho * Wo
    P_pad = -(-P // p_pad_to) * p_pad_to
    if P_pad != P:
        p = jnp.pad(p, ((0, 0), (0, P_pad - P), (0, 0)))
    return p, Ho, Wo


def spectral_normalize(w, n_iters=50):
    """Normalize conv weight (Cout, Cin, K, K) by its top singular value,
    matching torch spectral_norm's w.reshape(Cout, -1) convention.
    # TODO(synk): torch runs 1 power iteration per forward with a persisted
    # random u; we run a converged power iteration on the fixed synthetic weight.
    """
    cout = w.shape[0]
    w_mat = w.reshape(cout, -1)
    u = jax.random.normal(jax.random.PRNGKey(1234), (cout,), dtype=w.dtype)
    u = u / (jnp.linalg.norm(u) + 1e-12)
    v = None
    for _ in range(n_iters):
        v = w_mat.T @ u
        v = v / (jnp.linalg.norm(v) + 1e-12)
        u = w_mat @ v
        u = u / (jnp.linalg.norm(u) + 1e-12)
    sigma = u @ (w_mat @ v)
    return w / sigma


# Layer configs for NLayerDiscriminator(input_nc=19, ndf=64, n_layers=3,
# norm='spectralinstance', use_sigmoid=False, getIntermFeat=True).
# Note: per the reference module, the first and last convs are NOT wrapped by
# the norm layer, so they keep their bias and get no spectral/instance norm.
def build_layer_cfgs(input_nc=19, ndf=64, n_layers=3):
    cfgs = []
    # model0: Conv(input_nc, ndf, 4, s=2, p=2) + bias, LeakyReLU
    cfgs.append(dict(cin=input_nc, cout=ndf, stride=2, bias=True,
                     spectral=False, inorm=False, act=True))
    nf = ndf
    for _ in range(1, n_layers):
        nf_prev, nf = nf, min(nf * 2, 512)
        cfgs.append(dict(cin=nf_prev, cout=nf, stride=2, bias=False,
                         spectral=True, inorm=True, act=True))
    nf_prev, nf = nf, min(nf * 2, 512)
    cfgs.append(dict(cin=nf_prev, cout=nf, stride=1, bias=False,
                     spectral=True, inorm=True, act=True))
    # final: Conv(nf, 1, 4, s=1, p=2) + bias, no activation
    cfgs.append(dict(cin=nf, cout=1, stride=1, bias=True,
                     spectral=False, inorm=False, act=False))
    return cfgs


def init_params(cfgs, key, kw=4):
    params = []
    for cfg in cfgs:
        key, kw_key, kb_key = jax.random.split(key, 3)
        fan_in = cfg["cin"] * kw * kw
        bound = 1.0 / jnp.sqrt(fan_in)
        w = jax.random.uniform(kw_key, (cfg["cout"], cfg["cin"], kw, kw),
                               jnp.float32, -bound, bound)
        if cfg["spectral"]:
            w = spectral_normalize(w)
        if cfg["bias"]:
            b = jax.random.uniform(kb_key, (cfg["cout"],), jnp.float32,
                                   -bound, bound)
        else:
            b = jnp.zeros((cfg["cout"],), jnp.float32)
        # flatten weight to (CK, Cout) with the same (c, i, j) order as im2col
        w_mat = w.reshape(cfg["cout"], -1).T
        params.append(dict(w_mat=w_mat, b=b.reshape(1, -1)))
    return params


def nlayer_discriminator_forward(x, cfgs, params, kw=4, padw=2):
    """Returns list of intermediate features (getIntermFeat=True), NCHW each."""
    res = []
    h = x
    for li, (cfg, prm) in enumerate(zip(cfgs, params)):
        is_last = li == len(cfgs) - 1
        n = h.shape[0]
        cout = prm["w_mat"].shape[1]
        if is_last:
            # Final Cout=1 conv: 1-wide lane output is a poor fit for the MXU /
            # store path, so keep it as a plain XLA einsum (per perf guidance).
            patches, ho, wo = im2col(h, kw, cfg["stride"], padw, p_pad_to=1)
            y = jnp.einsum('npk,kc->npc', patches, prm["w_mat"]) + prm["b"]
        else:
            patches, ho, wo = im2col(h, kw, cfg["stride"], padw, p_pad_to=8)
            y = conv_layer_pallas(patches, prm["w_mat"], prm["b"],
                                  p_real=ho * wo,
                                  do_norm=cfg["inorm"], do_act=cfg["act"])
            y = y[:, :ho * wo]                     # drop padded spatial rows
        h = jnp.transpose(y, (0, 2, 1)).reshape(n, cout, ho, wo)
        res.append(h)
    return res


# --------------------------------- main --------------------------------------

if __name__ == "__main__":
    key = jax.random.PRNGKey(0)
    kx, kp = jax.random.split(key)

    # NCHW input, input_nc=19 as in the module defaults, small spatial size.
    x = jax.random.normal(kx, (2, 19, 16, 16), jnp.float32)

    cfgs = build_layer_cfgs(input_nc=19, ndf=64, n_layers=3)
    params = init_params(cfgs, kp)

    fwd = jax.jit(lambda xx, pp: nlayer_discriminator_forward(xx, cfgs, pp))
    outs = fwd(x, params)
    outs = [jax.block_until_ready(o) for o in outs]

    # Sanity: 5 intermediate features with the expected shapes.
    expected = [(2, 64, 9, 9), (2, 128, 5, 5), (2, 256, 3, 3),
                (2, 512, 4, 4), (2, 1, 5, 5)]
    assert [tuple(o.shape) for o in outs] == expected, \
        [tuple(o.shape) for o in outs]
    assert all(bool(jnp.all(jnp.isfinite(o))) for o in outs)

    print("KERNEL_OK")
</pallas_src>

<mosaic_0001>
module attributes {stable_mosaic.version = 11 : i64} {
  func.func @_conv_layer_kernel(%arg0: i32, %arg1: i32, %arg2: memref<1x88x304xbf16, #tpu.memory_space<vmem>>, %arg3: memref<304x128xbf16, #tpu.memory_space<vmem>>, %arg4: memref<1x128xf32, #tpu.memory_space<vmem>>, %arg5: memref<1x88x128xf32, #tpu.memory_space<vmem>>) attributes {dimension_semantics = [#tpu.dimension_semantics<parallel>, #tpu.dimension_semantics<parallel>], iteration_bounds = array<i64: 2, 1>, scalar_prefetch = 0 : i64, scratch_operands = 0 : i64, tpu.core_type = #tpu.core_type<tc>, window_params = [{transform_indices = @transform_0, window_bounds = array<i64: 1, 88, 304>}, {transform_indices = @transform_1, window_bounds = array<i64: 304, 128>}, {transform_indices = @transform_2, window_bounds = array<i64: 1, 128>}, {transform_indices = @transform_3, window_bounds = array<i64: 1, 88, 128>}]} {
    %c0 = arith.constant 0 : index
    %c0_0 = arith.constant 0 : index
    %c0_1 = arith.constant 0 : index
    %0 = vector.load %arg2[%c0, %c0_0, %c0_1] : memref<1x88x304xbf16, #tpu.memory_space<vmem>>, vector<1x88x304xbf16>
    %1 = vector.shape_cast %0 : vector<1x88x304xbf16> to vector<88x304xbf16>
    %c0_2 = arith.constant 0 : index
    %c0_3 = arith.constant 0 : index
    %2 = vector.load %arg3[%c0_2, %c0_3] : memref<304x128xbf16, #tpu.memory_space<vmem>>, vector<304x128xbf16>
    %cst = arith.constant dense<0.000000e+00> : vector<88x128xf32>
    %3 = tpu.matmul %1, %2, %cst {dimension_numbers = #tpu.dot_dimension_numbers<[1], [0], [0], [1], [0, 0, 1, 1], [], []>} : vector<88x304xbf16>, vector<304x128xbf16>, vector<88x128xf32> -> vector<88x128xf32>
    %c0_4 = arith.constant 0 : index
    %c0_5 = arith.constant 0 : index
    %4 = vector.load %arg4[%c0_4, %c0_5] : memref<1x128xf32, #tpu.memory_space<vmem>>, vector<1x128xf32>
    %5 = vector.broadcast %4 : vector<1x128xf32> to vector<88x128xf32>
    %6 = arith.addf %3, %5 : vector<88x128xf32>
    %cst_6 = arith.constant 0.000000e+00 : f32
    %7 = vector.broadcast %cst_6 : f32 to vector<88x128xf32>
    %8 = arith.cmpf oge, %6, %7 : vector<88x128xf32>
    %cst_7 = arith.constant 2.000000e-01 : f32
    %9 = vector.broadcast %cst_7 : f32 to vector<88x128xf32>
    %10 = arith.mulf %9, %6 : vector<88x128xf32>
    %11 = arith.select %8, %6, %10 : vector<88x128xi1>, vector<88x128xf32>
    %c0_8 = arith.constant 0 : index
    %c0_9 = arith.constant 0 : index
    %c0_10 = arith.constant 0 : index
    %12 = vector.load %arg5[%c0_8, %c0_9, %c0_10] : memref<1x88x128xf32, #tpu.memory_space<vmem>>, vector<1x88x128xf32>
    %13 = vector.shape_cast %12 : vector<1x88x128xf32> to vector<88x128xf32>
    %14 = vector.shape_cast %11 : vector<88x128xf32> to vector<1x88x128xf32>
    tpu.vector_store %arg5[%c0_8, %c0_9, %c0_10], %14 {strides = array<i32>} : memref<1x88x128xf32, #tpu.memory_space<vmem>>, vector<1x88x128xf32>,
    return
  }
  func.func @transform_0(%arg0: i32, %arg1: i32) -> (i32, i32, i32) {
    %c0_i32 = arith.constant 0 : i32
    %c0_i32_0 = arith.constant 0 : i32
    %c0_i32_1 = arith.constant 0 : i32
    return %arg0, %c0_i32, %c0_i32_0 : i32, i32, i32
  }
  func.func @transform_1(%arg0: i32, %arg1: i32) -> (i32, i32) {
    %c0_i32 = arith.constant 0 : i32
    %c0_i32_0 = arith.constant 0 : i32
    return %c0_i32, %arg1 : i32, i32
  }
  func.func @transform_2(%arg0: i32, %arg1: i32) -> (i32, i32) {
    %c0_i32 = arith.constant 0 : i32
    %c0_i32_0 = arith.constant 0 : i32
    return %c0_i32, %arg1 : i32, i32
  }
  func.func @transform_3(%arg0: i32, %arg1: i32) -> (i32, i32, i32) {
    %c0_i32 = arith.constant 0 : i32
    %c0_i32_0 = arith.constant 0 : i32
    return %arg0, %c0_i32, %arg1 : i32, i32, i32
  }
}

module attributes {stable_mosaic.version = 11 : i64} {
  func.func @_conv_layer_kernel(%arg0: i32, %arg1: i32, %arg2: memref<1x32x1024xbf16, #tpu.memory_space<vmem>>, %arg3: memref<1024x128xbf16, #tpu.memory_space<vmem>>, %arg4: memref<1x128xf32, #tpu.memory_space<vmem>>, %arg5: memref<1x32x128xf32, #tpu.memory_space<vmem>>) attributes {dimension_semantics = [#tpu.dimension_semantics<parallel>, #tpu.dimension_semantics<parallel>], iteration_bounds = array<i64: 2, 1>, scalar_prefetch = 0 : i64, scratch_operands = 0 : i64, tpu.core_type = #tpu.core_type<tc>, window_params = [{transform_indices = @transform_0, window_bounds = array<i64: 1, 32, 1024>}, {transform_indices = @transform_1, window_bounds = array<i64: 1024, 128>}, {transform_indices = @transform_2, window_bounds = array<i64: 1, 128>}, {transform_indices = @transform_3, window_bounds = array<i64: 1, 32, 128>}]} {
    %c0 = arith.constant 0 : index
    %c0_0 = arith.constant 0 : index
    %c0_1 = arith.constant 0 : index
    %0 = vector.load %arg2[%c0, %c0_0, %c0_1] : memref<1x32x1024xbf16, #tpu.memory_space<vmem>>, vector<1x32x1024xbf16>
    %1 = vector.shape_cast %0 : vector<1x32x1024xbf16> to vector<32x1024xbf16>
    %c0_2 = arith.constant 0 : index
    %c0_3 = arith.constant 0 : index
    %2 = vector.load %arg3[%c0_2, %c0_3] : memref<1024x128xbf16, #tpu.memory_space<vmem>>, vector<1024x128xbf16>
    %cst = arith.constant dense<0.000000e+00> : vector<32x128xf32>
    %3 = tpu.matmul %1, %2, %cst {dimension_numbers = #tpu.dot_dimension_numbers<[1], [0], [0], [1], [0, 0, 1, 1], [], []>} : vector<32x1024xbf16>, vector<1024x128xbf16>, vector<32x128xf32> -> vector<32x128xf32>
    %c0_4 = arith.constant 0 : index
    %c0_5 = arith.constant 0 : index
    %4 = vector.load %arg4[%c0_4, %c0_5] : memref<1x128xf32, #tpu.memory_space<vmem>>, vector<1x128xf32>
    %5 = vector.broadcast %4 : vector<1x128xf32> to vector<32x128xf32>
    %6 = arith.addf %3, %5 : vector<32x128xf32>
    %cst_6 = arith.constant dense<0.000000e+00> : vector<128xf32>
    %7 = vector.multi_reduction <add>, %6, %cst_6 [0] : vector<32x128xf32> to vector<128xf32>
    %8 = vector.shape_cast %7 : vector<128xf32> to vector<1x128xf32>
    %9 = arith.mulf %6, %6 : vector<32x128xf32>
    %cst_7 = arith.constant dense<0.000000e+00> : vector<128xf32>
    %10 = vector.multi_reduction <add>, %9, %cst_7 [0] : vector<32x128xf32> to vector<128xf32>
    %11 = vector.shape_cast %10 : vector<128xf32> to vector<1x128xf32>
    %cst_8 = arith.constant 4.000000e-02 : f32
    %12 = vector.broadcast %cst_8 : f32 to vector<1x128xf32>
    %13 = arith.mulf %8, %12 : vector<1x128xf32>
    %cst_9 = arith.constant 4.000000e-02 : f32
    %14 = vector.broadcast %cst_9 : f32 to vector<1x128xf32>
    %15 = arith.mulf %11, %14 : vector<1x128xf32>
    %16 = arith.mulf %13, %13 : vector<1x128xf32>
    %17 = arith.subf %15, %16 : vector<1x128xf32>
    %cst_10 = arith.constant 0.000000e+00 : f32
    %18 = vector.broadcast %cst_10 : f32 to vector<1x128xf32>
    %19 = arith.maximumf %17, %18 : vector<1x128xf32>
    %20 = vector.broadcast %13 : vector<1x128xf32> to vector<32x128xf32>
    %21 = arith.subf %6, %20 : vector<32x128xf32>
    %cst_11 = arith.constant 9.99999974E-6 : f32
    %22 = vector.broadcast %cst_11 : f32 to vector<1x128xf32>
    %23 = arith.addf %19, %22 : vector<1x128xf32>
    %24 = math.rsqrt %23 : vector<1x128xf32>
    %25 = vector.broadcast %24 : vector<1x128xf32> to vector<32x128xf32>
    %26 = arith.mulf %21, %25 : vector<32x128xf32>
    %cst_12 = arith.constant 0.000000e+00 : f32
    %27 = vector.broadcast %cst_12 : f32 to vector<32x128xf32>
    %28 = arith.cmpf oge, %26, %27 : vector<32x128xf32>
    %cst_13 = arith.constant 2.000000e-01 : f32
    %29 = vector.broadcast %cst_13 : f32 to vector<32x128xf32>
    %30 = arith.mulf %29, %26 : vector<32x128xf32>
    %31 = arith.select %28, %26, %30 : vector<32x128xi1>, vector<32x128xf32>
    %c0_14 = arith.constant 0 : index
    %c0_15 = arith.constant 0 : index
    %c0_16 = arith.constant 0 : index
    %32 = vector.load %arg5[%c0_14, %c0_15, %c0_16] : memref<1x32x128xf32, #tpu.memory_space<vmem>>, vector<1x32x128xf32>
    %33 = vector.shape_cast %32 : vector<1x32x128xf32> to vector<32x128xf32>
    %34 = vector.shape_cast %31 : vector<32x128xf32> to vector<1x32x128xf32>
    tpu.vector_store %arg5[%c0_14, %c0_15, %c0_16], %34 {strides = array<i32>} : memref<1x32x128xf32, #tpu.memory_space<vmem>>, vector<1x32x128xf32>,
    return
  }
  func.func @transform_0(%arg0: i32, %arg1: i32) -> (i32, i32, i32) {
    %c0_i32 = arith.constant 0 : i32
    %c0_i32_0 = arith.constant 0 : i32
    %c0_i32_1 = arith.constant 0 : i32
    return %arg0, %c0_i32, %c0_i32_0 : i32, i32, i32
  }
  func.func @transform_1(%arg0: i32, %arg1: i32) -> (i32, i32) {
    %c0_i32 = arith.constant 0 : i32
    %c0_i32_0 = arith.constant 0 : i32
    return %c0_i32, %arg1 : i32, i32
  }
  func.func @transform_2(%arg0: i32, %arg1: i32) -> (i32, i32) {
    %c0_i32 = arith.constant 0 : i32
    %c0_i32_0 = arith.constant 0 : i32
    return %c0_i32, %arg1 : i32, i32
  }
  func.func @transform_3(%arg0: i32, %arg1: i32) -> (i32, i32, i32) {
    %c0_i32 = arith.constant 0 : i32
    %c0_i32_0 = arith.constant 0 : i32
    return %arg0, %c0_i32, %arg1 : i32, i32, i32
  }
}

module attributes {stable_mosaic.version = 11 : i64} {
  func.func @_conv_layer_kernel(%arg0: i32, %arg1: i32, %arg2: memref<1x16x2048xbf16, #tpu.memory_space<vmem>>, %arg3: memref<2048x256xbf16, #tpu.memory_space<vmem>>, %arg4: memref<1x256xf32, #tpu.memory_space<vmem>>, %arg5: memref<1x16x256xf32, #tpu.memory_space<vmem>>) attributes {dimension_semantics = [#tpu.dimension_semantics<parallel>, #tpu.dimension_semantics<parallel>], iteration_bounds = array<i64: 2, 1>, scalar_prefetch = 0 : i64, scratch_operands = 0 : i64, tpu.core_type = #tpu.core_type<tc>, window_params = [{transform_indices = @transform_0, window_bounds = array<i64: 1, 16, 2048>}, {transform_indices = @transform_1, window_bounds = array<i64: 2048, 256>}, {transform_indices = @transform_2, window_bounds = array<i64: 1, 256>}, {transform_indices = @transform_3, window_bounds = array<i64: 1, 16, 256>}]} {
    %c0 = arith.constant 0 : index
    %c0_0 = arith.constant 0 : index
    %c0_1 = arith.constant 0 : index
    %0 = vector.load %arg2[%c0, %c0_0, %c0_1] : memref<1x16x2048xbf16, #tpu.memory_space<vmem>>, vector<1x16x2048xbf16>
    %1 = vector.shape_cast %0 : vector<1x16x2048xbf16> to vector<16x2048xbf16>
    %c0_2 = arith.constant 0 : index
    %c0_3 = arith.constant 0 : index
    %2 = vector.load %arg3[%c0_2, %c0_3] : memref<2048x256xbf16, #tpu.memory_space<vmem>>, vector<2048x256xbf16>
    %cst = arith.constant dense<0.000000e+00> : vector<16x256xf32>
    %3 = tpu.matmul %1, %2, %cst {dimension_numbers = #tpu.dot_dimension_numbers<[1], [0], [0], [1], [0, 0, 1, 1], [], []>} : vector<16x2048xbf16>, vector<2048x256xbf16>, vector<16x256xf32> -> vector<16x256xf32>
    %c0_4 = arith.constant 0 : index
    %c0_5 = arith.constant 0 : index
    %4 = vector.load %arg4[%c0_4, %c0_5] : memref<1x256xf32, #tpu.memory_space<vmem>>, vector<1x256xf32>
    %5 = vector.broadcast %4 : vector<1x256xf32> to vector<16x256xf32>
    %6 = arith.addf %3, %5 : vector<16x256xf32>
    %cst_6 = arith.constant dense<0.000000e+00> : vector<256xf32>
    %7 = vector.multi_reduction <add>, %6, %cst_6 [0] : vector<16x256xf32> to vector<256xf32>
    %8 = vector.shape_cast %7 : vector<256xf32> to vector<1x256xf32>
    %9 = arith.mulf %6, %6 : vector<16x256xf32>
    %cst_7 = arith.constant dense<0.000000e+00> : vector<256xf32>
    %10 = vector.multi_reduction <add>, %9, %cst_7 [0] : vector<16x256xf32> to vector<256xf32>
    %11 = vector.shape_cast %10 : vector<256xf32> to vector<1x256xf32>
    %cst_8 = arith.constant 0.111111112 : f32
    %12 = vector.broadcast %cst_8 : f32 to vector<1x256xf32>
    %13 = arith.mulf %8, %12 : vector<1x256xf32>
    %cst_9 = arith.constant 0.111111112 : f32
    %14 = vector.broadcast %cst_9 : f32 to vector<1x256xf32>
    %15 = arith.mulf %11, %14 : vector<1x256xf32>
    %16 = arith.mulf %13, %13 : vector<1x256xf32>
    %17 = arith.subf %15, %16 : vector<1x256xf32>
    %cst_10 = arith.constant 0.000000e+00 : f32
    %18 = vector.broadcast %cst_10 : f32 to vector<1x256xf32>
    %19 = arith.maximumf %17, %18 : vector<1x256xf32>
    %20 = vector.broadcast %13 : vector<1x256xf32> to vector<16x256xf32>
    %21 = arith.subf %6, %20 : vector<16x256xf32>
    %cst_11 = arith.constant 9.99999974E-6 : f32
    %22 = vector.broadcast %cst_11 : f32 to vector<1x256xf32>
    %23 = arith.addf %19, %22 : vector<1x256xf32>
    %24 = math.rsqrt %23 : vector<1x256xf32>
    %25 = vector.broadcast %24 : vector<1x256xf32> to vector<16x256xf32>
    %26 = arith.mulf %21, %25 : vector<16x256xf32>
    %cst_12 = arith.constant 0.000000e+00 : f32
    %27 = vector.broadcast %cst_12 : f32 to vector<16x256xf32>
    %28 = arith.cmpf oge, %26, %27 : vector<16x256xf32>
    %cst_13 = arith.constant 2.000000e-01 : f32
    %29 = vector.broadcast %cst_13 : f32 to vector<16x256xf32>
    %30 = arith.mulf %29, %26 : vector<16x256xf32>
    %31 = arith.select %28, %26, %30 : vector<16x256xi1>, vector<16x256xf32>
    %c0_14 = arith.constant 0 : index
    %c0_15 = arith.constant 0 : index
    %c0_16 = arith.constant 0 : index
    %32 = vector.load %arg5[%c0_14, %c0_15, %c0_16] : memref<1x16x256xf32, #tpu.memory_space<vmem>>, vector<1x16x256xf32>
    %33 = vector.shape_cast %32 : vector<1x16x256xf32> to vector<16x256xf32>
    %34 = vector.shape_cast %31 : vector<16x256xf32> to vector<1x16x256xf32>
    tpu.vector_store %arg5[%c0_14, %c0_15, %c0_16], %34 {strides = array<i32>} : memref<1x16x256xf32, #tpu.memory_space<vmem>>, vector<1x16x256xf32>,
    return
  }
  func.func @transform_0(%arg0: i32, %arg1: i32) -> (i32, i32, i32) {
    %c0_i32 = arith.constant 0 : i32
    %c0_i32_0 = arith.constant 0 : i32
    %c0_i32_1 = arith.constant 0 : i32
    return %arg0, %c0_i32, %c0_i32_0 : i32, i32, i32
  }
  func.func @transform_1(%arg0: i32, %arg1: i32) -> (i32, i32) {
    %c0_i32 = arith.constant 0 : i32
    %c0_i32_0 = arith.constant 0 : i32
    return %c0_i32, %arg1 : i32, i32
  }
  func.func @transform_2(%arg0: i32, %arg1: i32) -> (i32, i32) {
    %c0_i32 = arith.constant 0 : i32
    %c0_i32_0 = arith.constant 0 : i32
    return %c0_i32, %arg1 : i32, i32
  }
  func.func @transform_3(%arg0: i32, %arg1: i32) -> (i32, i32, i32) {
    %c0_i32 = arith.constant 0 : i32
    %c0_i32_0 = arith.constant 0 : i32
    return %arg0, %c0_i32, %arg1 : i32, i32, i32
  }
}

module attributes {stable_mosaic.version = 11 : i64} {
  func.func @_conv_layer_kernel(%arg0: i32, %arg1: i32, %arg2: memref<1x16x4096xbf16, #tpu.memory_space<vmem>>, %arg3: memref<4096x256xbf16, #tpu.memory_space<vmem>>, %arg4: memref<1x256xf32, #tpu.memory_space<vmem>>, %arg5: memref<1x16x256xf32, #tpu.memory_space<vmem>>) attributes {dimension_semantics = [#tpu.dimension_semantics<parallel>, #tpu.dimension_semantics<parallel>], iteration_bounds = array<i64: 2, 2>, scalar_prefetch = 0 : i64, scratch_operands = 0 : i64, tpu.core_type = #tpu.core_type<tc>, window_params = [{transform_indices = @transform_0, window_bounds = array<i64: 1, 16, 4096>}, {transform_indices = @transform_1, window_bounds = array<i64: 4096, 256>}, {transform_indices = @transform_2, window_bounds = array<i64: 1, 256>}, {transform_indices = @transform_3, window_bounds = array<i64: 1, 16, 256>}]} {
    %c0 = arith.constant 0 : index
    %c0_0 = arith.constant 0 : index
    %c0_1 = arith.constant 0 : index
    %0 = vector.load %arg2[%c0, %c0_0, %c0_1] : memref<1x16x4096xbf16, #tpu.memory_space<vmem>>, vector<1x16x4096xbf16>
    %1 = vector.shape_cast %0 : vector<1x16x4096xbf16> to vector<16x4096xbf16>
    %c0_2 = arith.constant 0 : index
    %c0_3 = arith.constant 0 : index
    %2 = vector.load %arg3[%c0_2, %c0_3] : memref<4096x256xbf16, #tpu.memory_space<vmem>>, vector<4096x256xbf16>
    %cst = arith.constant dense<0.000000e+00> : vector<16x256xf32>
    %3 = tpu.matmul %1, %2, %cst {dimension_numbers = #tpu.dot_dimension_numbers<[1], [0], [0], [1], [0, 0, 1, 1], [], []>} : vector<16x4096xbf16>, vector<4096x256xbf16>, vector<16x256xf32> -> vector<16x256xf32>
    %c0_4 = arith.constant 0 : index
    %c0_5 = arith.constant 0 : index
    %4 = vector.load %arg4[%c0_4, %c0_5] : memref<1x256xf32, #tpu.memory_space<vmem>>, vector<1x256xf32>
    %5 = vector.broadcast %4 : vector<1x256xf32> to vector<16x256xf32>
    %6 = arith.addf %3, %5 : vector<16x256xf32>
    %cst_6 = arith.constant dense<0.000000e+00> : vector<256xf32>
    %7 = vector.multi_reduction <add>, %6, %cst_6 [0] : vector<16x256xf32> to vector<256xf32>
    %8 = vector.shape_cast %7 : vector<256xf32> to vector<1x256xf32>
    %9 = arith.mulf %6, %6 : vector<16x256xf32>
    %cst_7 = arith.constant dense<0.000000e+00> : vector<256xf32>
    %10 = vector.multi_reduction <add>, %9, %cst_7 [0] : vector<16x256xf32> to vector<256xf32>
    %11 = vector.shape_cast %10 : vector<256xf32> to vector<1x256xf32>
    %cst_8 = arith.constant 6.250000e-02 : f32
    %12 = vector.broadcast %cst_8 : f32 to vector<1x256xf32>
    %13 = arith.mulf %8, %12 : vector<1x256xf32>
    %cst_9 = arith.constant 6.250000e-02 : f32
    %14 = vector.broadcast %cst_9 : f32 to vector<1x256xf32>
    %15 = arith.mulf %11, %14 : vector<1x256xf32>
    %16 = arith.mulf %13, %13 : vector<1x256xf32>
    %17 = arith.subf %15, %16 : vector<1x256xf32>
    %cst_10 = arith.constant 0.000000e+00 : f32
    %18 = vector.broadcast %cst_10 : f32 to vector<1x256xf32>
    %19 = arith.maximumf %17, %18 : vector<1x256xf32>
    %20 = vector.broadcast %13 : vector<1x256xf32> to vector<16x256xf32>
    %21 = arith.subf %6, %20 : vector<16x256xf32>
    %cst_11 = arith.constant 9.99999974E-6 : f32
    %22 = vector.broadcast %cst_11 : f32 to vector<1x256xf32>
    %23 = arith.addf %19, %22 : vector<1x256xf32>
    %24 = math.rsqrt %23 : vector<1x256xf32>
    %25 = vector.broadcast %24 : vector<1x256xf32> to vector<16x256xf32>
    %26 = arith.mulf %21, %25 : vector<16x256xf32>
    %cst_12 = arith.constant 0.000000e+00 : f32
    %27 = vector.broadcast %cst_12 : f32 to vector<16x256xf32>
    %28 = arith.cmpf oge, %26, %27 : vector<16x256xf32>
    %cst_13 = arith.constant 2.000000e-01 : f32
    %29 = vector.broadcast %cst_13 : f32 to vector<16x256xf32>
    %30 = arith.mulf %29, %26 : vector<16x256xf32>
    %31 = arith.select %28, %26, %30 : vector<16x256xi1>, vector<16x256xf32>
    %c0_14 = arith.constant 0 : index
    %c0_15 = arith.constant 0 : index
    %c0_16 = arith.constant 0 : index
    %32 = vector.load %arg5[%c0_14, %c0_15, %c0_16] : memref<1x16x256xf32, #tpu.memory_space<vmem>>, vector<1x16x256xf32>
    %33 = vector.shape_cast %32 : vector<1x16x256xf32> to vector<16x256xf32>
    %34 = vector.shape_cast %31 : vector<16x256xf32> to vector<1x16x256xf32>
    tpu.vector_store %arg5[%c0_14, %c0_15, %c0_16], %34 {strides = array<i32>} : memref<1x16x256xf32, #tpu.memory_space<vmem>>, vector<1x16x256xf32>,
    return
  }
  func.func @transform_0(%arg0: i32, %arg1: i32) -> (i32, i32, i32) {
    %c0_i32 = arith.constant 0 : i32
    %c0_i32_0 = arith.constant 0 : i32
    %c0_i32_1 = arith.constant 0 : i32
    return %arg0, %c0_i32, %c0_i32_0 : i32, i32, i32
  }
  func.func @transform_1(%arg0: i32, %arg1: i32) -> (i32, i32) {
    %c0_i32 = arith.constant 0 : i32
    %c0_i32_0 = arith.constant 0 : i32
    return %c0_i32, %arg1 : i32, i32
  }
  func.func @transform_2(%arg0: i32, %arg1: i32) -> (i32, i32) {
    %c0_i32 = arith.constant 0 : i32
    %c0_i32_0 = arith.constant 0 : i32
    return %c0_i32, %arg1 : i32, i32
  }
  func.func @transform_3(%arg0: i32, %arg1: i32) -> (i32, i32, i32) {
    %c0_i32 = arith.constant 0 : i32
    %c0_i32_0 = arith.constant 0 : i32
    return %arg0, %c0_i32, %arg1 : i32, i32, i32
  }
}

</mosaic_0001>

<bundles_post_ra>
// kernel: _lambda_.4
= control target key start
LH: loop header
LB: loop body
LE: loop exit
PB: predicated region body
PF: predicated region fallthrough
CT: control target
= control target key end

     0   :  { %s1079_s12 = smov 0   ;;  %s1081_s13 = smov 0   ;;  %s1230_s0 = inlined_call_operand.vmem [shape: bf16[2,88,304], index: 0, kind: input, shape index: {}]   ;;  %s1231_s1 = inlined_call_operand.vmem [shape: bf16[304,128], index: 1, kind: input, shape index: {}]   ;;  %s1232_s2 = inlined_call_operand.vmem [shape: f32[1,128], index: 2, kind: input, shape index: {}]   ;;  %s1233_s3 = inlined_call_operand.vmem [shape: f32[2,88,128], index: 3, kind: output, shape index: {}]  }
   0x1   :  { %s1083_s14 = smov 0  }
   0x2 LB: > { %s25_s15 = sadd.s32 1, %s1053_s13  ;;  %p823_p0 = scmp.ge.s32.totalorder %s1057_s14, 1  ;;  %s1057_s14 = sphi %s1083_s14, %s13_s14   ;;  %s1053_s13 = sphi %s1081_s13, %s1235_s13   ;;  %s1049_s12 = sphi %s1079_s12, %s1234_s12  }
   0x3   : > { %p27_p1 = scmp.ge.s32.totalorder %s25_s15, 2  ;;  %p168_p2 = scmp.lt.s32.totalorder %s1057_s14, 3 }
   0x5   : > { %s1237_s15 = smov (%p27_p1, %s25_s15), 0  ;;  %p169_p3 = pnand %p823_p0, %p168_p2 }
   0x6   : > { %v993_v0 = vld [vmem:[%s1231_s1 + $0x40] sm:$0xff] (!%p169_p3)   ;;  %v995_v2 = vld [vmem:[%s1231_s1 + $0x48] sm:$0xff] (!%p169_p3)   ;;  %p202_p4 = scmp.lt.s32.totalorder (!%p169_p3), %s1049_s12, 1  ;;  %v997_v4 = vld [vmem:[%s1231_s1 + $0x50] sm:$0xff] (!%p169_p3)   ;;  %vm489_vm0 = vcmask (!%p169_p3), 392192  }
   0x7   : > { %172 = sbr.rel (%p169_p3) target bundleno = 296 (0x128), region = 32  ;;  %v994_v1 = vld [vmem:[%s1231_s1] sm:$0xff] (!%p169_p3)   ;;  %872 = vmatprep.subr.bf16.mxu0 (!%p169_p3), %v993_v0  ;;  %951 = vmatprep.subr.bf16.mxu1 (!%p169_p3), %v993_v0  ;;  %v996_v3 = vld [vmem:[%s1231_s1 + $0x8] sm:$0xff] (!%p169_p3)   ;;  %v998_v5 = vld [vmem:[%s1231_s1 + $0x10] sm:$0xff] (!%p169_p3)  }
   0x8   : > { %873 = vmatpush3.bf16.msra.mxu0 (!%p169_p3), %v994_v1  ;;  %959 = vmatpush3.bf16.msra.mxu1 (!%p169_p3), %v994_v1  ;;  %v999_v6 = vld [vmem:[%s1231_s1 + $0x58] sm:$0xff] (!%p169_p3)   ;;  %v1001_v8 = vld [vmem:[%s1231_s1 + $0x60] sm:$0xff] (!%p169_p3)   ;;  %v1003_v10 = vld [vmem:[%s1231_s1 + $0x68] sm:$0xff] (!%p169_p3)  }
   0x9   : > { %874 = vmatprep.subr.bf16.mxu0 (!%p169_p3), %v995_v2  ;;  %952 = vmatprep.subr.bf16.mxu1 (!%p169_p3), %v995_v2  ;;  %v1000_v7 = vld [vmem:[%s1231_s1 + $0x18] sm:$0xff] (!%p169_p3)   ;;  %v1002_v9 = vld [vmem:[%s1231_s1 + $0x20] sm:$0xff] (!%p169_p3)   ;;  %v1004_v14 = vld [vmem:[%s1231_s1 + $0x28] sm:$0xff] (!%p169_p3)  }
   0xa   : > { %v1005_v15 = vld [vmem:[%s1231_s1 + $0x70] sm:$0xff] (!%p169_p3)   ;;  %v1007_v17 = vld [vmem:[%s1231_s1 + $0x78] sm:$0xff] (!%p169_p3)   ;;  %v1014_v19 = vld [vmem:[%s1231_s1 + $0x80] sm:$0xff] (!%p169_p3)  }
   0xb   : > { %v1006_v16 = vld [vmem:[%s1231_s1 + $0x30] sm:$0xff] (!%p169_p3)   ;;  %v1008_v18 = vld [vmem:[%s1231_s1 + $0x38] sm:$0xff] (!%p169_p3)   ;;  %v1015_v23 = vld [vmem:[%s1231_s1 + $0x88] sm:$0xff] (!%p169_p3)  }
   0xc   : > { %875 = vmatpush3.bf16.msra.mxu0 (!%p169_p3), %v996_v3  ;;  %960 = vmatpush3.bf16.msra.mxu1 (!%p169_p3), %v996_v3  ;;  %v1019_v25 = vld [vmem:[%s1231_s1 + $0x90] sm:$0xff] (!%p169_p3)   ;;  %v1190_v51 = vld [vmem:[%s1232_s2] ss:$0 sm:$0xff] (!%p169_p3) }
   0xd   : > { %876 = vmatprep.subr.bf16.mxu0 (!%p169_p3), %v997_v4  ;;  %953 = vmatprep.subr.bf16.mxu1 (!%p169_p3), %v997_v4 }
   0xe   : > { %s1239_s12 = smov (!%p202_p4, %s1049_s12), 1 }
   0xf   : > { %s967_s30 = smul.u32 132, %s1239_s12 }
  0x10   : > { %877 = vmatpush3.bf16.msra.mxu0 %v998_v5  ;;  %961 = vmatpush3.bf16.msra.mxu1 %v998_v5 }
  0x11   : > { %878 = vmatprep.subr.bf16.mxu0 %v999_v6  ;;  %954 = vmatprep.subr.bf16.mxu1 %v999_v6  ;;  %s1130_s10 = scalar_lea.vmem %s1230_s0, %s967_s30 }
  0x12   : > { %v1011_v11 = vld [vmem:[%s1130_s10 + $0x4] ss:$12 sps:$4 sm:$0xff]   ;;  %v243_v12 = vld [vmem:[%s1130_s10 + $0x78] sm:$0xff]  ;;  %v1009_v20 = vld [vmem:[%s1130_s10] ss:$12 sps:$4 sm:$0xff]  }
  0x13   : > { %v843_v13 = vcombine.high %v243_v12, %v243_v12  ;;  %540 = vmatprep.mubr.bf16.mxu0 %v1011_v11  ;;  %v842_v21 = vcombine.low %v243_v12, %v243_v12  ;;  %v1016_v22 = vld [vmem:[%s1130_s10 + $0x1c] ss:$12 sps:$4 sm:$0xff]   ;;  %v1018_v26 = vld [vmem:[%s1130_s10 + $0x18] ss:$12 sps:$4 sm:$0xff]   ;;  %v1022_v27 = vld [vmem:[%s1130_s10 + $0x34] ss:$12 sps:$4 sm:$0xff]  }
  0x14   : > { %879 = vmatpush3.bf16.msra.mxu0 %v1000_v7  ;;  %962 = vmatpush3.bf16.msra.mxu1 %v1000_v7  ;;  %v1020_v24 = vld [vmem:[%s1130_s10 + $0x8] ss:$12 sps:$4 sm:$0xff]   ;;  %v1021_v28 = vld [vmem:[%s1130_s10 + $0x20] ss:$12 sps:$4 sm:$0xff]   ;;  %v1025_v29 = vld [vmem:[%s1130_s10 + $0x38] ss:$12 sps:$4 sm:$0xff]  }
  0x15   : > { %880 = vmatprep.subr.bf16.mxu0 %v1001_v8  ;;  %955 = vmatprep.subr.bf16.mxu1 %v1001_v8  ;;  %v1024_v30 = vld [vmem:[%s1130_s10 + $0x30] ss:$12 sps:$4 sm:$0xff]   ;;  %v1027_v31 = vld [vmem:[%s1130_s10 + $0x4c] ss:$12 sps:$4 sm:$0xff]   ;;  %v1030_v33 = vld [vmem:[%s1130_s10 + $0x68] ss:$12 sps:$4 sm:$0xff]  }
  0x16   : > { %580 = vmatprep.mubr.bf16.mxu1 %v843_v13  ;;  %v1026_v32 = vld [vmem:[%s1130_s10 + $0x50] ss:$12 sps:$4 sm:$0xff]   ;;  %v1029_v34 = vld [vmem:[%s1130_s10 + $0x48] ss:$12 sps:$4 sm:$0xff]   ;;  %v1031_v36 = vld [vmem:[%s1130_s10 + $0x80] ss:$0 sps:$4 sm:$0xff]  }
  0x17   : > { %v1032_v35 = vld [vmem:[%s1130_s10 + $0x64] ss:$12 sps:$4 sm:$0xff]   ;;  %v1034_v37 = vld [vmem:[%s1130_s10 + $0x60] ss:$12 sps:$4 sm:$0xff]   ;;  %s968_s10 = smul.u32 88, %s1239_s12 }
  0x18   : > { %881 = vmatpush3.bf16.msra.mxu0 %v1002_v9  ;;  %963 = vmatpush3.bf16.msra.mxu1 %v1002_v9 }
  0x19   : > { %882 = vmatprep.subr.bf16.mxu0 %v1003_v10  ;;  %956 = vmatprep.subr.bf16.mxu1 %v1003_v10  ;;  %s1200_s17 = scalar_lea.vmem %s1233_s3, %s968_s10 }
  0x1c   : > { %883 = vmatpush3.bf16.msra.mxu0 %v1004_v14  ;;  %964 = vmatpush3.bf16.msra.mxu1 %v1004_v14 }
  0x1d   : > { %884 = vmatprep.subr.bf16.mxu0 %v1005_v15  ;;  %957 = vmatprep.subr.bf16.mxu1 %v1005_v15 }
  0x20   : > { %885 = vmatpush3.bf16.msra.mxu0 %v1006_v16  ;;  %965 = vmatpush3.bf16.msra.mxu1 %v1006_v16 }
  0x21   : > { %886 = vmatprep.subr.bf16.mxu0 %v1007_v17  ;;  %958 = vmatprep.subr.bf16.mxu1 %v1007_v17 }
  0x24   : > { %887 = vmatpush3.bf16.msra.mxu0 %v1008_v18  ;;  %966 = vmatpush3.bf16.msra.mxu1 %v1008_v18 }
  0x25   : > { %933 = vmatprep.subr.bf16.mxu1 %v1014_v19 }
  0x27   : > { %541 = vmatmul.mubr.bf16.vlgmr.msra.gmra.mrb[0].mxu0 %v1009_v20  ;;  %581 = vmatmul.mubr.bf16.vlgmr.msra.gmra.mrb[0].mxu1 %v842_v21 }
  0x28   : > { %934 = vmatpush3.bf16.msra.mxu1 %v1014_v19  ;;  %548 = vmatprep.mubr.bf16.mxu0 %v1016_v22 }
  0x29   : > { %935 = vmatprep.subr.bf16.mxu1 %v1015_v23  ;;  %939 = vmatprep.mubr.msk.bf16.mxu1 %vm489_vm0, %v1020_v24 }
  0x2c   : > { %936 = vmatpush3.bf16.msra.mxu1 %v1015_v23 }
  0x2d   : > { %937 = vmatprep.subr.bf16.mxu1 %v1019_v25 }
  0x2f   : > { %549 = vmatmul.mubr.bf16.gmra.mrb[4].mxu0 %v1018_v26 }
  0x30   : > { %938 = vmatpush3.bf16.msra.mxu1 %v1019_v25  ;;  %556 = vmatprep.mubr.bf16.mxu0 %v1022_v27 }
  0x33   : > { %940 = vmatmul.mubr.msk.bf16.vlgmr.msra.gmra.mrb[4].mxu1 %vm489_vm0, %v1021_v28 }
  0x34   : > { %943 = vmatprep.mubr.msk.bf16.mxu1 %vm489_vm0, %v1025_v29 }
  0x37   : > { %557 = vmatmul.mubr.bf16.gmra.mrb[8].mxu0 %v1024_v30 }
  0x38   : > { %564 = vmatprep.mubr.bf16.mxu0 %v1027_v31 }
  0x3b   : > { %944 = vmatmul.mubr.msk.bf16.gmra.mrb[8].mxu1 %vm489_vm0, %v1026_v32 }
  0x3c   : > { %947 = vmatprep.mubr.msk.bf16.mxu1 %vm489_vm0, %v1030_v33 }
  0x3f   : > { %565 = vmatmul.mubr.bf16.gmra.mrb[12].mxu0 %v1029_v34 }
  0x40   : > { %572 = vmatprep.mubr.bf16.mxu0 %v1032_v35 }
  0x43   : > { %948 = vmatmul.mubr.msk.bf16.gmra.mrb[12].mxu1 %vm489_vm0, %v1031_v36 }
  0x47   : > { %573 = vmatmul.mubr.bf16.gmra.mrb[16].mxu0 %v1034_v37 }
  0xfa   : > { %v888_v38 = vpop.f32.mrb[0].mxu0  ;;  %v918_v39 = vpop.f32.mrb[0].mxu1 }
  0xfb   : > { %v889_v40 = vpop.f32.mrb[1].mxu0  ;;  %v919_v41 = vpop.f32.mrb[1].mxu1 }
  0xfc   : > { %v890_v42 = vadd.f32 %v889_v40, %v888_v38  ;;  %v891_v43 = vpop.f32.mrb[2].mxu0  ;;  %v1185_v44 = vadd.f32 %v919_v41, %v918_v39  ;;  %v921_v45 = vpop.f32.mrb[2].mxu1 }
  0xfd   : > { %v892_v46 = vpop.f32.mrb[3].mxu0  ;;  %v922_v47 = vpop.f32.mrb[3].mxu1 }
  0xfe   : > { %v893_v48 = vadd.f32 %v892_v46, %v891_v43  ;;  %v543_v58 = vadd.f32 %v890_v42, %v1190_v51  ;;  %v583_v32 = vadd.f32 %v1185_v44, %v1190_v51 }
 0x100   : > { %v546_v0 = vadd.f32 %v893_v48, %v1190_v51 }
 0x102   : > { %v894_v49 = vpop.f32.mrb[4].mxu0 }
 0x103   : > { %v895_v50 = vpop.f32.mrb[5].mxu0 }
 0x104   : > { %v896_v52 = vadd.f32 %v895_v50, %v894_v49  ;;  %v897_v53 = vpop.f32.mrb[6].mxu0 }
 0x105   : > { %v898_v54 = vpop.f32.mrb[7].mxu0 }
 0x106   : > { %v899_v55 = vadd.f32 %v898_v54, %v897_v53  ;;  %v551_v56 = vadd.f32 %v896_v52, %v1190_v51  ;;  %v941_v57 = vpop.f32.mrb[4].mxu1 }
 0x107   : > { %v622_v59 = vpop.f32.mrb[5].mxu1 }
 0x108   : > { %v631_v60 = vadd.f32 %v941_v57, %v551_v56  ;;  %v623_v61 = vadd.f32 %v622_v59, %v543_v58  ;;  %v554_v62 = vadd.f32 %v899_v55, %v1190_v51  ;;  %v942_v63 = vpop.f32.mrb[6].mxu1 }
 0x109   : > { %v625_v1 = vpop.f32.mrb[7].mxu1 }
 0x10a   : > { %vm670_vm1 = vcmp.ge.f32.partialorder %v631_v60, 0.0  ;;  %v681_v2 = vmul.f32 0.2, %v631_v60  ;;  %vm668_vm2 = vcmp.ge.f32.partialorder %v623_v61, 0.0  ;;  %v679_v3 = vmul.f32 0.2, %v623_v61 }
 0x10b   : > { %v634_v4 = vadd.f32 %v942_v63, %v554_v62  ;;  %v626_v5 = vadd.f32 %v625_v1, %v546_v0  ;;  %v900_v6 = vpop.f32.mrb[8].mxu0 }
 0x10c   : > { %v692_v7 = vsel %vm670_vm1, %v631_v60, %v681_v2  ;;  %v690_v8 = vsel %vm668_vm2, %v623_v61, %v679_v3  ;;  %v901_v9 = vpop.f32.mrb[9].mxu0 }
 0x10d   : > { %703 = vst [vmem:[%s1200_s17 + $0x10] sm:$0xff] %v692_v7  ;;  %701 = vst [vmem:[%s1200_s17] sm:$0xff] %v690_v8  ;;  %vm671_vm3 = vcmp.ge.f32.partialorder %v634_v4, 0.0  ;;  %v682_v10 = vmul.f32 0.2, %v634_v4  ;;  %vm669_vm4 = vcmp.ge.f32.partialorder %v626_v5, 0.0  ;;  %v902_v12 = vadd.f32 %v901_v9, %v900_v6  ;;  %v903_v13 = vpop.f32.mrb[10].mxu0 }
 0x10e   : > { %v680_v11 = vmul.f32 0.2, %v626_v5  ;;  %v945_v14 = vpop.f32.mrb[8].mxu1  ;;  %v904_v17 = vpop.f32.mrb[11].mxu0 }
 0x10f   : > { %v693_v15 = vsel %vm671_vm3, %v634_v4, %v682_v10  ;;  %v638_v18 = vpop.f32.mrb[9].mxu1  ;;  %v905_v19 = vadd.f32 %v904_v17, %v903_v13  ;;  %v559_v20 = vadd.f32 %v902_v12, %v1190_v51 }
 0x110   : > { %v691_v16 = vsel %vm669_vm4, %v626_v5, %v680_v11  ;;  %704 = vst [vmem:[%s1200_s17 + $0x18] sm:$0xff] %v693_v15  ;;  %v946_v21 = vpop.f32.mrb[10].mxu1 }
 0x111   : > { %702 = vst [vmem:[%s1200_s17 + $0x8] sm:$0xff] %v691_v16  ;;  %v641_v22 = vpop.f32.mrb[11].mxu1  ;;  %v639_v23 = vadd.f32 %v638_v18, %v559_v20  ;;  %v562_v24 = vadd.f32 %v905_v19, %v1190_v51 }
 0x112   : > { %v906_v25 = vpop.f32.mrb[12].mxu0 }
 0x113   : > { %v907_v26 = vpop.f32.mrb[13].mxu0  ;;  %vm672_vm5 = vcmp.ge.f32.partialorder %v639_v23, 0.0  ;;  %v683_v27 = vmul.f32 0.2, %v639_v23  ;;  %v642_v28 = vadd.f32 %v641_v22, %v562_v24 }
 0x114   : > { %v908_v29 = vadd.f32 %v907_v26, %v906_v25  ;;  %v909_v30 = vpop.f32.mrb[14].mxu0 }
 0x115   : > { %v910_v31 = vpop.f32.mrb[15].mxu0  ;;  %v694_v33 = vsel %vm672_vm5, %v639_v23, %v683_v27  ;;  %vm673_vm6 = vcmp.ge.f32.partialorder %v642_v28, 0.0  ;;  %v684_v34 = vmul.f32 0.2, %v642_v28 }
 0x116   : > { %v567_v35 = vadd.f32 %v908_v29, %v1190_v51  ;;  %v949_v36 = vpop.f32.mrb[12].mxu1  ;;  %705 = vst [vmem:[%s1200_s17 + $0x20] sm:$0xff] %v694_v33  ;;  %v911_v37 = vadd.f32 %v910_v31, %v909_v30 }
 0x117   : > { %v663_v38 = vadd.f32 %v949_v36, %v583_v32  ;;  %v654_v39 = vpop.f32.mrb[13].mxu1  ;;  %v695_v40 = vsel %vm673_vm6, %v642_v28, %v684_v34 }
 0x118   : > { %v647_v41 = vadd.f32 %v945_v14, %v567_v35  ;;  %v950_v42 = vpop.f32.mrb[14].mxu1  ;;  %706 = vst [vmem:[%s1200_s17 + $0x28] sm:$0xff] %v695_v40  ;;  %v570_v43 = vadd.f32 %v911_v37, %v1190_v51 }
 0x119   : > { %vm678_vm7 = vcmp.ge.f32.partialorder %v663_v38, 0.0  ;;  %v689_v44 = vmul.f32 0.2, %v663_v38  ;;  %v657_v45 = vpop.f32.mrb[15].mxu1 }
 0x11a   : > { %vm674_vm8 = vcmp.ge.f32.partialorder %v647_v41, 0.0  ;;  %v685_v46 = vmul.f32 0.2, %v647_v41  ;;  %v912_v47 = vpop.f32.mrb[16].mxu0  ;;  %v650_v48 = vadd.f32 %v946_v21, %v570_v43 }
 0x11b   : > { %v700_v49 = vsel %vm678_vm7, %v663_v38, %v689_v44  ;;  %v913_v50 = vpop.f32.mrb[17].mxu0 }
 0x11c   : > { %v696_v52 = vsel %vm674_vm8, %v647_v41, %v685_v46  ;;  %711 = vst [vmem:[%s1200_s17 + $0x50] sm:$0xff] %v700_v49  ;;  %v914_v53 = vadd.f32 %v913_v50, %v912_v47  ;;  %v915_v54 = vpop.f32.mrb[18].mxu0  ;;  %vm675_vm9 = vcmp.ge.f32.partialorder %v650_v48, 0.0  ;;  %v686_v55 = vmul.f32 0.2, %v650_v48 }
 0x11d   : > { %707 = vst [vmem:[%s1200_s17 + $0x30] sm:$0xff] %v696_v52  ;;  %v916_v56 = vpop.f32.mrb[19].mxu0 }
 0x11e   : > { %v575_v57 = vadd.f32 %v914_v53, %v1190_v51  ;;  %v917_v58 = vadd.f32 %v916_v56, %v915_v54  ;;  %v697_v59 = vsel %vm675_vm9, %v650_v48, %v686_v55 }
 0x11f   : > { %708 = vst [vmem:[%s1200_s17 + $0x38] sm:$0xff] %v697_v59 }
 0x120   : > { %v655_v60 = vadd.f32 %v654_v39, %v575_v57  ;;  %v578_v61 = vadd.f32 %v917_v58, %v1190_v51 }
 0x122   : > { %vm676_vm10 = vcmp.ge.f32.partialorder %v655_v60, 0.0  ;;  %v687_v62 = vmul.f32 0.2, %v655_v60  ;;  %v658_v63 = vadd.f32 %v657_v45, %v578_v61 }
 0x124   : > { %v698_v0 = vsel %vm676_vm10, %v655_v60, %v687_v62  ;;  %vm677_vm11 = vcmp.ge.f32.partialorder %v658_v63, 0.0  ;;  %v688_v1 = vmul.f32 0.2, %v658_v63 }
 0x125   : > { %709 = vst [vmem:[%s1200_s17 + $0x40] sm:$0xff] %v698_v0 }
 0x126   : > { %v699_v2 = vsel %vm677_vm11, %v658_v63, %v688_v1 }
 0x127   : > { %710 = vst [vmem:[%s1200_s17 + $0x48] sm:$0xff] %v699_v2 }
 0x128 PF: > { %s13_s14 = sadd.s32 1, %s1057_s14   ;;  %s1234_s12 = smov %s1053_s13 }
 0x129   : > { %p10_p5 = scmp.ge.s32.totalorder %s13_s14, 4   ;;  %s1235_s13 = smov %s1237_s15 }
 0x12b   :  { %12 = sbr.rel (!%p10_p5) target bundleno = 2 (0x2), region = 68 }

// kernel: _lambda_.5
= control target key start
LH: loop header
LB: loop body
LE: loop exit
PB: predicated region body
PF: predicated region fallthrough
CT: control target
= control target key end

     0   :  { %s1534_s12 = smov 0   ;;  %s1536_s13 = smov 0   ;;  %s1788_s0 = inlined_call_operand.vmem [shape: bf16[2,32,1024], index: 0, kind: input, shape index: {}]   ;;  %s1789_s1 = inlined_call_operand.vmem [shape: bf16[1024,128], index: 1, kind: input, shape index: {}]   ;;  %s1790_s2 = inlined_call_operand.vmem [shape: f32[1,128], index: 2, kind: input, shape index: {}]   ;;  %s1791_s3 = inlined_call_operand.vmem [shape: f32[2,32,128], index: 3, kind: output, shape index: {}]  }
   0x1   :  { %s1538_s14 = smov 0  }
   0x2 LB: > { %s25_s15 = sadd.s32 1, %s1508_s13  ;;  %p1198_p0 = scmp.ge.s32.totalorder %s1512_s14, 1  ;;  %s1512_s14 = sphi %s1538_s14, %s13_s14   ;;  %s1508_s13 = sphi %s1536_s13, %s1793_s13   ;;  %s1504_s12 = sphi %s1534_s12, %s1792_s12  }
   0x3   : > { %p27_p1 = scmp.ge.s32.totalorder %s25_s15, 2  ;;  %p168_p2 = scmp.lt.s32.totalorder %s1512_s14, 3 }
   0x5   : > { %s1795_s15 = smov (%p27_p1, %s25_s15), 0  ;;  %p169_p3 = pnand %p1198_p0, %p168_p2 }
   0x6   : > { %v1424_v0 = vld [vmem:[%s1789_s1 + $0x40] sm:$0xff] (!%p169_p3)   ;;  %v1428_v4 = vld [vmem:[%s1789_s1 + $0x48] sm:$0xff] (!%p169_p3)   ;;  %v1432_v8 = vld [vmem:[%s1789_s1 + $0x50] sm:$0xff] (!%p169_p3)   ;;  %p202_p4 = scmp.lt.s32.totalorder (!%p169_p3), %s1504_s12, 1 }
   0x7   : > { %172 = sbr.rel (%p169_p3) target bundleno = 344 (0x158), region = 32  ;;  %v1425_v1 = vld [vmem:[%s1789_s1 + $0xc0] sm:$0xff] (!%p169_p3)   ;;  %1288 = vmatprep.subr.bf16.mxu0 (!%p169_p3), %v1424_v0  ;;  %v1429_v5 = vld [vmem:[%s1789_s1 + $0xc8] sm:$0xff] (!%p169_p3)   ;;  %v1433_v9 = vld [vmem:[%s1789_s1 + $0xd0] sm:$0xff] (!%p169_p3)  }
   0x8   : > { %v1426_v2 = vld [vmem:[%s1789_s1] sm:$0xff] (!%p169_p3)   ;;  %1316 = vmatprep.subr.bf16.mxu1 (!%p169_p3), %v1425_v1  ;;  %v1430_v6 = vld [vmem:[%s1789_s1 + $0x8] sm:$0xff] (!%p169_p3)   ;;  %v1434_v10 = vld [vmem:[%s1789_s1 + $0x10] sm:$0xff] (!%p169_p3)  }
   0x9   : > { %v1427_v3 = vld [vmem:[%s1789_s1 + $0x80] sm:$0xff] (!%p169_p3)   ;;  %1289 = vmatpush3.bf16.msra.mxu0 (!%p169_p3), %v1426_v2  ;;  %v1431_v7 = vld [vmem:[%s1789_s1 + $0x88] sm:$0xff] (!%p169_p3)   ;;  %v1435_v11 = vld [vmem:[%s1789_s1 + $0x90] sm:$0xff] (!%p169_p3)  }
   0xa   : > { %1317 = vmatpush3.bf16.msra.mxu1 (!%p169_p3), %v1427_v3  ;;  %1290 = vmatprep.subr.bf16.mxu0 (!%p169_p3), %v1428_v4  ;;  %v1436_v12 = vld [vmem:[%s1789_s1 + $0x58] sm:$0xff] (!%p169_p3)   ;;  %v1440_v16 = vld [vmem:[%s1789_s1 + $0x60] sm:$0xff] (!%p169_p3)   ;;  %v1444_v20 = vld [vmem:[%s1789_s1 + $0x68] sm:$0xff] (!%p169_p3)  }
   0xb   : > { %1318 = vmatprep.subr.bf16.mxu1 (!%p169_p3), %v1429_v5  ;;  %v1437_v13 = vld [vmem:[%s1789_s1 + $0xd8] sm:$0xff] (!%p169_p3)   ;;  %v1441_v17 = vld [vmem:[%s1789_s1 + $0xe0] sm:$0xff] (!%p169_p3)   ;;  %v1445_v21 = vld [vmem:[%s1789_s1 + $0xe8] sm:$0xff] (!%p169_p3)  }
   0xc   : > { %v1438_v14 = vld [vmem:[%s1789_s1 + $0x18] sm:$0xff] (!%p169_p3)   ;;  %v1442_v18 = vld [vmem:[%s1789_s1 + $0x20] sm:$0xff] (!%p169_p3)   ;;  %v1446_v22 = vld [vmem:[%s1789_s1 + $0x28] sm:$0xff] (!%p169_p3)  }
   0xd   : > { %1291 = vmatpush3.bf16.msra.mxu0 (!%p169_p3), %v1430_v6  ;;  %v1439_v15 = vld [vmem:[%s1789_s1 + $0x98] sm:$0xff] (!%p169_p3)   ;;  %v1443_v19 = vld [vmem:[%s1789_s1 + $0xa0] sm:$0xff] (!%p169_p3)   ;;  %v1447_v23 = vld [vmem:[%s1789_s1 + $0xa8] sm:$0xff] (!%p169_p3)  }
   0xe   : > { %1319 = vmatpush3.bf16.msra.mxu1 %v1431_v7  ;;  %1292 = vmatprep.subr.bf16.mxu0 %v1432_v8  ;;  %s1797_s12 = smov (!%p202_p4, %s1504_s12), 1  ;;  %v1448_v24 = vld [vmem:[%s1789_s1 + $0x70] sm:$0xff]   ;;  %v1452_v28 = vld [vmem:[%s1789_s1 + $0x78] sm:$0xff]   ;;  %v1456_v40 = vld [vmem:[%s1789_s1 + $0x140] sm:$0xff]  }
   0xf   : > { %1320 = vmatprep.subr.bf16.mxu1 %v1433_v9  ;;  %v1449_v25 = vld [vmem:[%s1789_s1 + $0xf0] sm:$0xff]   ;;  %s1286_s24 = sshll.u32 %s1797_s12, 7  ;;  %v1453_v29 = vld [vmem:[%s1789_s1 + $0xf8] sm:$0xff]   ;;  %v1457_v41 = vld [vmem:[%s1789_s1 + $0x1c0] sm:$0xff]  }
  0x10   : > { %v1450_v26 = vld [vmem:[%s1789_s1 + $0x30] sm:$0xff]   ;;  %s1652_s6 = scalar_lea.vmem %s1788_s0, %s1286_s24  ;;  %v1454_v30 = vld [vmem:[%s1789_s1 + $0x38] sm:$0xff]   ;;  %v1458_v42 = vld [vmem:[%s1789_s1 + $0x100] sm:$0xff]  }
  0x11   : > { %1293 = vmatpush3.bf16.msra.mxu0 %v1434_v10  ;;  %v1451_v27 = vld [vmem:[%s1789_s1 + $0xb0] sm:$0xff]   ;;  %v1455_v31 = vld [vmem:[%s1789_s1 + $0xb8] sm:$0xff]   ;;  %v223_v32 = vld [vmem:[%s1652_s6] sm:$0xff] }
  0x12   : > { %1321 = vmatpush3.bf16.msra.mxu1 %v1435_v11  ;;  %1294 = vmatprep.subr.bf16.mxu0 %v1436_v12  ;;  %v227_v33 = vld [vmem:[%s1652_s6 + $0x20] sm:$0xff]  ;;  %v224_v34 = vld [vmem:[%s1652_s6 + $0x8] sm:$0xff]  ;;  %v1464_v48 = vld [vmem:[%s1789_s1 + $0x150] sm:$0xff]  }
  0x13   : > { %1322 = vmatprep.subr.bf16.mxu1 %v1437_v13  ;;  %v1204_v35 = vcombine.low %v223_v32, %v227_v33  ;;  %v1205_v36 = vcombine.high %v223_v32, %v227_v33  ;;  %v228_v37 = vld [vmem:[%s1652_s6 + $0x28] sm:$0xff]  ;;  %v1459_v43 = vld [vmem:[%s1789_s1 + $0x180] sm:$0xff]   ;;  %v1465_v49 = vld [vmem:[%s1789_s1 + $0x1d0] sm:$0xff]  }
  0x14   : > { %v1206_v38 = vcombine.low %v224_v34, %v228_v37  ;;  %v1207_v39 = vcombine.high %v224_v34, %v228_v37  ;;  %v1460_v44 = vld [vmem:[%s1789_s1 + $0x148] sm:$0xff]   ;;  %v1466_v50 = vld [vmem:[%s1789_s1 + $0x110] sm:$0xff]   ;;  %v1468_v52 = vld [vmem:[%s1789_s1 + $0x158] sm:$0xff]  }
  0x15   : > { %1295 = vmatpush3.bf16.msra.mxu0 %v1438_v14  ;;  %870 = vmatprep.mubr.bf16.mxu0 %v1205_v36  ;;  %v1461_v45 = vld [vmem:[%s1789_s1 + $0x1c8] sm:$0xff]   ;;  %v1467_v51 = vld [vmem:[%s1789_s1 + $0x190] sm:$0xff]   ;;  %v1469_v53 = vld [vmem:[%s1789_s1 + $0x1d8] sm:$0xff]  }
  0x16   : > { %1323 = vmatpush3.bf16.msra.mxu1 %v1439_v15  ;;  %1296 = vmatprep.subr.bf16.mxu0 %v1440_v16  ;;  %v1462_v46 = vld [vmem:[%s1789_s1 + $0x108] sm:$0xff]   ;;  %v1470_v54 = vld [vmem:[%s1789_s1 + $0x118] sm:$0xff]   ;;  %v1472_v56 = vld [vmem:[%s1789_s1 + $0x160] sm:$0xff]  }
  0x17   : > { %1324 = vmatprep.subr.bf16.mxu1 %v1441_v17  ;;  %919 = vmatprep.mubr.bf16.mxu1 %v1207_v39  ;;  %v1463_v47 = vld [vmem:[%s1789_s1 + $0x188] sm:$0xff]   ;;  %v1471_v55 = vld [vmem:[%s1789_s1 + $0x198] sm:$0xff]   ;;  %v1473_v57 = vld [vmem:[%s1789_s1 + $0x1e0] sm:$0xff]  }
  0x18   : > { %v1474_v58 = vld [vmem:[%s1789_s1 + $0x120] sm:$0xff]   ;;  %v1476_v63 = vld [vmem:[%s1789_s1 + $0x168] sm:$0xff]   ;;  %v1480_v8 = vld [vmem:[%s1789_s1 + $0x170] sm:$0xff]  }
  0x19   : > { %1297 = vmatpush3.bf16.msra.mxu0 %v1442_v18  ;;  %v1475_v59 = vld [vmem:[%s1789_s1 + $0x1a0] sm:$0xff]   ;;  %v1477_v1 = vld [vmem:[%s1789_s1 + $0x1e8] sm:$0xff]   ;;  %v1481_v9 = vld [vmem:[%s1789_s1 + $0x1f0] sm:$0xff]  }
  0x1a   : > { %1325 = vmatpush3.bf16.msra.mxu1 %v1443_v19  ;;  %1298 = vmatprep.subr.bf16.mxu0 %v1444_v20  ;;  %v231_v60 = vld [vmem:[%s1652_s6 + $0x40] sm:$0xff]  ;;  %v1478_v2 = vld [vmem:[%s1789_s1 + $0x128] sm:$0xff]   ;;  %v1482_v10 = vld [vmem:[%s1789_s1 + $0x130] sm:$0xff]  }
  0x1b   : > { %1326 = vmatprep.subr.bf16.mxu1 %v1445_v21  ;;  %v235_v61 = vld [vmem:[%s1652_s6 + $0x60] sm:$0xff]  ;;  %v1479_v3 = vld [vmem:[%s1789_s1 + $0x1a8] sm:$0xff]   ;;  %v1483_v11 = vld [vmem:[%s1789_s1 + $0x1b0] sm:$0xff]  }
  0x1c   : > { %v1213_v62 = vcombine.high %v231_v60, %v235_v61  ;;  %v1212_v0 = vcombine.low %v231_v60, %v235_v61  ;;  %v232_v4 = vld [vmem:[%s1652_s6 + $0x48] sm:$0xff]  ;;  %v1484_v12 = vld [vmem:[%s1789_s1 + $0x178] sm:$0xff]   ;;  %v225_v16 = vld [vmem:[%s1652_s6 + $0x10] sm:$0xff] }
  0x1d   : > { %1299 = vmatpush3.bf16.msra.mxu0 %v1446_v22  ;;  %v236_v5 = vld [vmem:[%s1652_s6 + $0x68] sm:$0xff]  ;;  %v1485_v13 = vld [vmem:[%s1789_s1 + $0x1f8] sm:$0xff]   ;;  %v229_v17 = vld [vmem:[%s1652_s6 + $0x30] sm:$0xff] }
  0x1e   : > { %1327 = vmatpush3.bf16.msra.mxu1 %v1447_v23  ;;  %1300 = vmatprep.subr.bf16.mxu0 %v1448_v24  ;;  %v1215_v6 = vcombine.high %v232_v4, %v236_v5  ;;  %v1214_v7 = vcombine.low %v232_v4, %v236_v5  ;;  %v1486_v14 = vld [vmem:[%s1789_s1 + $0x138] sm:$0xff]   ;;  %v1208_v20 = vcombine.low %v225_v16, %v229_v17  ;;  %v233_v24 = vld [vmem:[%s1652_s6 + $0x50] sm:$0xff]  ;;  %v1203_v34 = vld [vmem:[%s1790_s2] ss:$0 sm:$0xff] }
  0x1f   : > { %1328 = vmatprep.subr.bf16.mxu1 %v1449_v25  ;;  %v1487_v15 = vld [vmem:[%s1789_s1 + $0x1b8] sm:$0xff]   ;;  %v1209_v21 = vcombine.high %v225_v16, %v229_v17  ;;  %v237_v25 = vld [vmem:[%s1652_s6 + $0x70] sm:$0xff] }
  0x20   : > { %v226_v18 = vld [vmem:[%s1652_s6 + $0x18] sm:$0xff] }
  0x21   : > { %1301 = vmatpush3.bf16.msra.mxu0 %v1450_v26  ;;  %v230_v19 = vld [vmem:[%s1652_s6 + $0x38] sm:$0xff] }
  0x22   : > { %1329 = vmatpush3.bf16.msra.mxu1 %v1451_v27  ;;  %1302 = vmatprep.subr.bf16.mxu0 %v1452_v28  ;;  %v1210_v22 = vcombine.low %v226_v18, %v230_v19  ;;  %v1211_v23 = vcombine.high %v226_v18, %v230_v19  ;;  %v234_v26 = vld [vmem:[%s1652_s6 + $0x58] sm:$0xff]  ;;  %v1217_v27 = vcombine.high %v233_v24, %v237_v25 }
  0x23   : > { %1330 = vmatprep.subr.bf16.mxu1 %v1453_v29  ;;  %v238_v28 = vld [vmem:[%s1652_s6 + $0x78] sm:$0xff]  ;;  %s1287_s6 = sshll.u32 %s1797_s12, 5 }
  0x24   : > { %v1219_v29 = vcombine.high %v234_v26, %v238_v28  ;;  %s221_s17 = scalar_lea.vmem %s1791_s3, %s1287_s6 }
  0x25   : > { %1303 = vmatpush3.bf16.msra.mxu0 %v1454_v30  ;;  %v1216_v30 = vcombine.low %v233_v24, %v237_v25 }
  0x26   : > { %1331 = vmatpush3.bf16.msra.mxu1 %v1455_v31  ;;  %1344 = vmatprep.subr.bf16.mxu0 %v1456_v40  ;;  %v1218_v31 = vcombine.low %v234_v26, %v238_v28 }
  0x27   : > { %1372 = vmatprep.subr.bf16.mxu1 %v1457_v41 }
  0x28   : > { %871 = vmatmul.mubr.bf16.vlgmr.msra.gmra.mrb[0].mxu0 %v1204_v35 }
  0x29   : > { %920 = vmatmul.mubr.bf16.vlgmr.msra.gmra.mrb[0].mxu1 %v1206_v38  ;;  %1345 = vmatpush3.bf16.msra.mxu0 %v1458_v42 }
  0x2a   : > { %1373 = vmatpush3.bf16.msra.mxu1 %v1459_v43  ;;  %1346 = vmatprep.subr.bf16.mxu0 %v1460_v44 }
  0x2b   : > { %1374 = vmatprep.subr.bf16.mxu1 %v1461_v45  ;;  %878 = vmatprep.mubr.bf16.mxu0 %v1213_v62 }
  0x2c   : > { %927 = vmatprep.mubr.bf16.mxu1 %v1215_v6 }
  0x2d   : > { %1347 = vmatpush3.bf16.msra.mxu0 %v1462_v46 }
  0x2e   : > { %1375 = vmatpush3.bf16.msra.mxu1 %v1463_v47  ;;  %1348 = vmatprep.subr.bf16.mxu0 %v1464_v48 }
  0x2f   : > { %1376 = vmatprep.subr.bf16.mxu1 %v1465_v49 }
  0x30   : > { %879 = vmatmul.mubr.bf16.gmra.mrb[4].mxu0 %v1212_v0 }
  0x31   : > { %1349 = vmatpush3.bf16.msra.mxu0 %v1466_v50  ;;  %928 = vmatmul.mubr.bf16.gmra.mrb[4].mxu1 %v1214_v7 }
  0x32   : > { %1377 = vmatpush3.bf16.msra.mxu1 %v1467_v51  ;;  %1350 = vmatprep.subr.bf16.mxu0 %v1468_v52 }
  0x33   : > { %1378 = vmatprep.subr.bf16.mxu1 %v1469_v53  ;;  %968 = vmatprep.mubr.bf16.mxu0 %v1209_v21 }
  0x34   : > { %1017 = vmatprep.mubr.bf16.mxu1 %v1211_v23 }
  0x35   : > { %1351 = vmatpush3.bf16.msra.mxu0 %v1470_v54 }
  0x36   : > { %1379 = vmatpush3.bf16.msra.mxu1 %v1471_v55  ;;  %1352 = vmatprep.subr.bf16.mxu0 %v1472_v56 }
  0x37   : > { %1380 = vmatprep.subr.bf16.mxu1 %v1473_v57 }
  0x39   : > { %1353 = vmatpush3.bf16.msra.mxu0 %v1474_v58 }
  0x3a   : > { %1381 = vmatpush3.bf16.msra.mxu1 %v1475_v59  ;;  %1354 = vmatprep.subr.bf16.mxu0 %v1476_v63 }
  0x3b   : > { %1382 = vmatprep.subr.bf16.mxu1 %v1477_v1 }
  0x3d   : > { %1355 = vmatpush3.bf16.msra.mxu0 %v1478_v2 }
  0x3e   : > { %1383 = vmatpush3.bf16.msra.mxu1 %v1479_v3  ;;  %1356 = vmatprep.subr.bf16.mxu0 %v1480_v8 }
  0x3f   : > { %1384 = vmatprep.subr.bf16.mxu1 %v1481_v9 }
  0x41   : > { %1357 = vmatpush3.bf16.msra.mxu0 %v1482_v10 }
  0x42   : > { %1385 = vmatpush3.bf16.msra.mxu1 %v1483_v11  ;;  %1358 = vmatprep.subr.bf16.mxu0 %v1484_v12 }
  0x43   : > { %1386 = vmatprep.subr.bf16.mxu1 %v1485_v13 }
  0x45   : > { %1359 = vmatpush3.bf16.msra.mxu0 %v1486_v14 }
  0x46   : > { %1387 = vmatpush3.bf16.msra.mxu1 %v1487_v15 }
  0x48   : > { %969 = vmatmul.mubr.bf16.vlgmr.msra.gmra.mrb[8].mxu0 %v1208_v20 }
  0x49   : > { %1018 = vmatmul.mubr.bf16.vlgmr.msra.gmra.mrb[8].mxu1 %v1210_v22  ;;  %976 = vmatprep.mubr.bf16.mxu0 %v1217_v27 }
  0x4a   : > { %1025 = vmatprep.mubr.bf16.mxu1 %v1219_v29 }
  0x50   : > { %977 = vmatmul.mubr.bf16.gmra.mrb[12].mxu0 %v1216_v30 }
  0x51   : > { %1026 = vmatmul.mubr.bf16.gmra.mrb[12].mxu1 %v1218_v31 }
  0xfb   : > { %v1304_v32 = vpop.f32.mrb[0].mxu0 }
  0xfc   : > { %v1332_v33 = vpop.f32.mrb[0].mxu1  ;;  %v1305_v35 = vpop.f32.mrb[1].mxu0 }
  0xfd   : > { %v1306_v36 = vadd.f32 %v1305_v35, %v1304_v32  ;;  %v1333_v37 = vpop.f32.mrb[1].mxu1  ;;  %v1307_v38 = vpop.f32.mrb[2].mxu0 }
  0xfe   : > { %v1334_v39 = vadd.f32 %v1333_v37, %v1332_v33  ;;  %v1335_v40 = vpop.f32.mrb[2].mxu1  ;;  %v1308_v41 = vpop.f32.mrb[3].mxu0 }
  0xff   : > { %v873_v42 = vadd.f32 %v1306_v36, %v1203_v34  ;;  %v1309_v43 = vadd.f32 %v1308_v41, %v1307_v38  ;;  %v1336_v44 = vpop.f32.mrb[3].mxu1 }
 0x100   : > { %v1337_v45 = vadd.f32 %v1336_v44, %v1335_v40 }
 0x101   : > { %v922_v46 = vadd.f32 %v1334_v39, %v873_v42  ;;  %v876_v47 = vadd.f32 %v1309_v43, %v1203_v34 }
 0x103   : > { %v925_v48 = vadd.f32 %v1337_v45, %v876_v47  ;;  %v1310_v49 = vpop.f32.mrb[4].mxu0 }
 0x104   : > { %v1311_v50 = vpop.f32.mrb[5].mxu0  ;;  %v1338_v56 = vpop.f32.mrb[4].mxu1 }
 0x105   : > { %v1312_v51 = vadd.f32 %v1311_v50, %v1310_v49  ;;  %v1313_v52 = vpop.f32.mrb[6].mxu0  ;;  %v1339_v57 = vpop.f32.mrb[5].mxu1 }
 0x106   : > { %v1314_v53 = vpop.f32.mrb[7].mxu0  ;;  %v1340_v59 = vadd.f32 %v1339_v57, %v1338_v56  ;;  %v1341_v60 = vpop.f32.mrb[6].mxu1 }
 0x107   : > { %v1315_v54 = vadd.f32 %v1314_v53, %v1313_v52  ;;  %v881_v55 = vadd.f32 %v1312_v51, %v1203_v34  ;;  %v1342_v61 = vpop.f32.mrb[7].mxu1 }
 0x108   : > { %v1343_v63 = vadd.f32 %v1342_v61, %v1341_v60 }
 0x109   : > { %v884_v58 = vadd.f32 %v1315_v54, %v1203_v34  ;;  %v930_v62 = vadd.f32 %v1340_v59, %v881_v55 }
 0x10b   : > { %v933_v0 = vadd.f32 %v1343_v63, %v884_v58 }
 0x11b   : > { %v1360_v1 = vpop.f32.mrb[8].mxu0 }
 0x11c   : > { %v1388_v2 = vpop.f32.mrb[8].mxu1  ;;  %v1361_v3 = vpop.f32.mrb[9].mxu0 }
 0x11d   : > { %v1389_v4 = vpop.f32.mrb[9].mxu1  ;;  %v1362_v5 = vadd.f32 %v1361_v3, %v1360_v1  ;;  %v1363_v7 = vpop.f32.mrb[10].mxu0 }
 0x11e   : > { %v1390_v6 = vadd.f32 %v1389_v4, %v1388_v2  ;;  %v1391_v8 = vpop.f32.mrb[10].mxu1  ;;  %v1364_v9 = vpop.f32.mrb[11].mxu0 }
 0x11f   : > { %v1392_v10 = vpop.f32.mrb[11].mxu1  ;;  %v971_v11 = vadd.f32 %v1362_v5, %v922_v46  ;;  %v1365_v12 = vadd.f32 %v1364_v9, %v1363_v7 }
 0x120   : > { %v1393_v13 = vadd.f32 %v1392_v10, %v1391_v8 }
 0x121   : > { %v1020_v14 = vadd.f32 %v1390_v6, %v971_v11  ;;  %v974_v15 = vadd.f32 %v1365_v12, %v925_v48 }
 0x123   : > { %v1023_v16 = vadd.f32 %v1393_v13, %v974_v15  ;;  %v1366_v17 = vpop.f32.mrb[12].mxu0  ;;  %v1043_v19 = vmul.f32 %v1020_v14, %v1020_v14 }
 0x124   : > { %v1394_v18 = vpop.f32.mrb[12].mxu1  ;;  %v1367_v20 = vpop.f32.mrb[13].mxu0 }
 0x125   : > { %v1395_v21 = vpop.f32.mrb[13].mxu1  ;;  %v1034_v22 = vadd.f32 %v1023_v16, %v1020_v14  ;;  %v1044_v23 = vmul.f32 %v1023_v16, %v1023_v16  ;;  %v1368_v24 = vadd.f32 %v1367_v20, %v1366_v17  ;;  %v1369_v26 = vpop.f32.mrb[14].mxu0 }
 0x126   : > { %v1396_v25 = vadd.f32 %v1395_v21, %v1394_v18  ;;  %v1397_v27 = vpop.f32.mrb[14].mxu1  ;;  %v1370_v28 = vpop.f32.mrb[15].mxu0 }
 0x127   : > { %v1398_v29 = vpop.f32.mrb[15].mxu1  ;;  %v1047_v30 = vadd.f32 %v1044_v23, %v1043_v19  ;;  %v979_v31 = vadd.f32 %v1368_v24, %v930_v62  ;;  %v1371_v32 = vadd.f32 %v1370_v28, %v1369_v26 }
 0x128   : > { %v1399_v33 = vadd.f32 %v1398_v29, %v1397_v27 }
 0x129   : > { %v1028_v34 = vadd.f32 %v1396_v25, %v979_v31  ;;  %v982_v35 = vadd.f32 %v1371_v32, %v933_v0 }
 0x12b   : > { %v1035_v36 = vadd.f32 %v1034_v22, %v1028_v34  ;;  %v1045_v37 = vmul.f32 %v1028_v34, %v1028_v34  ;;  %v1031_v38 = vadd.f32 %v1399_v33, %v982_v35 }
 0x12d   : > { %v1048_v39 = vadd.f32 %v1047_v30, %v1045_v37  ;;  %v1036_v40 = vadd.f32 %v1035_v36, %v1031_v38  ;;  %v1046_v41 = vmul.f32 %v1031_v38, %v1031_v38 }
 0x12f   : > { %v1037_v42 = vrot.slane %v1036_v40, 4  ;;  %v1049_v43 = vadd.f32 %v1048_v39, %v1046_v41 }
 0x131   : > { %v1038_v44 = vadd.f32 %v1037_v42, %v1036_v40  ;;  %v1050_v45 = vrot.slane %v1049_v43, 4 }
 0x133   : > { %v1039_v46 = vrot.slane %v1038_v44, 2  ;;  %v1051_v47 = vadd.f32 %v1050_v45, %v1049_v43 }
 0x135   : > { %v1040_v48 = vadd.f32 %v1039_v46, %v1038_v44  ;;  %v1052_v49 = vrot.slane %v1051_v47, 2 }
 0x137   : > { %v1041_v50 = vrot.slane %v1040_v48, 1  ;;  %v1053_v51 = vadd.f32 %v1052_v49, %v1051_v47 }
 0x139   : > { %v1042_v52 = vadd.f32 %v1041_v50, %v1040_v48  ;;  %v1054_v53 = vrot.slane %v1053_v51, 1 }
 0x13b   : > { %v1055_v54 = vadd.f32 %v1054_v53, %v1053_v51  ;;  %v1056_v55 = vmul.f32 0.04, %v1042_v52 }
 0x13d   : > { %v1057_v56 = vmul.f32 0.04, %v1055_v54  ;;  %v1058_v57 = vmul.f32 %v1056_v55, %v1056_v55  ;;  %v1061_v58 = vsub.f32 %v1020_v14, %v1056_v55  ;;  %v1062_v59 = vsub.f32 %v1023_v16, %v1056_v55 }
 0x13e   : > { %v1063_v60 = vsub.f32 %v1028_v34, %v1056_v55  ;;  %v1064_v61 = vsub.f32 %v1031_v38, %v1056_v55 }
 0x13f   : > { %v1059_v62 = vsub.f32 %v1057_v56, %v1058_v57 }
 0x141   : > { %v1060_v63 = vmax.f32 %v1059_v62, 0.0 }
 0x143   : > { %v1065_v0 = vadd.f32 1e-05, %v1060_v63 }
 0x145   : > { %1488 = vrsqrt.f32 %v1065_v0 }
 0x14f   : > { %v1489_v1 = vpop.eup %1488 }
 0x150   : > { %v1067_v2 = vmul.f32 %v1489_v1, %v1061_v58  ;;  %v1068_v3 = vmul.f32 %v1489_v1, %v1062_v59  ;;  %v1069_v4 = vmul.f32 %v1489_v1, %v1063_v60  ;;  %v1070_v5 = vmul.f32 %v1489_v1, %v1064_v61 }
 0x152   : > { %vm1071_vm0 = vcmp.ge.f32.partialorder %v1067_v2, 0.0  ;;  %vm1072_vm1 = vcmp.ge.f32.partialorder %v1068_v3, 0.0  ;;  %vm1073_vm2 = vcmp.ge.f32.partialorder %v1069_v4, 0.0  ;;  %vm1074_vm3 = vcmp.ge.f32.partialorder %v1070_v5, 0.0 }
 0x153   : > { %v1075_v6 = vmul.f32 0.2, %v1067_v2  ;;  %v1076_v7 = vmul.f32 0.2, %v1068_v3  ;;  %v1077_v8 = vmul.f32 0.2, %v1069_v4 }
 0x154   : > { %v1078_v9 = vmul.f32 0.2, %v1070_v5 }
 0x155   : > { %v1079_v10 = vsel %vm1071_vm0, %v1067_v2, %v1075_v6  ;;  %v1080_v11 = vsel %vm1072_vm1, %v1068_v3, %v1076_v7  ;;  %v1081_v12 = vsel %vm1073_vm2, %v1069_v4, %v1077_v8 }
 0x156   : > { %v1082_v13 = vsel %vm1074_vm3, %v1070_v5, %v1078_v9  ;;  %1083 = vst [vmem:[%s221_s17] sm:$0xff] %v1079_v10  ;;  %1084 = vst [vmem:[%s221_s17 + $0x8] sm:$0xff] %v1080_v11 }
 0x157   : > { %1085 = vst [vmem:[%s221_s17 + $0x10] sm:$0xff] %v1081_v12  ;;  %1086 = vst [vmem:[%s221_s17 + $0x18] sm:$0xff] %v1082_v13 }
 0x158 PF: > { %s13_s14 = sadd.s32 1, %s1512_s14   ;;  %s1792_s12 = smov %s1508_s13 }
 0x159   : > { %p10_p5 = scmp.ge.s32.totalorder %s13_s14, 4   ;;  %s1793_s13 = smov %s1795_s15 }
 0x15b   :  { %12 = sbr.rel (!%p10_p5) target bundleno = 2 (0x2), region = 68 }

// kernel: _lambda_.6
= control target key start
LH: loop header
LB: loop body
LE: loop exit
PB: predicated region body
PF: predicated region fallthrough
CT: control target
= control target key end

     0   :  { %s3176_s12 = smov 0   ;;  %s3178_s13 = smov 0   ;;  %s4054_s0 = inlined_call_operand.vmem [shape: bf16[2,16,2048], index: 0, kind: input, shape index: {}]   ;;  %s4055_s1 = inlined_call_operand.vmem [shape: bf16[2048,256], index: 1, kind: input, shape index: {}]   ;;  %s4056_s2 = inlined_call_operand.vmem [shape: f32[1,256], index: 2, kind: input, shape index: {}]   ;;  %s4057_s3 = inlined_call_operand.vmem [shape: f32[2,16,256], index: 3, kind: output, shape index: {}]  }
   0x1   :  { %s3180_s14 = smov 0  }
   0x2 LB: > { %s25_s15 = sadd.s32 1, %s3150_s13  ;;  %p2407_p0 = scmp.ge.s32.totalorder %s3154_s14, 1  ;;  %s3154_s14 = sphi %s3180_s14, %s13_s14   ;;  %s3150_s13 = sphi %s3178_s13, %s4059_s13   ;;  %s3146_s12 = sphi %s3176_s12, %s4058_s12  }
   0x3   : > { %p27_p1 = scmp.ge.s32.totalorder %s25_s15, 2  ;;  %p172_p2 = scmp.lt.s32.totalorder %s3154_s14, 3 }
   0x5   : > { %s4061_s15 = smov (%p27_p1, %s25_s15), 0  ;;  %p173_p3 = pnand %p2407_p0, %p172_p2 }
   0x6   : > { %v2744_v0 = vld [vmem:[%s4055_s1 + $0x4] ss:$8 sps:$4 sm:$0xff] (!%p173_p3)   ;;  %v2748_v2 = vld [vmem:[%s4055_s1] ss:$8 sps:$4 sm:$0xff] (!%p173_p3)   ;;  %v2750_v4 = vld [vmem:[%s4055_s1 + $0x14] ss:$8 sps:$4 sm:$0xff] (!%p173_p3)  }
   0x7   : > { %176 = sbr.rel (%p173_p3) target bundleno = 523 (0x20b), region = 32  ;;  %v2746_v1 = vld [vmem:[%s4055_s1 + $0x404] ss:$8 sps:$4 sm:$0xff] (!%p173_p3)   ;;  %1879 = vmatprep.subr.bf16.mxu1 (!%p173_p3), %v2744_v0  ;;  %v2749_v3 = vld [vmem:[%s4055_s1 + $0x400] ss:$8 sps:$4 sm:$0xff] (!%p173_p3)   ;;  %p209_p4 = scmp.lt.s32.totalorder (!%p173_p3), %s3146_s12, 1 }
   0x8   : > { %2051 = vmatprep.subr.bf16.mxu0 (!%p173_p3), %v2746_v1  ;;  %1880 = vmatpush1.bf16.msra.mxu1 (!%p173_p3), %v2748_v2  ;;  %v2752_v5 = vld [vmem:[%s4055_s1 + $0x414] ss:$8 sps:$4 sm:$0xff] (!%p173_p3)   ;;  %v2754_v6 = vld [vmem:[%s4055_s1 + $0x10] ss:$8 sps:$4 sm:$0xff] (!%p173_p3)   ;;  %v2756_v8 = vld [vmem:[%s4055_s1 + $0x24] ss:$8 sps:$4 sm:$0xff] (!%p173_p3)  }
   0x9   : > { %2052 = vmatpush1.bf16.msra.mxu0 (!%p173_p3), %v2749_v3  ;;  %1881 = vmatprep.subr.bf16.mxu1 (!%p173_p3), %v2750_v4  ;;  %v2755_v7 = vld [vmem:[%s4055_s1 + $0x410] ss:$8 sps:$4 sm:$0xff] (!%p173_p3)   ;;  %v2758_v9 = vld [vmem:[%s4055_s1 + $0x424] ss:$8 sps:$4 sm:$0xff] (!%p173_p3)   ;;  %v2760_v10 = vld [vmem:[%s4055_s1 + $0x20] ss:$8 sps:$4 sm:$0xff] (!%p173_p3)  }
   0xa   : > { %2053 = vmatprep.subr.bf16.mxu0 (!%p173_p3), %v2752_v5  ;;  %v2761_v11 = vld [vmem:[%s4055_s1 + $0x420] ss:$8 sps:$4 sm:$0xff] (!%p173_p3)   ;;  %v2762_v12 = vld [vmem:[%s4055_s1 + $0x34] ss:$8 sps:$4 sm:$0xff] (!%p173_p3)   ;;  %v2766_v14 = vld [vmem:[%s4055_s1 + $0x30] ss:$8 sps:$4 sm:$0xff] (!%p173_p3)  }
   0xb   : > { %v2764_v13 = vld [vmem:[%s4055_s1 + $0x434] ss:$8 sps:$4 sm:$0xff] (!%p173_p3)   ;;  %v2767_v15 = vld [vmem:[%s4055_s1 + $0x430] ss:$8 sps:$4 sm:$0xff] (!%p173_p3)   ;;  %v2768_v16 = vld [vmem:[%s4055_s1 + $0x44] ss:$8 sps:$4 sm:$0xff] (!%p173_p3)  }
   0xc   : > { %1882 = vmatpush1.bf16.msra.mxu1 (!%p173_p3), %v2754_v6  ;;  %v2770_v17 = vld [vmem:[%s4055_s1 + $0x444] ss:$8 sps:$4 sm:$0xff] (!%p173_p3)   ;;  %v2772_v18 = vld [vmem:[%s4055_s1 + $0x40] ss:$8 sps:$4 sm:$0xff] (!%p173_p3)   ;;  %v2774_v20 = vld [vmem:[%s4055_s1 + $0x54] ss:$8 sps:$4 sm:$0xff] (!%p173_p3)  }
   0xd   : > { %2054 = vmatpush1.bf16.msra.mxu0 (!%p173_p3), %v2755_v7  ;;  %1883 = vmatprep.subr.bf16.mxu1 (!%p173_p3), %v2756_v8  ;;  %v2773_v19 = vld [vmem:[%s4055_s1 + $0x440] ss:$8 sps:$4 sm:$0xff] (!%p173_p3)   ;;  %v2776_v21 = vld [vmem:[%s4055_s1 + $0x454] ss:$8 sps:$4 sm:$0xff] (!%p173_p3)   ;;  %v2778_v22 = vld [vmem:[%s4055_s1 + $0x50] ss:$8 sps:$4 sm:$0xff] (!%p173_p3)  }
   0xe   : > { %2055 = vmatprep.subr.bf16.mxu0 %v2758_v9  ;;  %v2779_v23 = vld [vmem:[%s4055_s1 + $0x450] ss:$8 sps:$4 sm:$0xff]   ;;  %v2780_v24 = vld [vmem:[%s4055_s1 + $0x64] ss:$8 sps:$4 sm:$0xff]   ;;  %v2784_v26 = vld [vmem:[%s4055_s1 + $0x60] ss:$8 sps:$4 sm:$0xff]  }
   0xf   : > { %v2782_v25 = vld [vmem:[%s4055_s1 + $0x464] ss:$8 sps:$4 sm:$0xff]   ;;  %v2785_v27 = vld [vmem:[%s4055_s1 + $0x460] ss:$8 sps:$4 sm:$0xff]   ;;  %v2786_v28 = vld [vmem:[%s4055_s1 + $0x74] ss:$8 sps:$4 sm:$0xff]  }
  0x10   : > { %1884 = vmatpush1.bf16.msra.mxu1 %v2760_v10  ;;  %v2788_v29 = vld [vmem:[%s4055_s1 + $0x474] ss:$8 sps:$4 sm:$0xff]   ;;  %v2790_v30 = vld [vmem:[%s4055_s1 + $0x70] ss:$8 sps:$4 sm:$0xff]   ;;  %v2792_v32 = vld [vmem:[%s4055_s1 + $0x84] ss:$8 sps:$4 sm:$0xff]  }
  0x11   : > { %2056 = vmatpush1.bf16.msra.mxu0 %v2761_v11  ;;  %1885 = vmatprep.subr.bf16.mxu1 %v2762_v12  ;;  %v2791_v31 = vld [vmem:[%s4055_s1 + $0x470] ss:$8 sps:$4 sm:$0xff]   ;;  %v2794_v33 = vld [vmem:[%s4055_s1 + $0x484] ss:$8 sps:$4 sm:$0xff]   ;;  %v2796_v34 = vld [vmem:[%s4055_s1 + $0x80] ss:$8 sps:$4 sm:$0xff]  }
  0x12   : > { %2057 = vmatprep.subr.bf16.mxu0 %v2764_v13  ;;  %v2797_v35 = vld [vmem:[%s4055_s1 + $0x480] ss:$8 sps:$4 sm:$0xff]   ;;  %v2798_v36 = vld [vmem:[%s4055_s1 + $0x94] ss:$8 sps:$4 sm:$0xff]   ;;  %s4063_s12 = smov (!%p209_p4, %s3146_s12), 1 }
  0x13   : > { %v2800_v37 = vld [vmem:[%s4055_s1 + $0x494] ss:$8 sps:$4 sm:$0xff]   ;;  %v2802_v38 = vld [vmem:[%s4055_s1 + $0x90] ss:$8 sps:$4 sm:$0xff]   ;;  %v2804_v40 = vld [vmem:[%s4055_s1 + $0xa4] ss:$8 sps:$4 sm:$0xff]  }
  0x14   : > { %1886 = vmatpush1.bf16.msra.mxu1 %v2766_v14  ;;  %v2803_v39 = vld [vmem:[%s4055_s1 + $0x490] ss:$8 sps:$4 sm:$0xff]   ;;  %s2686_s29 = sshll.u32 %s4063_s12, 7  ;;  %v2806_v41 = vld [vmem:[%s4055_s1 + $0x4a4] ss:$8 sps:$4 sm:$0xff]   ;;  %s2687_s18 = sshll.u32 %s4063_s12, 5 }
  0x15   : > { %2058 = vmatpush1.bf16.msra.mxu0 %v2767_v15  ;;  %1887 = vmatprep.subr.bf16.mxu1 %v2768_v16  ;;  %v2808_v42 = vld [vmem:[%s4055_s1 + $0xa0] ss:$8 sps:$4 sm:$0xff]   ;;  %s3336_s11 = scalar_lea.vmem %s4054_s0, %s2686_s29  ;;  %v2810_v44 = vld [vmem:[%s4055_s1 + $0xb4] ss:$8 sps:$4 sm:$0xff]   ;;  %v2814_v46 = vld [vmem:[%s4055_s1 + $0xb0] ss:$8 sps:$4 sm:$0xff]   ;;  %s233_s21 = scalar_lea.vmem %s4057_s3, %s2687_s18 }
  0x16   : > { %2059 = vmatprep.subr.bf16.mxu0 %v2770_v17  ;;  %v2809_v43 = vld [vmem:[%s4055_s1 + $0x4a0] ss:$8 sps:$4 sm:$0xff]   ;;  %v2812_v45 = vld [vmem:[%s4055_s1 + $0x4b4] ss:$8 sps:$4 sm:$0xff]   ;;  %v2815_v47 = vld [vmem:[%s4055_s1 + $0x4b0] ss:$8 sps:$4 sm:$0xff]  }
  0x17   : > { %v235_v48 = vld [vmem:[%s3336_s11] sm:$0xff]  ;;  %v2822_v58 = vld [vmem:[%s4055_s1 + $0xd4] ss:$8 sps:$4 sm:$0xff]   ;;  %v2826_v60 = vld [vmem:[%s4055_s1 + $0xd0] ss:$8 sps:$4 sm:$0xff]  }
  0x18   : > { %1888 = vmatpush1.bf16.msra.mxu1 %v2772_v18  ;;  %v243_v49 = vld [vmem:[%s3336_s11 + $0x40] sm:$0xff]  ;;  %v2824_v59 = vld [vmem:[%s4055_s1 + $0x4d4] ss:$8 sps:$4 sm:$0xff]   ;;  %v2827_v61 = vld [vmem:[%s4055_s1 + $0x4d0] ss:$8 sps:$4 sm:$0xff]  }
  0x19   : > { %2060 = vmatpush1.bf16.msra.mxu0 %v2773_v19  ;;  %1889 = vmatprep.subr.bf16.mxu1 %v2774_v20  ;;  %v2816_v50 = vld [vmem:[%s4055_s1 + $0xc4] ss:$8 sps:$4 sm:$0xff]   ;;  %v2413_v52 = vcombine.high %v235_v48, %v243_v49  ;;  %v2820_v56 = vld [vmem:[%s4055_s1 + $0xc0] ss:$8 sps:$4 sm:$0xff]   ;;  %v2834_v2 = vld [vmem:[%s4055_s1 + $0xf4] ss:$8 sps:$4 sm:$0xff]   ;;  %v2412_v8 = vcombine.low %v235_v48, %v243_v49 }
  0x1a   : > { %2061 = vmatprep.subr.bf16.mxu0 %v2776_v21  ;;  %v2818_v51 = vld [vmem:[%s4055_s1 + $0x4c4] ss:$8 sps:$4 sm:$0xff]   ;;  %v2821_v57 = vld [vmem:[%s4055_s1 + $0x4c0] ss:$8 sps:$4 sm:$0xff]   ;;  %v2836_v3 = vld [vmem:[%s4055_s1 + $0x4f4] ss:$8 sps:$4 sm:$0xff]  }
  0x1b   : > { %v239_v53 = vld [vmem:[%s3336_s11 + $0x20] sm:$0xff]  ;;  %1911 = vmatprep.mubr.bf16.mxu1 %v2413_v52  ;;  %v2838_v4 = vld [vmem:[%s4055_s1 + $0xf0] ss:$8 sps:$4 sm:$0xff]   ;;  %v2848_v12 = vld [vmem:[%s4055_s1 + $0x114] ss:$8 sps:$4 sm:$0xff]  }
  0x1c   : > { %1890 = vmatpush1.bf16.msra.mxu1 %v2778_v22  ;;  %v247_v54 = vld [vmem:[%s3336_s11 + $0x60] sm:$0xff]  ;;  %v2839_v5 = vld [vmem:[%s4055_s1 + $0x4f0] ss:$8 sps:$4 sm:$0xff]   ;;  %v2851_v13 = vld [vmem:[%s4055_s1 + $0x514] ss:$8 sps:$4 sm:$0xff]  }
  0x1d   : > { %2062 = vmatpush1.bf16.msra.mxu0 %v2779_v23  ;;  %1891 = vmatprep.subr.bf16.mxu1 %v2780_v24  ;;  %v2421_v55 = vcombine.high %v239_v53, %v247_v54  ;;  %v2828_v62 = vld [vmem:[%s4055_s1 + $0xe4] ss:$8 sps:$4 sm:$0xff]   ;;  %v2832_v0 = vld [vmem:[%s4055_s1 + $0xe0] ss:$8 sps:$4 sm:$0xff]   ;;  %v2420_v10 = vcombine.low %v239_v53, %v247_v54  ;;  %v2846_v14 = vld [vmem:[%s4055_s1 + $0x110] ss:$8 sps:$4 sm:$0xff]  }
  0x1e   : > { %2063 = vmatprep.subr.bf16.mxu0 %v2782_v25  ;;  %v2830_v63 = vld [vmem:[%s4055_s1 + $0x4e4] ss:$8 sps:$4 sm:$0xff]   ;;  %v2833_v1 = vld [vmem:[%s4055_s1 + $0x4e0] ss:$8 sps:$4 sm:$0xff]   ;;  %v2849_v15 = vld [vmem:[%s4055_s1 + $0x510] ss:$8 sps:$4 sm:$0xff]  }
  0x1f   : > { %2083 = vmatprep.mubr.bf16.mxu0 %v2421_v55  ;;  %v2842_v6 = vld [vmem:[%s4055_s1 + $0x104] ss:$8 sps:$4 sm:$0xff]   ;;  %v2840_v9 = vld [vmem:[%s4055_s1 + $0x100] ss:$8 sps:$4 sm:$0xff]   ;;  %v2860_v20 = vld [vmem:[%s4055_s1 + $0x134] ss:$8 sps:$4 sm:$0xff]  }
  0x20   : > { %1892 = vmatpush1.bf16.msra.mxu1 %v2784_v26  ;;  %v2845_v7 = vld [vmem:[%s4055_s1 + $0x504] ss:$8 sps:$4 sm:$0xff]   ;;  %v2843_v11 = vld [vmem:[%s4055_s1 + $0x500] ss:$8 sps:$4 sm:$0xff]   ;;  %v2863_v21 = vld [vmem:[%s4055_s1 + $0x534] ss:$8 sps:$4 sm:$0xff]  }
  0x21   : > { %2064 = vmatpush1.bf16.msra.mxu0 %v2785_v27  ;;  %1893 = vmatprep.subr.bf16.mxu1 %v2786_v28  ;;  %v2854_v16 = vld [vmem:[%s4055_s1 + $0x124] ss:$8 sps:$4 sm:$0xff]   ;;  %v2852_v18 = vld [vmem:[%s4055_s1 + $0x120] ss:$8 sps:$4 sm:$0xff]   ;;  %v2858_v22 = vld [vmem:[%s4055_s1 + $0x130] ss:$8 sps:$4 sm:$0xff]  }
  0x22   : > { %2065 = vmatprep.subr.bf16.mxu0 %v2788_v29  ;;  %v2857_v17 = vld [vmem:[%s4055_s1 + $0x524] ss:$8 sps:$4 sm:$0xff]   ;;  %v2855_v19 = vld [vmem:[%s4055_s1 + $0x520] ss:$8 sps:$4 sm:$0xff]   ;;  %v2861_v23 = vld [vmem:[%s4055_s1 + $0x530] ss:$8 sps:$4 sm:$0xff]  }
  0x23   : > { %v2866_v24 = vld [vmem:[%s4055_s1 + $0x144] ss:$8 sps:$4 sm:$0xff]   ;;  %v2864_v26 = vld [vmem:[%s4055_s1 + $0x140] ss:$8 sps:$4 sm:$0xff]   ;;  %v2872_v28 = vld [vmem:[%s4055_s1 + $0x154] ss:$8 sps:$4 sm:$0xff]  }
  0x24   : > { %1894 = vmatpush1.bf16.msra.mxu1 %v2790_v30  ;;  %v2869_v25 = vld [vmem:[%s4055_s1 + $0x544] ss:$8 sps:$4 sm:$0xff]   ;;  %v2867_v27 = vld [vmem:[%s4055_s1 + $0x540] ss:$8 sps:$4 sm:$0xff]   ;;  %v2875_v29 = vld [vmem:[%s4055_s1 + $0x554] ss:$8 sps:$4 sm:$0xff]  }
  0x25   : > { %2066 = vmatpush1.bf16.msra.mxu0 %v2791_v31  ;;  %1895 = vmatprep.subr.bf16.mxu1 %v2792_v32  ;;  %v2870_v30 = vld [vmem:[%s4055_s1 + $0x150] ss:$8 sps:$4 sm:$0xff]   ;;  %v2878_v32 = vld [vmem:[%s4055_s1 + $0x164] ss:$8 sps:$4 sm:$0xff]   ;;  %v2888_v48 = vld [vmem:[%s4055_s1 + $0x180] ss:$8 sps:$4 sm:$0xff]  }
  0x26   : > { %2067 = vmatprep.subr.bf16.mxu0 %v2794_v33  ;;  %v2873_v31 = vld [vmem:[%s4055_s1 + $0x550] ss:$8 sps:$4 sm:$0xff]   ;;  %v2881_v33 = vld [vmem:[%s4055_s1 + $0x564] ss:$8 sps:$4 sm:$0xff]   ;;  %v2891_v49 = vld [vmem:[%s4055_s1 + $0x580] ss:$8 sps:$4 sm:$0xff]  }
  0x27   : > { %v2894_v52 = vld [vmem:[%s4055_s1 + $0x190] ss:$8 sps:$4 sm:$0xff]   ;;  %v2902_v54 = vld [vmem:[%s4055_s1 + $0x1a4] ss:$8 sps:$4 sm:$0xff]  }
  0x28   : > { %1896 = vmatpush1.bf16.msra.mxu1 %v2796_v34  ;;  %v2876_v34 = vld [vmem:[%s4055_s1 + $0x160] ss:$8 sps:$4 sm:$0xff]   ;;  %v2897_v53 = vld [vmem:[%s4055_s1 + $0x590] ss:$8 sps:$4 sm:$0xff]   ;;  %v2905_v55 = vld [vmem:[%s4055_s1 + $0x5a4] ss:$8 sps:$4 sm:$0xff]  }
  0x29   : > { %2068 = vmatpush1.bf16.msra.mxu0 %v2797_v35  ;;  %1897 = vmatprep.subr.bf16.mxu1 %v2798_v36  ;;  %v2879_v35 = vld [vmem:[%s4055_s1 + $0x560] ss:$8 sps:$4 sm:$0xff]  }
  0x2a   : > { %2069 = vmatprep.subr.bf16.mxu0 %v2800_v37  ;;  %v3487_v36 = vld [vmem:[%s3336_s11 + $0x8] sm:$0xff] }
  0x2b   : > { %v3490_v37 = vld [vmem:[%s3336_s11 + $0x48] sm:$0xff] }
  0x2c   : > { %1898 = vmatpush1.bf16.msra.mxu1 %v2802_v38  ;;  %v2884_v38 = vld [vmem:[%s4055_s1 + $0x174] ss:$8 sps:$4 sm:$0xff]  }
  0x2d   : > { %2070 = vmatpush1.bf16.msra.mxu0 %v2803_v39  ;;  %1899 = vmatprep.subr.bf16.mxu1 %v2804_v40  ;;  %v2887_v39 = vld [vmem:[%s4055_s1 + $0x574] ss:$8 sps:$4 sm:$0xff]   ;;  %v2415_v40 = vcombine.high %v3487_v36, %v3490_v37 }
  0x2e   : > { %2071 = vmatprep.subr.bf16.mxu0 %v2806_v41  ;;  %v3501_v41 = vld [vmem:[%s3336_s11 + $0x28] sm:$0xff] }
  0x30   : > { %1900 = vmatpush1.bf16.msra.mxu1 %v2808_v42  ;;  %v3504_v42 = vld [vmem:[%s3336_s11 + $0x68] sm:$0xff] }
  0x31   : > { %2072 = vmatpush1.bf16.msra.mxu0 %v2809_v43  ;;  %1901 = vmatprep.subr.bf16.mxu1 %v2810_v44  ;;  %v2423_v43 = vcombine.high %v3501_v41, %v3504_v42  ;;  %v2882_v44 = vld [vmem:[%s4055_s1 + $0x170] ss:$8 sps:$4 sm:$0xff]  }
  0x32   : > { %2073 = vmatprep.subr.bf16.mxu0 %v2812_v45  ;;  %v2885_v45 = vld [vmem:[%s4055_s1 + $0x570] ss:$8 sps:$4 sm:$0xff]  }
  0x34   : > { %1902 = vmatpush1.bf16.msra.mxu1 %v2814_v46  ;;  %v2890_v46 = vld [vmem:[%s4055_s1 + $0x184] ss:$8 sps:$4 sm:$0xff]  }
  0x35   : > { %2074 = vmatpush1.bf16.msra.mxu0 %v2815_v47  ;;  %1903 = vmatprep.subr.bf16.mxu1 %v2816_v50  ;;  %v2893_v47 = vld [vmem:[%s4055_s1 + $0x584] ss:$8 sps:$4 sm:$0xff]   ;;  %v2896_v50 = vld [vmem:[%s4055_s1 + $0x194] ss:$8 sps:$4 sm:$0xff]  }
  0x36   : > { %2075 = vmatprep.subr.bf16.mxu0 %v2818_v51  ;;  %v2899_v51 = vld [vmem:[%s4055_s1 + $0x594] ss:$8 sps:$4 sm:$0xff]  }
  0x38   : > { %1904 = vmatpush1.bf16.msra.mxu1 %v2820_v56  ;;  %v2900_v56 = vld [vmem:[%s4055_s1 + $0x1a0] ss:$8 sps:$4 sm:$0xff]  }
  0x39   : > { %2076 = vmatpush1.bf16.msra.mxu0 %v2821_v57  ;;  %1905 = vmatprep.subr.bf16.mxu1 %v2822_v58  ;;  %v2903_v57 = vld [vmem:[%s4055_s1 + $0x5a0] ss:$8 sps:$4 sm:$0xff]   ;;  %v2908_v58 = vld [vmem:[%s4055_s1 + $0x1b4] ss:$8 sps:$4 sm:$0xff]  }
  0x3a   : > { %2077 = vmatprep.subr.bf16.mxu0 %v2824_v59  ;;  %v2911_v59 = vld [vmem:[%s4055_s1 + $0x5b4] ss:$8 sps:$4 sm:$0xff]  }
  0x3c   : > { %1906 = vmatpush1.bf16.msra.mxu1 %v2826_v60  ;;  %v2906_v60 = vld [vmem:[%s4055_s1 + $0x1b0] ss:$8 sps:$4 sm:$0xff]  }
  0x3d   : > { %2078 = vmatpush1.bf16.msra.mxu0 %v2827_v61  ;;  %1907 = vmatprep.subr.bf16.mxu1 %v2828_v62  ;;  %v2909_v61 = vld [vmem:[%s4055_s1 + $0x5b0] ss:$8 sps:$4 sm:$0xff]   ;;  %v2914_v62 = vld [vmem:[%s4055_s1 + $0x1c4] ss:$8 sps:$4 sm:$0xff]  }
  0x3e   : > { %2079 = vmatprep.subr.bf16.mxu0 %v2830_v63  ;;  %v2917_v63 = vld [vmem:[%s4055_s1 + $0x5c4] ss:$8 sps:$4 sm:$0xff]  }
  0x40   : > { %1908 = vmatpush1.bf16.msra.mxu1 %v2832_v0  ;;  %v2912_v0 = vld [vmem:[%s4055_s1 + $0x1c0] ss:$8 sps:$4 sm:$0xff]  }
  0x41   : > { %2080 = vmatpush1.bf16.msra.mxu0 %v2833_v1  ;;  %1909 = vmatprep.subr.bf16.mxu1 %v2834_v2  ;;  %v2915_v1 = vld [vmem:[%s4055_s1 + $0x5c0] ss:$8 sps:$4 sm:$0xff]   ;;  %v2920_v2 = vld [vmem:[%s4055_s1 + $0x1d4] ss:$8 sps:$4 sm:$0xff]  }
  0x42   : > { %2081 = vmatprep.subr.bf16.mxu0 %v2836_v3  ;;  %v2923_v3 = vld [vmem:[%s4055_s1 + $0x5d4] ss:$8 sps:$4 sm:$0xff]  }
  0x44   : > { %1910 = vmatpush1.bf16.msra.mxu1 %v2838_v4  ;;  %v2918_v4 = vld [vmem:[%s4055_s1 + $0x1d0] ss:$8 sps:$4 sm:$0xff]  }
  0x45   : > { %2082 = vmatpush1.bf16.msra.mxu0 %v2839_v5  ;;  %1922 = vmatprep.subr.bf16.mxu1 %v2842_v6  ;;  %v2921_v5 = vld [vmem:[%s4055_s1 + $0x5d0] ss:$8 sps:$4 sm:$0xff]   ;;  %v2926_v6 = vld [vmem:[%s4055_s1 + $0x1e4] ss:$8 sps:$4 sm:$0xff]  }
  0x46   : > { %2094 = vmatprep.subr.bf16.mxu0 %v2845_v7  ;;  %v2929_v7 = vld [vmem:[%s4055_s1 + $0x5e4] ss:$8 sps:$4 sm:$0xff]  }
  0x47   : > { %1912 = vmatmul.mubr.bf16.vlgmr.msra.gmra.mrb[0].mxu1 %v2412_v8  ;;  %v2924_v8 = vld [vmem:[%s4055_s1 + $0x1e0] ss:$8 sps:$4 sm:$0xff]  }
  0x48   : > { %2084 = vmatmul.mubr.bf16.vlgmr.msra.gmra.mrb[0].mxu0 %v2420_v10  ;;  %1923 = vmatpush1.bf16.msra.mxu1 %v2840_v9  ;;  %v2927_v9 = vld [vmem:[%s4055_s1 + $0x5e0] ss:$8 sps:$4 sm:$0xff]   ;;  %v2932_v10 = vld [vmem:[%s4055_s1 + $0x1f4] ss:$8 sps:$4 sm:$0xff]  }
  0x49   : > { %2095 = vmatpush1.bf16.msra.mxu0 %v2843_v11  ;;  %1924 = vmatprep.subr.bf16.mxu1 %v2848_v12  ;;  %v2935_v11 = vld [vmem:[%s4055_s1 + $0x5f4] ss:$8 sps:$4 sm:$0xff]   ;;  %v2930_v12 = vld [vmem:[%s4055_s1 + $0x1f0] ss:$8 sps:$4 sm:$0xff]  }
  0x4a   : > { %2096 = vmatprep.subr.bf16.mxu0 %v2851_v13  ;;  %1954 = vmatprep.mubr.bf16.mxu1 %v2415_v40  ;;  %v2933_v13 = vld [vmem:[%s4055_s1 + $0x5f0] ss:$8 sps:$4 sm:$0xff]   ;;  %v2960_v40 = vld [vmem:[%s4055_s1 + $0x240] ss:$8 sps:$4 sm:$0xff]  }
  0x4b   : > { %2126 = vmatprep.mubr.bf16.mxu0 %v2423_v43  ;;  %v2971_v43 = vld [vmem:[%s4055_s1 + $0x654] ss:$8 sps:$4 sm:$0xff]  }
  0x4c   : > { %1925 = vmatpush1.bf16.msra.mxu1 %v2846_v14  ;;  %v2938_v14 = vld [vmem:[%s4055_s1 + $0x204] ss:$8 sps:$4 sm:$0xff]  }
  0x4d   : > { %2097 = vmatpush1.bf16.msra.mxu0 %v2849_v15  ;;  %1926 = vmatprep.subr.bf16.mxu1 %v2854_v16  ;;  %v2941_v15 = vld [vmem:[%s4055_s1 + $0x604] ss:$8 sps:$4 sm:$0xff]   ;;  %v2414_v16 = vcombine.low %v3487_v36, %v3490_v37  ;;  %v2954_v36 = vld [vmem:[%s4055_s1 + $0x230] ss:$8 sps:$4 sm:$0xff]  }
  0x4e   : > { %2098 = vmatprep.subr.bf16.mxu0 %v2857_v17  ;;  %v2936_v17 = vld [vmem:[%s4055_s1 + $0x200] ss:$8 sps:$4 sm:$0xff]   ;;  %v2957_v37 = vld [vmem:[%s4055_s1 + $0x630] ss:$8 sps:$4 sm:$0xff]  }
  0x50   : > { %1927 = vmatpush1.bf16.msra.mxu1 %v2852_v18  ;;  %v2422_v18 = vcombine.low %v3501_v41, %v3504_v42  ;;  %v2963_v41 = vld [vmem:[%s4055_s1 + $0x640] ss:$8 sps:$4 sm:$0xff]   ;;  %v2968_v42 = vld [vmem:[%s4055_s1 + $0x254] ss:$8 sps:$4 sm:$0xff]  }
  0x51   : > { %2099 = vmatpush1.bf16.msra.mxu0 %v2855_v19  ;;  %1928 = vmatprep.subr.bf16.mxu1 %v2860_v20  ;;  %v2939_v19 = vld [vmem:[%s4055_s1 + $0x600] ss:$8 sps:$4 sm:$0xff]   ;;  %v2944_v20 = vld [vmem:[%s4055_s1 + $0x214] ss:$8 sps:$4 sm:$0xff]  }
  0x52   : > { %2100 = vmatprep.subr.bf16.mxu0 %v2863_v21  ;;  %v2947_v21 = vld [vmem:[%s4055_s1 + $0x614] ss:$8 sps:$4 sm:$0xff]  }
  0x54   : > { %1929 = vmatpush1.bf16.msra.mxu1 %v2858_v22  ;;  %v2942_v22 = vld [vmem:[%s4055_s1 + $0x210] ss:$8 sps:$4 sm:$0xff]  }
  0x55   : > { %2101 = vmatpush1.bf16.msra.mxu0 %v2861_v23  ;;  %1930 = vmatprep.subr.bf16.mxu1 %v2866_v24  ;;  %v2945_v23 = vld [vmem:[%s4055_s1 + $0x610] ss:$8 sps:$4 sm:$0xff]  }
  0x56   : > { %2102 = vmatprep.subr.bf16.mxu0 %v2869_v25  ;;  %v3639_v24 = vld [vmem:[%s3336_s11 + $0x10] sm:$0xff] }
  0x57   : > { %v3642_v25 = vld [vmem:[%s3336_s11 + $0x50] sm:$0xff] }
  0x58   : > { %1931 = vmatpush1.bf16.msra.mxu1 %v2864_v26  ;;  %v2950_v26 = vld [vmem:[%s4055_s1 + $0x224] ss:$8 sps:$4 sm:$0xff]  }
  0x59   : > { %2103 = vmatpush1.bf16.msra.mxu0 %v2867_v27  ;;  %1932 = vmatprep.subr.bf16.mxu1 %v2872_v28  ;;  %v2953_v27 = vld [vmem:[%s4055_s1 + $0x624] ss:$8 sps:$4 sm:$0xff]   ;;  %v2417_v28 = vcombine.high %v3639_v24, %v3642_v25 }
  0x5a   : > { %2104 = vmatprep.subr.bf16.mxu0 %v2875_v29  ;;  %v3653_v29 = vld [vmem:[%s3336_s11 + $0x30] sm:$0xff] }
  0x5c   : > { %1933 = vmatpush1.bf16.msra.mxu1 %v2870_v30  ;;  %v3656_v30 = vld [vmem:[%s3336_s11 + $0x70] sm:$0xff] }
  0x5d   : > { %2105 = vmatpush1.bf16.msra.mxu0 %v2873_v31  ;;  %1934 = vmatprep.subr.bf16.mxu1 %v2878_v32  ;;  %v2425_v31 = vcombine.high %v3653_v29, %v3656_v30  ;;  %v2948_v32 = vld [vmem:[%s4055_s1 + $0x220] ss:$8 sps:$4 sm:$0xff]  }
  0x5e   : > { %2106 = vmatprep.subr.bf16.mxu0 %v2881_v33  ;;  %v2951_v33 = vld [vmem:[%s4055_s1 + $0x620] ss:$8 sps:$4 sm:$0xff]  }
  0x60   : > { %1935 = vmatpush1.bf16.msra.mxu1 %v2876_v34  ;;  %v2956_v34 = vld [vmem:[%s4055_s1 + $0x234] ss:$8 sps:$4 sm:$0xff]  }
  0x61   : > { %2107 = vmatpush1.bf16.msra.mxu0 %v2879_v35  ;;  %1936 = vmatprep.subr.bf16.mxu1 %v2884_v38  ;;  %v2959_v35 = vld [vmem:[%s4055_s1 + $0x634] ss:$8 sps:$4 sm:$0xff]   ;;  %v2962_v38 = vld [vmem:[%s4055_s1 + $0x244] ss:$8 sps:$4 sm:$0xff]  }
  0x62   : > { %2108 = vmatprep.subr.bf16.mxu0 %v2887_v39  ;;  %v2965_v39 = vld [vmem:[%s4055_s1 + $0x644] ss:$8 sps:$4 sm:$0xff]  }
  0x64   : > { %1937 = vmatpush1.bf16.msra.mxu1 %v2882_v44  ;;  %v2966_v44 = vld [vmem:[%s4055_s1 + $0x250] ss:$8 sps:$4 sm:$0xff]  }
  0x65   : > { %2109 = vmatpush1.bf16.msra.mxu0 %v2885_v45  ;;  %1938 = vmatprep.subr.bf16.mxu1 %v2890_v46  ;;  %v2969_v45 = vld [vmem:[%s4055_s1 + $0x650] ss:$8 sps:$4 sm:$0xff]   ;;  %v2974_v46 = vld [vmem:[%s4055_s1 + $0x264] ss:$8 sps:$4 sm:$0xff]  }
  0x66   : > { %2110 = vmatprep.subr.bf16.mxu0 %v2893_v47  ;;  %v2977_v47 = vld [vmem:[%s4055_s1 + $0x664] ss:$8 sps:$4 sm:$0xff]  }
  0x68   : > { %1939 = vmatpush1.bf16.msra.mxu1 %v2888_v48  ;;  %v2972_v48 = vld [vmem:[%s4055_s1 + $0x260] ss:$8 sps:$4 sm:$0xff]  }
  0x69   : > { %2111 = vmatpush1.bf16.msra.mxu0 %v2891_v49  ;;  %1940 = vmatprep.subr.bf16.mxu1 %v2896_v50  ;;  %v2975_v49 = vld [vmem:[%s4055_s1 + $0x660] ss:$8 sps:$4 sm:$0xff]   ;;  %v2980_v50 = vld [vmem:[%s4055_s1 + $0x274] ss:$8 sps:$4 sm:$0xff]  }
  0x6a   : > { %2112 = vmatprep.subr.bf16.mxu0 %v2899_v51  ;;  %v2983_v51 = vld [vmem:[%s4055_s1 + $0x674] ss:$8 sps:$4 sm:$0xff]  }
  0x6c   : > { %1941 = vmatpush1.bf16.msra.mxu1 %v2894_v52  ;;  %v2978_v52 = vld [vmem:[%s4055_s1 + $0x270] ss:$8 sps:$4 sm:$0xff]  }
  0x6d   : > { %2113 = vmatpush1.bf16.msra.mxu0 %v2897_v53  ;;  %1942 = vmatprep.subr.bf16.mxu1 %v2902_v54  ;;  %v2981_v53 = vld [vmem:[%s4055_s1 + $0x670] ss:$8 sps:$4 sm:$0xff]   ;;  %v2986_v54 = vld [vmem:[%s4055_s1 + $0x284] ss:$8 sps:$4 sm:$0xff]  }
  0x6e   : > { %2114 = vmatprep.subr.bf16.mxu0 %v2905_v55  ;;  %v2989_v55 = vld [vmem:[%s4055_s1 + $0x684] ss:$8 sps:$4 sm:$0xff]  }
  0x70   : > { %1943 = vmatpush1.bf16.msra.mxu1 %v2900_v56  ;;  %v2984_v56 = vld [vmem:[%s4055_s1 + $0x280] ss:$8 sps:$4 sm:$0xff]  }
  0x71   : > { %2115 = vmatpush1.bf16.msra.mxu0 %v2903_v57  ;;  %1944 = vmatprep.subr.bf16.mxu1 %v2908_v58  ;;  %v2987_v57 = vld [vmem:[%s4055_s1 + $0x680] ss:$8 sps:$4 sm:$0xff]   ;;  %v2992_v58 = vld [vmem:[%s4055_s1 + $0x294] ss:$8 sps:$4 sm:$0xff]  }
  0x72   : > { %2116 = vmatprep.subr.bf16.mxu0 %v2911_v59  ;;  %v2995_v59 = vld [vmem:[%s4055_s1 + $0x694] ss:$8 sps:$4 sm:$0xff]  }
  0x74   : > { %1945 = vmatpush1.bf16.msra.mxu1 %v2906_v60  ;;  %v2990_v60 = vld [vmem:[%s4055_s1 + $0x290] ss:$8 sps:$4 sm:$0xff]  }
  0x75   : > { %2117 = vmatpush1.bf16.msra.mxu0 %v2909_v61  ;;  %1946 = vmatprep.subr.bf16.mxu1 %v2914_v62  ;;  %v2993_v61 = vld [vmem:[%s4055_s1 + $0x690] ss:$8 sps:$4 sm:$0xff]   ;;  %v2998_v62 = vld [vmem:[%s4055_s1 + $0x2a4] ss:$8 sps:$4 sm:$0xff]  }
  0x76   : > { %2118 = vmatprep.subr.bf16.mxu0 %v2917_v63  ;;  %v3001_v63 = vld [vmem:[%s4055_s1 + $0x6a4] ss:$8 sps:$4 sm:$0xff]  }
  0x78   : > { %1947 = vmatpush1.bf16.msra.mxu1 %v2912_v0  ;;  %v2996_v0 = vld [vmem:[%s4055_s1 + $0x2a0] ss:$8 sps:$4 sm:$0xff]  }
  0x79   : > { %2119 = vmatpush1.bf16.msra.mxu0 %v2915_v1  ;;  %1948 = vmatprep.subr.bf16.mxu1 %v2920_v2  ;;  %v2999_v1 = vld [vmem:[%s4055_s1 + $0x6a0] ss:$8 sps:$4 sm:$0xff]   ;;  %v3004_v2 = vld [vmem:[%s4055_s1 + $0x2b4] ss:$8 sps:$4 sm:$0xff]  }
  0x7a   : > { %2120 = vmatprep.subr.bf16.mxu0 %v2923_v3  ;;  %v3007_v3 = vld [vmem:[%s4055_s1 + $0x6b4] ss:$8 sps:$4 sm:$0xff]  }
  0x7c   : > { %1949 = vmatpush1.bf16.msra.mxu1 %v2918_v4  ;;  %v3002_v4 = vld [vmem:[%s4055_s1 + $0x2b0] ss:$8 sps:$4 sm:$0xff]  }
  0x7d   : > { %2121 = vmatpush1.bf16.msra.mxu0 %v2921_v5  ;;  %1950 = vmatprep.subr.bf16.mxu1 %v2926_v6  ;;  %v3005_v5 = vld [vmem:[%s4055_s1 + $0x6b0] ss:$8 sps:$4 sm:$0xff]   ;;  %v3010_v6 = vld [vmem:[%s4055_s1 + $0x2c4] ss:$8 sps:$4 sm:$0xff]  }
  0x7e   : > { %2122 = vmatprep.subr.bf16.mxu0 %v2929_v7  ;;  %v3013_v7 = vld [vmem:[%s4055_s1 + $0x6c4] ss:$8 sps:$4 sm:$0xff]  }
  0x80   : > { %1951 = vmatpush1.bf16.msra.mxu1 %v2924_v8  ;;  %v3008_v8 = vld [vmem:[%s4055_s1 + $0x2c0] ss:$8 sps:$4 sm:$0xff]  }
  0x81   : > { %2123 = vmatpush1.bf16.msra.mxu0 %v2927_v9  ;;  %1952 = vmatprep.subr.bf16.mxu1 %v2932_v10  ;;  %v3011_v9 = vld [vmem:[%s4055_s1 + $0x6c0] ss:$8 sps:$4 sm:$0xff]   ;;  %v3016_v10 = vld [vmem:[%s4055_s1 + $0x2d4] ss:$8 sps:$4 sm:$0xff]  }
  0x82   : > { %2124 = vmatprep.subr.bf16.mxu0 %v2935_v11  ;;  %v3019_v11 = vld [vmem:[%s4055_s1 + $0x6d4] ss:$8 sps:$4 sm:$0xff]  }
  0x84   : > { %1953 = vmatpush1.bf16.msra.mxu1 %v2930_v12  ;;  %v3014_v12 = vld [vmem:[%s4055_s1 + $0x2d0] ss:$8 sps:$4 sm:$0xff]  }
  0x85   : > { %2125 = vmatpush1.bf16.msra.mxu0 %v2933_v13  ;;  %1965 = vmatprep.subr.bf16.mxu1 %v2938_v14  ;;  %v3017_v13 = vld [vmem:[%s4055_s1 + $0x6d0] ss:$8 sps:$4 sm:$0xff]   ;;  %v3022_v14 = vld [vmem:[%s4055_s1 + $0x2e4] ss:$8 sps:$4 sm:$0xff]  }
  0x86   : > { %2137 = vmatprep.subr.bf16.mxu0 %v2941_v15  ;;  %v3025_v15 = vld [vmem:[%s4055_s1 + $0x6e4] ss:$8 sps:$4 sm:$0xff]  }
  0x87   : > { %1955 = vmatmul.mubr.bf16.vlgmr.msra.gmra.mrb[0].mxu1 %v2414_v16  ;;  %v3020_v16 = vld [vmem:[%s4055_s1 + $0x2e0] ss:$8 sps:$4 sm:$0xff]  }
  0x88   : > { %2127 = vmatmul.mubr.bf16.vlgmr.msra.gmra.mrb[0].mxu0 %v2422_v18  ;;  %1966 = vmatpush1.bf16.msra.mxu1 %v2936_v17  ;;  %v3023_v17 = vld [vmem:[%s4055_s1 + $0x6e0] ss:$8 sps:$4 sm:$0xff]   ;;  %v3028_v18 = vld [vmem:[%s4055_s1 + $0x2f4] ss:$8 sps:$4 sm:$0xff]  }
  0x89   : > { %2138 = vmatpush1.bf16.msra.mxu0 %v2939_v19  ;;  %1967 = vmatprep.subr.bf16.mxu1 %v2944_v20  ;;  %v3031_v19 = vld [vmem:[%s4055_s1 + $0x6f4] ss:$8 sps:$4 sm:$0xff]   ;;  %v3026_v20 = vld [vmem:[%s4055_s1 + $0x2f0] ss:$8 sps:$4 sm:$0xff]  }
  0x8a   : > { %2139 = vmatprep.subr.bf16.mxu0 %v2947_v21  ;;  %1997 = vmatprep.mubr.bf16.mxu1 %v2417_v28  ;;  %v3029_v21 = vld [vmem:[%s4055_s1 + $0x6f0] ss:$8 sps:$4 sm:$0xff]   ;;  %v2424_v28 = vcombine.low %v3653_v29, %v3656_v30 }
  0x8b   : > { %2169 = vmatprep.mubr.bf16.mxu0 %v2425_v31  ;;  %v3836_v31 = vld [vmem:[%s3336_s11 + $0x58] sm:$0xff] }
  0x8c   : > { %1968 = vmatpush1.bf16.msra.mxu1 %v2942_v22  ;;  %v3034_v22 = vld [vmem:[%s4055_s1 + $0x304] ss:$8 sps:$4 sm:$0xff]  }
  0x8d   : > { %2140 = vmatpush1.bf16.msra.mxu0 %v2945_v23  ;;  %1969 = vmatprep.subr.bf16.mxu1 %v2950_v26  ;;  %v3037_v23 = vld [vmem:[%s4055_s1 + $0x704] ss:$8 sps:$4 sm:$0xff]   ;;  %v3829_v26 = vld [vmem:[%s3336_s11 + $0x18] sm:$0xff] }
  0x8e   : > { %2141 = vmatprep.subr.bf16.mxu0 %v2953_v27  ;;  %v2416_v27 = vcombine.low %v3639_v24, %v3642_v25  ;;  %v3040_v24 = vld [vmem:[%s4055_s1 + $0x314] ss:$8 sps:$4 sm:$0xff]   ;;  %v2419_v29 = vcombine.high %v3829_v26, %v3836_v31 }
  0x8f   : > { %v3043_v25 = vld [vmem:[%s4055_s1 + $0x714] ss:$8 sps:$4 sm:$0xff]  }
  0x90   : > { %1970 = vmatpush1.bf16.msra.mxu1 %v2948_v32  ;;  %v3839_v32 = vld [vmem:[%s3336_s11 + $0x38] sm:$0xff] }
  0x91   : > { %2142 = vmatpush1.bf16.msra.mxu0 %v2951_v33  ;;  %1971 = vmatprep.subr.bf16.mxu1 %v2956_v34  ;;  %v3842_v33 = vld [vmem:[%s3336_s11 + $0x78] sm:$0xff]  ;;  %v3032_v34 = vld [vmem:[%s4055_s1 + $0x300] ss:$8 sps:$4 sm:$0xff]  }
  0x92   : > { %2143 = vmatprep.subr.bf16.mxu0 %v2959_v35  ;;  %v3035_v35 = vld [vmem:[%s4055_s1 + $0x700] ss:$8 sps:$4 sm:$0xff]   ;;  %v2427_v30 = vcombine.high %v3839_v32, %v3842_v33 }
  0x94   : > { %1972 = vmatpush1.bf16.msra.mxu1 %v2954_v36  ;;  %v3038_v36 = vld [vmem:[%s4055_s1 + $0x310] ss:$8 sps:$4 sm:$0xff]  }
  0x95   : > { %2144 = vmatpush1.bf16.msra.mxu0 %v2957_v37  ;;  %1973 = vmatprep.subr.bf16.mxu1 %v2962_v38  ;;  %v3041_v37 = vld [vmem:[%s4055_s1 + $0x710] ss:$8 sps:$4 sm:$0xff]   ;;  %v3046_v38 = vld [vmem:[%s4055_s1 + $0x324] ss:$8 sps:$4 sm:$0xff]  }
  0x96   : > { %2145 = vmatprep.subr.bf16.mxu0 %v2965_v39  ;;  %v3049_v39 = vld [vmem:[%s4055_s1 + $0x724] ss:$8 sps:$4 sm:$0xff]  }
  0x98   : > { %1974 = vmatpush1.bf16.msra.mxu1 %v2960_v40  ;;  %v3044_v40 = vld [vmem:[%s4055_s1 + $0x320] ss:$8 sps:$4 sm:$0xff]  }
  0x99   : > { %2146 = vmatpush1.bf16.msra.mxu0 %v2963_v41  ;;  %1975 = vmatprep.subr.bf16.mxu1 %v2968_v42  ;;  %v3047_v41 = vld [vmem:[%s4055_s1 + $0x720] ss:$8 sps:$4 sm:$0xff]   ;;  %v3052_v42 = vld [vmem:[%s4055_s1 + $0x334] ss:$8 sps:$4 sm:$0xff]  }
  0x9a   : > { %2147 = vmatprep.subr.bf16.mxu0 %v2971_v43  ;;  %v3055_v43 = vld [vmem:[%s4055_s1 + $0x734] ss:$8 sps:$4 sm:$0xff]  }
  0x9c   : > { %1976 = vmatpush1.bf16.msra.mxu1 %v2966_v44  ;;  %v3050_v44 = vld [vmem:[%s4055_s1 + $0x330] ss:$8 sps:$4 sm:$0xff]  }
  0x9d   : > { %2148 = vmatpush1.bf16.msra.mxu0 %v2969_v45  ;;  %1977 = vmatprep.subr.bf16.mxu1 %v2974_v46  ;;  %v3053_v45 = vld [vmem:[%s4055_s1 + $0x730] ss:$8 sps:$4 sm:$0xff]   ;;  %v3058_v46 = vld [vmem:[%s4055_s1 + $0x344] ss:$8 sps:$4 sm:$0xff]  }
  0x9e   : > { %2149 = vmatprep.subr.bf16.mxu0 %v2977_v47  ;;  %v3061_v47 = vld [vmem:[%s4055_s1 + $0x744] ss:$8 sps:$4 sm:$0xff]  }
  0xa0   : > { %1978 = vmatpush1.bf16.msra.mxu1 %v2972_v48  ;;  %v3056_v48 = vld [vmem:[%s4055_s1 + $0x340] ss:$8 sps:$4 sm:$0xff]  }
  0xa1   : > { %2150 = vmatpush1.bf16.msra.mxu0 %v2975_v49  ;;  %1979 = vmatprep.subr.bf16.mxu1 %v2980_v50  ;;  %v3059_v49 = vld [vmem:[%s4055_s1 + $0x740] ss:$8 sps:$4 sm:$0xff]   ;;  %v3064_v50 = vld [vmem:[%s4055_s1 + $0x354] ss:$8 sps:$4 sm:$0xff]  }
  0xa2   : > { %2151 = vmatprep.subr.bf16.mxu0 %v2983_v51  ;;  %v3067_v51 = vld [vmem:[%s4055_s1 + $0x754] ss:$8 sps:$4 sm:$0xff]  }
  0xa4   : > { %1980 = vmatpush1.bf16.msra.mxu1 %v2978_v52  ;;  %v3062_v52 = vld [vmem:[%s4055_s1 + $0x350] ss:$8 sps:$4 sm:$0xff]  }
  0xa5   : > { %2152 = vmatpush1.bf16.msra.mxu0 %v2981_v53  ;;  %1981 = vmatprep.subr.bf16.mxu1 %v2986_v54  ;;  %v3065_v53 = vld [vmem:[%s4055_s1 + $0x750] ss:$8 sps:$4 sm:$0xff]   ;;  %v3070_v54 = vld [vmem:[%s4055_s1 + $0x364] ss:$8 sps:$4 sm:$0xff]  }
  0xa6   : > { %2153 = vmatprep.subr.bf16.mxu0 %v2989_v55  ;;  %v3073_v55 = vld [vmem:[%s4055_s1 + $0x764] ss:$8 sps:$4 sm:$0xff]  }
  0xa8   : > { %1982 = vmatpush1.bf16.msra.mxu1 %v2984_v56  ;;  %v3068_v56 = vld [vmem:[%s4055_s1 + $0x360] ss:$8 sps:$4 sm:$0xff]  }
  0xa9   : > { %2154 = vmatpush1.bf16.msra.mxu0 %v2987_v57  ;;  %1983 = vmatprep.subr.bf16.mxu1 %v2992_v58  ;;  %v3071_v57 = vld [vmem:[%s4055_s1 + $0x760] ss:$8 sps:$4 sm:$0xff]   ;;  %v3076_v58 = vld [vmem:[%s4055_s1 + $0x374] ss:$8 sps:$4 sm:$0xff]  }
  0xaa   : > { %2155 = vmatprep.subr.bf16.mxu0 %v2995_v59  ;;  %v3079_v59 = vld [vmem:[%s4055_s1 + $0x774] ss:$8 sps:$4 sm:$0xff]  }
  0xac   : > { %1984 = vmatpush1.bf16.msra.mxu1 %v2990_v60  ;;  %v3074_v60 = vld [vmem:[%s4055_s1 + $0x370] ss:$8 sps:$4 sm:$0xff]  }
  0xad   : > { %2156 = vmatpush1.bf16.msra.mxu0 %v2993_v61  ;;  %1985 = vmatprep.subr.bf16.mxu1 %v2998_v62  ;;  %v3077_v61 = vld [vmem:[%s4055_s1 + $0x770] ss:$8 sps:$4 sm:$0xff]   ;;  %v3082_v62 = vld [vmem:[%s4055_s1 + $0x384] ss:$8 sps:$4 sm:$0xff]  }
  0xae   : > { %2157 = vmatprep.subr.bf16.mxu0 %v3001_v63  ;;  %v3085_v63 = vld [vmem:[%s4055_s1 + $0x784] ss:$8 sps:$4 sm:$0xff]  }
  0xb0   : > { %1986 = vmatpush1.bf16.msra.mxu1 %v2996_v0  ;;  %v3080_v0 = vld [vmem:[%s4055_s1 + $0x380] ss:$8 sps:$4 sm:$0xff]  }
  0xb1   : > { %2158 = vmatpush1.bf16.msra.mxu0 %v2999_v1  ;;  %1987 = vmatprep.subr.bf16.mxu1 %v3004_v2  ;;  %v3083_v1 = vld [vmem:[%s4055_s1 + $0x780] ss:$8 sps:$4 sm:$0xff]   ;;  %v3088_v2 = vld [vmem:[%s4055_s1 + $0x394] ss:$8 sps:$4 sm:$0xff]  }
  0xb2   : > { %2159 = vmatprep.subr.bf16.mxu0 %v3007_v3  ;;  %v3091_v3 = vld [vmem:[%s4055_s1 + $0x794] ss:$8 sps:$4 sm:$0xff]  }
  0xb4   : > { %1988 = vmatpush1.bf16.msra.mxu1 %v3002_v4  ;;  %v3086_v4 = vld [vmem:[%s4055_s1 + $0x390] ss:$8 sps:$4 sm:$0xff]  }
  0xb5   : > { %2160 = vmatpush1.bf16.msra.mxu0 %v3005_v5  ;;  %1989 = vmatprep.subr.bf16.mxu1 %v3010_v6  ;;  %v3089_v5 = vld [vmem:[%s4055_s1 + $0x790] ss:$8 sps:$4 sm:$0xff]   ;;  %v3094_v6 = vld [vmem:[%s4055_s1 + $0x3a4] ss:$8 sps:$4 sm:$0xff]  }
  0xb6   : > { %2161 = vmatprep.subr.bf16.mxu0 %v3013_v7  ;;  %v3097_v7 = vld [vmem:[%s4055_s1 + $0x7a4] ss:$8 sps:$4 sm:$0xff]  }
  0xb8   : > { %1990 = vmatpush1.bf16.msra.mxu1 %v3008_v8  ;;  %v3092_v8 = vld [vmem:[%s4055_s1 + $0x3a0] ss:$8 sps:$4 sm:$0xff]  }
  0xb9   : > { %2162 = vmatpush1.bf16.msra.mxu0 %v3011_v9  ;;  %1991 = vmatprep.subr.bf16.mxu1 %v3016_v10  ;;  %v3095_v9 = vld [vmem:[%s4055_s1 + $0x7a0] ss:$8 sps:$4 sm:$0xff]   ;;  %v3100_v10 = vld [vmem:[%s4055_s1 + $0x3b4] ss:$8 sps:$4 sm:$0xff]  }
  0xba   : > { %2163 = vmatprep.subr.bf16.mxu0 %v3019_v11  ;;  %v3103_v11 = vld [vmem:[%s4055_s1 + $0x7b4] ss:$8 sps:$4 sm:$0xff]  }
  0xbc   : > { %1992 = vmatpush1.bf16.msra.mxu1 %v3014_v12  ;;  %v3098_v12 = vld [vmem:[%s4055_s1 + $0x3b0] ss:$8 sps:$4 sm:$0xff]  }
  0xbd   : > { %2164 = vmatpush1.bf16.msra.mxu0 %v3017_v13  ;;  %1993 = vmatprep.subr.bf16.mxu1 %v3022_v14  ;;  %v3101_v13 = vld [vmem:[%s4055_s1 + $0x7b0] ss:$8 sps:$4 sm:$0xff]   ;;  %v3106_v14 = vld [vmem:[%s4055_s1 + $0x3c4] ss:$8 sps:$4 sm:$0xff]  }
  0xbe   : > { %2165 = vmatprep.subr.bf16.mxu0 %v3025_v15  ;;  %v3109_v15 = vld [vmem:[%s4055_s1 + $0x7c4] ss:$8 sps:$4 sm:$0xff]  }
  0xc0   : > { %1994 = vmatpush1.bf16.msra.mxu1 %v3020_v16  ;;  %v3104_v16 = vld [vmem:[%s4055_s1 + $0x3c0] ss:$8 sps:$4 sm:$0xff]  }
  0xc1   : > { %2166 = vmatpush1.bf16.msra.mxu0 %v3023_v17  ;;  %1995 = vmatprep.subr.bf16.mxu1 %v3028_v18  ;;  %v3107_v17 = vld [vmem:[%s4055_s1 + $0x7c0] ss:$8 sps:$4 sm:$0xff]   ;;  %v3112_v18 = vld [vmem:[%s4055_s1 + $0x3d4] ss:$8 sps:$4 sm:$0xff]  }
  0xc2   : > { %2167 = vmatprep.subr.bf16.mxu0 %v3031_v19  ;;  %v3115_v19 = vld [vmem:[%s4055_s1 + $0x7d4] ss:$8 sps:$4 sm:$0xff]  }
  0xc4   : > { %1996 = vmatpush1.bf16.msra.mxu1 %v3026_v20  ;;  %v3110_v20 = vld [vmem:[%s4055_s1 + $0x3d0] ss:$8 sps:$4 sm:$0xff]  }
  0xc5   : > { %2168 = vmatpush1.bf16.msra.mxu0 %v3029_v21  ;;  %2008 = vmatprep.subr.bf16.mxu1 %v3034_v22  ;;  %v3113_v21 = vld [vmem:[%s4055_s1 + $0x7d0] ss:$8 sps:$4 sm:$0xff]   ;;  %v3118_v22 = vld [vmem:[%s4055_s1 + $0x3e4] ss:$8 sps:$4 sm:$0xff]  }
  0xc6   : > { %2180 = vmatprep.subr.bf16.mxu0 %v3037_v23  ;;  %v3121_v23 = vld [vmem:[%s4055_s1 + $0x7e4] ss:$8 sps:$4 sm:$0xff]  }
  0xc7   : > { %1998 = vmatmul.mubr.bf16.vlgmr.msra.gmra.mrb[0].mxu1 %v2416_v27  ;;  %v3116_v27 = vld [vmem:[%s4055_s1 + $0x3e0] ss:$8 sps:$4 sm:$0xff]  }
  0xc8   : > { %2170 = vmatmul.mubr.bf16.vlgmr.msra.gmra.mrb[0].mxu0 %v2424_v28  ;;  %2009 = vmatpush1.bf16.msra.mxu1 %v3032_v34  ;;  %v3119_v28 = vld [vmem:[%s4055_s1 + $0x7e0] ss:$8 sps:$4 sm:$0xff]   ;;  %v3124_v34 = vld [vmem:[%s4055_s1 + $0x3f4] ss:$8 sps:$4 sm:$0xff]  }
  0xc9   : > { %2181 = vmatpush1.bf16.msra.mxu0 %v3035_v35  ;;  %2010 = vmatprep.subr.bf16.mxu1 %v3040_v24  ;;  %v3127_v35 = vld [vmem:[%s4055_s1 + $0x7f4] ss:$8 sps:$4 sm:$0xff]   ;;  %v3122_v24 = vld [vmem:[%s4055_s1 + $0x3f0] ss:$8 sps:$4 sm:$0xff]  }
  0xca   : > { %2182 = vmatprep.subr.bf16.mxu0 %v3043_v25  ;;  %2040 = vmatprep.mubr.bf16.mxu1 %v2419_v29  ;;  %v3125_v25 = vld [vmem:[%s4055_s1 + $0x7f0] ss:$8 sps:$4 sm:$0xff]   ;;  %v2418_v29 = vcombine.low %v3829_v26, %v3836_v31 }
  0xcb   : > { %2212 = vmatprep.mubr.bf16.mxu0 %v2427_v30  ;;  %v2426_v30 = vcombine.low %v3839_v32, %v3842_v33 }
  0xcc   : > { %2011 = vmatpush1.bf16.msra.mxu1 %v3038_v36  ;;  %v509_v36 = vlaneseq }
  0xcd   : > { %2183 = vmatpush1.bf16.msra.mxu0 %v3041_v37  ;;  %2012 = vmatprep.subr.bf16.mxu1 %v3046_v38 }
  0xce   : > { %2184 = vmatprep.subr.bf16.mxu0 %v3049_v39  ;;  %v510_v37 = vshrl.u32 %v509_v36, 7  ;;  %v507_v39 = vld [vmem:[%s4056_s2] sm:$0x3] }
  0xd0   : > { %2013 = vmatpush1.bf16.msra.mxu1 %v3044_v40  ;;  %v511_v38 = vsub.s32 0, %v510_v37  ;;  %v515_v40 = vsub.s32 1, %v510_v37 }
  0xd1   : > { %2185 = vmatpush1.bf16.msra.mxu0 %v3047_v41  ;;  %2014 = vmatprep.subr.bf16.mxu1 %v3052_v42 }
  0xd2   : > { %2186 = vmatprep.subr.bf16.mxu0 %v3055_v43  ;;  %v512_v41 = vrot.slane %v507_v39, %v511_v38  ;;  %v516_v42 = vrot.slane %v507_v39, %v515_v40 }
  0xd4   : > { %2015 = vmatpush1.bf16.msra.mxu1 %v3050_v44 }
  0xd5   : > { %2187 = vmatpush1.bf16.msra.mxu0 %v3053_v45  ;;  %2016 = vmatprep.subr.bf16.mxu1 %v3058_v46 }
  0xd6   : > { %2188 = vmatprep.subr.bf16.mxu0 %v3061_v47 }
  0xd8   : > { %2017 = vmatpush1.bf16.msra.mxu1 %v3056_v48 }
  0xd9   : > { %2189 = vmatpush1.bf16.msra.mxu0 %v3059_v49  ;;  %2018 = vmatprep.subr.bf16.mxu1 %v3064_v50 }
  0xda   : > { %2190 = vmatprep.subr.bf16.mxu0 %v3067_v51 }
  0xdc   : > { %2019 = vmatpush1.bf16.msra.mxu1 %v3062_v52 }
  0xdd   : > { %2191 = vmatpush1.bf16.msra.mxu0 %v3065_v53  ;;  %2020 = vmatprep.subr.bf16.mxu1 %v3070_v54 }
  0xde   : > { %2192 = vmatprep.subr.bf16.mxu0 %v3073_v55 }
  0xe0   : > { %2021 = vmatpush1.bf16.msra.mxu1 %v3068_v56 }
  0xe1   : > { %2193 = vmatpush1.bf16.msra.mxu0 %v3071_v57  ;;  %2022 = vmatprep.subr.bf16.mxu1 %v3076_v58 }
  0xe2   : > { %2194 = vmatprep.subr.bf16.mxu0 %v3079_v59 }
  0xe4   : > { %2023 = vmatpush1.bf16.msra.mxu1 %v3074_v60 }
  0xe5   : > { %2195 = vmatpush1.bf16.msra.mxu0 %v3077_v61  ;;  %2024 = vmatprep.subr.bf16.mxu1 %v3082_v62 }
  0xe6   : > { %2196 = vmatprep.subr.bf16.mxu0 %v3085_v63 }
  0xe8   : > { %2025 = vmatpush1.bf16.msra.mxu1 %v3080_v0 }
  0xe9   : > { %2197 = vmatpush1.bf16.msra.mxu0 %v3083_v1  ;;  %2026 = vmatprep.subr.bf16.mxu1 %v3088_v2 }
  0xea   : > { %2198 = vmatprep.subr.bf16.mxu0 %v3091_v3 }
  0xec   : > { %2027 = vmatpush1.bf16.msra.mxu1 %v3086_v4 }
  0xed   : > { %2199 = vmatpush1.bf16.msra.mxu0 %v3089_v5  ;;  %2028 = vmatprep.subr.bf16.mxu1 %v3094_v6 }
  0xee   : > { %2200 = vmatprep.subr.bf16.mxu0 %v3097_v7 }
  0xf0   : > { %2029 = vmatpush1.bf16.msra.mxu1 %v3092_v8 }
  0xf1   : > { %2201 = vmatpush1.bf16.msra.mxu0 %v3095_v9  ;;  %2030 = vmatprep.subr.bf16.mxu1 %v3100_v10 }
  0xf2   : > { %2202 = vmatprep.subr.bf16.mxu0 %v3103_v11 }
  0xf4   : > { %2031 = vmatpush1.bf16.msra.mxu1 %v3098_v12 }
  0xf5   : > { %2203 = vmatpush1.bf16.msra.mxu0 %v3101_v13  ;;  %2032 = vmatprep.subr.bf16.mxu1 %v3106_v14 }
  0xf6   : > { %2204 = vmatprep.subr.bf16.mxu0 %v3109_v15 }
  0xf8   : > { %2033 = vmatpush1.bf16.msra.mxu1 %v3104_v16 }
  0xf9   : > { %2205 = vmatpush1.bf16.msra.mxu0 %v3107_v17  ;;  %2034 = vmatprep.subr.bf16.mxu1 %v3112_v18 }
  0xfa   : > { %2206 = vmatprep.subr.bf16.mxu0 %v3115_v19 }
  0xfc   : > { %2035 = vmatpush1.bf16.msra.mxu1 %v3110_v20 }
  0xfd   : > { %2207 = vmatpush1.bf16.msra.mxu0 %v3113_v21  ;;  %2036 = vmatprep.subr.bf16.mxu1 %v3118_v22 }
  0xfe   : > { %2208 = vmatprep.subr.bf16.mxu0 %v3121_v23 }
 0x100   : > { %2037 = vmatpush1.bf16.msra.mxu1 %v3116_v27 }
 0x101   : > { %2209 = vmatpush1.bf16.msra.mxu0 %v3119_v28  ;;  %2038 = vmatprep.subr.bf16.mxu1 %v3124_v34 }
 0x102   : > { %2210 = vmatprep.subr.bf16.mxu0 %v3127_v35 }
 0x104   : > { %2039 = vmatpush1.bf16.msra.mxu1 %v3122_v24 }
 0x105   : > { %2211 = vmatpush1.bf16.msra.mxu0 %v3125_v25 }
 0x107   : > { %2041 = vmatmul.mubr.bf16.vlgmr.msra.gmra.mrb[0].mxu1 %v2418_v29 }
 0x108   : > { %2213 = vmatmul.mubr.bf16.vlgmr.msra.gmra.mrb[0].mxu0 %v2426_v30 }
 0x1da   : > { %v2042_v43 = vpop.f32.mrb[0].mxu1 }
 0x1db   : > { %v2214_v44 = vpop.f32.mrb[0].mxu0  ;;  %v2688_v26 = vadd.f32 %v2042_v43, %v512_v41  ;;  %v2044_v31 = vpop.f32.mrb[1].mxu1 }
 0x1dc   : > { %v2216_v45 = vpop.f32.mrb[1].mxu0  ;;  %v2690_v32 = vadd.f32 %v2044_v31, %v516_v42  ;;  %v2046_v33 = vpop.f32.mrb[2].mxu1 }
 0x1dd   : > { %v2218_v46 = vpop.f32.mrb[2].mxu0  ;;  %v2689_v47 = vadd.f32 %v2688_v26, %v2214_v44  ;;  %v2692_v48 = vadd.f32 %v2046_v33, %v512_v41  ;;  %v2048_v49 = vpop.f32.mrb[3].mxu1 }
 0x1de   : > { %v2220_v50 = vpop.f32.mrb[3].mxu0  ;;  %v2691_v51 = vadd.f32 %v2690_v32, %v2216_v45  ;;  %v2694_v52 = vadd.f32 %v2048_v49, %v516_v42 }
 0x1df   : > { %v2693_v53 = vadd.f32 %v2692_v48, %v2218_v46  ;;  %v2237_v55 = vmul.f32 %v2689_v47, %v2689_v47 }
 0x1e0   : > { %v2695_v54 = vadd.f32 %v2694_v52, %v2220_v50  ;;  %v2238_v58 = vmul.f32 %v2691_v51, %v2691_v51 }
 0x1e1   : > { %v2223_v56 = vadd.f32 %v2693_v53, %v2689_v47  ;;  %v2239_v57 = vmul.f32 %v2693_v53, %v2693_v53 }
 0x1e2   : > { %v2230_v59 = vadd.f32 %v2695_v54, %v2691_v51  ;;  %v2240_v60 = vmul.f32 %v2695_v54, %v2695_v54 }
 0x1e3   : > { %v2224_v61 = vrot.slane %v2223_v56, 4  ;;  %v2241_v62 = vadd.f32 %v2239_v57, %v2237_v55 }
 0x1e4   : > { %v2231_v63 = vrot.slane %v2230_v59, 4  ;;  %v2248_v0 = vadd.f32 %v2240_v60, %v2238_v58 }
 0x1e5   : > { %v2225_v1 = vadd.f32 %v2224_v61, %v2223_v56  ;;  %v2242_v2 = vrot.slane %v2241_v62, 4 }
 0x1e6   : > { %v2232_v3 = vadd.f32 %v2231_v63, %v2230_v59  ;;  %v2249_v4 = vrot.slane %v2248_v0, 4 }
 0x1e7   : > { %v2226_v5 = vrot.slane %v2225_v1, 2  ;;  %v2243_v6 = vadd.f32 %v2242_v2, %v2241_v62 }
 0x1e8   : > { %v2233_v7 = vrot.slane %v2232_v3, 2  ;;  %v2250_v8 = vadd.f32 %v2249_v4, %v2248_v0 }
 0x1e9   : > { %v2227_v9 = vadd.f32 %v2226_v5, %v2225_v1  ;;  %v2244_v10 = vrot.slane %v2243_v6, 2 }
 0x1ea   : > { %v2234_v11 = vadd.f32 %v2233_v7, %v2232_v3  ;;  %v2251_v12 = vrot.slane %v2250_v8, 2 }
 0x1eb   : > { %v2228_v13 = vrot.slane %v2227_v9, 1  ;;  %v2245_v14 = vadd.f32 %v2244_v10, %v2243_v6 }
 0x1ec   : > { %v2235_v15 = vrot.slane %v2234_v11, 1  ;;  %v2252_v16 = vadd.f32 %v2251_v12, %v2250_v8 }
 0x1ed   : > { %v2229_v17 = vadd.f32 %v2228_v13, %v2227_v9  ;;  %v2246_v18 = vrot.slane %v2245_v14, 1 }
 0x1ee   : > { %v2236_v19 = vadd.f32 %v2235_v15, %v2234_v11  ;;  %v2253_v20 = vrot.slane %v2252_v16, 1 }
 0x1ef   : > { %v2247_v21 = vadd.f32 %v2246_v18, %v2245_v14  ;;  %v2255_v22 = vmul.f32 0.11111111, %v2229_v17 }
 0x1f0   : > { %v2254_v23 = vadd.f32 %v2253_v20, %v2252_v16  ;;  %v2256_v27 = vmul.f32 0.11111111, %v2236_v19 }
 0x1f1   : > { %v2257_v28 = vmul.f32 0.11111111, %v2247_v21  ;;  %v2259_v34 = vmul.f32 %v2255_v22, %v2255_v22  ;;  %v2265_v35 = vsub.f32 %v2689_v47, %v2255_v22  ;;  %v2267_v24 = vsub.f32 %v2693_v53, %v2255_v22 }
 0x1f2   : > { %v2258_v25 = vmul.f32 0.11111111, %v2254_v23  ;;  %v2260_v29 = vmul.f32 %v2256_v27, %v2256_v27  ;;  %v2266_v30 = vsub.f32 %v2691_v51, %v2256_v27  ;;  %v2268_v36 = vsub.f32 %v2695_v54, %v2256_v27 }
 0x1f3   : > { %v2261_v37 = vsub.f32 %v2257_v28, %v2259_v34 }
 0x1f4   : > { %v2262_v38 = vsub.f32 %v2258_v25, %v2260_v29 }
 0x1f5   : > { %v2263_v39 = vmax.f32 %v2261_v37, 0.0 }
 0x1f6   : > { %v2264_v40 = vmax.f32 %v2262_v38, 0.0 }
 0x1f7   : > { %v2269_v41 = vadd.f32 1e-05, %v2263_v39 }
 0x1f8   : > { %v2270_v42 = vadd.f32 1e-05, %v2264_v40 }
 0x1f9   : > { %3128 = vrsqrt.f32 %v2269_v41 }
 0x1fa   : > { %3130 = vrsqrt.f32 %v2270_v42 }
 0x203   : > { %v3129_v43 = vpop.eup %3128 }
 0x204   : > { %v3131_v44 = vpop.eup %3130  ;;  %v2273_v26 = vmul.f32 %v3129_v43, %v2265_v35  ;;  %v2275_v31 = vmul.f32 %v3129_v43, %v2267_v24 }
 0x205   : > { %v2274_v45 = vmul.f32 %v3131_v44, %v2266_v30  ;;  %v2276_v32 = vmul.f32 %v3131_v44, %v2268_v36 }
 0x206   : > { %vm2277_vm0 = vcmp.ge.f32.partialorder %v2273_v26, 0.0  ;;  %vm2279_vm1 = vcmp.ge.f32.partialorder %v2275_v31, 0.0  ;;  %v2281_v33 = vmul.f32 0.2, %v2273_v26  ;;  %v2283_v46 = vmul.f32 0.2, %v2275_v31 }
 0x207   : > { %vm2278_vm2 = vcmp.ge.f32.partialorder %v2274_v45, 0.0  ;;  %vm2280_vm3 = vcmp.ge.f32.partialorder %v2276_v32, 0.0  ;;  %v2282_v47 = vmul.f32 0.2, %v2274_v45  ;;  %v2284_v48 = vmul.f32 0.2, %v2276_v32 }
 0x208   : > { %v2285_v49 = vsel %vm2277_vm0, %v2273_v26, %v2281_v33  ;;  %v2287_v50 = vsel %vm2279_vm1, %v2275_v31, %v2283_v46 }
 0x209   : > { %2289 = vst [vmem:[%s233_s21] sm:$0xff] %v2285_v49  ;;  %2291 = vst [vmem:[%s233_s21 + $0x10] sm:$0xff] %v2287_v50  ;;  %v2286_v51 = vsel %vm2278_vm2, %v2274_v45, %v2282_v47  ;;  %v2288_v52 = vsel %vm2280_vm3, %v2276_v32, %v2284_v48 }
 0x20a   : > { %2290 = vst [vmem:[%s233_s21 + $0x8] sm:$0xff] %v2286_v51  ;;  %2292 = vst [vmem:[%s233_s21 + $0x18] sm:$0xff] %v2288_v52 }
 0x20b PF: > { %s13_s14 = sadd.s32 1, %s3154_s14   ;;  %s4058_s12 = smov %s3150_s13 }
 0x20c   : > { %p10_p5 = scmp.ge.s32.totalorder %s13_s14, 4   ;;  %s4059_s13 = smov %s4061_s15 }
 0x20e   :  { %12 = sbr.rel (!%p10_p5) target bundleno = 2 (0x2), region = 68 }

// kernel: _lambda_.7
= control target key start
LH: loop header
LB: loop body
LE: loop exit
PB: predicated region body
PF: predicated region fallthrough
CT: control target
= control target key end

     0   :  { %s10121_s12 = smov 0   ;;  %s10123_s13 = smov 0   ;;  %s11946_s0 = inlined_call_operand.vmem [shape: bf16[2,16,4096], index: 0, kind: input, shape index: {}]   ;;  %s11947_s1 = inlined_call_operand.vmem [shape: bf16[4096,512], index: 1, kind: input, shape index: {}]   ;;  %s11948_s2 = inlined_call_operand.vmem [shape: f32[1,512], index: 2, kind: input, shape index: {}]   ;;  %s11949_s3 = inlined_call_operand.vmem [shape: f32[2,16,512], index: 3, kind: output, shape index: {}]  }
   0x1   :  { %s10125_s14 = smov 0   ;;  %s10127_s15 = smov 0  }
   0x2   :  { %s10129_s16 = smov 0   ;;  %s10131_s17 = smov 0  }
   0x3   :  { %s10133_s18 = smov 0   ;;  %s10135_s19 = smov 0  }
   0x4   :  { %s10137_s20 = smov 0  }
   0x5 LB: > { %s8556_s21 = sadd.s32 4294967295, %s10099_s20   ;;  %s22_s22 = sadd.s32 1, %s10091_s18  ;;  %s10099_s20 = sphi %s10137_s20, %s13_s20   ;;  %s10095_s19 = sphi %s10135_s19, %s11958_s19   ;;  %s10091_s18 = sphi %s10133_s18, %s11957_s18   ;;  %s10087_s17 = sphi %s10131_s17, %s11956_s17   ;;  %s10083_s16 = sphi %s10129_s16, %s11955_s16   ;;  %s10079_s15 = sphi %s10127_s15, %s11954_s15   ;;  %s10075_s14 = sphi %s10125_s14, %s11953_s14   ;;  %s10071_s13 = sphi %s10123_s13, %s11952_s13   ;;  %s10067_s12 = sphi %s10121_s12, %s11951_s12  }
   0x6   : > { %p23_p0 = scmp.ge.s32.totalorder %s22_s22, 2  ;;  %s25_s23 = sadd.s32 1, %s10095_s19 }
   0x7   : > { %s58_s24 = sadd.s32 1, %s10079_s15  ;;  %p65_p1 = scmp.ne.s32.totalorder %s10079_s15, %s10075_s14 }
   0x8   : > { %s11960_s22 = smov (%p23_p0, %s22_s22), 0  ;;  %s11962_s23 = smov (!%p23_p0, %s25_s23), %s10095_s19 }
   0x9   : > { %s55_s25 = ssub.s32 %s10091_s18, %s11960_s22  ;;  %p66_p2 = scmp.eq.s32.totalorder %s10099_s20, 0 }
   0xa   : > { %p27_p3 = scmp.ge.s32.totalorder %s11962_s23, 2  ;;  %p56_p4 = scmp.eq.s32.totalorder %s55_s25, 0 }
   0xb   : > { %p67_p5 = por %p66_p2, %p65_p1  ;;  %s112_s26 = sadd.s32 1, %s10071_s13 }
   0xc   : > { %s11964_s23 = smov (%p27_p3, %s11962_s23), 0  ;;  %p122_p6 = scmp.ne.s32.totalorder %s10071_s13, %s10067_s12 }
   0xd   : > { %s10182_s27 = scalar_select %p56_p4, %s10079_s15, %s58_s24  }
   0xe   : > { %s107_s28 = ssub.s32 %s10095_s19, %s11964_s23  ;;  %p123_p7 = scmp.eq.s32.totalorder %s8556_s21, 3 }
   0xf   : > { %s109_s29 = sor.u32 %s107_s28, %s55_s25  ;;  %p8559_p10 = scmp.ge.s32.totalorder %s10099_s20, 4 }
  0x10   : > { %p110_p8 = scmp.eq.s32.totalorder %s109_s29, 0  ;;  %p10188_p9 = por %p123_p7, %p122_p6 }
  0x11   : > { %145 = sbr.rel (%p8559_p10) target bundleno = 284 (0x11c), region = 16 }
  0x12   : > { %s10193_s4 = scalar_select %p110_p8, %s10071_s13, %s112_s26  }
  0x18   : > { %156 = sbr.rel (!%p67_p5) target bundleno = 284 (0x11c), region = 24  ;;  %s158_s5 = sand.u32 (%p67_p5), 1, %s10079_s15  }
  0x19   : > { %s9119_s6 = sshll.u32 (%p67_p5), %s10091_s18, 3  ;;  %s8560_s7 = sshll.u32 (%p67_p5), %s158_s5, 12 }
  0x1a   : > { %s10201_s10 = scalar_lea.vmem (%p67_p5), %s11947_s1, %s9119_s6  ;;  %s10206_s11 = scalar_lea.vmem (%p67_p5), [#allocation2], %s8560_s7 }
  0x1b   : > { %v1216_v0 = vld [vmem:[%s10201_s10] sm:$0xff] (%p67_p5)  ;;  %v1218_v1 = vld [vmem:[%s10201_s10 + $0x10] sm:$0xff] (%p67_p5) }
  0x1c   : > { %v1220_v2 = vld [vmem:[%s10201_s10 + $0x20] sm:$0xff] (%p67_p5)  ;;  %1217 = vst [vmem:[%s10206_s11] sm:$0xff] (%p67_p5), %v1216_v0  ;;  %1219 = vst [vmem:[%s10206_s11 + $0x8] sm:$0xff] (%p67_p5), %v1218_v1  ;;  %v1222_v3 = vld [vmem:[%s10201_s10 + $0x30] sm:$0xff] (%p67_p5) }
  0x1d   : > { %1221 = vst [vmem:[%s10206_s11 + $0x10] sm:$0xff] (%p67_p5), %v1220_v2  ;;  %v1224_v4 = vld [vmem:[%s10201_s10 + $0x40] sm:$0xff] (%p67_p5)  ;;  %v1226_v5 = vld [vmem:[%s10201_s10 + $0x50] sm:$0xff] (%p67_p5)  ;;  %1223 = vst [vmem:[%s10206_s11 + $0x18] sm:$0xff] (%p67_p5), %v1222_v3 }
  0x1e   : > { %1225 = vst [vmem:[%s10206_s11 + $0x20] sm:$0xff] (%p67_p5), %v1224_v4  ;;  %1227 = vst [vmem:[%s10206_s11 + $0x28] sm:$0xff] (%p67_p5), %v1226_v5  ;;  %v1228_v6 = vld [vmem:[%s10201_s10 + $0x60] sm:$0xff] (%p67_p5)  ;;  %v1230_v7 = vld [vmem:[%s10201_s10 + $0x70] sm:$0xff] (%p67_p5) }
  0x1f   : > { %v1232_v8 = vld [vmem:[%s10201_s10 + $0x80] sm:$0xff]  ;;  %1229 = vst [vmem:[%s10206_s11 + $0x30] sm:$0xff] %v1228_v6  ;;  %1231 = vst [vmem:[%s10206_s11 + $0x38] sm:$0xff] %v1230_v7  ;;  %v1234_v9 = vld [vmem:[%s10201_s10 + $0x90] sm:$0xff] }
  0x20   : > { %1233 = vst [vmem:[%s10206_s11 + $0x40] sm:$0xff] %v1232_v8  ;;  %v1236_v10 = vld [vmem:[%s10201_s10 + $0xa0] sm:$0xff]  ;;  %v1238_v11 = vld [vmem:[%s10201_s10 + $0xb0] sm:$0xff]  ;;  %1235 = vst [vmem:[%s10206_s11 + $0x48] sm:$0xff] %v1234_v9 }
  0x21   : > { %1237 = vst [vmem:[%s10206_s11 + $0x50] sm:$0xff] %v1236_v10  ;;  %1239 = vst [vmem:[%s10206_s11 + $0x58] sm:$0xff] %v1238_v11  ;;  %v1240_v12 = vld [vmem:[%s10201_s10 + $0xc0] sm:$0xff]  ;;  %v1242_v13 = vld [vmem:[%s10201_s10 + $0xd0] sm:$0xff] }
  0x22   : > { %v1244_v14 = vld [vmem:[%s10201_s10 + $0xe0] sm:$0xff]  ;;  %1241 = vst [vmem:[%s10206_s11 + $0x60] sm:$0xff] %v1240_v12  ;;  %1243 = vst [vmem:[%s10206_s11 + $0x68] sm:$0xff] %v1242_v13  ;;  %v1246_v15 = vld [vmem:[%s10201_s10 + $0xf0] sm:$0xff] }
  0x23   : > { %1245 = vst [vmem:[%s10206_s11 + $0x70] sm:$0xff] %v1244_v14  ;;  %v1248_v16 = vld [vmem:[%s10201_s10 + $0x100] sm:$0xff]  ;;  %v1250_v17 = vld [vmem:[%s10201_s10 + $0x110] sm:$0xff]  ;;  %1247 = vst [vmem:[%s10206_s11 + $0x78] sm:$0xff] %v1246_v15 }
  0x24   : > { %1249 = vst [vmem:[%s10206_s11 + $0x80] sm:$0xff] %v1248_v16  ;;  %1251 = vst [vmem:[%s10206_s11 + $0x88] sm:$0xff] %v1250_v17  ;;  %v1252_v18 = vld [vmem:[%s10201_s10 + $0x120] sm:$0xff]  ;;  %v1254_v19 = vld [vmem:[%s10201_s10 + $0x130] sm:$0xff] }
  0x25   : > { %v1256_v20 = vld [vmem:[%s10201_s10 + $0x140] sm:$0xff]  ;;  %1253 = vst [vmem:[%s10206_s11 + $0x90] sm:$0xff] %v1252_v18  ;;  %1255 = vst [vmem:[%s10206_s11 + $0x98] sm:$0xff] %v1254_v19  ;;  %v1258_v21 = vld [vmem:[%s10201_s10 + $0x150] sm:$0xff] }
  0x26   : > { %1257 = vst [vmem:[%s10206_s11 + $0xa0] sm:$0xff] %v1256_v20  ;;  %v1260_v22 = vld [vmem:[%s10201_s10 + $0x160] sm:$0xff]  ;;  %v1262_v23 = vld [vmem:[%s10201_s10 + $0x170] sm:$0xff]  ;;  %1259 = vst [vmem:[%s10206_s11 + $0xa8] sm:$0xff] %v1258_v21 }
  0x27   : > { %1261 = vst [vmem:[%s10206_s11 + $0xb0] sm:$0xff] %v1260_v22  ;;  %1263 = vst [vmem:[%s10206_s11 + $0xb8] sm:$0xff] %v1262_v23  ;;  %v1264_v24 = vld [vmem:[%s10201_s10 + $0x180] sm:$0xff]  ;;  %v1266_v25 = vld [vmem:[%s10201_s10 + $0x190] sm:$0xff] }
  0x28   : > { %v1268_v26 = vld [vmem:[%s10201_s10 + $0x1a0] sm:$0xff]  ;;  %1265 = vst [vmem:[%s10206_s11 + $0xc0] sm:$0xff] %v1264_v24  ;;  %1267 = vst [vmem:[%s10206_s11 + $0xc8] sm:$0xff] %v1266_v25  ;;  %v1270_v27 = vld [vmem:[%s10201_s10 + $0x1b0] sm:$0xff] }
  0x29   : > { %1269 = vst [vmem:[%s10206_s11 + $0xd0] sm:$0xff] %v1268_v26  ;;  %v1272_v28 = vld [vmem:[%s10201_s10 + $0x1c0] sm:$0xff]  ;;  %v1274_v29 = vld [vmem:[%s10201_s10 + $0x1d0] sm:$0xff]  ;;  %1271 = vst [vmem:[%s10206_s11 + $0xd8] sm:$0xff] %v1270_v27 }
  0x2a   : > { %1273 = vst [vmem:[%s10206_s11 + $0xe0] sm:$0xff] %v1272_v28  ;;  %1275 = vst [vmem:[%s10206_s11 + $0xe8] sm:$0xff] %v1274_v29  ;;  %v1276_v30 = vld [vmem:[%s10201_s10 + $0x1e0] sm:$0xff]  ;;  %v1278_v31 = vld [vmem:[%s10201_s10 + $0x1f0] sm:$0xff] }
  0x2b   : > { %v1280_v32 = vld [vmem:[%s10201_s10 + $0x200] sm:$0xff]  ;;  %1277 = vst [vmem:[%s10206_s11 + $0xf0] sm:$0xff] %v1276_v30  ;;  %1279 = vst [vmem:[%s10206_s11 + $0xf8] sm:$0xff] %v1278_v31  ;;  %v1282_v33 = vld [vmem:[%s10201_s10 + $0x210] sm:$0xff] }
  0x2c   : > { %1281 = vst [vmem:[%s10206_s11 + $0x100] sm:$0xff] %v1280_v32  ;;  %v1284_v34 = vld [vmem:[%s10201_s10 + $0x220] sm:$0xff]  ;;  %v1286_v35 = vld [vmem:[%s10201_s10 + $0x230] sm:$0xff]  ;;  %1283 = vst [vmem:[%s10206_s11 + $0x108] sm:$0xff] %v1282_v33 }
  0x2d   : > { %1285 = vst [vmem:[%s10206_s11 + $0x110] sm:$0xff] %v1284_v34  ;;  %1287 = vst [vmem:[%s10206_s11 + $0x118] sm:$0xff] %v1286_v35  ;;  %v1288_v36 = vld [vmem:[%s10201_s10 + $0x240] sm:$0xff]  ;;  %v1290_v37 = vld [vmem:[%s10201_s10 + $0x250] sm:$0xff] }
  0x2e   : > { %v1292_v38 = vld [vmem:[%s10201_s10 + $0x260] sm:$0xff]  ;;  %1289 = vst [vmem:[%s10206_s11 + $0x120] sm:$0xff] %v1288_v36  ;;  %1291 = vst [vmem:[%s10206_s11 + $0x128] sm:$0xff] %v1290_v37  ;;  %v1294_v39 = vld [vmem:[%s10201_s10 + $0x270] sm:$0xff] }
  0x2f   : > { %1293 = vst [vmem:[%s10206_s11 + $0x130] sm:$0xff] %v1292_v38  ;;  %v1296_v40 = vld [vmem:[%s10201_s10 + $0x280] sm:$0xff]  ;;  %v1298_v41 = vld [vmem:[%s10201_s10 + $0x290] sm:$0xff]  ;;  %1295 = vst [vmem:[%s10206_s11 + $0x138] sm:$0xff] %v1294_v39 }
  0x30   : > { %1297 = vst [vmem:[%s10206_s11 + $0x140] sm:$0xff] %v1296_v40  ;;  %1299 = vst [vmem:[%s10206_s11 + $0x148] sm:$0xff] %v1298_v41  ;;  %v1300_v42 = vld [vmem:[%s10201_s10 + $0x2a0] sm:$0xff]  ;;  %v1302_v43 = vld [vmem:[%s10201_s10 + $0x2b0] sm:$0xff] }
  0x31   : > { %v1304_v44 = vld [vmem:[%s10201_s10 + $0x2c0] sm:$0xff]  ;;  %1301 = vst [vmem:[%s10206_s11 + $0x150] sm:$0xff] %v1300_v42  ;;  %1303 = vst [vmem:[%s10206_s11 + $0x158] sm:$0xff] %v1302_v43  ;;  %v1306_v45 = vld [vmem:[%s10201_s10 + $0x2d0] sm:$0xff] }
  0x32   : > { %1305 = vst [vmem:[%s10206_s11 + $0x160] sm:$0xff] %v1304_v44  ;;  %v1308_v46 = vld [vmem:[%s10201_s10 + $0x2e0] sm:$0xff]  ;;  %v1310_v47 = vld [vmem:[%s10201_s10 + $0x2f0] sm:$0xff]  ;;  %1307 = vst [vmem:[%s10206_s11 + $0x168] sm:$0xff] %v1306_v45 }
  0x33   : > { %1309 = vst [vmem:[%s10206_s11 + $0x170] sm:$0xff] %v1308_v46  ;;  %1311 = vst [vmem:[%s10206_s11 + $0x178] sm:$0xff] %v1310_v47  ;;  %v1312_v48 = vld [vmem:[%s10201_s10 + $0x300] sm:$0xff]  ;;  %v1314_v49 = vld [vmem:[%s10201_s10 + $0x310] sm:$0xff] }
  0x34   : > { %v1316_v50 = vld [vmem:[%s10201_s10 + $0x320] sm:$0xff]  ;;  %1313 = vst [vmem:[%s10206_s11 + $0x180] sm:$0xff] %v1312_v48  ;;  %1315 = vst [vmem:[%s10206_s11 + $0x188] sm:$0xff] %v1314_v49  ;;  %v1318_v51 = vld [vmem:[%s10201_s10 + $0x330] sm:$0xff] }
  0x35   : > { %1317 = vst [vmem:[%s10206_s11 + $0x190] sm:$0xff] %v1316_v50  ;;  %v1320_v52 = vld [vmem:[%s10201_s10 + $0x340] sm:$0xff]  ;;  %v1322_v53 = vld [vmem:[%s10201_s10 + $0x350] sm:$0xff]  ;;  %1319 = vst [vmem:[%s10206_s11 + $0x198] sm:$0xff] %v1318_v51 }
  0x36   : > { %1321 = vst [vmem:[%s10206_s11 + $0x1a0] sm:$0xff] %v1320_v52  ;;  %1323 = vst [vmem:[%s10206_s11 + $0x1a8] sm:$0xff] %v1322_v53  ;;  %v1324_v54 = vld [vmem:[%s10201_s10 + $0x360] sm:$0xff]  ;;  %v1326_v55 = vld [vmem:[%s10201_s10 + $0x370] sm:$0xff] }
  0x37   : > { %v1328_v56 = vld [vmem:[%s10201_s10 + $0x380] sm:$0xff]  ;;  %1325 = vst [vmem:[%s10206_s11 + $0x1b0] sm:$0xff] %v1324_v54  ;;  %1327 = vst [vmem:[%s10206_s11 + $0x1b8] sm:$0xff] %v1326_v55  ;;  %v1330_v57 = vld [vmem:[%s10201_s10 + $0x390] sm:$0xff] }
  0x38   : > { %1329 = vst [vmem:[%s10206_s11 + $0x1c0] sm:$0xff] %v1328_v56  ;;  %v1332_v58 = vld [vmem:[%s10201_s10 + $0x3a0] sm:$0xff]  ;;  %v1334_v59 = vld [vmem:[%s10201_s10 + $0x3b0] sm:$0xff]  ;;  %1331 = vst [vmem:[%s10206_s11 + $0x1c8] sm:$0xff] %v1330_v57 }
  0x39   : > { %1333 = vst [vmem:[%s10206_s11 + $0x1d0] sm:$0xff] %v1332_v58  ;;  %1335 = vst [vmem:[%s10206_s11 + $0x1d8] sm:$0xff] %v1334_v59  ;;  %v1336_v60 = vld [vmem:[%s10201_s10 + $0x3c0] sm:$0xff]  ;;  %v1338_v61 = vld [vmem:[%s10201_s10 + $0x3d0] sm:$0xff] }
  0x3a   : > { %v1340_v62 = vld [vmem:[%s10201_s10 + $0x3e0] sm:$0xff]  ;;  %1337 = vst [vmem:[%s10206_s11 + $0x1e0] sm:$0xff] %v1336_v60  ;;  %1339 = vst [vmem:[%s10206_s11 + $0x1e8] sm:$0xff] %v1338_v61  ;;  %v1342_v63 = vld [vmem:[%s10201_s10 + $0x3f0] sm:$0xff] }
  0x3b   : > { %1341 = vst [vmem:[%s10206_s11 + $0x1f0] sm:$0xff] %v1340_v62  ;;  %v1344_v0 = vld [vmem:[%s10201_s10 + $0x400] sm:$0xff]  ;;  %v1346_v1 = vld [vmem:[%s10201_s10 + $0x410] sm:$0xff]  ;;  %1343 = vst [vmem:[%s10206_s11 + $0x1f8] sm:$0xff] %v1342_v63 }
  0x3c   : > { %1345 = vst [vmem:[%s10206_s11 + $0x200] sm:$0xff] %v1344_v0  ;;  %1347 = vst [vmem:[%s10206_s11 + $0x208] sm:$0xff] %v1346_v1  ;;  %v1348_v2 = vld [vmem:[%s10201_s10 + $0x420] sm:$0xff]  ;;  %v1350_v3 = vld [vmem:[%s10201_s10 + $0x430] sm:$0xff] }
  0x3d   : > { %v1352_v4 = vld [vmem:[%s10201_s10 + $0x440] sm:$0xff]  ;;  %1349 = vst [vmem:[%s10206_s11 + $0x210] sm:$0xff] %v1348_v2  ;;  %1351 = vst [vmem:[%s10206_s11 + $0x218] sm:$0xff] %v1350_v3  ;;  %v1354_v5 = vld [vmem:[%s10201_s10 + $0x450] sm:$0xff] }
  0x3e   : > { %1353 = vst [vmem:[%s10206_s11 + $0x220] sm:$0xff] %v1352_v4  ;;  %v1356_v6 = vld [vmem:[%s10201_s10 + $0x460] sm:$0xff]  ;;  %v1358_v7 = vld [vmem:[%s10201_s10 + $0x470] sm:$0xff]  ;;  %1355 = vst [vmem:[%s10206_s11 + $0x228] sm:$0xff] %v1354_v5 }
  0x3f   : > { %1357 = vst [vmem:[%s10206_s11 + $0x230] sm:$0xff] %v1356_v6  ;;  %1359 = vst [vmem:[%s10206_s11 + $0x238] sm:$0xff] %v1358_v7  ;;  %v1360_v8 = vld [vmem:[%s10201_s10 + $0x480] sm:$0xff]  ;;  %v1362_v9 = vld [vmem:[%s10201_s10 + $0x490] sm:$0xff] }
  0x40   : > { %v1364_v10 = vld [vmem:[%s10201_s10 + $0x4a0] sm:$0xff]  ;;  %1361 = vst [vmem:[%s10206_s11 + $0x240] sm:$0xff] %v1360_v8  ;;  %1363 = vst [vmem:[%s10206_s11 + $0x248] sm:$0xff] %v1362_v9  ;;  %v1366_v11 = vld [vmem:[%s10201_s10 + $0x4b0] sm:$0xff] }
  0x41   : > { %1365 = vst [vmem:[%s10206_s11 + $0x250] sm:$0xff] %v1364_v10  ;;  %v1368_v12 = vld [vmem:[%s10201_s10 + $0x4c0] sm:$0xff]  ;;  %v1370_v13 = vld [vmem:[%s10201_s10 + $0x4d0] sm:$0xff]  ;;  %1367 = vst [vmem:[%s10206_s11 + $0x258] sm:$0xff] %v1366_v11 }
  0x42   : > { %1369 = vst [vmem:[%s10206_s11 + $0x260] sm:$0xff] %v1368_v12  ;;  %1371 = vst [vmem:[%s10206_s11 + $0x268] sm:$0xff] %v1370_v13  ;;  %v1372_v14 = vld [vmem:[%s10201_s10 + $0x4e0] sm:$0xff]  ;;  %v1374_v15 = vld [vmem:[%s10201_s10 + $0x4f0] sm:$0xff] }
  0x43   : > { %v1376_v16 = vld [vmem:[%s10201_s10 + $0x500] sm:$0xff]  ;;  %1373 = vst [vmem:[%s10206_s11 + $0x270] sm:$0xff] %v1372_v14  ;;  %1375 = vst [vmem:[%s10206_s11 + $0x278] sm:$0xff] %v1374_v15  ;;  %v1378_v17 = vld [vmem:[%s10201_s10 + $0x510] sm:$0xff] }
  0x44   : > { %1377 = vst [vmem:[%s10206_s11 + $0x280] sm:$0xff] %v1376_v16  ;;  %v1380_v18 = vld [vmem:[%s10201_s10 + $0x520] sm:$0xff]  ;;  %v1382_v19 = vld [vmem:[%s10201_s10 + $0x530] sm:$0xff]  ;;  %1379 = vst [vmem:[%s10206_s11 + $0x288] sm:$0xff] %v1378_v17 }
  0x45   : > { %1381 = vst [vmem:[%s10206_s11 + $0x290] sm:$0xff] %v1380_v18  ;;  %1383 = vst [vmem:[%s10206_s11 + $0x298] sm:$0xff] %v1382_v19  ;;  %v1384_v20 = vld [vmem:[%s10201_s10 + $0x540] sm:$0xff]  ;;  %v1386_v21 = vld [vmem:[%s10201_s10 + $0x550] sm:$0xff] }
  0x46   : > { %v1388_v22 = vld [vmem:[%s10201_s10 + $0x560] sm:$0xff]  ;;  %1385 = vst [vmem:[%s10206_s11 + $0x2a0] sm:$0xff] %v1384_v20  ;;  %1387 = vst [vmem:[%s10206_s11 + $0x2a8] sm:$0xff] %v1386_v21  ;;  %v1390_v23 = vld [vmem:[%s10201_s10 + $0x570] sm:$0xff] }
  0x47   : > { %1389 = vst [vmem:[%s10206_s11 + $0x2b0] sm:$0xff] %v1388_v22  ;;  %v1392_v24 = vld [vmem:[%s10201_s10 + $0x580] sm:$0xff]  ;;  %v1394_v25 = vld [vmem:[%s10201_s10 + $0x590] sm:$0xff]  ;;  %1391 = vst [vmem:[%s10206_s11 + $0x2b8] sm:$0xff] %v1390_v23 }
  0x48   : > { %1393 = vst [vmem:[%s10206_s11 + $0x2c0] sm:$0xff] %v1392_v24  ;;  %1395 = vst [vmem:[%s10206_s11 + $0x2c8] sm:$0xff] %v1394_v25  ;;  %v1396_v26 = vld [vmem:[%s10201_s10 + $0x5a0] sm:$0xff]  ;;  %v1398_v27 = vld [vmem:[%s10201_s10 + $0x5b0] sm:$0xff] }
  0x49   : > { %v1400_v28 = vld [vmem:[%s10201_s10 + $0x5c0] sm:$0xff]  ;;  %1397 = vst [vmem:[%s10206_s11 + $0x2d0] sm:$0xff] %v1396_v26  ;;  %1399 = vst [vmem:[%s10206_s11 + $0x2d8] sm:$0xff] %v1398_v27  ;;  %v1402_v29 = vld [vmem:[%s10201_s10 + $0x5d0] sm:$0xff] }
  0x4a   : > { %1401 = vst [vmem:[%s10206_s11 + $0x2e0] sm:$0xff] %v1400_v28  ;;  %v1404_v30 = vld [vmem:[%s10201_s10 + $0x5e0] sm:$0xff]  ;;  %v1406_v31 = vld [vmem:[%s10201_s10 + $0x5f0] sm:$0xff]  ;;  %1403 = vst [vmem:[%s10206_s11 + $0x2e8] sm:$0xff] %v1402_v29 }
  0x4b   : > { %1405 = vst [vmem:[%s10206_s11 + $0x2f0] sm:$0xff] %v1404_v30  ;;  %1407 = vst [vmem:[%s10206_s11 + $0x2f8] sm:$0xff] %v1406_v31  ;;  %v1408_v32 = vld [vmem:[%s10201_s10 + $0x600] sm:$0xff]  ;;  %v1410_v33 = vld [vmem:[%s10201_s10 + $0x610] sm:$0xff] }
  0x4c   : > { %v1412_v34 = vld [vmem:[%s10201_s10 + $0x620] sm:$0xff]  ;;  %1409 = vst [vmem:[%s10206_s11 + $0x300] sm:$0xff] %v1408_v32  ;;  %1411 = vst [vmem:[%s10206_s11 + $0x308] sm:$0xff] %v1410_v33  ;;  %v1414_v35 = vld [vmem:[%s10201_s10 + $0x630] sm:$0xff] }
  0x4d   : > { %1413 = vst [vmem:[%s10206_s11 + $0x310] sm:$0xff] %v1412_v34  ;;  %v1416_v36 = vld [vmem:[%s10201_s10 + $0x640] sm:$0xff]  ;;  %v1418_v37 = vld [vmem:[%s10201_s10 + $0x650] sm:$0xff]  ;;  %1415 = vst [vmem:[%s10206_s11 + $0x318] sm:$0xff] %v1414_v35 }
  0x4e   : > { %1417 = vst [vmem:[%s10206_s11 + $0x320] sm:$0xff] %v1416_v36  ;;  %1419 = vst [vmem:[%s10206_s11 + $0x328] sm:$0xff] %v1418_v37  ;;  %v1420_v38 = vld [vmem:[%s10201_s10 + $0x660] sm:$0xff]  ;;  %v1422_v39 = vld [vmem:[%s10201_s10 + $0x670] sm:$0xff] }
  0x4f   : > { %v1424_v40 = vld [vmem:[%s10201_s10 + $0x680] sm:$0xff]  ;;  %1421 = vst [vmem:[%s10206_s11 + $0x330] sm:$0xff] %v1420_v38  ;;  %1423 = vst [vmem:[%s10206_s11 + $0x338] sm:$0xff] %v1422_v39  ;;  %v1426_v41 = vld [vmem:[%s10201_s10 + $0x690] sm:$0xff] }
  0x50   : > { %1425 = vst [vmem:[%s10206_s11 + $0x340] sm:$0xff] %v1424_v40  ;;  %v1428_v42 = vld [vmem:[%s10201_s10 + $0x6a0] sm:$0xff]  ;;  %v1430_v43 = vld [vmem:[%s10201_s10 + $0x6b0] sm:$0xff]  ;;  %1427 = vst [vmem:[%s10206_s11 + $0x348] sm:$0xff] %v1426_v41 }
  0x51   : > { %1429 = vst [vmem:[%s10206_s11 + $0x350] sm:$0xff] %v1428_v42  ;;  %1431 = vst [vmem:[%s10206_s11 + $0x358] sm:$0xff] %v1430_v43  ;;  %v1432_v44 = vld [vmem:[%s10201_s10 + $0x6c0] sm:$0xff]  ;;  %v1434_v45 = vld [vmem:[%s10201_s10 + $0x6d0] sm:$0xff] }
  0x52   : > { %v1436_v46 = vld [vmem:[%s10201_s10 + $0x6e0] sm:$0xff]  ;;  %1433 = vst [vmem:[%s10206_s11 + $0x360] sm:$0xff] %v1432_v44  ;;  %1435 = vst [vmem:[%s10206_s11 + $0x368] sm:$0xff] %v1434_v45  ;;  %v1438_v47 = vld [vmem:[%s10201_s10 + $0x6f0] sm:$0xff] }
  0x53   : > { %1437 = vst [vmem:[%s10206_s11 + $0x370] sm:$0xff] %v1436_v46  ;;  %v1440_v48 = vld [vmem:[%s10201_s10 + $0x700] sm:$0xff]  ;;  %v1442_v49 = vld [vmem:[%s10201_s10 + $0x710] sm:$0xff]  ;;  %1439 = vst [vmem:[%s10206_s11 + $0x378] sm:$0xff] %v1438_v47 }
  0x54   : > { %1441 = vst [vmem:[%s10206_s11 + $0x380] sm:$0xff] %v1440_v48  ;;  %1443 = vst [vmem:[%s10206_s11 + $0x388] sm:$0xff] %v1442_v49  ;;  %v1444_v50 = vld [vmem:[%s10201_s10 + $0x720] sm:$0xff]  ;;  %v1446_v51 = vld [vmem:[%s10201_s10 + $0x730] sm:$0xff] }
  0x55   : > { %v1448_v52 = vld [vmem:[%s10201_s10 + $0x740] sm:$0xff]  ;;  %1445 = vst [vmem:[%s10206_s11 + $0x390] sm:$0xff] %v1444_v50  ;;  %1447 = vst [vmem:[%s10206_s11 + $0x398] sm:$0xff] %v1446_v51  ;;  %v1450_v53 = vld [vmem:[%s10201_s10 + $0x750] sm:$0xff] }
  0x56   : > { %1449 = vst [vmem:[%s10206_s11 + $0x3a0] sm:$0xff] %v1448_v52  ;;  %v1452_v54 = vld [vmem:[%s10201_s10 + $0x760] sm:$0xff]  ;;  %v1454_v55 = vld [vmem:[%s10201_s10 + $0x770] sm:$0xff]  ;;  %1451 = vst [vmem:[%s10206_s11 + $0x3a8] sm:$0xff] %v1450_v53 }
  0x57   : > { %1453 = vst [vmem:[%s10206_s11 + $0x3b0] sm:$0xff] %v1452_v54  ;;  %1455 = vst [vmem:[%s10206_s11 + $0x3b8] sm:$0xff] %v1454_v55  ;;  %v1456_v56 = vld [vmem:[%s10201_s10 + $0x780] sm:$0xff]  ;;  %v1458_v57 = vld [vmem:[%s10201_s10 + $0x790] sm:$0xff] }
  0x58   : > { %v1460_v58 = vld [vmem:[%s10201_s10 + $0x7a0] sm:$0xff]  ;;  %1457 = vst [vmem:[%s10206_s11 + $0x3c0] sm:$0xff] %v1456_v56  ;;  %1459 = vst [vmem:[%s10206_s11 + $0x3c8] sm:$0xff] %v1458_v57  ;;  %v1462_v59 = vld [vmem:[%s10201_s10 + $0x7b0] sm:$0xff] }
  0x59   : > { %1461 = vst [vmem:[%s10206_s11 + $0x3d0] sm:$0xff] %v1460_v58  ;;  %v1464_v60 = vld [vmem:[%s10201_s10 + $0x7c0] sm:$0xff]  ;;  %v1466_v61 = vld [vmem:[%s10201_s10 + $0x7d0] sm:$0xff]  ;;  %1463 = vst [vmem:[%s10206_s11 + $0x3d8] sm:$0xff] %v1462_v59 }
  0x5a   : > { %1465 = vst [vmem:[%s10206_s11 + $0x3e0] sm:$0xff] %v1464_v60  ;;  %1467 = vst [vmem:[%s10206_s11 + $0x3e8] sm:$0xff] %v1466_v61  ;;  %v1468_v62 = vld [vmem:[%s10201_s10 + $0x7e0] sm:$0xff]  ;;  %v1470_v63 = vld [vmem:[%s10201_s10 + $0x7f0] sm:$0xff] }
  0x5b   : > { %v1472_v0 = vld [vmem:[%s10201_s10 + $0x800] sm:$0xff]  ;;  %1469 = vst [vmem:[%s10206_s11 + $0x3f0] sm:$0xff] %v1468_v62  ;;  %1471 = vst [vmem:[%s10206_s11 + $0x3f8] sm:$0xff] %v1470_v63  ;;  %v1474_v1 = vld [vmem:[%s10201_s10 + $0x810] sm:$0xff] }
  0x5c   : > { %1473 = vst [vmem:[%s10206_s11 + $0x400] sm:$0xff] %v1472_v0  ;;  %v1476_v2 = vld [vmem:[%s10201_s10 + $0x820] sm:$0xff]  ;;  %v1478_v3 = vld [vmem:[%s10201_s10 + $0x830] sm:$0xff]  ;;  %1475 = vst [vmem:[%s10206_s11 + $0x408] sm:$0xff] %v1474_v1 }
  0x5d   : > { %1477 = vst [vmem:[%s10206_s11 + $0x410] sm:$0xff] %v1476_v2  ;;  %1479 = vst [vmem:[%s10206_s11 + $0x418] sm:$0xff] %v1478_v3  ;;  %v1480_v4 = vld [vmem:[%s10201_s10 + $0x840] sm:$0xff]  ;;  %v1482_v5 = vld [vmem:[%s10201_s10 + $0x850] sm:$0xff] }
  0x5e   : > { %v1484_v6 = vld [vmem:[%s10201_s10 + $0x860] sm:$0xff]  ;;  %1481 = vst [vmem:[%s10206_s11 + $0x420] sm:$0xff] %v1480_v4  ;;  %1483 = vst [vmem:[%s10206_s11 + $0x428] sm:$0xff] %v1482_v5  ;;  %v1486_v7 = vld [vmem:[%s10201_s10 + $0x870] sm:$0xff] }
  0x5f   : > { %1485 = vst [vmem:[%s10206_s11 + $0x430] sm:$0xff] %v1484_v6  ;;  %v1488_v8 = vld [vmem:[%s10201_s10 + $0x880] sm:$0xff]  ;;  %v1490_v9 = vld [vmem:[%s10201_s10 + $0x890] sm:$0xff]  ;;  %1487 = vst [vmem:[%s10206_s11 + $0x438] sm:$0xff] %v1486_v7 }
  0x60   : > { %1489 = vst [vmem:[%s10206_s11 + $0x440] sm:$0xff] %v1488_v8  ;;  %1491 = vst [vmem:[%s10206_s11 + $0x448] sm:$0xff] %v1490_v9  ;;  %v1492_v10 = vld [vmem:[%s10201_s10 + $0x8a0] sm:$0xff]  ;;  %v1494_v11 = vld [vmem:[%s10201_s10 + $0x8b0] sm:$0xff] }
  0x61   : > { %v1496_v12 = vld [vmem:[%s10201_s10 + $0x8c0] sm:$0xff]  ;;  %1493 = vst [vmem:[%s10206_s11 + $0x450] sm:$0xff] %v1492_v10  ;;  %1495 = vst [vmem:[%s10206_s11 + $0x458] sm:$0xff] %v1494_v11  ;;  %v1498_v13 = vld [vmem:[%s10201_s10 + $0x8d0] sm:$0xff] }
  0x62   : > { %1497 = vst [vmem:[%s10206_s11 + $0x460] sm:$0xff] %v1496_v12  ;;  %v1500_v14 = vld [vmem:[%s10201_s10 + $0x8e0] sm:$0xff]  ;;  %v1502_v15 = vld [vmem:[%s10201_s10 + $0x8f0] sm:$0xff]  ;;  %1499 = vst [vmem:[%s10206_s11 + $0x468] sm:$0xff] %v1498_v13 }
  0x63   : > { %1501 = vst [vmem:[%s10206_s11 + $0x470] sm:$0xff] %v1500_v14  ;;  %1503 = vst [vmem:[%s10206_s11 + $0x478] sm:$0xff] %v1502_v15  ;;  %v1504_v16 = vld [vmem:[%s10201_s10 + $0x900] sm:$0xff]  ;;  %v1506_v17 = vld [vmem:[%s10201_s10 + $0x910] sm:$0xff] }
  0x64   : > { %v1508_v18 = vld [vmem:[%s10201_s10 + $0x920] sm:$0xff]  ;;  %1505 = vst [vmem:[%s10206_s11 + $0x480] sm:$0xff] %v1504_v16  ;;  %1507 = vst [vmem:[%s10206_s11 + $0x488] sm:$0xff] %v1506_v17  ;;  %v1510_v19 = vld [vmem:[%s10201_s10 + $0x930] sm:$0xff] }
  0x65   : > { %1509 = vst [vmem:[%s10206_s11 + $0x490] sm:$0xff] %v1508_v18  ;;  %v1512_v20 = vld [vmem:[%s10201_s10 + $0x940] sm:$0xff]  ;;  %v1514_v21 = vld [vmem:[%s10201_s10 + $0x950] sm:$0xff]  ;;  %1511 = vst [vmem:[%s10206_s11 + $0x498] sm:$0xff] %v1510_v19 }
  0x66   : > { %1513 = vst [vmem:[%s10206_s11 + $0x4a0] sm:$0xff] %v1512_v20  ;;  %1515 = vst [vmem:[%s10206_s11 + $0x4a8] sm:$0xff] %v1514_v21  ;;  %v1516_v22 = vld [vmem:[%s10201_s10 + $0x960] sm:$0xff]  ;;  %v1518_v23 = vld [vmem:[%s10201_s10 + $0x970] sm:$0xff] }
  0x67   : > { %v1520_v24 = vld [vmem:[%s10201_s10 + $0x980] sm:$0xff]  ;;  %1517 = vst [vmem:[%s10206_s11 + $0x4b0] sm:$0xff] %v1516_v22  ;;  %1519 = vst [vmem:[%s10206_s11 + $0x4b8] sm:$0xff] %v1518_v23  ;;  %v1522_v25 = vld [vmem:[%s10201_s10 + $0x990] sm:$0xff] }
  0x68   : > { %1521 = vst [vmem:[%s10206_s11 + $0x4c0] sm:$0xff] %v1520_v24  ;;  %v1524_v26 = vld [vmem:[%s10201_s10 + $0x9a0] sm:$0xff]  ;;  %v1526_v27 = vld [vmem:[%s10201_s10 + $0x9b0] sm:$0xff]  ;;  %1523 = vst [vmem:[%s10206_s11 + $0x4c8] sm:$0xff] %v1522_v25 }
  0x69   : > { %1525 = vst [vmem:[%s10206_s11 + $0x4d0] sm:$0xff] %v1524_v26  ;;  %1527 = vst [vmem:[%s10206_s11 + $0x4d8] sm:$0xff] %v1526_v27  ;;  %v1528_v28 = vld [vmem:[%s10201_s10 + $0x9c0] sm:$0xff]  ;;  %v1530_v29 = vld [vmem:[%s10201_s10 + $0x9d0] sm:$0xff] }
  0x6a   : > { %v1532_v30 = vld [vmem:[%s10201_s10 + $0x9e0] sm:$0xff]  ;;  %1529 = vst [vmem:[%s10206_s11 + $0x4e0] sm:$0xff] %v1528_v28  ;;  %1531 = vst [vmem:[%s10206_s11 + $0x4e8] sm:$0xff] %v1530_v29  ;;  %v1534_v31 = vld [vmem:[%s10201_s10 + $0x9f0] sm:$0xff] }
  0x6b   : > { %1533 = vst [vmem:[%s10206_s11 + $0x4f0] sm:$0xff] %v1532_v30  ;;  %v1536_v32 = vld [vmem:[%s10201_s10 + $0xa00] sm:$0xff]  ;;  %v1538_v33 = vld [vmem:[%s10201_s10 + $0xa10] sm:$0xff]  ;;  %1535 = vst [vmem:[%s10206_s11 + $0x4f8] sm:$0xff] %v1534_v31 }
  0x6c   : > { %1537 = vst [vmem:[%s10206_s11 + $0x500] sm:$0xff] %v1536_v32  ;;  %1539 = vst [vmem:[%s10206_s11 + $0x508] sm:$0xff] %v1538_v33  ;;  %v1540_v34 = vld [vmem:[%s10201_s10 + $0xa20] sm:$0xff]  ;;  %v1542_v35 = vld [vmem:[%s10201_s10 + $0xa30] sm:$0xff] }
  0x6d   : > { %v1544_v36 = vld [vmem:[%s10201_s10 + $0xa40] sm:$0xff]  ;;  %1541 = vst [vmem:[%s10206_s11 + $0x510] sm:$0xff] %v1540_v34  ;;  %1543 = vst [vmem:[%s10206_s11 + $0x518] sm:$0xff] %v1542_v35  ;;  %v1546_v37 = vld [vmem:[%s10201_s10 + $0xa50] sm:$0xff] }
  0x6e   : > { %1545 = vst [vmem:[%s10206_s11 + $0x520] sm:$0xff] %v1544_v36  ;;  %v1548_v38 = vld [vmem:[%s10201_s10 + $0xa60] sm:$0xff]  ;;  %v1550_v39 = vld [vmem:[%s10201_s10 + $0xa70] sm:$0xff]  ;;  %1547 = vst [vmem:[%s10206_s11 + $0x528] sm:$0xff] %v1546_v37 }
  0x6f   : > { %1549 = vst [vmem:[%s10206_s11 + $0x530] sm:$0xff] %v1548_v38  ;;  %1551 = vst [vmem:[%s10206_s11 + $0x538] sm:$0xff] %v1550_v39  ;;  %v1552_v40 = vld [vmem:[%s10201_s10 + $0xa80] sm:$0xff]  ;;  %v1554_v41 = vld [vmem:[%s10201_s10 + $0xa90] sm:$0xff] }
  0x70   : > { %v1556_v42 = vld [vmem:[%s10201_s10 + $0xaa0] sm:$0xff]  ;;  %1553 = vst [vmem:[%s10206_s11 + $0x540] sm:$0xff] %v1552_v40  ;;  %1555 = vst [vmem:[%s10206_s11 + $0x548] sm:$0xff] %v1554_v41  ;;  %v1558_v43 = vld [vmem:[%s10201_s10 + $0xab0] sm:$0xff] }
  0x71   : > { %1557 = vst [vmem:[%s10206_s11 + $0x550] sm:$0xff] %v1556_v42  ;;  %v1560_v44 = vld [vmem:[%s10201_s10 + $0xac0] sm:$0xff]  ;;  %v1562_v45 = vld [vmem:[%s10201_s10 + $0xad0] sm:$0xff]  ;;  %1559 = vst [vmem:[%s10206_s11 + $0x558] sm:$0xff] %v1558_v43 }
  0x72   : > { %1561 = vst [vmem:[%s10206_s11 + $0x560] sm:$0xff] %v1560_v44  ;;  %1563 = vst [vmem:[%s10206_s11 + $0x568] sm:$0xff] %v1562_v45  ;;  %v1564_v46 = vld [vmem:[%s10201_s10 + $0xae0] sm:$0xff]  ;;  %v1566_v47 = vld [vmem:[%s10201_s10 + $0xaf0] sm:$0xff] }
  0x73   : > { %v1568_v48 = vld [vmem:[%s10201_s10 + $0xb00] sm:$0xff]  ;;  %1565 = vst [vmem:[%s10206_s11 + $0x570] sm:$0xff] %v1564_v46  ;;  %1567 = vst [vmem:[%s10206_s11 + $0x578] sm:$0xff] %v1566_v47  ;;  %v1570_v49 = vld [vmem:[%s10201_s10 + $0xb10] sm:$0xff] }
  0x74   : > { %1569 = vst [vmem:[%s10206_s11 + $0x580] sm:$0xff] %v1568_v48  ;;  %v1572_v50 = vld [vmem:[%s10201_s10 + $0xb20] sm:$0xff]  ;;  %v1574_v51 = vld [vmem:[%s10201_s10 + $0xb30] sm:$0xff]  ;;  %1571 = vst [vmem:[%s10206_s11 + $0x588] sm:$0xff] %v1570_v49 }
  0x75   : > { %1573 = vst [vmem:[%s10206_s11 + $0x590] sm:$0xff] %v1572_v50  ;;  %1575 = vst [vmem:[%s10206_s11 + $0x598] sm:$0xff] %v1574_v51  ;;  %v1576_v52 = vld [vmem:[%s10201_s10 + $0xb40] sm:$0xff]  ;;  %v1578_v53 = vld [vmem:[%s10201_s10 + $0xb50] sm:$0xff] }
  0x76   : > { %v1580_v54 = vld [vmem:[%s10201_s10 + $0xb60] sm:$0xff]  ;;  %1577 = vst [vmem:[%s10206_s11 + $0x5a0] sm:$0xff] %v1576_v52  ;;  %1579 = vst [vmem:[%s10206_s11 + $0x5a8] sm:$0xff] %v1578_v53  ;;  %v1582_v55 = vld [vmem:[%s10201_s10 + $0xb70] sm:$0xff] }
  0x77   : > { %1581 = vst [vmem:[%s10206_s11 + $0x5b0] sm:$0xff] %v1580_v54  ;;  %v1584_v56 = vld [vmem:[%s10201_s10 + $0xb80] sm:$0xff]  ;;  %v1586_v57 = vld [vmem:[%s10201_s10 + $0xb90] sm:$0xff]  ;;  %1583 = vst [vmem:[%s10206_s11 + $0x5b8] sm:$0xff] %v1582_v55 }
  0x78   : > { %1585 = vst [vmem:[%s10206_s11 + $0x5c0] sm:$0xff] %v1584_v56  ;;  %1587 = vst [vmem:[%s10206_s11 + $0x5c8] sm:$0xff] %v1586_v57  ;;  %v1588_v58 = vld [vmem:[%s10201_s10 + $0xba0] sm:$0xff]  ;;  %v1590_v59 = vld [vmem:[%s10201_s10 + $0xbb0] sm:$0xff] }
  0x79   : > { %v1592_v60 = vld [vmem:[%s10201_s10 + $0xbc0] sm:$0xff]  ;;  %1589 = vst [vmem:[%s10206_s11 + $0x5d0] sm:$0xff] %v1588_v58  ;;  %1591 = vst [vmem:[%s10206_s11 + $0x5d8] sm:$0xff] %v1590_v59  ;;  %v1594_v61 = vld [vmem:[%s10201_s10 + $0xbd0] sm:$0xff] }
  0x7a   : > { %1593 = vst [vmem:[%s10206_s11 + $0x5e0] sm:$0xff] %v1592_v60  ;;  %v1596_v62 = vld [vmem:[%s10201_s10 + $0xbe0] sm:$0xff]  ;;  %v1598_v63 = vld [vmem:[%s10201_s10 + $0xbf0] sm:$0xff]  ;;  %1595 = vst [vmem:[%s10206_s11 + $0x5e8] sm:$0xff] %v1594_v61 }
  0x7b   : > { %1597 = vst [vmem:[%s10206_s11 + $0x5f0] sm:$0xff] %v1596_v62  ;;  %1599 = vst [vmem:[%s10206_s11 + $0x5f8] sm:$0xff] %v1598_v63  ;;  %v1600_v0 = vld [vmem:[%s10201_s10 + $0xc00] sm:$0xff]  ;;  %v1602_v1 = vld [vmem:[%s10201_s10 + $0xc10] sm:$0xff] }
  0x7c   : > { %v1604_v2 = vld [vmem:[%s10201_s10 + $0xc20] sm:$0xff]  ;;  %1601 = vst [vmem:[%s10206_s11 + $0x600] sm:$0xff] %v1600_v0  ;;  %1603 = vst [vmem:[%s10206_s11 + $0x608] sm:$0xff] %v1602_v1  ;;  %v1606_v3 = vld [vmem:[%s10201_s10 + $0xc30] sm:$0xff] }
  0x7d   : > { %1605 = vst [vmem:[%s10206_s11 + $0x610] sm:$0xff] %v1604_v2  ;;  %v1608_v4 = vld [vmem:[%s10201_s10 + $0xc40] sm:$0xff]  ;;  %v1610_v5 = vld [vmem:[%s10201_s10 + $0xc50] sm:$0xff]  ;;  %1607 = vst [vmem:[%s10206_s11 + $0x618] sm:$0xff] %v1606_v3 }
  0x7e   : > { %1609 = vst [vmem:[%s10206_s11 + $0x620] sm:$0xff] %v1608_v4  ;;  %1611 = vst [vmem:[%s10206_s11 + $0x628] sm:$0xff] %v1610_v5  ;;  %v1612_v6 = vld [vmem:[%s10201_s10 + $0xc60] sm:$0xff]  ;;  %v1614_v7 = vld [vmem:[%s10201_s10 + $0xc70] sm:$0xff] }
  0x7f   : > { %v1616_v8 = vld [vmem:[%s10201_s10 + $0xc80] sm:$0xff]  ;;  %1613 = vst [vmem:[%s10206_s11 + $0x630] sm:$0xff] %v1612_v6  ;;  %1615 = vst [vmem:[%s10206_s11 + $0x638] sm:$0xff] %v1614_v7  ;;  %v1618_v9 = vld [vmem:[%s10201_s10 + $0xc90] sm:$0xff] }
  0x80   : > { %1617 = vst [vmem:[%s10206_s11 + $0x640] sm:$0xff] %v1616_v8  ;;  %v1620_v10 = vld [vmem:[%s10201_s10 + $0xca0] sm:$0xff]  ;;  %v1622_v11 = vld [vmem:[%s10201_s10 + $0xcb0] sm:$0xff]  ;;  %1619 = vst [vmem:[%s10206_s11 + $0x648] sm:$0xff] %v1618_v9 }
  0x81   : > { %1621 = vst [vmem:[%s10206_s11 + $0x650] sm:$0xff] %v1620_v10  ;;  %1623 = vst [vmem:[%s10206_s11 + $0x658] sm:$0xff] %v1622_v11  ;;  %v1624_v12 = vld [vmem:[%s10201_s10 + $0xcc0] sm:$0xff]  ;;  %v1626_v13 = vld [vmem:[%s10201_s10 + $0xcd0] sm:$0xff] }
  0x82   : > { %v1628_v14 = vld [vmem:[%s10201_s10 + $0xce0] sm:$0xff]  ;;  %1625 = vst [vmem:[%s10206_s11 + $0x660] sm:$0xff] %v1624_v12  ;;  %1627 = vst [vmem:[%s10206_s11 + $0x668] sm:$0xff] %v1626_v13  ;;  %v1630_v15 = vld [vmem:[%s10201_s10 + $0xcf0] sm:$0xff] }
  0x83   : > { %1629 = vst [vmem:[%s10206_s11 + $0x670] sm:$0xff] %v1628_v14  ;;  %v1632_v16 = vld [vmem:[%s10201_s10 + $0xd00] sm:$0xff]  ;;  %v1634_v17 = vld [vmem:[%s10201_s10 + $0xd10] sm:$0xff]  ;;  %1631 = vst [vmem:[%s10206_s11 + $0x678] sm:$0xff] %v1630_v15 }
  0x84   : > { %1633 = vst [vmem:[%s10206_s11 + $0x680] sm:$0xff] %v1632_v16  ;;  %1635 = vst [vmem:[%s10206_s11 + $0x688] sm:$0xff] %v1634_v17  ;;  %v1636_v18 = vld [vmem:[%s10201_s10 + $0xd20] sm:$0xff]  ;;  %v1638_v19 = vld [vmem:[%s10201_s10 + $0xd30] sm:$0xff] }
  0x85   : > { %v1640_v20 = vld [vmem:[%s10201_s10 + $0xd40] sm:$0xff]  ;;  %1637 = vst [vmem:[%s10206_s11 + $0x690] sm:$0xff] %v1636_v18  ;;  %1639 = vst [vmem:[%s10206_s11 + $0x698] sm:$0xff] %v1638_v19  ;;  %v1642_v21 = vld [vmem:[%s10201_s10 + $0xd50] sm:$0xff] }
  0x86   : > { %1641 = vst [vmem:[%s10206_s11 + $0x6a0] sm:$0xff] %v1640_v20  ;;  %v1644_v22 = vld [vmem:[%s10201_s10 + $0xd60] sm:$0xff]  ;;  %v1646_v23 = vld [vmem:[%s10201_s10 + $0xd70] sm:$0xff]  ;;  %1643 = vst [vmem:[%s10206_s11 + $0x6a8] sm:$0xff] %v1642_v21 }
  0x87   : > { %1645 = vst [vmem:[%s10206_s11 + $0x6b0] sm:$0xff] %v1644_v22  ;;  %1647 = vst [vmem:[%s10206_s11 + $0x6b8] sm:$0xff] %v1646_v23  ;;  %v1648_v24 = vld [vmem:[%s10201_s10 + $0xd80] sm:$0xff]  ;;  %v1650_v25 = vld [vmem:[%s10201_s10 + $0xd90] sm:$0xff] }
  0x88   : > { %v1652_v26 = vld [vmem:[%s10201_s10 + $0xda0] sm:$0xff]  ;;  %1649 = vst [vmem:[%s10206_s11 + $0x6c0] sm:$0xff] %v1648_v24  ;;  %1651 = vst [vmem:[%s10206_s11 + $0x6c8] sm:$0xff] %v1650_v25  ;;  %v1654_v27 = vld [vmem:[%s10201_s10 + $0xdb0] sm:$0xff] }
  0x89   : > { %1653 = vst [vmem:[%s10206_s11 + $0x6d0] sm:$0xff] %v1652_v26  ;;  %v1656_v28 = vld [vmem:[%s10201_s10 + $0xdc0] sm:$0xff]  ;;  %v1658_v29 = vld [vmem:[%s10201_s10 + $0xdd0] sm:$0xff]  ;;  %1655 = vst [vmem:[%s10206_s11 + $0x6d8] sm:$0xff] %v1654_v27 }
  0x8a   : > { %1657 = vst [vmem:[%s10206_s11 + $0x6e0] sm:$0xff] %v1656_v28  ;;  %1659 = vst [vmem:[%s10206_s11 + $0x6e8] sm:$0xff] %v1658_v29  ;;  %v1660_v30 = vld [vmem:[%s10201_s10 + $0xde0] sm:$0xff]  ;;  %v1662_v31 = vld [vmem:[%s10201_s10 + $0xdf0] sm:$0xff] }
  0x8b   : > { %v1664_v32 = vld [vmem:[%s10201_s10 + $0xe00] sm:$0xff]  ;;  %1661 = vst [vmem:[%s10206_s11 + $0x6f0] sm:$0xff] %v1660_v30  ;;  %1663 = vst [vmem:[%s10206_s11 + $0x6f8] sm:$0xff] %v1662_v31  ;;  %v1666_v33 = vld [vmem:[%s10201_s10 + $0xe10] sm:$0xff] }
  0x8c   : > { %1665 = vst [vmem:[%s10206_s11 + $0x700] sm:$0xff] %v1664_v32  ;;  %v1668_v34 = vld [vmem:[%s10201_s10 + $0xe20] sm:$0xff]  ;;  %v1670_v35 = vld [vmem:[%s10201_s10 + $0xe30] sm:$0xff]  ;;  %1667 = vst [vmem:[%s10206_s11 + $0x708] sm:$0xff] %v1666_v33 }
  0x8d   : > { %1669 = vst [vmem:[%s10206_s11 + $0x710] sm:$0xff] %v1668_v34  ;;  %1671 = vst [vmem:[%s10206_s11 + $0x718] sm:$0xff] %v1670_v35  ;;  %v1672_v36 = vld [vmem:[%s10201_s10 + $0xe40] sm:$0xff]  ;;  %v1674_v37 = vld [vmem:[%s10201_s10 + $0xe50] sm:$0xff] }
  0x8e   : > { %v1676_v38 = vld [vmem:[%s10201_s10 + $0xe60] sm:$0xff]  ;;  %1673 = vst [vmem:[%s10206_s11 + $0x720] sm:$0xff] %v1672_v36  ;;  %1675 = vst [vmem:[%s10206_s11 + $0x728] sm:$0xff] %v1674_v37  ;;  %v1678_v39 = vld [vmem:[%s10201_s10 + $0xe70] sm:$0xff] }
  0x8f   : > { %1677 = vst [vmem:[%s10206_s11 + $0x730] sm:$0xff] %v1676_v38  ;;  %v1680_v40 = vld [vmem:[%s10201_s10 + $0xe80] sm:$0xff]  ;;  %v1682_v41 = vld [vmem:[%s10201_s10 + $0xe90] sm:$0xff]  ;;  %1679 = vst [vmem:[%s10206_s11 + $0x738] sm:$0xff] %v1678_v39 }
  0x90   : > { %1681 = vst [vmem:[%s10206_s11 + $0x740] sm:$0xff] %v1680_v40  ;;  %1683 = vst [vmem:[%s10206_s11 + $0x748] sm:$0xff] %v1682_v41  ;;  %v1684_v42 = vld [vmem:[%s10201_s10 + $0xea0] sm:$0xff]  ;;  %v1686_v43 = vld [vmem:[%s10201_s10 + $0xeb0] sm:$0xff] }
  0x91   : > { %v1688_v44 = vld [vmem:[%s10201_s10 + $0xec0] sm:$0xff]  ;;  %1685 = vst [vmem:[%s10206_s11 + $0x750] sm:$0xff] %v1684_v42  ;;  %1687 = vst [vmem:[%s10206_s11 + $0x758] sm:$0xff] %v1686_v43  ;;  %v1690_v45 = vld [vmem:[%s10201_s10 + $0xed0] sm:$0xff] }
  0x92   : > { %1689 = vst [vmem:[%s10206_s11 + $0x760] sm:$0xff] %v1688_v44  ;;  %v1692_v46 = vld [vmem:[%s10201_s10 + $0xee0] sm:$0xff]  ;;  %v1694_v47 = vld [vmem:[%s10201_s10 + $0xef0] sm:$0xff]  ;;  %1691 = vst [vmem:[%s10206_s11 + $0x768] sm:$0xff] %v1690_v45 }
  0x93   : > { %1693 = vst [vmem:[%s10206_s11 + $0x770] sm:$0xff] %v1692_v46  ;;  %1695 = vst [vmem:[%s10206_s11 + $0x778] sm:$0xff] %v1694_v47  ;;  %v1696_v48 = vld [vmem:[%s10201_s10 + $0xf00] sm:$0xff]  ;;  %v1698_v49 = vld [vmem:[%s10201_s10 + $0xf10] sm:$0xff] }
  0x94   : > { %v1700_v50 = vld [vmem:[%s10201_s10 + $0xf20] sm:$0xff]  ;;  %1697 = vst [vmem:[%s10206_s11 + $0x780] sm:$0xff] %v1696_v48  ;;  %1699 = vst [vmem:[%s10206_s11 + $0x788] sm:$0xff] %v1698_v49  ;;  %v1702_v51 = vld [vmem:[%s10201_s10 + $0xf30] sm:$0xff] }
  0x95   : > { %1701 = vst [vmem:[%s10206_s11 + $0x790] sm:$0xff] %v1700_v50  ;;  %v1704_v52 = vld [vmem:[%s10201_s10 + $0xf40] sm:$0xff]  ;;  %v1706_v53 = vld [vmem:[%s10201_s10 + $0xf50] sm:$0xff]  ;;  %1703 = vst [vmem:[%s10206_s11 + $0x798] sm:$0xff] %v1702_v51 }
  0x96   : > { %1705 = vst [vmem:[%s10206_s11 + $0x7a0] sm:$0xff] %v1704_v52  ;;  %1707 = vst [vmem:[%s10206_s11 + $0x7a8] sm:$0xff] %v1706_v53  ;;  %v1708_v54 = vld [vmem:[%s10201_s10 + $0xf60] sm:$0xff]  ;;  %v1710_v55 = vld [vmem:[%s10201_s10 + $0xf70] sm:$0xff] }
  0x97   : > { %v1712_v56 = vld [vmem:[%s10201_s10 + $0xf80] sm:$0xff]  ;;  %1709 = vst [vmem:[%s10206_s11 + $0x7b0] sm:$0xff] %v1708_v54  ;;  %1711 = vst [vmem:[%s10206_s11 + $0x7b8] sm:$0xff] %v1710_v55  ;;  %v1714_v57 = vld [vmem:[%s10201_s10 + $0xf90] sm:$0xff] }
  0x98   : > { %1713 = vst [vmem:[%s10206_s11 + $0x7c0] sm:$0xff] %v1712_v56  ;;  %v1716_v58 = vld [vmem:[%s10201_s10 + $0xfa0] sm:$0xff]  ;;  %v1718_v59 = vld [vmem:[%s10201_s10 + $0xfb0] sm:$0xff]  ;;  %1715 = vst [vmem:[%s10206_s11 + $0x7c8] sm:$0xff] %v1714_v57 }
  0x99   : > { %1717 = vst [vmem:[%s10206_s11 + $0x7d0] sm:$0xff] %v1716_v58  ;;  %1719 = vst [vmem:[%s10206_s11 + $0x7d8] sm:$0xff] %v1718_v59  ;;  %v1720_v60 = vld [vmem:[%s10201_s10 + $0xfc0] sm:$0xff]  ;;  %v1722_v61 = vld [vmem:[%s10201_s10 + $0xfd0] sm:$0xff] }
  0x9a   : > { %v1724_v62 = vld [vmem:[%s10201_s10 + $0xfe0] sm:$0xff]  ;;  %1721 = vst [vmem:[%s10206_s11 + $0x7e0] sm:$0xff] %v1720_v60  ;;  %1723 = vst [vmem:[%s10206_s11 + $0x7e8] sm:$0xff] %v1722_v61  ;;  %v1726_v63 = vld [vmem:[%s10201_s10 + $0xff0] sm:$0xff] }
  0x9b   : > { %1725 = vst [vmem:[%s10206_s11 + $0x7f0] sm:$0xff] %v1724_v62  ;;  %v1728_v0 = vld [vmem:[%s10201_s10 + $0x1000] sm:$0xff]  ;;  %v1730_v1 = vld [vmem:[%s10201_s10 + $0x1010] sm:$0xff]  ;;  %1727 = vst [vmem:[%s10206_s11 + $0x7f8] sm:$0xff] %v1726_v63 }
  0x9c   : > { %1729 = vst [vmem:[%s10206_s11 + $0x800] sm:$0xff] %v1728_v0  ;;  %1731 = vst [vmem:[%s10206_s11 + $0x808] sm:$0xff] %v1730_v1  ;;  %v1732_v2 = vld [vmem:[%s10201_s10 + $0x1020] sm:$0xff]  ;;  %v1734_v3 = vld [vmem:[%s10201_s10 + $0x1030] sm:$0xff] }
  0x9d   : > { %v1736_v4 = vld [vmem:[%s10201_s10 + $0x1040] sm:$0xff]  ;;  %1733 = vst [vmem:[%s10206_s11 + $0x810] sm:$0xff] %v1732_v2  ;;  %1735 = vst [vmem:[%s10206_s11 + $0x818] sm:$0xff] %v1734_v3  ;;  %v1738_v5 = vld [vmem:[%s10201_s10 + $0x1050] sm:$0xff] }
  0x9e   : > { %1737 = vst [vmem:[%s10206_s11 + $0x820] sm:$0xff] %v1736_v4  ;;  %v1740_v6 = vld [vmem:[%s10201_s10 + $0x1060] sm:$0xff]  ;;  %v1742_v7 = vld [vmem:[%s10201_s10 + $0x1070] sm:$0xff]  ;;  %1739 = vst [vmem:[%s10206_s11 + $0x828] sm:$0xff] %v1738_v5 }
  0x9f   : > { %1741 = vst [vmem:[%s10206_s11 + $0x830] sm:$0xff] %v1740_v6  ;;  %1743 = vst [vmem:[%s10206_s11 + $0x838] sm:$0xff] %v1742_v7  ;;  %v1744_v8 = vld [vmem:[%s10201_s10 + $0x1080] sm:$0xff]  ;;  %v1746_v9 = vld [vmem:[%s10201_s10 + $0x1090] sm:$0xff] }
  0xa0   : > { %v1748_v10 = vld [vmem:[%s10201_s10 + $0x10a0] sm:$0xff]  ;;  %1745 = vst [vmem:[%s10206_s11 + $0x840] sm:$0xff] %v1744_v8  ;;  %1747 = vst [vmem:[%s10206_s11 + $0x848] sm:$0xff] %v1746_v9  ;;  %v1750_v11 = vld [vmem:[%s10201_s10 + $0x10b0] sm:$0xff] }
  0xa1   : > { %1749 = vst [vmem:[%s10206_s11 + $0x850] sm:$0xff] %v1748_v10  ;;  %v1752_v12 = vld [vmem:[%s10201_s10 + $0x10c0] sm:$0xff]  ;;  %v1754_v13 = vld [vmem:[%s10201_s10 + $0x10d0] sm:$0xff]  ;;  %1751 = vst [vmem:[%s10206_s11 + $0x858] sm:$0xff] %v1750_v11 }
  0xa2   : > { %1753 = vst [vmem:[%s10206_s11 + $0x860] sm:$0xff] %v1752_v12  ;;  %1755 = vst [vmem:[%s10206_s11 + $0x868] sm:$0xff] %v1754_v13  ;;  %v1756_v14 = vld [vmem:[%s10201_s10 + $0x10e0] sm:$0xff]  ;;  %v1758_v15 = vld [vmem:[%s10201_s10 + $0x10f0] sm:$0xff] }
  0xa3   : > { %v1760_v16 = vld [vmem:[%s10201_s10 + $0x1100] sm:$0xff]  ;;  %1757 = vst [vmem:[%s10206_s11 + $0x870] sm:$0xff] %v1756_v14  ;;  %1759 = vst [vmem:[%s10206_s11 + $0x878] sm:$0xff] %v1758_v15  ;;  %v1762_v17 = vld [vmem:[%s10201_s10 + $0x1110] sm:$0xff] }
  0xa4   : > { %1761 = vst [vmem:[%s10206_s11 + $0x880] sm:$0xff] %v1760_v16  ;;  %v1764_v18 = vld [vmem:[%s10201_s10 + $0x1120] sm:$0xff]  ;;  %v1766_v19 = vld [vmem:[%s10201_s10 + $0x1130] sm:$0xff]  ;;  %1763 = vst [vmem:[%s10206_s11 + $0x888] sm:$0xff] %v1762_v17 }
  0xa5   : > { %1765 = vst [vmem:[%s10206_s11 + $0x890] sm:$0xff] %v1764_v18  ;;  %1767 = vst [vmem:[%s10206_s11 + $0x898] sm:$0xff] %v1766_v19  ;;  %v1768_v20 = vld [vmem:[%s10201_s10 + $0x1140] sm:$0xff]  ;;  %v1770_v21 = vld [vmem:[%s10201_s10 + $0x1150] sm:$0xff] }
  0xa6   : > { %v1772_v22 = vld [vmem:[%s10201_s10 + $0x1160] sm:$0xff]  ;;  %1769 = vst [vmem:[%s10206_s11 + $0x8a0] sm:$0xff] %v1768_v20  ;;  %1771 = vst [vmem:[%s10206_s11 + $0x8a8] sm:$0xff] %v1770_v21  ;;  %v1774_v23 = vld [vmem:[%s10201_s10 + $0x1170] sm:$0xff] }
  0xa7   : > { %1773 = vst [vmem:[%s10206_s11 + $0x8b0] sm:$0xff] %v1772_v22  ;;  %v1776_v24 = vld [vmem:[%s10201_s10 + $0x1180] sm:$0xff]  ;;  %v1778_v25 = vld [vmem:[%s10201_s10 + $0x1190] sm:$0xff]  ;;  %1775 = vst [vmem:[%s10206_s11 + $0x8b8] sm:$0xff] %v1774_v23 }
  0xa8   : > { %1777 = vst [vmem:[%s10206_s11 + $0x8c0] sm:$0xff] %v1776_v24  ;;  %1779 = vst [vmem:[%s10206_s11 + $0x8c8] sm:$0xff] %v1778_v25  ;;  %v1780_v26 = vld [vmem:[%s10201_s10 + $0x11a0] sm:$0xff]  ;;  %v1782_v27 = vld [vmem:[%s10201_s10 + $0x11b0] sm:$0xff] }
  0xa9   : > { %v1784_v28 = vld [vmem:[%s10201_s10 + $0x11c0] sm:$0xff]  ;;  %1781 = vst [vmem:[%s10206_s11 + $0x8d0] sm:$0xff] %v1780_v26  ;;  %1783 = vst [vmem:[%s10206_s11 + $0x8d8] sm:$0xff] %v1782_v27  ;;  %v1786_v29 = vld [vmem:[%s10201_s10 + $0x11d0] sm:$0xff] }
  0xaa   : > { %1785 = vst [vmem:[%s10206_s11 + $0x8e0] sm:$0xff] %v1784_v28  ;;  %v1788_v30 = vld [vmem:[%s10201_s10 + $0x11e0] sm:$0xff]  ;;  %v1790_v31 = vld [vmem:[%s10201_s10 + $0x11f0] sm:$0xff]  ;;  %1787 = vst [vmem:[%s10206_s11 + $0x8e8] sm:$0xff] %v1786_v29 }
  0xab   : > { %1789 = vst [vmem:[%s10206_s11 + $0x8f0] sm:$0xff] %v1788_v30  ;;  %1791 = vst [vmem:[%s10206_s11 + $0x8f8] sm:$0xff] %v1790_v31  ;;  %v1792_v32 = vld [vmem:[%s10201_s10 + $0x1200] sm:$0xff]  ;;  %v1794_v33 = vld [vmem:[%s10201_s10 + $0x1210] sm:$0xff] }
  0xac   : > { %v1796_v34 = vld [vmem:[%s10201_s10 + $0x1220] sm:$0xff]  ;;  %1793 = vst [vmem:[%s10206_s11 + $0x900] sm:$0xff] %v1792_v32  ;;  %1795 = vst [vmem:[%s10206_s11 + $0x908] sm:$0xff] %v1794_v33  ;;  %v1798_v35 = vld [vmem:[%s10201_s10 + $0x1230] sm:$0xff] }
  0xad   : > { %1797 = vst [vmem:[%s10206_s11 + $0x910] sm:$0xff] %v1796_v34  ;;  %v1800_v36 = vld [vmem:[%s10201_s10 + $0x1240] sm:$0xff]  ;;  %v1802_v37 = vld [vmem:[%s10201_s10 + $0x1250] sm:$0xff]  ;;  %1799 = vst [vmem:[%s10206_s11 + $0x918] sm:$0xff] %v1798_v35 }
  0xae   : > { %1801 = vst [vmem:[%s10206_s11 + $0x920] sm:$0xff] %v1800_v36  ;;  %1803 = vst [vmem:[%s10206_s11 + $0x928] sm:$0xff] %v1802_v37  ;;  %v1804_v38 = vld [vmem:[%s10201_s10 + $0x1260] sm:$0xff]  ;;  %v1806_v39 = vld [vmem:[%s10201_s10 + $0x1270] sm:$0xff] }
  0xaf   : > { %v1808_v40 = vld [vmem:[%s10201_s10 + $0x1280] sm:$0xff]  ;;  %1805 = vst [vmem:[%s10206_s11 + $0x930] sm:$0xff] %v1804_v38  ;;  %1807 = vst [vmem:[%s10206_s11 + $0x938] sm:$0xff] %v1806_v39  ;;  %v1810_v41 = vld [vmem:[%s10201_s10 + $0x1290] sm:$0xff] }
  0xb0   : > { %1809 = vst [vmem:[%s10206_s11 + $0x940] sm:$0xff] %v1808_v40  ;;  %v1812_v42 = vld [vmem:[%s10201_s10 + $0x12a0] sm:$0xff]  ;;  %v1814_v43 = vld [vmem:[%s10201_s10 + $0x12b0] sm:$0xff]  ;;  %1811 = vst [vmem:[%s10206_s11 + $0x948] sm:$0xff] %v1810_v41 }
  0xb1   : > { %1813 = vst [vmem:[%s10206_s11 + $0x950] sm:$0xff] %v1812_v42  ;;  %1815 = vst [vmem:[%s10206_s11 + $0x958] sm:$0xff] %v1814_v43  ;;  %v1816_v44 = vld [vmem:[%s10201_s10 + $0x12c0] sm:$0xff]  ;;  %v1818_v45 = vld [vmem:[%s10201_s10 + $0x12d0] sm:$0xff] }
  0xb2   : > { %v1820_v46 = vld [vmem:[%s10201_s10 + $0x12e0] sm:$0xff]  ;;  %1817 = vst [vmem:[%s10206_s11 + $0x960] sm:$0xff] %v1816_v44  ;;  %1819 = vst [vmem:[%s10206_s11 + $0x968] sm:$0xff] %v1818_v45  ;;  %v1822_v47 = vld [vmem:[%s10201_s10 + $0x12f0] sm:$0xff] }
  0xb3   : > { %1821 = vst [vmem:[%s10206_s11 + $0x970] sm:$0xff] %v1820_v46  ;;  %v1824_v48 = vld [vmem:[%s10201_s10 + $0x1300] sm:$0xff]  ;;  %v1826_v49 = vld [vmem:[%s10201_s10 + $0x1310] sm:$0xff]  ;;  %1823 = vst [vmem:[%s10206_s11 + $0x978] sm:$0xff] %v1822_v47 }
  0xb4   : > { %1825 = vst [vmem:[%s10206_s11 + $0x980] sm:$0xff] %v1824_v48  ;;  %1827 = vst [vmem:[%s10206_s11 + $0x988] sm:$0xff] %v1826_v49  ;;  %v1828_v50 = vld [vmem:[%s10201_s10 + $0x1320] sm:$0xff]  ;;  %v1830_v51 = vld [vmem:[%s10201_s10 + $0x1330] sm:$0xff] }
  0xb5   : > { %v1832_v52 = vld [vmem:[%s10201_s10 + $0x1340] sm:$0xff]  ;;  %1829 = vst [vmem:[%s10206_s11 + $0x990] sm:$0xff] %v1828_v50  ;;  %1831 = vst [vmem:[%s10206_s11 + $0x998] sm:$0xff] %v1830_v51  ;;  %v1834_v53 = vld [vmem:[%s10201_s10 + $0x1350] sm:$0xff] }
  0xb6   : > { %1833 = vst [vmem:[%s10206_s11 + $0x9a0] sm:$0xff] %v1832_v52  ;;  %v1836_v54 = vld [vmem:[%s10201_s10 + $0x1360] sm:$0xff]  ;;  %v1838_v55 = vld [vmem:[%s10201_s10 + $0x1370] sm:$0xff]  ;;  %1835 = vst [vmem:[%s10206_s11 + $0x9a8] sm:$0xff] %v1834_v53 }
  0xb7   : > { %1837 = vst [vmem:[%s10206_s11 + $0x9b0] sm:$0xff] %v1836_v54  ;;  %1839 = vst [vmem:[%s10206_s11 + $0x9b8] sm:$0xff] %v1838_v55  ;;  %v1840_v56 = vld [vmem:[%s10201_s10 + $0x1380] sm:$0xff]  ;;  %v1842_v57 = vld [vmem:[%s10201_s10 + $0x1390] sm:$0xff] }
  0xb8   : > { %v1844_v58 = vld [vmem:[%s10201_s10 + $0x13a0] sm:$0xff]  ;;  %1841 = vst [vmem:[%s10206_s11 + $0x9c0] sm:$0xff] %v1840_v56  ;;  %1843 = vst [vmem:[%s10206_s11 + $0x9c8] sm:$0xff] %v1842_v57  ;;  %v1846_v59 = vld [vmem:[%s10201_s10 + $0x13b0] sm:$0xff] }
  0xb9   : > { %1845 = vst [vmem:[%s10206_s11 + $0x9d0] sm:$0xff] %v1844_v58  ;;  %v1848_v60 = vld [vmem:[%s10201_s10 + $0x13c0] sm:$0xff]  ;;  %v1850_v61 = vld [vmem:[%s10201_s10 + $0x13d0] sm:$0xff]  ;;  %1847 = vst [vmem:[%s10206_s11 + $0x9d8] sm:$0xff] %v1846_v59 }
  0xba   : > { %1849 = vst [vmem:[%s10206_s11 + $0x9e0] sm:$0xff] %v1848_v60  ;;  %1851 = vst [vmem:[%s10206_s11 + $0x9e8] sm:$0xff] %v1850_v61  ;;  %v1852_v62 = vld [vmem:[%s10201_s10 + $0x13e0] sm:$0xff]  ;;  %v1854_v63 = vld [vmem:[%s10201_s10 + $0x13f0] sm:$0xff] }
  0xbb   : > { %v1856_v0 = vld [vmem:[%s10201_s10 + $0x1400] sm:$0xff]  ;;  %1853 = vst [vmem:[%s10206_s11 + $0x9f0] sm:$0xff] %v1852_v62  ;;  %1855 = vst [vmem:[%s10206_s11 + $0x9f8] sm:$0xff] %v1854_v63  ;;  %v1858_v1 = vld [vmem:[%s10201_s10 + $0x1410] sm:$0xff] }
  0xbc   : > { %1857 = vst [vmem:[%s10206_s11 + $0xa00] sm:$0xff] %v1856_v0  ;;  %v1860_v2 = vld [vmem:[%s10201_s10 + $0x1420] sm:$0xff]  ;;  %v1862_v3 = vld [vmem:[%s10201_s10 + $0x1430] sm:$0xff]  ;;  %1859 = vst [vmem:[%s10206_s11 + $0xa08] sm:$0xff] %v1858_v1 }
  0xbd   : > { %1861 = vst [vmem:[%s10206_s11 + $0xa10] sm:$0xff] %v1860_v2  ;;  %1863 = vst [vmem:[%s10206_s11 + $0xa18] sm:$0xff] %v1862_v3  ;;  %v1864_v4 = vld [vmem:[%s10201_s10 + $0x1440] sm:$0xff]  ;;  %v1866_v5 = vld [vmem:[%s10201_s10 + $0x1450] sm:$0xff] }
  0xbe   : > { %v1868_v6 = vld [vmem:[%s10201_s10 + $0x1460] sm:$0xff]  ;;  %1865 = vst [vmem:[%s10206_s11 + $0xa20] sm:$0xff] %v1864_v4  ;;  %1867 = vst [vmem:[%s10206_s11 + $0xa28] sm:$0xff] %v1866_v5  ;;  %v1870_v7 = vld [vmem:[%s10201_s10 + $0x1470] sm:$0xff] }
  0xbf   : > { %1869 = vst [vmem:[%s10206_s11 + $0xa30] sm:$0xff] %v1868_v6  ;;  %v1872_v8 = vld [vmem:[%s10201_s10 + $0x1480] sm:$0xff]  ;;  %v1874_v9 = vld [vmem:[%s10201_s10 + $0x1490] sm:$0xff]  ;;  %1871 = vst [vmem:[%s10206_s11 + $0xa38] sm:$0xff] %v1870_v7 }
  0xc0   : > { %1873 = vst [vmem:[%s10206_s11 + $0xa40] sm:$0xff] %v1872_v8  ;;  %1875 = vst [vmem:[%s10206_s11 + $0xa48] sm:$0xff] %v1874_v9  ;;  %v1876_v10 = vld [vmem:[%s10201_s10 + $0x14a0] sm:$0xff]  ;;  %v1878_v11 = vld [vmem:[%s10201_s10 + $0x14b0] sm:$0xff] }
  0xc1   : > { %v1880_v12 = vld [vmem:[%s10201_s10 + $0x14c0] sm:$0xff]  ;;  %1877 = vst [vmem:[%s10206_s11 + $0xa50] sm:$0xff] %v1876_v10  ;;  %1879 = vst [vmem:[%s10206_s11 + $0xa58] sm:$0xff] %v1878_v11  ;;  %v1882_v13 = vld [vmem:[%s10201_s10 + $0x14d0] sm:$0xff] }
  0xc2   : > { %1881 = vst [vmem:[%s10206_s11 + $0xa60] sm:$0xff] %v1880_v12  ;;  %v1884_v14 = vld [vmem:[%s10201_s10 + $0x14e0] sm:$0xff]  ;;  %v1886_v15 = vld [vmem:[%s10201_s10 + $0x14f0] sm:$0xff]  ;;  %1883 = vst [vmem:[%s10206_s11 + $0xa68] sm:$0xff] %v1882_v13 }
  0xc3   : > { %1885 = vst [vmem:[%s10206_s11 + $0xa70] sm:$0xff] %v1884_v14  ;;  %1887 = vst [vmem:[%s10206_s11 + $0xa78] sm:$0xff] %v1886_v15  ;;  %v1888_v16 = vld [vmem:[%s10201_s10 + $0x1500] sm:$0xff]  ;;  %v1890_v17 = vld [vmem:[%s10201_s10 + $0x1510] sm:$0xff] }
  0xc4   : > { %v1892_v18 = vld [vmem:[%s10201_s10 + $0x1520] sm:$0xff]  ;;  %1889 = vst [vmem:[%s10206_s11 + $0xa80] sm:$0xff] %v1888_v16  ;;  %1891 = vst [vmem:[%s10206_s11 + $0xa88] sm:$0xff] %v1890_v17  ;;  %v1894_v19 = vld [vmem:[%s10201_s10 + $0x1530] sm:$0xff] }
  0xc5   : > { %1893 = vst [vmem:[%s10206_s11 + $0xa90] sm:$0xff] %v1892_v18  ;;  %v1896_v20 = vld [vmem:[%s10201_s10 + $0x1540] sm:$0xff]  ;;  %v1898_v21 = vld [vmem:[%s10201_s10 + $0x1550] sm:$0xff]  ;;  %1895 = vst [vmem:[%s10206_s11 + $0xa98] sm:$0xff] %v1894_v19 }
  0xc6   : > { %1897 = vst [vmem:[%s10206_s11 + $0xaa0] sm:$0xff] %v1896_v20  ;;  %1899 = vst [vmem:[%s10206_s11 + $0xaa8] sm:$0xff] %v1898_v21  ;;  %v1900_v22 = vld [vmem:[%s10201_s10 + $0x1560] sm:$0xff]  ;;  %v1902_v23 = vld [vmem:[%s10201_s10 + $0x1570] sm:$0xff] }
  0xc7   : > { %v1904_v24 = vld [vmem:[%s10201_s10 + $0x1580] sm:$0xff]  ;;  %1901 = vst [vmem:[%s10206_s11 + $0xab0] sm:$0xff] %v1900_v22  ;;  %1903 = vst [vmem:[%s10206_s11 + $0xab8] sm:$0xff] %v1902_v23  ;;  %v1906_v25 = vld [vmem:[%s10201_s10 + $0x1590] sm:$0xff] }
  0xc8   : > { %1905 = vst [vmem:[%s10206_s11 + $0xac0] sm:$0xff] %v1904_v24  ;;  %v1908_v26 = vld [vmem:[%s10201_s10 + $0x15a0] sm:$0xff]  ;;  %v1910_v27 = vld [vmem:[%s10201_s10 + $0x15b0] sm:$0xff]  ;;  %1907 = vst [vmem:[%s10206_s11 + $0xac8] sm:$0xff] %v1906_v25 }
  0xc9   : > { %1909 = vst [vmem:[%s10206_s11 + $0xad0] sm:$0xff] %v1908_v26  ;;  %1911 = vst [vmem:[%s10206_s11 + $0xad8] sm:$0xff] %v1910_v27  ;;  %v1912_v28 = vld [vmem:[%s10201_s10 + $0x15c0] sm:$0xff]  ;;  %v1914_v29 = vld [vmem:[%s10201_s10 + $0x15d0] sm:$0xff] }
  0xca   : > { %v1916_v30 = vld [vmem:[%s10201_s10 + $0x15e0] sm:$0xff]  ;;  %1913 = vst [vmem:[%s10206_s11 + $0xae0] sm:$0xff] %v1912_v28  ;;  %1915 = vst [vmem:[%s10206_s11 + $0xae8] sm:$0xff] %v1914_v29  ;;  %v1918_v31 = vld [vmem:[%s10201_s10 + $0x15f0] sm:$0xff] }
  0xcb   : > { %1917 = vst [vmem:[%s10206_s11 + $0xaf0] sm:$0xff] %v1916_v30  ;;  %v1920_v32 = vld [vmem:[%s10201_s10 + $0x1600] sm:$0xff]  ;;  %v1922_v33 = vld [vmem:[%s10201_s10 + $0x1610] sm:$0xff]  ;;  %1919 = vst [vmem:[%s10206_s11 + $0xaf8] sm:$0xff] %v1918_v31 }
  0xcc   : > { %1921 = vst [vmem:[%s10206_s11 + $0xb00] sm:$0xff] %v1920_v32  ;;  %1923 = vst [vmem:[%s10206_s11 + $0xb08] sm:$0xff] %v1922_v33  ;;  %v1924_v34 = vld [vmem:[%s10201_s10 + $0x1620] sm:$0xff]  ;;  %v1926_v35 = vld [vmem:[%s10201_s10 + $0x1630] sm:$0xff] }
  0xcd   : > { %v1928_v36 = vld [vmem:[%s10201_s10 + $0x1640] sm:$0xff]  ;;  %1925 = vst [vmem:[%s10206_s11 + $0xb10] sm:$0xff] %v1924_v34  ;;  %1927 = vst [vmem:[%s10206_s11 + $0xb18] sm:$0xff] %v1926_v35  ;;  %v1930_v37 = vld [vmem:[%s10201_s10 + $0x1650] sm:$0xff] }
  0xce   : > { %1929 = vst [vmem:[%s10206_s11 + $0xb20] sm:$0xff] %v1928_v36  ;;  %v1932_v38 = vld [vmem:[%s10201_s10 + $0x1660] sm:$0xff]  ;;  %v1934_v39 = vld [vmem:[%s10201_s10 + $0x1670] sm:$0xff]  ;;  %1931 = vst [vmem:[%s10206_s11 + $0xb28] sm:$0xff] %v1930_v37 }
  0xcf   : > { %1933 = vst [vmem:[%s10206_s11 + $0xb30] sm:$0xff] %v1932_v38  ;;  %1935 = vst [vmem:[%s10206_s11 + $0xb38] sm:$0xff] %v1934_v39  ;;  %v1936_v40 = vld [vmem:[%s10201_s10 + $0x1680] sm:$0xff]  ;;  %v1938_v41 = vld [vmem:[%s10201_s10 + $0x1690] sm:$0xff] }
  0xd0   : > { %v1940_v42 = vld [vmem:[%s10201_s10 + $0x16a0] sm:$0xff]  ;;  %1937 = vst [vmem:[%s10206_s11 + $0xb40] sm:$0xff] %v1936_v40  ;;  %1939 = vst [vmem:[%s10206_s11 + $0xb48] sm:$0xff] %v1938_v41  ;;  %v1942_v43 = vld [vmem:[%s10201_s10 + $0x16b0] sm:$0xff] }
  0xd1   : > { %1941 = vst [vmem:[%s10206_s11 + $0xb50] sm:$0xff] %v1940_v42  ;;  %v1944_v44 = vld [vmem:[%s10201_s10 + $0x16c0] sm:$0xff]  ;;  %v1946_v45 = vld [vmem:[%s10201_s10 + $0x16d0] sm:$0xff]  ;;  %1943 = vst [vmem:[%s10206_s11 + $0xb58] sm:$0xff] %v1942_v43 }
  0xd2   : > { %1945 = vst [vmem:[%s10206_s11 + $0xb60] sm:$0xff] %v1944_v44  ;;  %1947 = vst [vmem:[%s10206_s11 + $0xb68] sm:$0xff] %v1946_v45  ;;  %v1948_v46 = vld [vmem:[%s10201_s10 + $0x16e0] sm:$0xff]  ;;  %v1950_v47 = vld [vmem:[%s10201_s10 + $0x16f0] sm:$0xff] }
  0xd3   : > { %v1952_v48 = vld [vmem:[%s10201_s10 + $0x1700] sm:$0xff]  ;;  %1949 = vst [vmem:[%s10206_s11 + $0xb70] sm:$0xff] %v1948_v46  ;;  %1951 = vst [vmem:[%s10206_s11 + $0xb78] sm:$0xff] %v1950_v47  ;;  %v1954_v49 = vld [vmem:[%s10201_s10 + $0x1710] sm:$0xff] }
  0xd4   : > { %1953 = vst [vmem:[%s10206_s11 + $0xb80] sm:$0xff] %v1952_v48  ;;  %v1956_v50 = vld [vmem:[%s10201_s10 + $0x1720] sm:$0xff]  ;;  %v1958_v51 = vld [vmem:[%s10201_s10 + $0x1730] sm:$0xff]  ;;  %1955 = vst [vmem:[%s10206_s11 + $0xb88] sm:$0xff] %v1954_v49 }
  0xd5   : > { %1957 = vst [vmem:[%s10206_s11 + $0xb90] sm:$0xff] %v1956_v50  ;;  %1959 = vst [vmem:[%s10206_s11 + $0xb98] sm:$0xff] %v1958_v51  ;;  %v1960_v52 = vld [vmem:[%s10201_s10 + $0x1740] sm:$0xff]  ;;  %v1962_v53 = vld [vmem:[%s10201_s10 + $0x1750] sm:$0xff] }
  0xd6   : > { %v1964_v54 = vld [vmem:[%s10201_s10 + $0x1760] sm:$0xff]  ;;  %1961 = vst [vmem:[%s10206_s11 + $0xba0] sm:$0xff] %v1960_v52  ;;  %1963 = vst [vmem:[%s10206_s11 + $0xba8] sm:$0xff] %v1962_v53  ;;  %v1966_v55 = vld [vmem:[%s10201_s10 + $0x1770] sm:$0xff] }
  0xd7   : > { %1965 = vst [vmem:[%s10206_s11 + $0xbb0] sm:$0xff] %v1964_v54  ;;  %v1968_v56 = vld [vmem:[%s10201_s10 + $0x1780] sm:$0xff]  ;;  %v1970_v57 = vld [vmem:[%s10201_s10 + $0x1790] sm:$0xff]  ;;  %1967 = vst [vmem:[%s10206_s11 + $0xbb8] sm:$0xff] %v1966_v55 }
  0xd8   : > { %1969 = vst [vmem:[%s10206_s11 + $0xbc0] sm:$0xff] %v1968_v56  ;;  %1971 = vst [vmem:[%s10206_s11 + $0xbc8] sm:$0xff] %v1970_v57  ;;  %v1972_v58 = vld [vmem:[%s10201_s10 + $0x17a0] sm:$0xff]  ;;  %v1974_v59 = vld [vmem:[%s10201_s10 + $0x17b0] sm:$0xff] }
  0xd9   : > { %v1976_v60 = vld [vmem:[%s10201_s10 + $0x17c0] sm:$0xff]  ;;  %1973 = vst [vmem:[%s10206_s11 + $0xbd0] sm:$0xff] %v1972_v58  ;;  %1975 = vst [vmem:[%s10206_s11 + $0xbd8] sm:$0xff] %v1974_v59  ;;  %v1978_v61 = vld [vmem:[%s10201_s10 + $0x17d0] sm:$0xff] }
  0xda   : > { %1977 = vst [vmem:[%s10206_s11 + $0xbe0] sm:$0xff] %v1976_v60  ;;  %v1980_v62 = vld [vmem:[%s10201_s10 + $0x17e0] sm:$0xff]  ;;  %v1982_v63 = vld [vmem:[%s10201_s10 + $0x17f0] sm:$0xff]  ;;  %1979 = vst [vmem:[%s10206_s11 + $0xbe8] sm:$0xff] %v1978_v61 }
  0xdb   : > { %1981 = vst [vmem:[%s10206_s11 + $0xbf0] sm:$0xff] %v1980_v62  ;;  %1983 = vst [vmem:[%s10206_s11 + $0xbf8] sm:$0xff] %v1982_v63  ;;  %v1984_v0 = vld [vmem:[%s10201_s10 + $0x1800] sm:$0xff]  ;;  %v1986_v1 = vld [vmem:[%s10201_s10 + $0x1810] sm:$0xff] }
  0xdc   : > { %v1988_v2 = vld [vmem:[%s10201_s10 + $0x1820] sm:$0xff]  ;;  %1985 = vst [vmem:[%s10206_s11 + $0xc00] sm:$0xff] %v1984_v0  ;;  %1987 = vst [vmem:[%s10206_s11 + $0xc08] sm:$0xff] %v1986_v1  ;;  %v1990_v3 = vld [vmem:[%s10201_s10 + $0x1830] sm:$0xff] }
  0xdd   : > { %1989 = vst [vmem:[%s10206_s11 + $0xc10] sm:$0xff] %v1988_v2  ;;  %v1992_v4 = vld [vmem:[%s10201_s10 + $0x1840] sm:$0xff]  ;;  %v1994_v5 = vld [vmem:[%s10201_s10 + $0x1850] sm:$0xff]  ;;  %1991 = vst [vmem:[%s10206_s11 + $0xc18] sm:$0xff] %v1990_v3 }
  0xde   : > { %1993 = vst [vmem:[%s10206_s11 + $0xc20] sm:$0xff] %v1992_v4  ;;  %1995 = vst [vmem:[%s10206_s11 + $0xc28] sm:$0xff] %v1994_v5  ;;  %v1996_v6 = vld [vmem:[%s10201_s10 + $0x1860] sm:$0xff]  ;;  %v1998_v7 = vld [vmem:[%s10201_s10 + $0x1870] sm:$0xff] }
  0xdf   : > { %v2000_v8 = vld [vmem:[%s10201_s10 + $0x1880] sm:$0xff]  ;;  %1997 = vst [vmem:[%s10206_s11 + $0xc30] sm:$0xff] %v1996_v6  ;;  %1999 = vst [vmem:[%s10206_s11 + $0xc38] sm:$0xff] %v1998_v7  ;;  %v2002_v9 = vld [vmem:[%s10201_s10 + $0x1890] sm:$0xff] }
  0xe0   : > { %2001 = vst [vmem:[%s10206_s11 + $0xc40] sm:$0xff] %v2000_v8  ;;  %v2004_v10 = vld [vmem:[%s10201_s10 + $0x18a0] sm:$0xff]  ;;  %v2006_v11 = vld [vmem:[%s10201_s10 + $0x18b0] sm:$0xff]  ;;  %2003 = vst [vmem:[%s10206_s11 + $0xc48] sm:$0xff] %v2002_v9 }
  0xe1   : > { %2005 = vst [vmem:[%s10206_s11 + $0xc50] sm:$0xff] %v2004_v10  ;;  %2007 = vst [vmem:[%s10206_s11 + $0xc58] sm:$0xff] %v2006_v11  ;;  %v2008_v12 = vld [vmem:[%s10201_s10 + $0x18c0] sm:$0xff]  ;;  %v2010_v13 = vld [vmem:[%s10201_s10 + $0x18d0] sm:$0xff] }
  0xe2   : > { %v2012_v14 = vld [vmem:[%s10201_s10 + $0x18e0] sm:$0xff]  ;;  %2009 = vst [vmem:[%s10206_s11 + $0xc60] sm:$0xff] %v2008_v12  ;;  %2011 = vst [vmem:[%s10206_s11 + $0xc68] sm:$0xff] %v2010_v13  ;;  %v2014_v15 = vld [vmem:[%s10201_s10 + $0x18f0] sm:$0xff] }
  0xe3   : > { %2013 = vst [vmem:[%s10206_s11 + $0xc70] sm:$0xff] %v2012_v14  ;;  %v2016_v16 = vld [vmem:[%s10201_s10 + $0x1900] sm:$0xff]  ;;  %v2018_v17 = vld [vmem:[%s10201_s10 + $0x1910] sm:$0xff]  ;;  %2015 = vst [vmem:[%s10206_s11 + $0xc78] sm:$0xff] %v2014_v15 }
  0xe4   : > { %2017 = vst [vmem:[%s10206_s11 + $0xc80] sm:$0xff] %v2016_v16  ;;  %2019 = vst [vmem:[%s10206_s11 + $0xc88] sm:$0xff] %v2018_v17  ;;  %v2020_v18 = vld [vmem:[%s10201_s10 + $0x1920] sm:$0xff]  ;;  %v2022_v19 = vld [vmem:[%s10201_s10 + $0x1930] sm:$0xff] }
  0xe5   : > { %v2024_v20 = vld [vmem:[%s10201_s10 + $0x1940] sm:$0xff]  ;;  %2021 = vst [vmem:[%s10206_s11 + $0xc90] sm:$0xff] %v2020_v18  ;;  %2023 = vst [vmem:[%s10206_s11 + $0xc98] sm:$0xff] %v2022_v19  ;;  %v2026_v21 = vld [vmem:[%s10201_s10 + $0x1950] sm:$0xff] }
  0xe6   : > { %2025 = vst [vmem:[%s10206_s11 + $0xca0] sm:$0xff] %v2024_v20  ;;  %v2028_v22 = vld [vmem:[%s10201_s10 + $0x1960] sm:$0xff]  ;;  %v2030_v23 = vld [vmem:[%s10201_s10 + $0x1970] sm:$0xff]  ;;  %2027 = vst [vmem:[%s10206_s11 + $0xca8] sm:$0xff] %v2026_v21 }
  0xe7   : > { %2029 = vst [vmem:[%s10206_s11 + $0xcb0] sm:$0xff] %v2028_v22  ;;  %2031 = vst [vmem:[%s10206_s11 + $0xcb8] sm:$0xff] %v2030_v23  ;;  %v2032_v24 = vld [vmem:[%s10201_s10 + $0x1980] sm:$0xff]  ;;  %v2034_v25 = vld [vmem:[%s10201_s10 + $0x1990] sm:$0xff] }
  0xe8   : > { %v2036_v26 = vld [vmem:[%s10201_s10 + $0x19a0] sm:$0xff]  ;;  %2033 = vst [vmem:[%s10206_s11 + $0xcc0] sm:$0xff] %v2032_v24  ;;  %2035 = vst [vmem:[%s10206_s11 + $0xcc8] sm:$0xff] %v2034_v25  ;;  %v2038_v27 = vld [vmem:[%s10201_s10 + $0x19b0] sm:$0xff] }
  0xe9   : > { %2037 = vst [vmem:[%s10206_s11 + $0xcd0] sm:$0xff] %v2036_v26  ;;  %v2040_v28 = vld [vmem:[%s10201_s10 + $0x19c0] sm:$0xff]  ;;  %v2042_v29 = vld [vmem:[%s10201_s10 + $0x19d0] sm:$0xff]  ;;  %2039 = vst [vmem:[%s10206_s11 + $0xcd8] sm:$0xff] %v2038_v27 }
  0xea   : > { %2041 = vst [vmem:[%s10206_s11 + $0xce0] sm:$0xff] %v2040_v28  ;;  %2043 = vst [vmem:[%s10206_s11 + $0xce8] sm:$0xff] %v2042_v29  ;;  %v2044_v30 = vld [vmem:[%s10201_s10 + $0x19e0] sm:$0xff]  ;;  %v2046_v31 = vld [vmem:[%s10201_s10 + $0x19f0] sm:$0xff] }
  0xeb   : > { %v2048_v32 = vld [vmem:[%s10201_s10 + $0x1a00] sm:$0xff]  ;;  %2045 = vst [vmem:[%s10206_s11 + $0xcf0] sm:$0xff] %v2044_v30  ;;  %2047 = vst [vmem:[%s10206_s11 + $0xcf8] sm:$0xff] %v2046_v31  ;;  %v2050_v33 = vld [vmem:[%s10201_s10 + $0x1a10] sm:$0xff] }
  0xec   : > { %2049 = vst [vmem:[%s10206_s11 + $0xd00] sm:$0xff] %v2048_v32  ;;  %v2052_v34 = vld [vmem:[%s10201_s10 + $0x1a20] sm:$0xff]  ;;  %v2054_v35 = vld [vmem:[%s10201_s10 + $0x1a30] sm:$0xff]  ;;  %2051 = vst [vmem:[%s10206_s11 + $0xd08] sm:$0xff] %v2050_v33 }
  0xed   : > { %2053 = vst [vmem:[%s10206_s11 + $0xd10] sm:$0xff] %v2052_v34  ;;  %2055 = vst [vmem:[%s10206_s11 + $0xd18] sm:$0xff] %v2054_v35  ;;  %v2056_v36 = vld [vmem:[%s10201_s10 + $0x1a40] sm:$0xff]  ;;  %v2058_v37 = vld [vmem:[%s10201_s10 + $0x1a50] sm:$0xff] }
  0xee   : > { %v2060_v38 = vld [vmem:[%s10201_s10 + $0x1a60] sm:$0xff]  ;;  %2057 = vst [vmem:[%s10206_s11 + $0xd20] sm:$0xff] %v2056_v36  ;;  %2059 = vst [vmem:[%s10206_s11 + $0xd28] sm:$0xff] %v2058_v37  ;;  %v2062_v39 = vld [vmem:[%s10201_s10 + $0x1a70] sm:$0xff] }
  0xef   : > { %2061 = vst [vmem:[%s10206_s11 + $0xd30] sm:$0xff] %v2060_v38  ;;  %v2064_v40 = vld [vmem:[%s10201_s10 + $0x1a80] sm:$0xff]  ;;  %v2066_v41 = vld [vmem:[%s10201_s10 + $0x1a90] sm:$0xff]  ;;  %2063 = vst [vmem:[%s10206_s11 + $0xd38] sm:$0xff] %v2062_v39 }
  0xf0   : > { %2065 = vst [vmem:[%s10206_s11 + $0xd40] sm:$0xff] %v2064_v40  ;;  %2067 = vst [vmem:[%s10206_s11 + $0xd48] sm:$0xff] %v2066_v41  ;;  %v2068_v42 = vld [vmem:[%s10201_s10 + $0x1aa0] sm:$0xff]  ;;  %v2070_v43 = vld [vmem:[%s10201_s10 + $0x1ab0] sm:$0xff] }
  0xf1   : > { %v2072_v44 = vld [vmem:[%s10201_s10 + $0x1ac0] sm:$0xff]  ;;  %2069 = vst [vmem:[%s10206_s11 + $0xd50] sm:$0xff] %v2068_v42  ;;  %2071 = vst [vmem:[%s10206_s11 + $0xd58] sm:$0xff] %v2070_v43  ;;  %v2074_v45 = vld [vmem:[%s10201_s10 + $0x1ad0] sm:$0xff] }
  0xf2   : > { %2073 = vst [vmem:[%s10206_s11 + $0xd60] sm:$0xff] %v2072_v44  ;;  %v2076_v46 = vld [vmem:[%s10201_s10 + $0x1ae0] sm:$0xff]  ;;  %v2078_v47 = vld [vmem:[%s10201_s10 + $0x1af0] sm:$0xff]  ;;  %2075 = vst [vmem:[%s10206_s11 + $0xd68] sm:$0xff] %v2074_v45 }
  0xf3   : > { %2077 = vst [vmem:[%s10206_s11 + $0xd70] sm:$0xff] %v2076_v46  ;;  %2079 = vst [vmem:[%s10206_s11 + $0xd78] sm:$0xff] %v2078_v47  ;;  %v2080_v48 = vld [vmem:[%s10201_s10 + $0x1b00] sm:$0xff]  ;;  %v2082_v49 = vld [vmem:[%s10201_s10 + $0x1b10] sm:$0xff] }
  0xf4   : > { %v2084_v50 = vld [vmem:[%s10201_s10 + $0x1b20] sm:$0xff]  ;;  %2081 = vst [vmem:[%s10206_s11 + $0xd80] sm:$0xff] %v2080_v48  ;;  %2083 = vst [vmem:[%s10206_s11 + $0xd88] sm:$0xff] %v2082_v49  ;;  %v2086_v51 = vld [vmem:[%s10201_s10 + $0x1b30] sm:$0xff] }
  0xf5   : > { %2085 = vst [vmem:[%s10206_s11 + $0xd90] sm:$0xff] %v2084_v50  ;;  %v2088_v52 = vld [vmem:[%s10201_s10 + $0x1b40] sm:$0xff]  ;;  %v2090_v53 = vld [vmem:[%s10201_s10 + $0x1b50] sm:$0xff]  ;;  %2087 = vst [vmem:[%s10206_s11 + $0xd98] sm:$0xff] %v2086_v51 }
  0xf6   : > { %2089 = vst [vmem:[%s10206_s11 + $0xda0] sm:$0xff] %v2088_v52  ;;  %2091 = vst [vmem:[%s10206_s11 + $0xda8] sm:$0xff] %v2090_v53  ;;  %v2092_v54 = vld [vmem:[%s10201_s10 + $0x1b60] sm:$0xff]  ;;  %v2094_v55 = vld [vmem:[%s10201_s10 + $0x1b70] sm:$0xff] }
  0xf7   : > { %v2096_v56 = vld [vmem:[%s10201_s10 + $0x1b80] sm:$0xff]  ;;  %2093 = vst [vmem:[%s10206_s11 + $0xdb0] sm:$0xff] %v2092_v54  ;;  %2095 = vst [vmem:[%s10206_s11 + $0xdb8] sm:$0xff] %v2094_v55  ;;  %v2098_v57 = vld [vmem:[%s10201_s10 + $0x1b90] sm:$0xff] }
  0xf8   : > { %2097 = vst [vmem:[%s10206_s11 + $0xdc0] sm:$0xff] %v2096_v56  ;;  %v2100_v58 = vld [vmem:[%s10201_s10 + $0x1ba0] sm:$0xff]  ;;  %v2102_v59 = vld [vmem:[%s10201_s10 + $0x1bb0] sm:$0xff]  ;;  %2099 = vst [vmem:[%s10206_s11 + $0xdc8] sm:$0xff] %v2098_v57 }
  0xf9   : > { %2101 = vst [vmem:[%s10206_s11 + $0xdd0] sm:$0xff] %v2100_v58  ;;  %2103 = vst [vmem:[%s10206_s11 + $0xdd8] sm:$0xff] %v2102_v59  ;;  %v2104_v60 = vld [vmem:[%s10201_s10 + $0x1bc0] sm:$0xff]  ;;  %v2106_v61 = vld [vmem:[%s10201_s10 + $0x1bd0] sm:$0xff] }
  0xfa   : > { %v2108_v62 = vld [vmem:[%s10201_s10 + $0x1be0] sm:$0xff]  ;;  %2105 = vst [vmem:[%s10206_s11 + $0xde0] sm:$0xff] %v2104_v60  ;;  %2107 = vst [vmem:[%s10206_s11 + $0xde8] sm:$0xff] %v2106_v61  ;;  %v2110_v63 = vld [vmem:[%s10201_s10 + $0x1bf0] sm:$0xff] }
  0xfb   : > { %2109 = vst [vmem:[%s10206_s11 + $0xdf0] sm:$0xff] %v2108_v62  ;;  %v2112_v0 = vld [vmem:[%s10201_s10 + $0x1c00] sm:$0xff]  ;;  %v2114_v1 = vld [vmem:[%s10201_s10 + $0x1c10] sm:$0xff]  ;;  %2111 = vst [vmem:[%s10206_s11 + $0xdf8] sm:$0xff] %v2110_v63 }
  0xfc   : > { %2113 = vst [vmem:[%s10206_s11 + $0xe00] sm:$0xff] %v2112_v0  ;;  %2115 = vst [vmem:[%s10206_s11 + $0xe08] sm:$0xff] %v2114_v1  ;;  %v2116_v2 = vld [vmem:[%s10201_s10 + $0x1c20] sm:$0xff]  ;;  %v2118_v3 = vld [vmem:[%s10201_s10 + $0x1c30] sm:$0xff] }
  0xfd   : > { %v2120_v4 = vld [vmem:[%s10201_s10 + $0x1c40] sm:$0xff]  ;;  %2117 = vst [vmem:[%s10206_s11 + $0xe10] sm:$0xff] %v2116_v2  ;;  %2119 = vst [vmem:[%s10206_s11 + $0xe18] sm:$0xff] %v2118_v3  ;;  %v2122_v5 = vld [vmem:[%s10201_s10 + $0x1c50] sm:$0xff] }
  0xfe   : > { %2121 = vst [vmem:[%s10206_s11 + $0xe20] sm:$0xff] %v2120_v4  ;;  %v2124_v6 = vld [vmem:[%s10201_s10 + $0x1c60] sm:$0xff]  ;;  %v2126_v7 = vld [vmem:[%s10201_s10 + $0x1c70] sm:$0xff]  ;;  %2123 = vst [vmem:[%s10206_s11 + $0xe28] sm:$0xff] %v2122_v5 }
  0xff   : > { %2125 = vst [vmem:[%s10206_s11 + $0xe30] sm:$0xff] %v2124_v6  ;;  %2127 = vst [vmem:[%s10206_s11 + $0xe38] sm:$0xff] %v2126_v7  ;;  %v2128_v8 = vld [vmem:[%s10201_s10 + $0x1c80] sm:$0xff]  ;;  %v2130_v9 = vld [vmem:[%s10201_s10 + $0x1c90] sm:$0xff] }
 0x100   : > { %v2132_v10 = vld [vmem:[%s10201_s10 + $0x1ca0] sm:$0xff]  ;;  %2129 = vst [vmem:[%s10206_s11 + $0xe40] sm:$0xff] %v2128_v8  ;;  %2131 = vst [vmem:[%s10206_s11 + $0xe48] sm:$0xff] %v2130_v9  ;;  %v2134_v11 = vld [vmem:[%s10201_s10 + $0x1cb0] sm:$0xff] }
 0x101   : > { %2133 = vst [vmem:[%s10206_s11 + $0xe50] sm:$0xff] %v2132_v10  ;;  %v2136_v12 = vld [vmem:[%s10201_s10 + $0x1cc0] sm:$0xff]  ;;  %v2138_v13 = vld [vmem:[%s10201_s10 + $0x1cd0] sm:$0xff]  ;;  %2135 = vst [vmem:[%s10206_s11 + $0xe58] sm:$0xff] %v2134_v11 }
 0x102   : > { %2137 = vst [vmem:[%s10206_s11 + $0xe60] sm:$0xff] %v2136_v12  ;;  %2139 = vst [vmem:[%s10206_s11 + $0xe68] sm:$0xff] %v2138_v13  ;;  %v2140_v14 = vld [vmem:[%s10201_s10 + $0x1ce0] sm:$0xff]  ;;  %v2142_v15 = vld [vmem:[%s10201_s10 + $0x1cf0] sm:$0xff] }
 0x103   : > { %v2144_v16 = vld [vmem:[%s10201_s10 + $0x1d00] sm:$0xff]  ;;  %2141 = vst [vmem:[%s10206_s11 + $0xe70] sm:$0xff] %v2140_v14  ;;  %2143 = vst [vmem:[%s10206_s11 + $0xe78] sm:$0xff] %v2142_v15  ;;  %v2146_v17 = vld [vmem:[%s10201_s10 + $0x1d10] sm:$0xff] }
 0x104   : > { %2145 = vst [vmem:[%s10206_s11 + $0xe80] sm:$0xff] %v2144_v16  ;;  %v2148_v18 = vld [vmem:[%s10201_s10 + $0x1d20] sm:$0xff]  ;;  %v2150_v19 = vld [vmem:[%s10201_s10 + $0x1d30] sm:$0xff]  ;;  %2147 = vst [vmem:[%s10206_s11 + $0xe88] sm:$0xff] %v2146_v17 }
 0x105   : > { %2149 = vst [vmem:[%s10206_s11 + $0xe90] sm:$0xff] %v2148_v18  ;;  %2151 = vst [vmem:[%s10206_s11 + $0xe98] sm:$0xff] %v2150_v19  ;;  %v2152_v20 = vld [vmem:[%s10201_s10 + $0x1d40] sm:$0xff]  ;;  %v2154_v21 = vld [vmem:[%s10201_s10 + $0x1d50] sm:$0xff] }
 0x106   : > { %v2156_v22 = vld [vmem:[%s10201_s10 + $0x1d60] sm:$0xff]  ;;  %2153 = vst [vmem:[%s10206_s11 + $0xea0] sm:$0xff] %v2152_v20  ;;  %2155 = vst [vmem:[%s10206_s11 + $0xea8] sm:$0xff] %v2154_v21  ;;  %v2158_v23 = vld [vmem:[%s10201_s10 + $0x1d70] sm:$0xff] }
 0x107   : > { %2157 = vst [vmem:[%s10206_s11 + $0xeb0] sm:$0xff] %v2156_v22  ;;  %v2160_v24 = vld [vmem:[%s10201_s10 + $0x1d80] sm:$0xff]  ;;  %v2162_v25 = vld [vmem:[%s10201_s10 + $0x1d90] sm:$0xff]  ;;  %2159 = vst [vmem:[%s10206_s11 + $0xeb8] sm:$0xff] %v2158_v23 }
 0x108   : > { %2161 = vst [vmem:[%s10206_s11 + $0xec0] sm:$0xff] %v2160_v24  ;;  %2163 = vst [vmem:[%s10206_s11 + $0xec8] sm:$0xff] %v2162_v25  ;;  %v2164_v26 = vld [vmem:[%s10201_s10 + $0x1da0] sm:$0xff]  ;;  %v2166_v27 = vld [vmem:[%s10201_s10 + $0x1db0] sm:$0xff] }
 0x109   : > { %v2168_v28 = vld [vmem:[%s10201_s10 + $0x1dc0] sm:$0xff]  ;;  %2165 = vst [vmem:[%s10206_s11 + $0xed0] sm:$0xff] %v2164_v26  ;;  %2167 = vst [vmem:[%s10206_s11 + $0xed8] sm:$0xff] %v2166_v27  ;;  %v2170_v29 = vld [vmem:[%s10201_s10 + $0x1dd0] sm:$0xff] }
 0x10a   : > { %2169 = vst [vmem:[%s10206_s11 + $0xee0] sm:$0xff] %v2168_v28  ;;  %v2172_v30 = vld [vmem:[%s10201_s10 + $0x1de0] sm:$0xff]  ;;  %v2174_v31 = vld [vmem:[%s10201_s10 + $0x1df0] sm:$0xff]  ;;  %2171 = vst [vmem:[%s10206_s11 + $0xee8] sm:$0xff] %v2170_v29 }
 0x10b   : > { %2173 = vst [vmem:[%s10206_s11 + $0xef0] sm:$0xff] %v2172_v30  ;;  %2175 = vst [vmem:[%s10206_s11 + $0xef8] sm:$0xff] %v2174_v31  ;;  %v2176_v32 = vld [vmem:[%s10201_s10 + $0x1e00] sm:$0xff]  ;;  %v2178_v33 = vld [vmem:[%s10201_s10 + $0x1e10] sm:$0xff] }
 0x10c   : > { %v2180_v34 = vld [vmem:[%s10201_s10 + $0x1e20] sm:$0xff]  ;;  %2177 = vst [vmem:[%s10206_s11 + $0xf00] sm:$0xff] %v2176_v32  ;;  %2179 = vst [vmem:[%s10206_s11 + $0xf08] sm:$0xff] %v2178_v33  ;;  %v2182_v35 = vld [vmem:[%s10201_s10 + $0x1e30] sm:$0xff] }
 0x10d   : > { %2181 = vst [vmem:[%s10206_s11 + $0xf10] sm:$0xff] %v2180_v34  ;;  %v2184_v36 = vld [vmem:[%s10201_s10 + $0x1e40] sm:$0xff]  ;;  %v2186_v37 = vld [vmem:[%s10201_s10 + $0x1e50] sm:$0xff]  ;;  %2183 = vst [vmem:[%s10206_s11 + $0xf18] sm:$0xff] %v2182_v35 }
 0x10e   : > { %2185 = vst [vmem:[%s10206_s11 + $0xf20] sm:$0xff] %v2184_v36  ;;  %2187 = vst [vmem:[%s10206_s11 + $0xf28] sm:$0xff] %v2186_v37  ;;  %v2188_v38 = vld [vmem:[%s10201_s10 + $0x1e60] sm:$0xff]  ;;  %v2190_v39 = vld [vmem:[%s10201_s10 + $0x1e70] sm:$0xff] }
 0x10f   : > { %v2192_v40 = vld [vmem:[%s10201_s10 + $0x1e80] sm:$0xff]  ;;  %2189 = vst [vmem:[%s10206_s11 + $0xf30] sm:$0xff] %v2188_v38  ;;  %2191 = vst [vmem:[%s10206_s11 + $0xf38] sm:$0xff] %v2190_v39  ;;  %v2194_v41 = vld [vmem:[%s10201_s10 + $0x1e90] sm:$0xff] }
 0x110   : > { %2193 = vst [vmem:[%s10206_s11 + $0xf40] sm:$0xff] %v2192_v40  ;;  %v2196_v42 = vld [vmem:[%s10201_s10 + $0x1ea0] sm:$0xff]  ;;  %v2198_v43 = vld [vmem:[%s10201_s10 + $0x1eb0] sm:$0xff]  ;;  %2195 = vst [vmem:[%s10206_s11 + $0xf48] sm:$0xff] %v2194_v41 }
 0x111   : > { %2197 = vst [vmem:[%s10206_s11 + $0xf50] sm:$0xff] %v2196_v42  ;;  %2199 = vst [vmem:[%s10206_s11 + $0xf58] sm:$0xff] %v2198_v43  ;;  %v2200_v44 = vld [vmem:[%s10201_s10 + $0x1ec0] sm:$0xff]  ;;  %v2202_v45 = vld [vmem:[%s10201_s10 + $0x1ed0] sm:$0xff] }
 0x112   : > { %v2204_v46 = vld [vmem:[%s10201_s10 + $0x1ee0] sm:$0xff]  ;;  %2201 = vst [vmem:[%s10206_s11 + $0xf60] sm:$0xff] %v2200_v44  ;;  %2203 = vst [vmem:[%s10206_s11 + $0xf68] sm:$0xff] %v2202_v45  ;;  %v2206_v47 = vld [vmem:[%s10201_s10 + $0x1ef0] sm:$0xff] }
 0x113   : > { %2205 = vst [vmem:[%s10206_s11 + $0xf70] sm:$0xff] %v2204_v46  ;;  %v2208_v48 = vld [vmem:[%s10201_s10 + $0x1f00] sm:$0xff]  ;;  %v2210_v49 = vld [vmem:[%s10201_s10 + $0x1f10] sm:$0xff]  ;;  %2207 = vst [vmem:[%s10206_s11 + $0xf78] sm:$0xff] %v2206_v47 }
 0x114   : > { %2209 = vst [vmem:[%s10206_s11 + $0xf80] sm:$0xff] %v2208_v48  ;;  %2211 = vst [vmem:[%s10206_s11 + $0xf88] sm:$0xff] %v2210_v49  ;;  %v2212_v50 = vld [vmem:[%s10201_s10 + $0x1f20] sm:$0xff]  ;;  %v2214_v51 = vld [vmem:[%s10201_s10 + $0x1f30] sm:$0xff] }
 0x115   : > { %v2216_v52 = vld [vmem:[%s10201_s10 + $0x1f40] sm:$0xff]  ;;  %2213 = vst [vmem:[%s10206_s11 + $0xf90] sm:$0xff] %v2212_v50  ;;  %2215 = vst [vmem:[%s10206_s11 + $0xf98] sm:$0xff] %v2214_v51  ;;  %v2218_v53 = vld [vmem:[%s10201_s10 + $0x1f50] sm:$0xff] }
 0x116   : > { %2217 = vst [vmem:[%s10206_s11 + $0xfa0] sm:$0xff] %v2216_v52  ;;  %v2220_v54 = vld [vmem:[%s10201_s10 + $0x1f60] sm:$0xff]  ;;  %v2222_v55 = vld [vmem:[%s10201_s10 + $0x1f70] sm:$0xff]  ;;  %2219 = vst [vmem:[%s10206_s11 + $0xfa8] sm:$0xff] %v2218_v53 }
 0x117   : > { %2221 = vst [vmem:[%s10206_s11 + $0xfb0] sm:$0xff] %v2220_v54  ;;  %2223 = vst [vmem:[%s10206_s11 + $0xfb8] sm:$0xff] %v2222_v55  ;;  %v2224_v56 = vld [vmem:[%s10201_s10 + $0x1f80] sm:$0xff]  ;;  %v2226_v57 = vld [vmem:[%s10201_s10 + $0x1f90] sm:$0xff] }
 0x118   : > { %v2228_v58 = vld [vmem:[%s10201_s10 + $0x1fa0] sm:$0xff]  ;;  %2225 = vst [vmem:[%s10206_s11 + $0xfc0] sm:$0xff] %v2224_v56  ;;  %2227 = vst [vmem:[%s10206_s11 + $0xfc8] sm:$0xff] %v2226_v57  ;;  %v2230_v59 = vld [vmem:[%s10201_s10 + $0x1fb0] sm:$0xff] }
 0x119   : > { %2229 = vst [vmem:[%s10206_s11 + $0xfd0] sm:$0xff] %v2228_v58  ;;  %v2232_v60 = vld [vmem:[%s10201_s10 + $0x1fc0] sm:$0xff]  ;;  %v2234_v61 = vld [vmem:[%s10201_s10 + $0x1fd0] sm:$0xff]  ;;  %2231 = vst [vmem:[%s10206_s11 + $0xfd8] sm:$0xff] %v2230_v59 }
 0x11a   : > { %2233 = vst [vmem:[%s10206_s11 + $0xfe0] sm:$0xff] %v2232_v60  ;;  %2235 = vst [vmem:[%s10206_s11 + $0xfe8] sm:$0xff] %v2234_v61  ;;  %v2236_v62 = vld [vmem:[%s10201_s10 + $0x1fe0] sm:$0xff]  ;;  %v2238_v63 = vld [vmem:[%s10201_s10 + $0x1ff0] sm:$0xff] }
 0x11b   : > { %2237 = vst [vmem:[%s10206_s11 + $0xff0] sm:$0xff] %v2236_v62  ;;  %2239 = vst [vmem:[%s10206_s11 + $0xff8] sm:$0xff] %v2238_v63 }
 0x11c PF: > { %p8563_p11 = scmp.ge.s32.totalorder %s10099_s20, 1  ;;  %p4336_p12 = scmp.lt.s32.totalorder %s10099_s20, 5 }
 0x11e   : > { %p4337_p13 = pnand %p8563_p11, %p4336_p12 }
 0x11f   : > { %s4343_s21 = sand.u32 (!%p4337_p13), 1, %s10075_s14   ;;  %p4374_p0 = scmp.lt.s32.totalorder (!%p4337_p13), %s10087_s17, 1 }
 0x120   : > { %4340 = sbr.rel (%p4337_p13) target bundleno = 1071 (0x42f), region = 80  ;;  %s8564_s24 = sshll.u32 (!%p4337_p13), %s4343_s21, 12 }
 0x121   : > { %s11232_s25 = scalar_lea.vmem (!%p4337_p13), [#allocation2], %s8564_s24  ;;  %s11898_s6 = sshll.u32 (!%p4337_p13), %s10083_s16, 1 }
 0x122   : > { %v9257_v0 = vld [vmem:[%s11232_s25 + $0x4] ss:$8 sps:$4 sm:$0xff] (!%p4337_p13)   ;;  %v9261_v2 = vld [vmem:[%s11232_s25] ss:$8 sps:$4 sm:$0xff] (!%p4337_p13)   ;;  %v9263_v4 = vld [vmem:[%s11232_s25 + $0x14] ss:$8 sps:$4 sm:$0xff] (!%p4337_p13)  }
 0x123   : > { %v9259_v1 = vld [vmem:[%s11232_s25 + $0x804] ss:$8 sps:$4 sm:$0xff] (!%p4337_p13)   ;;  %7662 = vmatprep.subr.bf16.mxu1 (!%p4337_p13), %v9257_v0  ;;  %v9262_v3 = vld [vmem:[%s11232_s25 + $0x800] ss:$8 sps:$4 sm:$0xff] (!%p4337_p13)   ;;  %v9265_v5 = vld [vmem:[%s11232_s25 + $0x814] ss:$8 sps:$4 sm:$0xff] (!%p4337_p13)  }
 0x124   : > { %8006 = vmatprep.subr.bf16.mxu0 (!%p4337_p13), %v9259_v1  ;;  %7663 = vmatpush1.bf16.msra.mxu1 (!%p4337_p13), %v9261_v2  ;;  %v9267_v6 = vld [vmem:[%s11232_s25 + $0x10] ss:$8 sps:$4 sm:$0xff] (!%p4337_p13)   ;;  %v9269_v8 = vld [vmem:[%s11232_s25 + $0x24] ss:$8 sps:$4 sm:$0xff] (!%p4337_p13)   ;;  %v9273_v10 = vld [vmem:[%s11232_s25 + $0x20] ss:$8 sps:$4 sm:$0xff] (!%p4337_p13)  }
 0x125   : > { %8007 = vmatpush1.bf16.msra.mxu0 (!%p4337_p13), %v9262_v3  ;;  %7664 = vmatprep.subr.bf16.mxu1 (!%p4337_p13), %v9263_v4  ;;  %v9268_v7 = vld [vmem:[%s11232_s25 + $0x810] ss:$8 sps:$4 sm:$0xff] (!%p4337_p13)   ;;  %v9271_v9 = vld [vmem:[%s11232_s25 + $0x824] ss:$8 sps:$4 sm:$0xff] (!%p4337_p13)   ;;  %v9274_v11 = vld [vmem:[%s11232_s25 + $0x820] ss:$8 sps:$4 sm:$0xff] (!%p4337_p13)  }
 0x126   : > { %8008 = vmatprep.subr.bf16.mxu0 (!%p4337_p13), %v9265_v5  ;;  %v9275_v12 = vld [vmem:[%s11232_s25 + $0x34] ss:$8 sps:$4 sm:$0xff] (!%p4337_p13)   ;;  %v9279_v14 = vld [vmem:[%s11232_s25 + $0x30] ss:$8 sps:$4 sm:$0xff] (!%p4337_p13)   ;;  %v9281_v16 = vld [vmem:[%s11232_s25 + $0x44] ss:$8 sps:$4 sm:$0xff] (!%p4337_p13)  }
 0x127   : > { %v9277_v13 = vld [vmem:[%s11232_s25 + $0x834] ss:$8 sps:$4 sm:$0xff]   ;;  %v9280_v15 = vld [vmem:[%s11232_s25 + $0x830] ss:$8 sps:$4 sm:$0xff]   ;;  %v9283_v17 = vld [vmem:[%s11232_s25 + $0x844] ss:$8 sps:$4 sm:$0xff]  }
 0x128   : > { %7665 = vmatpush1.bf16.msra.mxu1 %v9267_v6  ;;  %v9285_v18 = vld [vmem:[%s11232_s25 + $0x40] ss:$8 sps:$4 sm:$0xff]   ;;  %v9287_v20 = vld [vmem:[%s11232_s25 + $0x54] ss:$8 sps:$4 sm:$0xff]   ;;  %v9291_v22 = vld [vmem:[%s11232_s25 + $0x50] ss:$8 sps:$4 sm:$0xff]  }
 0x129   : > { %8009 = vmatpush1.bf16.msra.mxu0 %v9268_v7  ;;  %7666 = vmatprep.subr.bf16.mxu1 %v9269_v8  ;;  %v9286_v19 = vld [vmem:[%s11232_s25 + $0x840] ss:$8 sps:$4 sm:$0xff]   ;;  %v9289_v21 = vld [vmem:[%s11232_s25 + $0x854] ss:$8 sps:$4 sm:$0xff]   ;;  %v9292_v23 = vld [vmem:[%s11232_s25 + $0x850] ss:$8 sps:$4 sm:$0xff]  }
 0x12a   : > { %8010 = vmatprep.subr.bf16.mxu0 %v9271_v9  ;;  %v9293_v24 = vld [vmem:[%s11232_s25 + $0x64] ss:$8 sps:$4 sm:$0xff]   ;;  %v9297_v26 = vld [vmem:[%s11232_s25 + $0x60] ss:$8 sps:$4 sm:$0xff]   ;;  %v9299_v28 = vld [vmem:[%s11232_s25 + $0x74] ss:$8 sps:$4 sm:$0xff]  }
 0x12b   : > { %v9295_v25 = vld [vmem:[%s11232_s25 + $0x864] ss:$8 sps:$4 sm:$0xff]   ;;  %v9298_v27 = vld [vmem:[%s11232_s25 + $0x860] ss:$8 sps:$4 sm:$0xff]   ;;  %v9301_v29 = vld [vmem:[%s11232_s25 + $0x874] ss:$8 sps:$4 sm:$0xff]  }
 0x12c   : > { %7667 = vmatpush1.bf16.msra.mxu1 %v9273_v10  ;;  %v9303_v30 = vld [vmem:[%s11232_s25 + $0x70] ss:$8 sps:$4 sm:$0xff]   ;;  %v9305_v32 = vld [vmem:[%s11232_s25 + $0x84] ss:$8 sps:$4 sm:$0xff]   ;;  %v9309_v34 = vld [vmem:[%s11232_s25 + $0x80] ss:$8 sps:$4 sm:$0xff]  }
 0x12d   : > { %8011 = vmatpush1.bf16.msra.mxu0 %v9274_v11  ;;  %7668 = vmatprep.subr.bf16.mxu1 %v9275_v12  ;;  %v9304_v31 = vld [vmem:[%s11232_s25 + $0x870] ss:$8 sps:$4 sm:$0xff]   ;;  %v9307_v33 = vld [vmem:[%s11232_s25 + $0x884] ss:$8 sps:$4 sm:$0xff]   ;;  %v9310_v35 = vld [vmem:[%s11232_s25 + $0x880] ss:$8 sps:$4 sm:$0xff]  }
 0x12e   : > { %8012 = vmatprep.subr.bf16.mxu0 %v9277_v13  ;;  %v9311_v36 = vld [vmem:[%s11232_s25 + $0x94] ss:$8 sps:$4 sm:$0xff]   ;;  %s4375_s14 = scalar_select %p4374_p0, %s10087_s17, 1  ;;  %v9315_v38 = vld [vmem:[%s11232_s25 + $0x90] ss:$8 sps:$4 sm:$0xff]  }
 0x12f   : > { %v9313_v37 = vld [vmem:[%s11232_s25 + $0x894] ss:$8 sps:$4 sm:$0xff]   ;;  %v9316_v39 = vld [vmem:[%s11232_s25 + $0x890] ss:$8 sps:$4 sm:$0xff]   ;;  %v9317_v40 = vld [vmem:[%s11232_s25 + $0xa4] ss:$8 sps:$4 sm:$0xff]  }
 0x130   : > { %7669 = vmatpush1.bf16.msra.mxu1 %v9279_v14  ;;  %s9120_s26 = sshll.u32 %s4375_s14, 8  ;;  %v9319_v41 = vld [vmem:[%s11232_s25 + $0x8a4] ss:$8 sps:$4 sm:$0xff]   ;;  %v9321_v42 = vld [vmem:[%s11232_s25 + $0xa0] ss:$8 sps:$4 sm:$0xff]   ;;  %p4381_p1 = scmp.lt.s32.totalorder %s11898_s6, 3 }
 0x131   : > { %8013 = vmatpush1.bf16.msra.mxu0 %v9280_v15  ;;  %7670 = vmatprep.subr.bf16.mxu1 %v9281_v16  ;;  %v9322_v43 = vld [vmem:[%s11232_s25 + $0x8a0] ss:$8 sps:$4 sm:$0xff]   ;;  %s11283_s5 = scalar_lea.vmem %s11946_s0, %s9120_s26  ;;  %v9323_v44 = vld [vmem:[%s11232_s25 + $0xb4] ss:$8 sps:$4 sm:$0xff]   ;;  %v9327_v46 = vld [vmem:[%s11232_s25 + $0xb0] ss:$8 sps:$4 sm:$0xff]  }
 0x132   : > { %8014 = vmatprep.subr.bf16.mxu0 %v9283_v17  ;;  %v9325_v45 = vld [vmem:[%s11232_s25 + $0x8b4] ss:$8 sps:$4 sm:$0xff]   ;;  %v9328_v47 = vld [vmem:[%s11232_s25 + $0x8b0] ss:$8 sps:$4 sm:$0xff]   ;;  %v4386_v48 = vld [vmem:[%s11283_s5] sm:$0xff]  ;;  %s4382_s7 = scalar_select %p4381_p1, %s11898_s6, 3 }
 0x133   : > { %v4402_v49 = vld [vmem:[%s11283_s5 + $0x80] sm:$0xff]  ;;  %v9335_v58 = vld [vmem:[%s11232_s25 + $0xd4] ss:$8 sps:$4 sm:$0xff]   ;;  %v9339_v60 = vld [vmem:[%s11232_s25 + $0xd0] ss:$8 sps:$4 sm:$0xff]   ;;  %s4371_s16 = sand.u32 1, %s10067_s12  }
 0x134   : > { %7671 = vmatpush1.bf16.msra.mxu1 %v9285_v18  ;;  %v9329_v50 = vld [vmem:[%s11232_s25 + $0xc4] ss:$8 sps:$4 sm:$0xff]   ;;  %v8570_v52 = vcombine.high %v4386_v48, %v4402_v49  ;;  %v9333_v56 = vld [vmem:[%s11232_s25 + $0xc0] ss:$8 sps:$4 sm:$0xff]   ;;  %v9337_v59 = vld [vmem:[%s11232_s25 + $0x8d4] ss:$8 sps:$4 sm:$0xff]   ;;  %v8569_v8 = vcombine.low %v4386_v48, %v4402_v49  ;;  %s4383_s10 = scalar_lea.vmem %s11948_s2, %s4382_s7 }
 0x135   : > { %8015 = vmatpush1.bf16.msra.mxu0 %v9286_v19  ;;  %7672 = vmatprep.subr.bf16.mxu1 %v9287_v20  ;;  %v9331_v51 = vld [vmem:[%s11232_s25 + $0x8c4] ss:$8 sps:$4 sm:$0xff]   ;;  %v9334_v57 = vld [vmem:[%s11232_s25 + $0x8c0] ss:$8 sps:$4 sm:$0xff]   ;;  %v9340_v61 = vld [vmem:[%s11232_s25 + $0x8d0] ss:$8 sps:$4 sm:$0xff]  }
 0x136   : > { %8016 = vmatprep.subr.bf16.mxu0 %v9289_v21  ;;  %v4394_v53 = vld [vmem:[%s11283_s5 + $0x40] sm:$0xff]  ;;  %7694 = vmatprep.mubr.bf16.mxu1 %v8570_v52  ;;  %v9347_v2 = vld [vmem:[%s11232_s25 + $0xf4] ss:$8 sps:$4 sm:$0xff]   ;;  %v9351_v4 = vld [vmem:[%s11232_s25 + $0xf0] ss:$8 sps:$4 sm:$0xff]   ;;  %s8565_s11 = sshll.u32 %s4371_s16, 5 }
 0x137   : > { %v4410_v54 = vld [vmem:[%s11283_s5 + $0xc0] sm:$0xff]  ;;  %v9349_v3 = vld [vmem:[%s11232_s25 + $0x8f4] ss:$8 sps:$4 sm:$0xff]   ;;  %v9352_v5 = vld [vmem:[%s11232_s25 + $0x8f0] ss:$8 sps:$4 sm:$0xff]   ;;  %s4373_s21 = scalar_lea.vmem [#allocation3], %s8565_s11 }
 0x138   : > { %7673 = vmatpush1.bf16.msra.mxu1 %v9291_v22  ;;  %v8586_v55 = vcombine.high %v4394_v53, %v4410_v54  ;;  %v9341_v62 = vld [vmem:[%s11232_s25 + $0xe4] ss:$8 sps:$4 sm:$0xff]   ;;  %v9345_v0 = vld [vmem:[%s11232_s25 + $0xe0] ss:$8 sps:$4 sm:$0xff]   ;;  %v8585_v10 = vcombine.low %v4394_v53, %v4410_v54  ;;  %v9361_v12 = vld [vmem:[%s11232_s25 + $0x114] ss:$8 sps:$4 sm:$0xff]  }
 0x139   : > { %8017 = vmatpush1.bf16.msra.mxu0 %v9292_v23  ;;  %7674 = vmatprep.subr.bf16.mxu1 %v9293_v24  ;;  %v9343_v63 = vld [vmem:[%s11232_s25 + $0x8e4] ss:$8 sps:$4 sm:$0xff]   ;;  %v9346_v1 = vld [vmem:[%s11232_s25 + $0x8e0] ss:$8 sps:$4 sm:$0xff]   ;;  %v9364_v13 = vld [vmem:[%s11232_s25 + $0x914] ss:$8 sps:$4 sm:$0xff]  }
 0x13a   : > { %8018 = vmatprep.subr.bf16.mxu0 %v9295_v25  ;;  %8038 = vmatprep.mubr.bf16.mxu0 %v8586_v55  ;;  %v9355_v6 = vld [vmem:[%s11232_s25 + $0x104] ss:$8 sps:$4 sm:$0xff]   ;;  %v9353_v9 = vld [vmem:[%s11232_s25 + $0x100] ss:$8 sps:$4 sm:$0xff]   ;;  %v9359_v14 = vld [vmem:[%s11232_s25 + $0x110] ss:$8 sps:$4 sm:$0xff]  }
 0x13b   : > { %v9358_v7 = vld [vmem:[%s11232_s25 + $0x904] ss:$8 sps:$4 sm:$0xff]   ;;  %v9356_v11 = vld [vmem:[%s11232_s25 + $0x900] ss:$8 sps:$4 sm:$0xff]   ;;  %v9362_v15 = vld [vmem:[%s11232_s25 + $0x910] ss:$8 sps:$4 sm:$0xff]  }
 0x13c   : > { %7675 = vmatpush1.bf16.msra.mxu1 %v9297_v26  ;;  %v9367_v16 = vld [vmem:[%s11232_s25 + $0x124] ss:$8 sps:$4 sm:$0xff]   ;;  %v9365_v18 = vld [vmem:[%s11232_s25 + $0x120] ss:$8 sps:$4 sm:$0xff]   ;;  %v9373_v20 = vld [vmem:[%s11232_s25 + $0x134] ss:$8 sps:$4 sm:$0xff]  }
 0x13d   : > { %8019 = vmatpush1.bf16.msra.mxu0 %v9298_v27  ;;  %7676 = vmatprep.subr.bf16.mxu1 %v9299_v28  ;;  %v9370_v17 = vld [vmem:[%s11232_s25 + $0x924] ss:$8 sps:$4 sm:$0xff]   ;;  %v9368_v19 = vld [vmem:[%s11232_s25 + $0x920] ss:$8 sps:$4 sm:$0xff]   ;;  %v9376_v21 = vld [vmem:[%s11232_s25 + $0x934] ss:$8 sps:$4 sm:$0xff]  }
 0x13e   : > { %8020 = vmatprep.subr.bf16.mxu0 %v9301_v29  ;;  %v9371_v22 = vld [vmem:[%s11232_s25 + $0x130] ss:$8 sps:$4 sm:$0xff]   ;;  %v9379_v24 = vld [vmem:[%s11232_s25 + $0x144] ss:$8 sps:$4 sm:$0xff]   ;;  %v9377_v26 = vld [vmem:[%s11232_s25 + $0x140] ss:$8 sps:$4 sm:$0xff]  }
 0x13f   : > { %v9374_v23 = vld [vmem:[%s11232_s25 + $0x930] ss:$8 sps:$4 sm:$0xff]   ;;  %v9382_v25 = vld [vmem:[%s11232_s25 + $0x944] ss:$8 sps:$4 sm:$0xff]   ;;  %v9380_v27 = vld [vmem:[%s11232_s25 + $0x940] ss:$8 sps:$4 sm:$0xff]  }
 0x140   : > { %7677 = vmatpush1.bf16.msra.mxu1 %v9303_v30  ;;  %v9385_v28 = vld [vmem:[%s11232_s25 + $0x154] ss:$8 sps:$4 sm:$0xff]   ;;  %v9383_v30 = vld [vmem:[%s11232_s25 + $0x150] ss:$8 sps:$4 sm:$0xff]   ;;  %v9401_v48 = vld [vmem:[%s11232_s25 + $0x180] ss:$8 sps:$4 sm:$0xff]  }
 0x141   : > { %8021 = vmatpush1.bf16.msra.mxu0 %v9304_v31  ;;  %7678 = vmatprep.subr.bf16.mxu1 %v9305_v32  ;;  %v9388_v29 = vld [vmem:[%s11232_s25 + $0x954] ss:$8 sps:$4 sm:$0xff]   ;;  %v9386_v31 = vld [vmem:[%s11232_s25 + $0x950] ss:$8 sps:$4 sm:$0xff]   ;;  %v9391_v32 = vld [vmem:[%s11232_s25 + $0x164] ss:$8 sps:$4 sm:$0xff]  }
 0x142   : > { %8022 = vmatprep.subr.bf16.mxu0 %v9307_v33  ;;  %v9394_v33 = vld [vmem:[%s11232_s25 + $0x964] ss:$8 sps:$4 sm:$0xff]   ;;  %v9404_v49 = vld [vmem:[%s11232_s25 + $0x980] ss:$8 sps:$4 sm:$0xff]   ;;  %v9407_v52 = vld [vmem:[%s11232_s25 + $0x190] ss:$8 sps:$4 sm:$0xff]  }
 0x143   : > { %v9410_v53 = vld [vmem:[%s11232_s25 + $0x990] ss:$8 sps:$4 sm:$0xff]   ;;  %v9415_v54 = vld [vmem:[%s11232_s25 + $0x1a4] ss:$8 sps:$4 sm:$0xff]   ;;  %s9115_s12 = sshll.u32 (%p10188_p9), %s10087_s17, 3 }
 0x144   : > { %7679 = vmatpush1.bf16.msra.mxu1 %v9309_v34  ;;  %v9389_v34 = vld [vmem:[%s11232_s25 + $0x160] ss:$8 sps:$4 sm:$0xff]   ;;  %v9418_v55 = vld [vmem:[%s11232_s25 + $0x9a4] ss:$8 sps:$4 sm:$0xff]   ;;  %s8429_s24 = sadd.s32 (%p10188_p9), %s9115_s12, %s11898_s6 }
 0x145   : > { %8023 = vmatpush1.bf16.msra.mxu0 %v9310_v35  ;;  %7680 = vmatprep.subr.bf16.mxu1 %v9311_v36  ;;  %v9392_v35 = vld [vmem:[%s11232_s25 + $0x960] ss:$8 sps:$4 sm:$0xff]  }
 0x146   : > { %8024 = vmatprep.subr.bf16.mxu0 %v9313_v37  ;;  %v11338_v36 = vld [vmem:[%s11283_s5 + $0x8] sm:$0xff] }
 0x147   : > { %v11341_v37 = vld [vmem:[%s11283_s5 + $0x88] sm:$0xff] }
 0x148   : > { %7681 = vmatpush1.bf16.msra.mxu1 %v9315_v38  ;;  %v9397_v38 = vld [vmem:[%s11232_s25 + $0x174] ss:$8 sps:$4 sm:$0xff]  }
 0x149   : > { %8025 = vmatpush1.bf16.msra.mxu0 %v9316_v39  ;;  %7682 = vmatprep.subr.bf16.mxu1 %v9317_v40  ;;  %v9400_v39 = vld [vmem:[%s11232_s25 + $0x974] ss:$8 sps:$4 sm:$0xff]   ;;  %v8572_v40 = vcombine.high %v11338_v36, %v11341_v37 }
 0x14a   : > { %8026 = vmatprep.subr.bf16.mxu0 %v9319_v41  ;;  %v11348_v41 = vld [vmem:[%s11283_s5 + $0x48] sm:$0xff] }
 0x14c   : > { %7683 = vmatpush1.bf16.msra.mxu1 %v9321_v42  ;;  %v11351_v42 = vld [vmem:[%s11283_s5 + $0xc8] sm:$0xff] }
 0x14d   : > { %8027 = vmatpush1.bf16.msra.mxu0 %v9322_v43  ;;  %7684 = vmatprep.subr.bf16.mxu1 %v9323_v44  ;;  %v8588_v43 = vcombine.high %v11348_v41, %v11351_v42  ;;  %v9395_v44 = vld [vmem:[%s11232_s25 + $0x170] ss:$8 sps:$4 sm:$0xff]  }
 0x14e   : > { %8028 = vmatprep.subr.bf16.mxu0 %v9325_v45  ;;  %v9398_v45 = vld [vmem:[%s11232_s25 + $0x970] ss:$8 sps:$4 sm:$0xff]  }
 0x150   : > { %7685 = vmatpush1.bf16.msra.mxu1 %v9327_v46  ;;  %v9403_v46 = vld [vmem:[%s11232_s25 + $0x184] ss:$8 sps:$4 sm:$0xff]  }
 0x151   : > { %8029 = vmatpush1.bf16.msra.mxu0 %v9328_v47  ;;  %7686 = vmatprep.subr.bf16.mxu1 %v9329_v50  ;;  %v9406_v47 = vld [vmem:[%s11232_s25 + $0x984] ss:$8 sps:$4 sm:$0xff]   ;;  %v9409_v50 = vld [vmem:[%s11232_s25 + $0x194] ss:$8 sps:$4 sm:$0xff]  }
 0x152   : > { %8030 = vmatprep.subr.bf16.mxu0 %v9331_v51  ;;  %v9412_v51 = vld [vmem:[%s11232_s25 + $0x994] ss:$8 sps:$4 sm:$0xff]  }
 0x154   : > { %7687 = vmatpush1.bf16.msra.mxu1 %v9333_v56  ;;  %v9413_v56 = vld [vmem:[%s11232_s25 + $0x1a0] ss:$8 sps:$4 sm:$0xff]  }
 0x155   : > { %8031 = vmatpush1.bf16.msra.mxu0 %v9334_v57  ;;  %7688 = vmatprep.subr.bf16.mxu1 %v9335_v58  ;;  %v9416_v57 = vld [vmem:[%s11232_s25 + $0x9a0] ss:$8 sps:$4 sm:$0xff]   ;;  %v9421_v58 = vld [vmem:[%s11232_s25 + $0x1b4] ss:$8 sps:$4 sm:$0xff]  }
 0x156   : > { %8032 = vmatprep.subr.bf16.mxu0 %v9337_v59  ;;  %v9424_v59 = vld [vmem:[%s11232_s25 + $0x9b4] ss:$8 sps:$4 sm:$0xff]  }
 0x158   : > { %7689 = vmatpush1.bf16.msra.mxu1 %v9339_v60  ;;  %v9419_v60 = vld [vmem:[%s11232_s25 + $0x1b0] ss:$8 sps:$4 sm:$0xff]  }
 0x159   : > { %8033 = vmatpush1.bf16.msra.mxu0 %v9340_v61  ;;  %7690 = vmatprep.subr.bf16.mxu1 %v9341_v62  ;;  %v9422_v61 = vld [vmem:[%s11232_s25 + $0x9b0] ss:$8 sps:$4 sm:$0xff]   ;;  %v9427_v62 = vld [vmem:[%s11232_s25 + $0x1c4] ss:$8 sps:$4 sm:$0xff]  }
 0x15a   : > { %8034 = vmatprep.subr.bf16.mxu0 %v9343_v63  ;;  %v9430_v63 = vld [vmem:[%s11232_s25 + $0x9c4] ss:$8 sps:$4 sm:$0xff]  }
 0x15c   : > { %7691 = vmatpush1.bf16.msra.mxu1 %v9345_v0  ;;  %v9425_v0 = vld [vmem:[%s11232_s25 + $0x1c0] ss:$8 sps:$4 sm:$0xff]  }
 0x15d   : > { %8035 = vmatpush1.bf16.msra.mxu0 %v9346_v1  ;;  %7692 = vmatprep.subr.bf16.mxu1 %v9347_v2  ;;  %v9428_v1 = vld [vmem:[%s11232_s25 + $0x9c0] ss:$8 sps:$4 sm:$0xff]   ;;  %v9433_v2 = vld [vmem:[%s11232_s25 + $0x1d4] ss:$8 sps:$4 sm:$0xff]  }
 0x15e   : > { %8036 = vmatprep.subr.bf16.mxu0 %v9349_v3  ;;  %v9436_v3 = vld [vmem:[%s11232_s25 + $0x9d4] ss:$8 sps:$4 sm:$0xff]  }
 0x160   : > { %7693 = vmatpush1.bf16.msra.mxu1 %v9351_v4  ;;  %v9431_v4 = vld [vmem:[%s11232_s25 + $0x1d0] ss:$8 sps:$4 sm:$0xff]  }
 0x161   : > { %8037 = vmatpush1.bf16.msra.mxu0 %v9352_v5  ;;  %7705 = vmatprep.subr.bf16.mxu1 %v9355_v6  ;;  %v9434_v5 = vld [vmem:[%s11232_s25 + $0x9d0] ss:$8 sps:$4 sm:$0xff]   ;;  %v9439_v6 = vld [vmem:[%s11232_s25 + $0x1e4] ss:$8 sps:$4 sm:$0xff]  }
 0x162   : > { %8049 = vmatprep.subr.bf16.mxu0 %v9358_v7  ;;  %v9442_v7 = vld [vmem:[%s11232_s25 + $0x9e4] ss:$8 sps:$4 sm:$0xff]  }
 0x163   : > { %7695 = vmatmul.mubr.bf16.vlgmr.msra.gmra.mrb[0].mxu1 %v8569_v8  ;;  %v9437_v8 = vld [vmem:[%s11232_s25 + $0x1e0] ss:$8 sps:$4 sm:$0xff]  }
 0x164   : > { %8039 = vmatmul.mubr.bf16.vlgmr.msra.gmra.mrb[0].mxu0 %v8585_v10  ;;  %7706 = vmatpush1.bf16.msra.mxu1 %v9353_v9  ;;  %v9440_v9 = vld [vmem:[%s11232_s25 + $0x9e0] ss:$8 sps:$4 sm:$0xff]   ;;  %v9445_v10 = vld [vmem:[%s11232_s25 + $0x1f4] ss:$8 sps:$4 sm:$0xff]  }
 0x165   : > { %8050 = vmatpush1.bf16.msra.mxu0 %v9356_v11  ;;  %7707 = vmatprep.subr.bf16.mxu1 %v9361_v12  ;;  %v9448_v11 = vld [vmem:[%s11232_s25 + $0x9f4] ss:$8 sps:$4 sm:$0xff]   ;;  %v9443_v12 = vld [vmem:[%s11232_s25 + $0x1f0] ss:$8 sps:$4 sm:$0xff]  }
 0x166   : > { %8051 = vmatprep.subr.bf16.mxu0 %v9364_v13  ;;  %7737 = vmatprep.mubr.bf16.mxu1 %v8572_v40  ;;  %v9446_v13 = vld [vmem:[%s11232_s25 + $0x9f0] ss:$8 sps:$4 sm:$0xff]   ;;  %v9473_v40 = vld [vmem:[%s11232_s25 + $0x240] ss:$8 sps:$4 sm:$0xff]  }
 0x167   : > { %8081 = vmatprep.mubr.bf16.mxu0 %v8588_v43  ;;  %v9484_v43 = vld [vmem:[%s11232_s25 + $0xa54] ss:$8 sps:$4 sm:$0xff]  }
 0x168   : > { %7708 = vmatpush1.bf16.msra.mxu1 %v9359_v14  ;;  %v9451_v14 = vld [vmem:[%s11232_s25 + $0x204] ss:$8 sps:$4 sm:$0xff]  }
 0x169   : > { %8052 = vmatpush1.bf16.msra.mxu0 %v9362_v15  ;;  %7709 = vmatprep.subr.bf16.mxu1 %v9367_v16  ;;  %v9454_v15 = vld [vmem:[%s11232_s25 + $0xa04] ss:$8 sps:$4 sm:$0xff]   ;;  %v8571_v16 = vcombine.low %v11338_v36, %v11341_v37  ;;  %v9467_v36 = vld [vmem:[%s11232_s25 + $0x230] ss:$8 sps:$4 sm:$0xff]  }
 0x16a   : > { %8053 = vmatprep.subr.bf16.mxu0 %v9370_v17  ;;  %v9449_v17 = vld [vmem:[%s11232_s25 + $0x200] ss:$8 sps:$4 sm:$0xff]   ;;  %v9470_v37 = vld [vmem:[%s11232_s25 + $0xa30] ss:$8 sps:$4 sm:$0xff]  }
 0x16c   : > { %7710 = vmatpush1.bf16.msra.mxu1 %v9365_v18  ;;  %v8587_v18 = vcombine.low %v11348_v41, %v11351_v42  ;;  %v9476_v41 = vld [vmem:[%s11232_s25 + $0xa40] ss:$8 sps:$4 sm:$0xff]   ;;  %v9481_v42 = vld [vmem:[%s11232_s25 + $0x254] ss:$8 sps:$4 sm:$0xff]  }
 0x16d   : > { %8054 = vmatpush1.bf16.msra.mxu0 %v9368_v19  ;;  %7711 = vmatprep.subr.bf16.mxu1 %v9373_v20  ;;  %v9452_v19 = vld [vmem:[%s11232_s25 + $0xa00] ss:$8 sps:$4 sm:$0xff]   ;;  %v9457_v20 = vld [vmem:[%s11232_s25 + $0x214] ss:$8 sps:$4 sm:$0xff]  }
 0x16e   : > { %8055 = vmatprep.subr.bf16.mxu0 %v9376_v21  ;;  %v9460_v21 = vld [vmem:[%s11232_s25 + $0xa14] ss:$8 sps:$4 sm:$0xff]  }
 0x170   : > { %7712 = vmatpush1.bf16.msra.mxu1 %v9371_v22  ;;  %v9455_v22 = vld [vmem:[%s11232_s25 + $0x210] ss:$8 sps:$4 sm:$0xff]  }
 0x171   : > { %8056 = vmatpush1.bf16.msra.mxu0 %v9374_v23  ;;  %7713 = vmatprep.subr.bf16.mxu1 %v9379_v24  ;;  %v9458_v23 = vld [vmem:[%s11232_s25 + $0xa10] ss:$8 sps:$4 sm:$0xff]  }
 0x172   : > { %8057 = vmatprep.subr.bf16.mxu0 %v9382_v25  ;;  %v11402_v24 = vld [vmem:[%s11283_s5 + $0x10] sm:$0xff] }
 0x173   : > { %v11405_v25 = vld [vmem:[%s11283_s5 + $0x90] sm:$0xff] }
 0x174   : > { %7714 = vmatpush1.bf16.msra.mxu1 %v9377_v26  ;;  %v9463_v26 = vld [vmem:[%s11232_s25 + $0x224] ss:$8 sps:$4 sm:$0xff]  }
 0x175   : > { %8058 = vmatpush1.bf16.msra.mxu0 %v9380_v27  ;;  %7715 = vmatprep.subr.bf16.mxu1 %v9385_v28  ;;  %v9466_v27 = vld [vmem:[%s11232_s25 + $0xa24] ss:$8 sps:$4 sm:$0xff]   ;;  %v8574_v28 = vcombine.high %v11402_v24, %v11405_v25 }
 0x176   : > { %8059 = vmatprep.subr.bf16.mxu0 %v9388_v29  ;;  %v11412_v29 = vld [vmem:[%s11283_s5 + $0x50] sm:$0xff] }
 0x178   : > { %7716 = vmatpush1.bf16.msra.mxu1 %v9383_v30  ;;  %v11415_v30 = vld [vmem:[%s11283_s5 + $0xd0] sm:$0xff] }
 0x179   : > { %8060 = vmatpush1.bf16.msra.mxu0 %v9386_v31  ;;  %7717 = vmatprep.subr.bf16.mxu1 %v9391_v32  ;;  %v8590_v31 = vcombine.high %v11412_v29, %v11415_v30  ;;  %v9461_v32 = vld [vmem:[%s11232_s25 + $0x220] ss:$8 sps:$4 sm:$0xff]  }
 0x17a   : > { %8061 = vmatprep.subr.bf16.mxu0 %v9394_v33  ;;  %v9464_v33 = vld [vmem:[%s11232_s25 + $0xa20] ss:$8 sps:$4 sm:$0xff]  }
 0x17c   : > { %7718 = vmatpush1.bf16.msra.mxu1 %v9389_v34  ;;  %v9469_v34 = vld [vmem:[%s11232_s25 + $0x234] ss:$8 sps:$4 sm:$0xff]  }
 0x17d   : > { %8062 = vmatpush1.bf16.msra.mxu0 %v9392_v35  ;;  %7719 = vmatprep.subr.bf16.mxu1 %v9397_v38  ;;  %v9472_v35 = vld [vmem:[%s11232_s25 + $0xa34] ss:$8 sps:$4 sm:$0xff]   ;;  %v9475_v38 = vld [vmem:[%s11232_s25 + $0x244] ss:$8 sps:$4 sm:$0xff]  }
 0x17e   : > { %8063 = vmatprep.subr.bf16.mxu0 %v9400_v39  ;;  %v9478_v39 = vld [vmem:[%s11232_s25 + $0xa44] ss:$8 sps:$4 sm:$0xff]  }
 0x180   : > { %7720 = vmatpush1.bf16.msra.mxu1 %v9395_v44  ;;  %v9479_v44 = vld [vmem:[%s11232_s25 + $0x250] ss:$8 sps:$4 sm:$0xff]  }
 0x181   : > { %8064 = vmatpush1.bf16.msra.mxu0 %v9398_v45  ;;  %7721 = vmatprep.subr.bf16.mxu1 %v9403_v46  ;;  %v9482_v45 = vld [vmem:[%s11232_s25 + $0xa50] ss:$8 sps:$4 sm:$0xff]   ;;  %v9487_v46 = vld [vmem:[%s11232_s25 + $0x264] ss:$8 sps:$4 sm:$0xff]  }
 0x182   : > { %8065 = vmatprep.subr.bf16.mxu0 %v9406_v47  ;;  %v9490_v47 = vld [vmem:[%s11232_s25 + $0xa64] ss:$8 sps:$4 sm:$0xff]  }
 0x184   : > { %7722 = vmatpush1.bf16.msra.mxu1 %v9401_v48  ;;  %v9485_v48 = vld [vmem:[%s11232_s25 + $0x260] ss:$8 sps:$4 sm:$0xff]  }
 0x185   : > { %8066 = vmatpush1.bf16.msra.mxu0 %v9404_v49  ;;  %7723 = vmatprep.subr.bf16.mxu1 %v9409_v50  ;;  %v9488_v49 = vld [vmem:[%s11232_s25 + $0xa60] ss:$8 sps:$4 sm:$0xff]   ;;  %v9493_v50 = vld [vmem:[%s11232_s25 + $0x274] ss:$8 sps:$4 sm:$0xff]  }
 0x186   : > { %8067 = vmatprep.subr.bf16.mxu0 %v9412_v51  ;;  %v9496_v51 = vld [vmem:[%s11232_s25 + $0xa74] ss:$8 sps:$4 sm:$0xff]  }
 0x188   : > { %7724 = vmatpush1.bf16.msra.mxu1 %v9407_v52  ;;  %v9491_v52 = vld [vmem:[%s11232_s25 + $0x270] ss:$8 sps:$4 sm:$0xff]  }
 0x189   : > { %8068 = vmatpush1.bf16.msra.mxu0 %v9410_v53  ;;  %7725 = vmatprep.subr.bf16.mxu1 %v9415_v54  ;;  %v9494_v53 = vld [vmem:[%s11232_s25 + $0xa70] ss:$8 sps:$4 sm:$0xff]   ;;  %v9499_v54 = vld [vmem:[%s11232_s25 + $0x284] ss:$8 sps:$4 sm:$0xff]  }
 0x18a   : > { %8069 = vmatprep.subr.bf16.mxu0 %v9418_v55  ;;  %v9502_v55 = vld [vmem:[%s11232_s25 + $0xa84] ss:$8 sps:$4 sm:$0xff]  }
 0x18c   : > { %7726 = vmatpush1.bf16.msra.mxu1 %v9413_v56  ;;  %v9497_v56 = vld [vmem:[%s11232_s25 + $0x280] ss:$8 sps:$4 sm:$0xff]  }
 0x18d   : > { %8070 = vmatpush1.bf16.msra.mxu0 %v9416_v57  ;;  %7727 = vmatprep.subr.bf16.mxu1 %v9421_v58  ;;  %v9500_v57 = vld [vmem:[%s11232_s25 + $0xa80] ss:$8 sps:$4 sm:$0xff]   ;;  %v9505_v58 = vld [vmem:[%s11232_s25 + $0x294] ss:$8 sps:$4 sm:$0xff]  }
 0x18e   : > { %8071 = vmatprep.subr.bf16.mxu0 %v9424_v59  ;;  %v9508_v59 = vld [vmem:[%s11232_s25 + $0xa94] ss:$8 sps:$4 sm:$0xff]  }
 0x190   : > { %7728 = vmatpush1.bf16.msra.mxu1 %v9419_v60  ;;  %v9503_v60 = vld [vmem:[%s11232_s25 + $0x290] ss:$8 sps:$4 sm:$0xff]  }
 0x191   : > { %8072 = vmatpush1.bf16.msra.mxu0 %v9422_v61  ;;  %7729 = vmatprep.subr.bf16.mxu1 %v9427_v62  ;;  %v9506_v61 = vld [vmem:[%s11232_s25 + $0xa90] ss:$8 sps:$4 sm:$0xff]   ;;  %v9511_v62 = vld [vmem:[%s11232_s25 + $0x2a4] ss:$8 sps:$4 sm:$0xff]  }
 0x192   : > { %8073 = vmatprep.subr.bf16.mxu0 %v9430_v63  ;;  %v9514_v63 = vld [vmem:[%s11232_s25 + $0xaa4] ss:$8 sps:$4 sm:$0xff]  }
 0x194   : > { %7730 = vmatpush1.bf16.msra.mxu1 %v9425_v0  ;;  %v9509_v0 = vld [vmem:[%s11232_s25 + $0x2a0] ss:$8 sps:$4 sm:$0xff]  }
 0x195   : > { %8074 = vmatpush1.bf16.msra.mxu0 %v9428_v1  ;;  %7731 = vmatprep.subr.bf16.mxu1 %v9433_v2  ;;  %v9512_v1 = vld [vmem:[%s11232_s25 + $0xaa0] ss:$8 sps:$4 sm:$0xff]   ;;  %v9517_v2 = vld [vmem:[%s11232_s25 + $0x2b4] ss:$8 sps:$4 sm:$0xff]  }
 0x196   : > { %8075 = vmatprep.subr.bf16.mxu0 %v9436_v3  ;;  %v9520_v3 = vld [vmem:[%s11232_s25 + $0xab4] ss:$8 sps:$4 sm:$0xff]  }
 0x198   : > { %7732 = vmatpush1.bf16.msra.mxu1 %v9431_v4  ;;  %v9515_v4 = vld [vmem:[%s11232_s25 + $0x2b0] ss:$8 sps:$4 sm:$0xff]  }
 0x199   : > { %8076 = vmatpush1.bf16.msra.mxu0 %v9434_v5  ;;  %7733 = vmatprep.subr.bf16.mxu1 %v9439_v6  ;;  %v9518_v5 = vld [vmem:[%s11232_s25 + $0xab0] ss:$8 sps:$4 sm:$0xff]   ;;  %v9523_v6 = vld [vmem:[%s11232_s25 + $0x2c4] ss:$8 sps:$4 sm:$0xff]  }
 0x19a   : > { %8077 = vmatprep.subr.bf16.mxu0 %v9442_v7  ;;  %v9526_v7 = vld [vmem:[%s11232_s25 + $0xac4] ss:$8 sps:$4 sm:$0xff]  }
 0x19c   : > { %7734 = vmatpush1.bf16.msra.mxu1 %v9437_v8  ;;  %v9521_v8 = vld [vmem:[%s11232_s25 + $0x2c0] ss:$8 sps:$4 sm:$0xff]  }
 0x19d   : > { %8078 = vmatpush1.bf16.msra.mxu0 %v9440_v9  ;;  %7735 = vmatprep.subr.bf16.mxu1 %v9445_v10  ;;  %v9524_v9 = vld [vmem:[%s11232_s25 + $0xac0] ss:$8 sps:$4 sm:$0xff]   ;;  %v9529_v10 = vld [vmem:[%s11232_s25 + $0x2d4] ss:$8 sps:$4 sm:$0xff]  }
 0x19e   : > { %8079 = vmatprep.subr.bf16.mxu0 %v9448_v11  ;;  %v9532_v11 = vld [vmem:[%s11232_s25 + $0xad4] ss:$8 sps:$4 sm:$0xff]  }
 0x1a0   : > { %7736 = vmatpush1.bf16.msra.mxu1 %v9443_v12  ;;  %v9527_v12 = vld [vmem:[%s11232_s25 + $0x2d0] ss:$8 sps:$4 sm:$0xff]  }
 0x1a1   : > { %8080 = vmatpush1.bf16.msra.mxu0 %v9446_v13  ;;  %7748 = vmatprep.subr.bf16.mxu1 %v9451_v14  ;;  %v9530_v13 = vld [vmem:[%s11232_s25 + $0xad0] ss:$8 sps:$4 sm:$0xff]   ;;  %v9535_v14 = vld [vmem:[%s11232_s25 + $0x2e4] ss:$8 sps:$4 sm:$0xff]  }
 0x1a2   : > { %8092 = vmatprep.subr.bf16.mxu0 %v9454_v15  ;;  %v9538_v15 = vld [vmem:[%s11232_s25 + $0xae4] ss:$8 sps:$4 sm:$0xff]  }
 0x1a3   : > { %7738 = vmatmul.mubr.bf16.vlgmr.msra.gmra.mrb[0].mxu1 %v8571_v16  ;;  %v9533_v16 = vld [vmem:[%s11232_s25 + $0x2e0] ss:$8 sps:$4 sm:$0xff]  }
 0x1a4   : > { %8082 = vmatmul.mubr.bf16.vlgmr.msra.gmra.mrb[0].mxu0 %v8587_v18  ;;  %7749 = vmatpush1.bf16.msra.mxu1 %v9449_v17  ;;  %v9536_v17 = vld [vmem:[%s11232_s25 + $0xae0] ss:$8 sps:$4 sm:$0xff]   ;;  %v9541_v18 = vld [vmem:[%s11232_s25 + $0x2f4] ss:$8 sps:$4 sm:$0xff]  }
 0x1a5   : > { %8093 = vmatpush1.bf16.msra.mxu0 %v9452_v19  ;;  %7750 = vmatprep.subr.bf16.mxu1 %v9457_v20  ;;  %v9544_v19 = vld [vmem:[%s11232_s25 + $0xaf4] ss:$8 sps:$4 sm:$0xff]   ;;  %v9539_v20 = vld [vmem:[%s11232_s25 + $0x2f0] ss:$8 sps:$4 sm:$0xff]  }
 0x1a6   : > { %8094 = vmatprep.subr.bf16.mxu0 %v9460_v21  ;;  %7780 = vmatprep.mubr.bf16.mxu1 %v8574_v28  ;;  %v9542_v21 = vld [vmem:[%s11232_s25 + $0xaf0] ss:$8 sps:$4 sm:$0xff]  }
 0x1a7   : > { %8124 = vmatprep.mubr.bf16.mxu0 %v8590_v31  ;;  %v11478_v28 = vld [vmem:[%s11283_s5 + $0x18] sm:$0xff] }
 0x1a8   : > { %7751 = vmatpush1.bf16.msra.mxu1 %v9455_v22  ;;  %v9547_v22 = vld [vmem:[%s11232_s25 + $0x304] ss:$8 sps:$4 sm:$0xff]   ;;  %v11481_v31 = vld [vmem:[%s11283_s5 + $0x98] sm:$0xff] }
 0x1a9   : > { %8095 = vmatpush1.bf16.msra.mxu0 %v9458_v23  ;;  %7752 = vmatprep.subr.bf16.mxu1 %v9463_v26  ;;  %v9550_v23 = vld [vmem:[%s11232_s25 + $0xb04] ss:$8 sps:$4 sm:$0xff]   ;;  %v9545_v26 = vld [vmem:[%s11232_s25 + $0x300] ss:$8 sps:$4 sm:$0xff]  }
 0x1aa   : > { %8096 = vmatprep.subr.bf16.mxu0 %v9466_v27  ;;  %v9548_v27 = vld [vmem:[%s11232_s25 + $0xb00] ss:$8 sps:$4 sm:$0xff]  }
 0x1ac   : > { %7753 = vmatpush1.bf16.msra.mxu1 %v9461_v32  ;;  %v8573_v32 = vcombine.low %v11402_v24, %v11405_v25  ;;  %v8576_v24 = vcombine.high %v11478_v28, %v11481_v31 }
 0x1ad   : > { %8097 = vmatpush1.bf16.msra.mxu0 %v9464_v33  ;;  %7754 = vmatprep.subr.bf16.mxu1 %v9469_v34  ;;  %v8589_v33 = vcombine.low %v11412_v29, %v11415_v30  ;;  %v11488_v34 = vld [vmem:[%s11283_s5 + $0x58] sm:$0xff] }
 0x1ae   : > { %8098 = vmatprep.subr.bf16.mxu0 %v9472_v35  ;;  %v11491_v35 = vld [vmem:[%s11283_s5 + $0xd8] sm:$0xff] }
 0x1af   : > { %v8592_v25 = vcombine.high %v11488_v34, %v11491_v35  ;;  %v9551_v29 = vld [vmem:[%s11232_s25 + $0x310] ss:$8 sps:$4 sm:$0xff]  }
 0x1b0   : > { %7755 = vmatpush1.bf16.msra.mxu1 %v9467_v36  ;;  %v9553_v36 = vld [vmem:[%s11232_s25 + $0x314] ss:$8 sps:$4 sm:$0xff]   ;;  %v9554_v30 = vld [vmem:[%s11232_s25 + $0xb10] ss:$8 sps:$4 sm:$0xff]  }
 0x1b1   : > { %8099 = vmatpush1.bf16.msra.mxu0 %v9470_v37  ;;  %7756 = vmatprep.subr.bf16.mxu1 %v9475_v38  ;;  %v9556_v37 = vld [vmem:[%s11232_s25 + $0xb14] ss:$8 sps:$4 sm:$0xff]   ;;  %v9559_v38 = vld [vmem:[%s11232_s25 + $0x324] ss:$8 sps:$4 sm:$0xff]  }
 0x1b2   : > { %8100 = vmatprep.subr.bf16.mxu0 %v9478_v39  ;;  %v9562_v39 = vld [vmem:[%s11232_s25 + $0xb24] ss:$8 sps:$4 sm:$0xff]  }
 0x1b4   : > { %7757 = vmatpush1.bf16.msra.mxu1 %v9473_v40  ;;  %v9557_v40 = vld [vmem:[%s11232_s25 + $0x320] ss:$8 sps:$4 sm:$0xff]  }
 0x1b5   : > { %8101 = vmatpush1.bf16.msra.mxu0 %v9476_v41  ;;  %7758 = vmatprep.subr.bf16.mxu1 %v9481_v42  ;;  %v9560_v41 = vld [vmem:[%s11232_s25 + $0xb20] ss:$8 sps:$4 sm:$0xff]   ;;  %v9565_v42 = vld [vmem:[%s11232_s25 + $0x334] ss:$8 sps:$4 sm:$0xff]  }
 0x1b6   : > { %8102 = vmatprep.subr.bf16.mxu0 %v9484_v43  ;;  %v9568_v43 = vld [vmem:[%s11232_s25 + $0xb34] ss:$8 sps:$4 sm:$0xff]  }
 0x1b8   : > { %7759 = vmatpush1.bf16.msra.mxu1 %v9479_v44  ;;  %v9563_v44 = vld [vmem:[%s11232_s25 + $0x330] ss:$8 sps:$4 sm:$0xff]  }
 0x1b9   : > { %8103 = vmatpush1.bf16.msra.mxu0 %v9482_v45  ;;  %7760 = vmatprep.subr.bf16.mxu1 %v9487_v46  ;;  %v9566_v45 = vld [vmem:[%s11232_s25 + $0xb30] ss:$8 sps:$4 sm:$0xff]   ;;  %v9571_v46 = vld [vmem:[%s11232_s25 + $0x344] ss:$8 sps:$4 sm:$0xff]  }
 0x1ba   : > { %8104 = vmatprep.subr.bf16.mxu0 %v9490_v47  ;;  %v9574_v47 = vld [vmem:[%s11232_s25 + $0xb44] ss:$8 sps:$4 sm:$0xff]  }
 0x1bc   : > { %7761 = vmatpush1.bf16.msra.mxu1 %v9485_v48  ;;  %v9569_v48 = vld [vmem:[%s11232_s25 + $0x340] ss:$8 sps:$4 sm:$0xff]  }
 0x1bd   : > { %8105 = vmatpush1.bf16.msra.mxu0 %v9488_v49  ;;  %7762 = vmatprep.subr.bf16.mxu1 %v9493_v50  ;;  %v9572_v49 = vld [vmem:[%s11232_s25 + $0xb40] ss:$8 sps:$4 sm:$0xff]   ;;  %v9577_v50 = vld [vmem:[%s11232_s25 + $0x354] ss:$8 sps:$4 sm:$0xff]  }
 0x1be   : > { %8106 = vmatprep.subr.bf16.mxu0 %v9496_v51  ;;  %v9580_v51 = vld [vmem:[%s11232_s25 + $0xb54] ss:$8 sps:$4 sm:$0xff]  }
 0x1c0   : > { %7763 = vmatpush1.bf16.msra.mxu1 %v9491_v52  ;;  %v9575_v52 = vld [vmem:[%s11232_s25 + $0x350] ss:$8 sps:$4 sm:$0xff]  }
 0x1c1   : > { %8107 = vmatpush1.bf16.msra.mxu0 %v9494_v53  ;;  %7764 = vmatprep.subr.bf16.mxu1 %v9499_v54  ;;  %v9578_v53 = vld [vmem:[%s11232_s25 + $0xb50] ss:$8 sps:$4 sm:$0xff]   ;;  %v9583_v54 = vld [vmem:[%s11232_s25 + $0x364] ss:$8 sps:$4 sm:$0xff]  }
 0x1c2   : > { %8108 = vmatprep.subr.bf16.mxu0 %v9502_v55  ;;  %v9586_v55 = vld [vmem:[%s11232_s25 + $0xb64] ss:$8 sps:$4 sm:$0xff]  }
 0x1c4   : > { %7765 = vmatpush1.bf16.msra.mxu1 %v9497_v56  ;;  %v9581_v56 = vld [vmem:[%s11232_s25 + $0x360] ss:$8 sps:$4 sm:$0xff]  }
 0x1c5   : > { %8109 = vmatpush1.bf16.msra.mxu0 %v9500_v57  ;;  %7766 = vmatprep.subr.bf16.mxu1 %v9505_v58  ;;  %v9584_v57 = vld [vmem:[%s11232_s25 + $0xb60] ss:$8 sps:$4 sm:$0xff]   ;;  %v9589_v58 = vld [vmem:[%s11232_s25 + $0x374] ss:$8 sps:$4 sm:$0xff]  }
 0x1c6   : > { %8110 = vmatprep.subr.bf16.mxu0 %v9508_v59  ;;  %v9592_v59 = vld [vmem:[%s11232_s25 + $0xb74] ss:$8 sps:$4 sm:$0xff]  }
 0x1c8   : > { %7767 = vmatpush1.bf16.msra.mxu1 %v9503_v60  ;;  %v9587_v60 = vld [vmem:[%s11232_s25 + $0x370] ss:$8 sps:$4 sm:$0xff]  }
 0x1c9   : > { %8111 = vmatpush1.bf16.msra.mxu0 %v9506_v61  ;;  %7768 = vmatprep.subr.bf16.mxu1 %v9511_v62  ;;  %v9590_v61 = vld [vmem:[%s11232_s25 + $0xb70] ss:$8 sps:$4 sm:$0xff]   ;;  %v9595_v62 = vld [vmem:[%s11232_s25 + $0x384] ss:$8 sps:$4 sm:$0xff]  }
 0x1ca   : > { %8112 = vmatprep.subr.bf16.mxu0 %v9514_v63  ;;  %v9598_v63 = vld [vmem:[%s11232_s25 + $0xb84] ss:$8 sps:$4 sm:$0xff]  }
 0x1cc   : > { %7769 = vmatpush1.bf16.msra.mxu1 %v9509_v0  ;;  %v9593_v0 = vld [vmem:[%s11232_s25 + $0x380] ss:$8 sps:$4 sm:$0xff]  }
 0x1cd   : > { %8113 = vmatpush1.bf16.msra.mxu0 %v9512_v1  ;;  %7770 = vmatprep.subr.bf16.mxu1 %v9517_v2  ;;  %v9596_v1 = vld [vmem:[%s11232_s25 + $0xb80] ss:$8 sps:$4 sm:$0xff]   ;;  %v9601_v2 = vld [vmem:[%s11232_s25 + $0x394] ss:$8 sps:$4 sm:$0xff]  }
 0x1ce   : > { %8114 = vmatprep.subr.bf16.mxu0 %v9520_v3  ;;  %v9604_v3 = vld [vmem:[%s11232_s25 + $0xb94] ss:$8 sps:$4 sm:$0xff]  }
 0x1d0   : > { %7771 = vmatpush1.bf16.msra.mxu1 %v9515_v4  ;;  %v9599_v4 = vld [vmem:[%s11232_s25 + $0x390] ss:$8 sps:$4 sm:$0xff]  }
 0x1d1   : > { %8115 = vmatpush1.bf16.msra.mxu0 %v9518_v5  ;;  %7772 = vmatprep.subr.bf16.mxu1 %v9523_v6  ;;  %v9602_v5 = vld [vmem:[%s11232_s25 + $0xb90] ss:$8 sps:$4 sm:$0xff]   ;;  %v9607_v6 = vld [vmem:[%s11232_s25 + $0x3a4] ss:$8 sps:$4 sm:$0xff]  }
 0x1d2   : > { %8116 = vmatprep.subr.bf16.mxu0 %v9526_v7  ;;  %v9610_v7 = vld [vmem:[%s11232_s25 + $0xba4] ss:$8 sps:$4 sm:$0xff]  }
 0x1d4   : > { %7773 = vmatpush1.bf16.msra.mxu1 %v9521_v8  ;;  %v9605_v8 = vld [vmem:[%s11232_s25 + $0x3a0] ss:$8 sps:$4 sm:$0xff]  }
 0x1d5   : > { %8117 = vmatpush1.bf16.msra.mxu0 %v9524_v9  ;;  %7774 = vmatprep.subr.bf16.mxu1 %v9529_v10  ;;  %v9608_v9 = vld [vmem:[%s11232_s25 + $0xba0] ss:$8 sps:$4 sm:$0xff]   ;;  %v9613_v10 = vld [vmem:[%s11232_s25 + $0x3b4] ss:$8 sps:$4 sm:$0xff]  }
 0x1d6   : > { %8118 = vmatprep.subr.bf16.mxu0 %v9532_v11  ;;  %v9616_v11 = vld [vmem:[%s11232_s25 + $0xbb4] ss:$8 sps:$4 sm:$0xff]  }
 0x1d8   : > { %7775 = vmatpush1.bf16.msra.mxu1 %v9527_v12  ;;  %v9611_v12 = vld [vmem:[%s11232_s25 + $0x3b0] ss:$8 sps:$4 sm:$0xff]  }
 0x1d9   : > { %8119 = vmatpush1.bf16.msra.mxu0 %v9530_v13  ;;  %7776 = vmatprep.subr.bf16.mxu1 %v9535_v14  ;;  %v9614_v13 = vld [vmem:[%s11232_s25 + $0xbb0] ss:$8 sps:$4 sm:$0xff]   ;;  %v9619_v14 = vld [vmem:[%s11232_s25 + $0x3c4] ss:$8 sps:$4 sm:$0xff]  }
 0x1da   : > { %8120 = vmatprep.subr.bf16.mxu0 %v9538_v15  ;;  %v9622_v15 = vld [vmem:[%s11232_s25 + $0xbc4] ss:$8 sps:$4 sm:$0xff]  }
 0x1dc   : > { %7777 = vmatpush1.bf16.msra.mxu1 %v9533_v16  ;;  %v9617_v16 = vld [vmem:[%s11232_s25 + $0x3c0] ss:$8 sps:$4 sm:$0xff]  }
 0x1dd   : > { %8121 = vmatpush1.bf16.msra.mxu0 %v9536_v17  ;;  %7778 = vmatprep.subr.bf16.mxu1 %v9541_v18  ;;  %v9620_v17 = vld [vmem:[%s11232_s25 + $0xbc0] ss:$8 sps:$4 sm:$0xff]   ;;  %v9625_v18 = vld [vmem:[%s11232_s25 + $0x3d4] ss:$8 sps:$4 sm:$0xff]  }
 0x1de   : > { %8122 = vmatprep.subr.bf16.mxu0 %v9544_v19  ;;  %v9628_v19 = vld [vmem:[%s11232_s25 + $0xbd4] ss:$8 sps:$4 sm:$0xff]  }
 0x1e0   : > { %7779 = vmatpush1.bf16.msra.mxu1 %v9539_v20  ;;  %v9623_v20 = vld [vmem:[%s11232_s25 + $0x3d0] ss:$8 sps:$4 sm:$0xff]  }
 0x1e1   : > { %8123 = vmatpush1.bf16.msra.mxu0 %v9542_v21  ;;  %7791 = vmatprep.subr.bf16.mxu1 %v9547_v22  ;;  %v9626_v21 = vld [vmem:[%s11232_s25 + $0xbd0] ss:$8 sps:$4 sm:$0xff]   ;;  %v9631_v22 = vld [vmem:[%s11232_s25 + $0x3e4] ss:$8 sps:$4 sm:$0xff]  }
 0x1e2   : > { %8135 = vmatprep.subr.bf16.mxu0 %v9550_v23  ;;  %v9634_v23 = vld [vmem:[%s11232_s25 + $0xbe4] ss:$8 sps:$4 sm:$0xff]  }
 0x1e3   : > { %7781 = vmatmul.mubr.bf16.vlgmr.msra.gmra.mrb[0].mxu1 %v8573_v32  ;;  %v9637_v32 = vld [vmem:[%s11232_s25 + $0x3f4] ss:$8 sps:$4 sm:$0xff]  }
 0x1e4   : > { %8125 = vmatmul.mubr.bf16.vlgmr.msra.gmra.mrb[0].mxu0 %v8589_v33  ;;  %7792 = vmatpush1.bf16.msra.mxu1 %v9545_v26  ;;  %v9629_v26 = vld [vmem:[%s11232_s25 + $0x3e0] ss:$8 sps:$4 sm:$0xff]   ;;  %v9640_v33 = vld [vmem:[%s11232_s25 + $0xbf4] ss:$8 sps:$4 sm:$0xff]  }
 0x1e5   : > { %8136 = vmatpush1.bf16.msra.mxu0 %v9548_v27  ;;  %7793 = vmatprep.subr.bf16.mxu1 %v9553_v36  ;;  %v9632_v27 = vld [vmem:[%s11232_s25 + $0xbe0] ss:$8 sps:$4 sm:$0xff]   ;;  %v9635_v36 = vld [vmem:[%s11232_s25 + $0x3f0] ss:$8 sps:$4 sm:$0xff]  }
 0x1e6   : > { %8137 = vmatprep.subr.bf16.mxu0 %v9556_v37  ;;  %7823 = vmatprep.mubr.bf16.mxu1 %v8576_v24  ;;  %v9638_v37 = vld [vmem:[%s11232_s25 + $0xbf0] ss:$8 sps:$4 sm:$0xff]   ;;  %v9643_v24 = vld [vmem:[%s11232_s25 + $0x404] ss:$8 sps:$4 sm:$0xff]  }
 0x1e7   : > { %8167 = vmatprep.mubr.bf16.mxu0 %v8592_v25  ;;  %v9646_v25 = vld [vmem:[%s11232_s25 + $0xc04] ss:$8 sps:$4 sm:$0xff]  }
 0x1e8   : > { %7794 = vmatpush1.bf16.msra.mxu1 %v9551_v29  ;;  %v9641_v29 = vld [vmem:[%s11232_s25 + $0x400] ss:$8 sps:$4 sm:$0xff]  }
 0x1e9   : > { %8138 = vmatpush1.bf16.msra.mxu0 %v9554_v30  ;;  %7795 = vmatprep.subr.bf16.mxu1 %v9559_v38  ;;  %v9644_v30 = vld [vmem:[%s11232_s25 + $0xc00] ss:$8 sps:$4 sm:$0xff]  }
 0x1ea   : > { %8139 = vmatprep.subr.bf16.mxu0 %v9562_v39  ;;  %v11562_v38 = vld [vmem:[%s11283_s5 + $0x20] sm:$0xff] }
 0x1eb   : > { %v11565_v39 = vld [vmem:[%s11283_s5 + $0xa0] sm:$0xff] }
 0x1ec   : > { %7796 = vmatpush1.bf16.msra.mxu1 %v9557_v40  ;;  %v8575_v40 = vcombine.low %v11478_v28, %v11481_v31  ;;  %v9647_v31 = vld [vmem:[%s11232_s25 + $0x410] ss:$8 sps:$4 sm:$0xff]  }
 0x1ed   : > { %8140 = vmatpush1.bf16.msra.mxu0 %v9560_v41  ;;  %7797 = vmatprep.subr.bf16.mxu1 %v9565_v42  ;;  %v8591_v41 = vcombine.low %v11488_v34, %v11491_v35  ;;  %v11572_v42 = vld [vmem:[%s11283_s5 + $0x60] sm:$0xff]  ;;  %v9650_v34 = vld [vmem:[%s11232_s25 + $0xc10] ss:$8 sps:$4 sm:$0xff]  }
 0x1ee   : > { %8141 = vmatprep.subr.bf16.mxu0 %v9568_v43  ;;  %v11575_v43 = vld [vmem:[%s11283_s5 + $0xe0] sm:$0xff] }
 0x1ef   : > { %v8594_v28 = vcombine.high %v11572_v42, %v11575_v43  ;;  %v9655_v35 = vld [vmem:[%s11232_s25 + $0x424] ss:$8 sps:$4 sm:$0xff]  }
 0x1f0   : > { %7798 = vmatpush1.bf16.msra.mxu1 %v9563_v44  ;;  %v9649_v44 = vld [vmem:[%s11232_s25 + $0x414] ss:$8 sps:$4 sm:$0xff]  }
 0x1f1   : > { %8142 = vmatpush1.bf16.msra.mxu0 %v9566_v45  ;;  %7799 = vmatprep.subr.bf16.mxu1 %v9571_v46  ;;  %v9652_v45 = vld [vmem:[%s11232_s25 + $0xc14] ss:$8 sps:$4 sm:$0xff]   ;;  %v8578_v46 = vcombine.high %v11562_v38, %v11565_v39 }
 0x1f2   : > { %8143 = vmatprep.subr.bf16.mxu0 %v9574_v47  ;;  %v9658_v47 = vld [vmem:[%s11232_s25 + $0xc24] ss:$8 sps:$4 sm:$0xff]  }
 0x1f4   : > { %7800 = vmatpush1.bf16.msra.mxu1 %v9569_v48  ;;  %v9653_v48 = vld [vmem:[%s11232_s25 + $0x420] ss:$8 sps:$4 sm:$0xff]  }
 0x1f5   : > { %8144 = vmatpush1.bf16.msra.mxu0 %v9572_v49  ;;  %7801 = vmatprep.subr.bf16.mxu1 %v9577_v50  ;;  %v9656_v49 = vld [vmem:[%s11232_s25 + $0xc20] ss:$8 sps:$4 sm:$0xff]   ;;  %v9661_v50 = vld [vmem:[%s11232_s25 + $0x434] ss:$8 sps:$4 sm:$0xff]  }
 0x1f6   : > { %8145 = vmatprep.subr.bf16.mxu0 %v9580_v51  ;;  %v9664_v51 = vld [vmem:[%s11232_s25 + $0xc34] ss:$8 sps:$4 sm:$0xff]  }
 0x1f8   : > { %7802 = vmatpush1.bf16.msra.mxu1 %v9575_v52  ;;  %v9659_v52 = vld [vmem:[%s11232_s25 + $0x430] ss:$8 sps:$4 sm:$0xff]  }
 0x1f9   : > { %8146 = vmatpush1.bf16.msra.mxu0 %v9578_v53  ;;  %7803 = vmatprep.subr.bf16.mxu1 %v9583_v54  ;;  %v9662_v53 = vld [vmem:[%s11232_s25 + $0xc30] ss:$8 sps:$4 sm:$0xff]   ;;  %v9667_v54 = vld [vmem:[%s11232_s25 + $0x444] ss:$8 sps:$4 sm:$0xff]  }
 0x1fa   : > { %8147 = vmatprep.subr.bf16.mxu0 %v9586_v55  ;;  %v9670_v55 = vld [vmem:[%s11232_s25 + $0xc44] ss:$8 sps:$4 sm:$0xff]  }
 0x1fc   : > { %7804 = vmatpush1.bf16.msra.mxu1 %v9581_v56  ;;  %v9665_v56 = vld [vmem:[%s11232_s25 + $0x440] ss:$8 sps:$4 sm:$0xff]  }
 0x1fd   : > { %8148 = vmatpush1.bf16.msra.mxu0 %v9584_v57  ;;  %7805 = vmatprep.subr.bf16.mxu1 %v9589_v58  ;;  %v9668_v57 = vld [vmem:[%s11232_s25 + $0xc40] ss:$8 sps:$4 sm:$0xff]   ;;  %v9673_v58 = vld [vmem:[%s11232_s25 + $0x454] ss:$8 sps:$4 sm:$0xff]  }
 0x1fe   : > { %8149 = vmatprep.subr.bf16.mxu0 %v9592_v59  ;;  %v9676_v59 = vld [vmem:[%s11232_s25 + $0xc54] ss:$8 sps:$4 sm:$0xff]  }
 0x200   : > { %7806 = vmatpush1.bf16.msra.mxu1 %v9587_v60  ;;  %v9671_v60 = vld [vmem:[%s11232_s25 + $0x450] ss:$8 sps:$4 sm:$0xff]  }
 0x201   : > { %8150 = vmatpush1.bf16.msra.mxu0 %v9590_v61  ;;  %7807 = vmatprep.subr.bf16.mxu1 %v9595_v62  ;;  %v9674_v61 = vld [vmem:[%s11232_s25 + $0xc50] ss:$8 sps:$4 sm:$0xff]   ;;  %v9679_v62 = vld [vmem:[%s11232_s25 + $0x464] ss:$8 sps:$4 sm:$0xff]  }
 0x202   : > { %8151 = vmatprep.subr.bf16.mxu0 %v9598_v63  ;;  %v9682_v63 = vld [vmem:[%s11232_s25 + $0xc64] ss:$8 sps:$4 sm:$0xff]  }
 0x204   : > { %7808 = vmatpush1.bf16.msra.mxu1 %v9593_v0  ;;  %v9677_v0 = vld [vmem:[%s11232_s25 + $0x460] ss:$8 sps:$4 sm:$0xff]  }
 0x205   : > { %8152 = vmatpush1.bf16.msra.mxu0 %v9596_v1  ;;  %7809 = vmatprep.subr.bf16.mxu1 %v9601_v2  ;;  %v9680_v1 = vld [vmem:[%s11232_s25 + $0xc60] ss:$8 sps:$4 sm:$0xff]   ;;  %v9685_v2 = vld [vmem:[%s11232_s25 + $0x474] ss:$8 sps:$4 sm:$0xff]  }
 0x206   : > { %8153 = vmatprep.subr.bf16.mxu0 %v9604_v3  ;;  %v9688_v3 = vld [vmem:[%s11232_s25 + $0xc74] ss:$8 sps:$4 sm:$0xff]  }
 0x208   : > { %7810 = vmatpush1.bf16.msra.mxu1 %v9599_v4  ;;  %v9683_v4 = vld [vmem:[%s11232_s25 + $0x470] ss:$8 sps:$4 sm:$0xff]  }
 0x209   : > { %8154 = vmatpush1.bf16.msra.mxu0 %v9602_v5  ;;  %7811 = vmatprep.subr.bf16.mxu1 %v9607_v6  ;;  %v9686_v5 = vld [vmem:[%s11232_s25 + $0xc70] ss:$8 sps:$4 sm:$0xff]   ;;  %v9691_v6 = vld [vmem:[%s11232_s25 + $0x484] ss:$8 sps:$4 sm:$0xff]  }
 0x20a   : > { %8155 = vmatprep.subr.bf16.mxu0 %v9610_v7  ;;  %v9694_v7 = vld [vmem:[%s11232_s25 + $0xc84] ss:$8 sps:$4 sm:$0xff]  }
 0x20c   : > { %7812 = vmatpush1.bf16.msra.mxu1 %v9605_v8  ;;  %v9689_v8 = vld [vmem:[%s11232_s25 + $0x480] ss:$8 sps:$4 sm:$0xff]  }
 0x20d   : > { %8156 = vmatpush1.bf16.msra.mxu0 %v9608_v9  ;;  %7813 = vmatprep.subr.bf16.mxu1 %v9613_v10  ;;  %v9692_v9 = vld [vmem:[%s11232_s25 + $0xc80] ss:$8 sps:$4 sm:$0xff]   ;;  %v9697_v10 = vld [vmem:[%s11232_s25 + $0x494] ss:$8 sps:$4 sm:$0xff]  }
 0x20e   : > { %8157 = vmatprep.subr.bf16.mxu0 %v9616_v11  ;;  %v9700_v11 = vld [vmem:[%s11232_s25 + $0xc94] ss:$8 sps:$4 sm:$0xff]  }
 0x210   : > { %7814 = vmatpush1.bf16.msra.mxu1 %v9611_v12  ;;  %v9695_v12 = vld [vmem:[%s11232_s25 + $0x490] ss:$8 sps:$4 sm:$0xff]  }
 0x211   : > { %8158 = vmatpush1.bf16.msra.mxu0 %v9614_v13  ;;  %7815 = vmatprep.subr.bf16.mxu1 %v9619_v14  ;;  %v9698_v13 = vld [vmem:[%s11232_s25 + $0xc90] ss:$8 sps:$4 sm:$0xff]   ;;  %v9703_v14 = vld [vmem:[%s11232_s25 + $0x4a4] ss:$8 sps:$4 sm:$0xff]  }
 0x212   : > { %8159 = vmatprep.subr.bf16.mxu0 %v9622_v15  ;;  %v9706_v15 = vld [vmem:[%s11232_s25 + $0xca4] ss:$8 sps:$4 sm:$0xff]  }
 0x214   : > { %7816 = vmatpush1.bf16.msra.mxu1 %v9617_v16  ;;  %v9701_v16 = vld [vmem:[%s11232_s25 + $0x4a0] ss:$8 sps:$4 sm:$0xff]  }
 0x215   : > { %8160 = vmatpush1.bf16.msra.mxu0 %v9620_v17  ;;  %7817 = vmatprep.subr.bf16.mxu1 %v9625_v18  ;;  %v9704_v17 = vld [vmem:[%s11232_s25 + $0xca0] ss:$8 sps:$4 sm:$0xff]   ;;  %v9709_v18 = vld [vmem:[%s11232_s25 + $0x4b4] ss:$8 sps:$4 sm:$0xff]  }
 0x216   : > { %8161 = vmatprep.subr.bf16.mxu0 %v9628_v19  ;;  %v9712_v19 = vld [vmem:[%s11232_s25 + $0xcb4] ss:$8 sps:$4 sm:$0xff]  }
 0x218   : > { %7818 = vmatpush1.bf16.msra.mxu1 %v9623_v20  ;;  %v9707_v20 = vld [vmem:[%s11232_s25 + $0x4b0] ss:$8 sps:$4 sm:$0xff]  }
 0x219   : > { %8162 = vmatpush1.bf16.msra.mxu0 %v9626_v21  ;;  %7819 = vmatprep.subr.bf16.mxu1 %v9631_v22  ;;  %v9710_v21 = vld [vmem:[%s11232_s25 + $0xcb0] ss:$8 sps:$4 sm:$0xff]   ;;  %v9715_v22 = vld [vmem:[%s11232_s25 + $0x4c4] ss:$8 sps:$4 sm:$0xff]  }
 0x21a   : > { %8163 = vmatprep.subr.bf16.mxu0 %v9634_v23  ;;  %v9718_v23 = vld [vmem:[%s11232_s25 + $0xcc4] ss:$8 sps:$4 sm:$0xff]  }
 0x21c   : > { %7820 = vmatpush1.bf16.msra.mxu1 %v9629_v26  ;;  %v9713_v26 = vld [vmem:[%s11232_s25 + $0x4c0] ss:$8 sps:$4 sm:$0xff]  }
 0x21d   : > { %8164 = vmatpush1.bf16.msra.mxu0 %v9632_v27  ;;  %7821 = vmatprep.subr.bf16.mxu1 %v9637_v32  ;;  %v9716_v27 = vld [vmem:[%s11232_s25 + $0xcc0] ss:$8 sps:$4 sm:$0xff]   ;;  %v9721_v32 = vld [vmem:[%s11232_s25 + $0x4d4] ss:$8 sps:$4 sm:$0xff]  }
 0x21e   : > { %8165 = vmatprep.subr.bf16.mxu0 %v9640_v33  ;;  %v9724_v33 = vld [vmem:[%s11232_s25 + $0xcd4] ss:$8 sps:$4 sm:$0xff]  }
 0x220   : > { %7822 = vmatpush1.bf16.msra.mxu1 %v9635_v36  ;;  %v9719_v36 = vld [vmem:[%s11232_s25 + $0x4d0] ss:$8 sps:$4 sm:$0xff]  }
 0x221   : > { %8166 = vmatpush1.bf16.msra.mxu0 %v9638_v37  ;;  %7834 = vmatprep.subr.bf16.mxu1 %v9643_v24  ;;  %v9722_v37 = vld [vmem:[%s11232_s25 + $0xcd0] ss:$8 sps:$4 sm:$0xff]   ;;  %v9727_v24 = vld [vmem:[%s11232_s25 + $0x4e4] ss:$8 sps:$4 sm:$0xff]  }
 0x222   : > { %8178 = vmatprep.subr.bf16.mxu0 %v9646_v25  ;;  %v9730_v25 = vld [vmem:[%s11232_s25 + $0xce4] ss:$8 sps:$4 sm:$0xff]  }
 0x223   : > { %7824 = vmatmul.mubr.bf16.vlgmr.msra.gmra.mrb[0].mxu1 %v8575_v40  ;;  %v9733_v40 = vld [vmem:[%s11232_s25 + $0x4f4] ss:$8 sps:$4 sm:$0xff]  }
 0x224   : > { %8168 = vmatmul.mubr.bf16.vlgmr.msra.gmra.mrb[0].mxu0 %v8591_v41  ;;  %7835 = vmatpush1.bf16.msra.mxu1 %v9641_v29  ;;  %v9725_v29 = vld [vmem:[%s11232_s25 + $0x4e0] ss:$8 sps:$4 sm:$0xff]   ;;  %v9736_v41 = vld [vmem:[%s11232_s25 + $0xcf4] ss:$8 sps:$4 sm:$0xff]  }
 0x225   : > { %8179 = vmatpush1.bf16.msra.mxu0 %v9644_v30  ;;  %7836 = vmatprep.subr.bf16.mxu1 %v9649_v44  ;;  %v9728_v30 = vld [vmem:[%s11232_s25 + $0xce0] ss:$8 sps:$4 sm:$0xff]   ;;  %v9731_v44 = vld [vmem:[%s11232_s25 + $0x4f0] ss:$8 sps:$4 sm:$0xff]  }
 0x226   : > { %8180 = vmatprep.subr.bf16.mxu0 %v9652_v45  ;;  %7866 = vmatprep.mubr.bf16.mxu1 %v8578_v46  ;;  %v9734_v45 = vld [vmem:[%s11232_s25 + $0xcf0] ss:$8 sps:$4 sm:$0xff]   ;;  %v9739_v46 = vld [vmem:[%s11232_s25 + $0x504] ss:$8 sps:$4 sm:$0xff]  }
 0x227   : > { %8210 = vmatprep.mubr.bf16.mxu0 %v8594_v28  ;;  %v9742_v28 = vld [vmem:[%s11232_s25 + $0xd04] ss:$8 sps:$4 sm:$0xff]  }
 0x228   : > { %7837 = vmatpush1.bf16.msra.mxu1 %v9647_v31  ;;  %v11644_v31 = vld [vmem:[%s11283_s5 + $0x28] sm:$0xff] }
 0x229   : > { %8181 = vmatpush1.bf16.msra.mxu0 %v9650_v34  ;;  %7838 = vmatprep.subr.bf16.mxu1 %v9655_v35  ;;  %v11647_v34 = vld [vmem:[%s11283_s5 + $0xa8] sm:$0xff] }
 0x22a   : > { %8182 = vmatprep.subr.bf16.mxu0 %v9658_v47  ;;  %v11650_v35 = vld [vmem:[%s11283_s5 + $0x68] sm:$0xff] }
 0x22b   : > { %v11653_v47 = vld [vmem:[%s11283_s5 + $0xe8] sm:$0xff] }
 0x22c   : > { %7839 = vmatpush1.bf16.msra.mxu1 %v9653_v48  ;;  %v8577_v48 = vcombine.low %v11562_v38, %v11565_v39  ;;  %v8596_v38 = vcombine.high %v11650_v35, %v11653_v47  ;;  %v9743_v39 = vld [vmem:[%s11232_s25 + $0x510] ss:$8 sps:$4 sm:$0xff]  }
 0x22d   : > { %8183 = vmatpush1.bf16.msra.mxu0 %v9656_v49  ;;  %7840 = vmatprep.subr.bf16.mxu1 %v9661_v50  ;;  %v8593_v49 = vcombine.low %v11572_v42, %v11575_v43  ;;  %v9737_v50 = vld [vmem:[%s11232_s25 + $0x500] ss:$8 sps:$4 sm:$0xff]   ;;  %v9746_v42 = vld [vmem:[%s11232_s25 + $0xd10] ss:$8 sps:$4 sm:$0xff]   ;;  %v9751_v43 = vld [vmem:[%s11232_s25 + $0x524] ss:$8 sps:$4 sm:$0xff]  }
 0x22e   : > { %8184 = vmatprep.subr.bf16.mxu0 %v9664_v51  ;;  %v9740_v51 = vld [vmem:[%s11232_s25 + $0xd00] ss:$8 sps:$4 sm:$0xff]  }
 0x230   : > { %7841 = vmatpush1.bf16.msra.mxu1 %v9659_v52  ;;  %v9745_v52 = vld [vmem:[%s11232_s25 + $0x514] ss:$8 sps:$4 sm:$0xff]  }
 0x231   : > { %8185 = vmatpush1.bf16.msra.mxu0 %v9662_v53  ;;  %7842 = vmatprep.subr.bf16.mxu1 %v9667_v54  ;;  %v9748_v53 = vld [vmem:[%s11232_s25 + $0xd14] ss:$8 sps:$4 sm:$0xff]   ;;  %v8580_v54 = vcombine.high %v11644_v31, %v11647_v34 }
 0x232   : > { %8186 = vmatprep.subr.bf16.mxu0 %v9670_v55  ;;  %v9754_v55 = vld [vmem:[%s11232_s25 + $0xd24] ss:$8 sps:$4 sm:$0xff]  }
 0x234   : > { %7843 = vmatpush1.bf16.msra.mxu1 %v9665_v56  ;;  %v9749_v56 = vld [vmem:[%s11232_s25 + $0x520] ss:$8 sps:$4 sm:$0xff]  }
 0x235   : > { %8187 = vmatpush1.bf16.msra.mxu0 %v9668_v57  ;;  %7844 = vmatprep.subr.bf16.mxu1 %v9673_v58  ;;  %v9752_v57 = vld [vmem:[%s11232_s25 + $0xd20] ss:$8 sps:$4 sm:$0xff]   ;;  %v9757_v58 = vld [vmem:[%s11232_s25 + $0x534] ss:$8 sps:$4 sm:$0xff]  }
 0x236   : > { %8188 = vmatprep.subr.bf16.mxu0 %v9676_v59  ;;  %v9760_v59 = vld [vmem:[%s11232_s25 + $0xd34] ss:$8 sps:$4 sm:$0xff]  }
 0x238   : > { %7845 = vmatpush1.bf16.msra.mxu1 %v9671_v60  ;;  %v9755_v60 = vld [vmem:[%s11232_s25 + $0x530] ss:$8 sps:$4 sm:$0xff]  }
 0x239   : > { %8189 = vmatpush1.bf16.msra.mxu0 %v9674_v61  ;;  %7846 = vmatprep.subr.bf16.mxu1 %v9679_v62  ;;  %v9758_v61 = vld [vmem:[%s11232_s25 + $0xd30] ss:$8 sps:$4 sm:$0xff]   ;;  %v9763_v62 = vld [vmem:[%s11232_s25 + $0x544] ss:$8 sps:$4 sm:$0xff]  }
 0x23a   : > { %8190 = vmatprep.subr.bf16.mxu0 %v9682_v63  ;;  %v9766_v63 = vld [vmem:[%s11232_s25 + $0xd44] ss:$8 sps:$4 sm:$0xff]  }
 0x23c   : > { %7847 = vmatpush1.bf16.msra.mxu1 %v9677_v0  ;;  %v9761_v0 = vld [vmem:[%s11232_s25 + $0x540] ss:$8 sps:$4 sm:$0xff]  }
 0x23d   : > { %8191 = vmatpush1.bf16.msra.mxu0 %v9680_v1  ;;  %7848 = vmatprep.subr.bf16.mxu1 %v9685_v2  ;;  %v9764_v1 = vld [vmem:[%s11232_s25 + $0xd40] ss:$8 sps:$4 sm:$0xff]   ;;  %v9769_v2 = vld [vmem:[%s11232_s25 + $0x554] ss:$8 sps:$4 sm:$0xff]  }
 0x23e   : > { %8192 = vmatprep.subr.bf16.mxu0 %v9688_v3  ;;  %v9772_v3 = vld [vmem:[%s11232_s25 + $0xd54] ss:$8 sps:$4 sm:$0xff]  }
 0x240   : > { %7849 = vmatpush1.bf16.msra.mxu1 %v9683_v4  ;;  %v9767_v4 = vld [vmem:[%s11232_s25 + $0x550] ss:$8 sps:$4 sm:$0xff]  }
 0x241   : > { %8193 = vmatpush1.bf16.msra.mxu0 %v9686_v5  ;;  %7850 = vmatprep.subr.bf16.mxu1 %v9691_v6  ;;  %v9770_v5 = vld [vmem:[%s11232_s25 + $0xd50] ss:$8 sps:$4 sm:$0xff]   ;;  %v9775_v6 = vld [vmem:[%s11232_s25 + $0x564] ss:$8 sps:$4 sm:$0xff]  }
 0x242   : > { %8194 = vmatprep.subr.bf16.mxu0 %v9694_v7  ;;  %v9778_v7 = vld [vmem:[%s11232_s25 + $0xd64] ss:$8 sps:$4 sm:$0xff]  }
 0x244   : > { %7851 = vmatpush1.bf16.msra.mxu1 %v9689_v8  ;;  %v9773_v8 = vld [vmem:[%s11232_s25 + $0x560] ss:$8 sps:$4 sm:$0xff]  }
 0x245   : > { %8195 = vmatpush1.bf16.msra.mxu0 %v9692_v9  ;;  %7852 = vmatprep.subr.bf16.mxu1 %v9697_v10  ;;  %v9776_v9 = vld [vmem:[%s11232_s25 + $0xd60] ss:$8 sps:$4 sm:$0xff]   ;;  %v9781_v10 = vld [vmem:[%s11232_s25 + $0x574] ss:$8 sps:$4 sm:$0xff]  }
 0x246   : > { %8196 = vmatprep.subr.bf16.mxu0 %v9700_v11  ;;  %v9784_v11 = vld [vmem:[%s11232_s25 + $0xd74] ss:$8 sps:$4 sm:$0xff]  }
 0x248   : > { %7853 = vmatpush1.bf16.msra.mxu1 %v9695_v12  ;;  %v9779_v12 = vld [vmem:[%s11232_s25 + $0x570] ss:$8 sps:$4 sm:$0xff]  }
 0x249   : > { %8197 = vmatpush1.bf16.msra.mxu0 %v9698_v13  ;;  %7854 = vmatprep.subr.bf16.mxu1 %v9703_v14  ;;  %v9782_v13 = vld [vmem:[%s11232_s25 + $0xd70] ss:$8 sps:$4 sm:$0xff]   ;;  %v9787_v14 = vld [vmem:[%s11232_s25 + $0x584] ss:$8 sps:$4 sm:$0xff]  }
 0x24a   : > { %8198 = vmatprep.subr.bf16.mxu0 %v9706_v15  ;;  %v9790_v15 = vld [vmem:[%s11232_s25 + $0xd84] ss:$8 sps:$4 sm:$0xff]  }
 0x24c   : > { %7855 = vmatpush1.bf16.msra.mxu1 %v9701_v16  ;;  %v9785_v16 = vld [vmem:[%s11232_s25 + $0x580] ss:$8 sps:$4 sm:$0xff]  }
 0x24d   : > { %8199 = vmatpush1.bf16.msra.mxu0 %v9704_v17  ;;  %7856 = vmatprep.subr.bf16.mxu1 %v9709_v18  ;;  %v9788_v17 = vld [vmem:[%s11232_s25 + $0xd80] ss:$8 sps:$4 sm:$0xff]   ;;  %v9793_v18 = vld [vmem:[%s11232_s25 + $0x594] ss:$8 sps:$4 sm:$0xff]  }
 0x24e   : > { %8200 = vmatprep.subr.bf16.mxu0 %v9712_v19  ;;  %v9796_v19 = vld [vmem:[%s11232_s25 + $0xd94] ss:$8 sps:$4 sm:$0xff]  }
 0x250   : > { %7857 = vmatpush1.bf16.msra.mxu1 %v9707_v20  ;;  %v9791_v20 = vld [vmem:[%s11232_s25 + $0x590] ss:$8 sps:$4 sm:$0xff]  }
 0x251   : > { %8201 = vmatpush1.bf16.msra.mxu0 %v9710_v21  ;;  %7858 = vmatprep.subr.bf16.mxu1 %v9715_v22  ;;  %v9794_v21 = vld [vmem:[%s11232_s25 + $0xd90] ss:$8 sps:$4 sm:$0xff]   ;;  %v9799_v22 = vld [vmem:[%s11232_s25 + $0x5a4] ss:$8 sps:$4 sm:$0xff]  }
 0x252   : > { %8202 = vmatprep.subr.bf16.mxu0 %v9718_v23  ;;  %v9802_v23 = vld [vmem:[%s11232_s25 + $0xda4] ss:$8 sps:$4 sm:$0xff]  }
 0x254   : > { %7859 = vmatpush1.bf16.msra.mxu1 %v9713_v26  ;;  %v9797_v26 = vld [vmem:[%s11232_s25 + $0x5a0] ss:$8 sps:$4 sm:$0xff]  }
 0x255   : > { %8203 = vmatpush1.bf16.msra.mxu0 %v9716_v27  ;;  %7860 = vmatprep.subr.bf16.mxu1 %v9721_v32  ;;  %v9800_v27 = vld [vmem:[%s11232_s25 + $0xda0] ss:$8 sps:$4 sm:$0xff]   ;;  %v9805_v32 = vld [vmem:[%s11232_s25 + $0x5b4] ss:$8 sps:$4 sm:$0xff]  }
 0x256   : > { %8204 = vmatprep.subr.bf16.mxu0 %v9724_v33  ;;  %v9808_v33 = vld [vmem:[%s11232_s25 + $0xdb4] ss:$8 sps:$4 sm:$0xff]  }
 0x258   : > { %7861 = vmatpush1.bf16.msra.mxu1 %v9719_v36  ;;  %v9803_v36 = vld [vmem:[%s11232_s25 + $0x5b0] ss:$8 sps:$4 sm:$0xff]  }
 0x259   : > { %8205 = vmatpush1.bf16.msra.mxu0 %v9722_v37  ;;  %7862 = vmatprep.subr.bf16.mxu1 %v9727_v24  ;;  %v9806_v37 = vld [vmem:[%s11232_s25 + $0xdb0] ss:$8 sps:$4 sm:$0xff]   ;;  %v9811_v24 = vld [vmem:[%s11232_s25 + $0x5c4] ss:$8 sps:$4 sm:$0xff]  }
 0x25a   : > { %8206 = vmatprep.subr.bf16.mxu0 %v9730_v25  ;;  %v9814_v25 = vld [vmem:[%s11232_s25 + $0xdc4] ss:$8 sps:$4 sm:$0xff]  }
 0x25c   : > { %7863 = vmatpush1.bf16.msra.mxu1 %v9725_v29  ;;  %v9809_v29 = vld [vmem:[%s11232_s25 + $0x5c0] ss:$8 sps:$4 sm:$0xff]  }
 0x25d   : > { %8207 = vmatpush1.bf16.msra.mxu0 %v9728_v30  ;;  %7864 = vmatprep.subr.bf16.mxu1 %v9733_v40  ;;  %v9812_v30 = vld [vmem:[%s11232_s25 + $0xdc0] ss:$8 sps:$4 sm:$0xff]   ;;  %v9817_v40 = vld [vmem:[%s11232_s25 + $0x5d4] ss:$8 sps:$4 sm:$0xff]  }
 0x25e   : > { %8208 = vmatprep.subr.bf16.mxu0 %v9736_v41  ;;  %v9820_v41 = vld [vmem:[%s11232_s25 + $0xdd4] ss:$8 sps:$4 sm:$0xff]  }
 0x260   : > { %7865 = vmatpush1.bf16.msra.mxu1 %v9731_v44  ;;  %v9815_v44 = vld [vmem:[%s11232_s25 + $0x5d0] ss:$8 sps:$4 sm:$0xff]  }
 0x261   : > { %8209 = vmatpush1.bf16.msra.mxu0 %v9734_v45  ;;  %7877 = vmatprep.subr.bf16.mxu1 %v9739_v46  ;;  %v9818_v45 = vld [vmem:[%s11232_s25 + $0xdd0] ss:$8 sps:$4 sm:$0xff]   ;;  %v9823_v46 = vld [vmem:[%s11232_s25 + $0x5e4] ss:$8 sps:$4 sm:$0xff]  }
 0x262   : > { %8221 = vmatprep.subr.bf16.mxu0 %v9742_v28  ;;  %v9826_v28 = vld [vmem:[%s11232_s25 + $0xde4] ss:$8 sps:$4 sm:$0xff]  }
 0x263   : > { %7867 = vmatmul.mubr.bf16.vlgmr.msra.gmra.mrb[0].mxu1 %v8577_v48  ;;  %v9821_v48 = vld [vmem:[%s11232_s25 + $0x5e0] ss:$8 sps:$4 sm:$0xff]  }
 0x264   : > { %8211 = vmatmul.mubr.bf16.vlgmr.msra.gmra.mrb[0].mxu0 %v8593_v49  ;;  %7878 = vmatpush1.bf16.msra.mxu1 %v9737_v50  ;;  %v9824_v49 = vld [vmem:[%s11232_s25 + $0xde0] ss:$8 sps:$4 sm:$0xff]   ;;  %v9829_v50 = vld [vmem:[%s11232_s25 + $0x5f4] ss:$8 sps:$4 sm:$0xff]  }
 0x265   : > { %8222 = vmatpush1.bf16.msra.mxu0 %v9740_v51  ;;  %7879 = vmatprep.subr.bf16.mxu1 %v9745_v52  ;;  %v9832_v51 = vld [vmem:[%s11232_s25 + $0xdf4] ss:$8 sps:$4 sm:$0xff]   ;;  %v9827_v52 = vld [vmem:[%s11232_s25 + $0x5f0] ss:$8 sps:$4 sm:$0xff]  }
 0x266   : > { %8223 = vmatprep.subr.bf16.mxu0 %v9748_v53  ;;  %7909 = vmatprep.mubr.bf16.mxu1 %v8580_v54  ;;  %v9830_v53 = vld [vmem:[%s11232_s25 + $0xdf0] ss:$8 sps:$4 sm:$0xff]   ;;  %v9835_v54 = vld [vmem:[%s11232_s25 + $0x604] ss:$8 sps:$4 sm:$0xff]  }
 0x267   : > { %8253 = vmatprep.mubr.bf16.mxu0 %v8596_v38  ;;  %v9838_v38 = vld [vmem:[%s11232_s25 + $0xe04] ss:$8 sps:$4 sm:$0xff]  }
 0x268   : > { %7880 = vmatpush1.bf16.msra.mxu1 %v9743_v39  ;;  %v11728_v39 = vld [vmem:[%s11283_s5 + $0x30] sm:$0xff] }
 0x269   : > { %8224 = vmatpush1.bf16.msra.mxu0 %v9746_v42  ;;  %7881 = vmatprep.subr.bf16.mxu1 %v9751_v43  ;;  %v8579_v42 = vcombine.low %v11644_v31, %v11647_v34  ;;  %v8595_v43 = vcombine.low %v11650_v35, %v11653_v47  ;;  %v9841_v31 = vld [vmem:[%s11232_s25 + $0x614] ss:$8 sps:$4 sm:$0xff]  }
 0x26a   : > { %8225 = vmatprep.subr.bf16.mxu0 %v9754_v55  ;;  %v11735_v55 = vld [vmem:[%s11283_s5 + $0xb0] sm:$0xff] }
 0x26b   : > { %v9844_v34 = vld [vmem:[%s11232_s25 + $0xe14] ss:$8 sps:$4 sm:$0xff]   ;;  %v8582_v35 = vcombine.high %v11728_v39, %v11735_v55 }
 0x26c   : > { %7882 = vmatpush1.bf16.msra.mxu1 %v9749_v56  ;;  %v11738_v56 = vld [vmem:[%s11283_s5 + $0x70] sm:$0xff] }
 0x26d   : > { %8226 = vmatpush1.bf16.msra.mxu0 %v9752_v57  ;;  %7883 = vmatprep.subr.bf16.mxu1 %v9757_v58  ;;  %v11741_v57 = vld [vmem:[%s11283_s5 + $0xf0] sm:$0xff]  ;;  %v9833_v58 = vld [vmem:[%s11232_s25 + $0x600] ss:$8 sps:$4 sm:$0xff]  }
 0x26e   : > { %8227 = vmatprep.subr.bf16.mxu0 %v9760_v59  ;;  %v9836_v59 = vld [vmem:[%s11232_s25 + $0xe00] ss:$8 sps:$4 sm:$0xff]   ;;  %v8598_v47 = vcombine.high %v11738_v56, %v11741_v57 }
 0x270   : > { %7884 = vmatpush1.bf16.msra.mxu1 %v9755_v60  ;;  %v9839_v60 = vld [vmem:[%s11232_s25 + $0x610] ss:$8 sps:$4 sm:$0xff]  }
 0x271   : > { %8228 = vmatpush1.bf16.msra.mxu0 %v9758_v61  ;;  %7885 = vmatprep.subr.bf16.mxu1 %v9763_v62  ;;  %v9842_v61 = vld [vmem:[%s11232_s25 + $0xe10] ss:$8 sps:$4 sm:$0xff]   ;;  %v9847_v62 = vld [vmem:[%s11232_s25 + $0x624] ss:$8 sps:$4 sm:$0xff]  }
 0x272   : > { %8229 = vmatprep.subr.bf16.mxu0 %v9766_v63  ;;  %v9850_v63 = vld [vmem:[%s11232_s25 + $0xe24] ss:$8 sps:$4 sm:$0xff]  }
 0x274   : > { %7886 = vmatpush1.bf16.msra.mxu1 %v9761_v0  ;;  %v9845_v0 = vld [vmem:[%s11232_s25 + $0x620] ss:$8 sps:$4 sm:$0xff]  }
 0x275   : > { %8230 = vmatpush1.bf16.msra.mxu0 %v9764_v1  ;;  %7887 = vmatprep.subr.bf16.mxu1 %v9769_v2  ;;  %v9848_v1 = vld [vmem:[%s11232_s25 + $0xe20] ss:$8 sps:$4 sm:$0xff]   ;;  %v9853_v2 = vld [vmem:[%s11232_s25 + $0x634] ss:$8 sps:$4 sm:$0xff]  }
 0x276   : > { %8231 = vmatprep.subr.bf16.mxu0 %v9772_v3  ;;  %v9856_v3 = vld [vmem:[%s11232_s25 + $0xe34] ss:$8 sps:$4 sm:$0xff]  }
 0x278   : > { %7888 = vmatpush1.bf16.msra.mxu1 %v9767_v4  ;;  %v9851_v4 = vld [vmem:[%s11232_s25 + $0x630] ss:$8 sps:$4 sm:$0xff]  }
 0x279   : > { %8232 = vmatpush1.bf16.msra.mxu0 %v9770_v5  ;;  %7889 = vmatprep.subr.bf16.mxu1 %v9775_v6  ;;  %v9854_v5 = vld [vmem:[%s11232_s25 + $0xe30] ss:$8 sps:$4 sm:$0xff]   ;;  %v9859_v6 = vld [vmem:[%s11232_s25 + $0x644] ss:$8 sps:$4 sm:$0xff]  }
 0x27a   : > { %8233 = vmatprep.subr.bf16.mxu0 %v9778_v7  ;;  %v9862_v7 = vld [vmem:[%s11232_s25 + $0xe44] ss:$8 sps:$4 sm:$0xff]  }
 0x27c   : > { %7890 = vmatpush1.bf16.msra.mxu1 %v9773_v8  ;;  %v9857_v8 = vld [vmem:[%s11232_s25 + $0x640] ss:$8 sps:$4 sm:$0xff]  }
 0x27d   : > { %8234 = vmatpush1.bf16.msra.mxu0 %v9776_v9  ;;  %7891 = vmatprep.subr.bf16.mxu1 %v9781_v10  ;;  %v9860_v9 = vld [vmem:[%s11232_s25 + $0xe40] ss:$8 sps:$4 sm:$0xff]   ;;  %v9865_v10 = vld [vmem:[%s11232_s25 + $0x654] ss:$8 sps:$4 sm:$0xff]  }
 0x27e   : > { %8235 = vmatprep.subr.bf16.mxu0 %v9784_v11  ;;  %v9868_v11 = vld [vmem:[%s11232_s25 + $0xe54] ss:$8 sps:$4 sm:$0xff]  }
 0x280   : > { %7892 = vmatpush1.bf16.msra.mxu1 %v9779_v12  ;;  %v9863_v12 = vld [vmem:[%s11232_s25 + $0x650] ss:$8 sps:$4 sm:$0xff]  }
 0x281   : > { %8236 = vmatpush1.bf16.msra.mxu0 %v9782_v13  ;;  %7893 = vmatprep.subr.bf16.mxu1 %v9787_v14  ;;  %v9866_v13 = vld [vmem:[%s11232_s25 + $0xe50] ss:$8 sps:$4 sm:$0xff]   ;;  %v9871_v14 = vld [vmem:[%s11232_s25 + $0x664] ss:$8 sps:$4 sm:$0xff]  }
 0x282   : > { %8237 = vmatprep.subr.bf16.mxu0 %v9790_v15  ;;  %v9874_v15 = vld [vmem:[%s11232_s25 + $0xe64] ss:$8 sps:$4 sm:$0xff]  }
 0x284   : > { %7894 = vmatpush1.bf16.msra.mxu1 %v9785_v16  ;;  %v9869_v16 = vld [vmem:[%s11232_s25 + $0x660] ss:$8 sps:$4 sm:$0xff]  }
 0x285   : > { %8238 = vmatpush1.bf16.msra.mxu0 %v9788_v17  ;;  %7895 = vmatprep.subr.bf16.mxu1 %v9793_v18  ;;  %v9872_v17 = vld [vmem:[%s11232_s25 + $0xe60] ss:$8 sps:$4 sm:$0xff]   ;;  %v9877_v18 = vld [vmem:[%s11232_s25 + $0x674] ss:$8 sps:$4 sm:$0xff]  }
 0x286   : > { %8239 = vmatprep.subr.bf16.mxu0 %v9796_v19  ;;  %v9880_v19 = vld [vmem:[%s11232_s25 + $0xe74] ss:$8 sps:$4 sm:$0xff]  }
 0x288   : > { %7896 = vmatpush1.bf16.msra.mxu1 %v9791_v20  ;;  %v9875_v20 = vld [vmem:[%s11232_s25 + $0x670] ss:$8 sps:$4 sm:$0xff]  }
 0x289   : > { %8240 = vmatpush1.bf16.msra.mxu0 %v9794_v21  ;;  %7897 = vmatprep.subr.bf16.mxu1 %v9799_v22  ;;  %v9878_v21 = vld [vmem:[%s11232_s25 + $0xe70] ss:$8 sps:$4 sm:$0xff]   ;;  %v9883_v22 = vld [vmem:[%s11232_s25 + $0x684] ss:$8 sps:$4 sm:$0xff]  }
 0x28a   : > { %8241 = vmatprep.subr.bf16.mxu0 %v9802_v23  ;;  %v9886_v23 = vld [vmem:[%s11232_s25 + $0xe84] ss:$8 sps:$4 sm:$0xff]  }
 0x28c   : > { %7898 = vmatpush1.bf16.msra.mxu1 %v9797_v26  ;;  %v9881_v26 = vld [vmem:[%s11232_s25 + $0x680] ss:$8 sps:$4 sm:$0xff]  }
 0x28d   : > { %8242 = vmatpush1.bf16.msra.mxu0 %v9800_v27  ;;  %7899 = vmatprep.subr.bf16.mxu1 %v9805_v32  ;;  %v9884_v27 = vld [vmem:[%s11232_s25 + $0xe80] ss:$8 sps:$4 sm:$0xff]   ;;  %v9889_v32 = vld [vmem:[%s11232_s25 + $0x694] ss:$8 sps:$4 sm:$0xff]  }
 0x28e   : > { %8243 = vmatprep.subr.bf16.mxu0 %v9808_v33  ;;  %v9892_v33 = vld [vmem:[%s11232_s25 + $0xe94] ss:$8 sps:$4 sm:$0xff]  }
 0x290   : > { %7900 = vmatpush1.bf16.msra.mxu1 %v9803_v36  ;;  %v9887_v36 = vld [vmem:[%s11232_s25 + $0x690] ss:$8 sps:$4 sm:$0xff]  }
 0x291   : > { %8244 = vmatpush1.bf16.msra.mxu0 %v9806_v37  ;;  %7901 = vmatprep.subr.bf16.mxu1 %v9811_v24  ;;  %v9890_v37 = vld [vmem:[%s11232_s25 + $0xe90] ss:$8 sps:$4 sm:$0xff]   ;;  %v9895_v24 = vld [vmem:[%s11232_s25 + $0x6a4] ss:$8 sps:$4 sm:$0xff]  }
 0x292   : > { %8245 = vmatprep.subr.bf16.mxu0 %v9814_v25  ;;  %v9898_v25 = vld [vmem:[%s11232_s25 + $0xea4] ss:$8 sps:$4 sm:$0xff]  }
 0x294   : > { %7902 = vmatpush1.bf16.msra.mxu1 %v9809_v29  ;;  %v9893_v29 = vld [vmem:[%s11232_s25 + $0x6a0] ss:$8 sps:$4 sm:$0xff]  }
 0x295   : > { %8246 = vmatpush1.bf16.msra.mxu0 %v9812_v30  ;;  %7903 = vmatprep.subr.bf16.mxu1 %v9817_v40  ;;  %v9896_v30 = vld [vmem:[%s11232_s25 + $0xea0] ss:$8 sps:$4 sm:$0xff]   ;;  %v9901_v40 = vld [vmem:[%s11232_s25 + $0x6b4] ss:$8 sps:$4 sm:$0xff]  }
 0x296   : > { %8247 = vmatprep.subr.bf16.mxu0 %v9820_v41  ;;  %v9904_v41 = vld [vmem:[%s11232_s25 + $0xeb4] ss:$8 sps:$4 sm:$0xff]  }
 0x298   : > { %7904 = vmatpush1.bf16.msra.mxu1 %v9815_v44  ;;  %v9899_v44 = vld [vmem:[%s11232_s25 + $0x6b0] ss:$8 sps:$4 sm:$0xff]  }
 0x299   : > { %8248 = vmatpush1.bf16.msra.mxu0 %v9818_v45  ;;  %7905 = vmatprep.subr.bf16.mxu1 %v9823_v46  ;;  %v9902_v45 = vld [vmem:[%s11232_s25 + $0xeb0] ss:$8 sps:$4 sm:$0xff]   ;;  %v9907_v46 = vld [vmem:[%s11232_s25 + $0x6c4] ss:$8 sps:$4 sm:$0xff]  }
 0x29a   : > { %8249 = vmatprep.subr.bf16.mxu0 %v9826_v28  ;;  %v9910_v28 = vld [vmem:[%s11232_s25 + $0xec4] ss:$8 sps:$4 sm:$0xff]  }
 0x29c   : > { %7906 = vmatpush1.bf16.msra.mxu1 %v9821_v48  ;;  %v9905_v48 = vld [vmem:[%s11232_s25 + $0x6c0] ss:$8 sps:$4 sm:$0xff]  }
 0x29d   : > { %8250 = vmatpush1.bf16.msra.mxu0 %v9824_v49  ;;  %7907 = vmatprep.subr.bf16.mxu1 %v9829_v50  ;;  %v9908_v49 = vld [vmem:[%s11232_s25 + $0xec0] ss:$8 sps:$4 sm:$0xff]   ;;  %v9913_v50 = vld [vmem:[%s11232_s25 + $0x6d4] ss:$8 sps:$4 sm:$0xff]  }
 0x29e   : > { %8251 = vmatprep.subr.bf16.mxu0 %v9832_v51  ;;  %v9916_v51 = vld [vmem:[%s11232_s25 + $0xed4] ss:$8 sps:$4 sm:$0xff]  }
 0x2a0   : > { %7908 = vmatpush1.bf16.msra.mxu1 %v9827_v52  ;;  %v9911_v52 = vld [vmem:[%s11232_s25 + $0x6d0] ss:$8 sps:$4 sm:$0xff]  }
 0x2a1   : > { %8252 = vmatpush1.bf16.msra.mxu0 %v9830_v53  ;;  %7920 = vmatprep.subr.bf16.mxu1 %v9835_v54  ;;  %v9914_v53 = vld [vmem:[%s11232_s25 + $0xed0] ss:$8 sps:$4 sm:$0xff]   ;;  %v9919_v54 = vld [vmem:[%s11232_s25 + $0x6e4] ss:$8 sps:$4 sm:$0xff]  }
 0x2a2   : > { %8264 = vmatprep.subr.bf16.mxu0 %v9838_v38  ;;  %v9922_v38 = vld [vmem:[%s11232_s25 + $0xee4] ss:$8 sps:$4 sm:$0xff]  }
 0x2a3   : > { %7910 = vmatmul.mubr.bf16.vlgmr.msra.gmra.mrb[0].mxu1 %v8579_v42  ;;  %v9917_v42 = vld [vmem:[%s11232_s25 + $0x6e0] ss:$8 sps:$4 sm:$0xff]  }
 0x2a4   : > { %8254 = vmatmul.mubr.bf16.vlgmr.msra.gmra.mrb[0].mxu0 %v8595_v43  ;;  %7921 = vmatpush1.bf16.msra.mxu1 %v9833_v58  ;;  %v9920_v43 = vld [vmem:[%s11232_s25 + $0xee0] ss:$8 sps:$4 sm:$0xff]   ;;  %v9925_v58 = vld [vmem:[%s11232_s25 + $0x6f4] ss:$8 sps:$4 sm:$0xff]  }
 0x2a5   : > { %8265 = vmatpush1.bf16.msra.mxu0 %v9836_v59  ;;  %7922 = vmatprep.subr.bf16.mxu1 %v9841_v31  ;;  %v9928_v59 = vld [vmem:[%s11232_s25 + $0xef4] ss:$8 sps:$4 sm:$0xff]   ;;  %v9923_v31 = vld [vmem:[%s11232_s25 + $0x6f0] ss:$8 sps:$4 sm:$0xff]  }
 0x2a6   : > { %8266 = vmatprep.subr.bf16.mxu0 %v9844_v34  ;;  %7952 = vmatprep.mubr.bf16.mxu1 %v8582_v35  ;;  %v9926_v34 = vld [vmem:[%s11232_s25 + $0xef0] ss:$8 sps:$4 sm:$0xff]   ;;  %v9931_v35 = vld [vmem:[%s11232_s25 + $0x704] ss:$8 sps:$4 sm:$0xff]  }
 0x2a7   : > { %8296 = vmatprep.mubr.bf16.mxu0 %v8598_v47  ;;  %v9934_v47 = vld [vmem:[%s11232_s25 + $0xf04] ss:$8 sps:$4 sm:$0xff]  }
 0x2a8   : > { %7923 = vmatpush1.bf16.msra.mxu1 %v9839_v60  ;;  %v11812_v60 = vld [vmem:[%s11283_s5 + $0x38] sm:$0xff] }
 0x2a9   : > { %8267 = vmatpush1.bf16.msra.mxu0 %v9842_v61  ;;  %7924 = vmatprep.subr.bf16.mxu1 %v9847_v62  ;;  %v8581_v61 = vcombine.low %v11728_v39, %v11735_v55  ;;  %v8597_v62 = vcombine.low %v11738_v56, %v11741_v57  ;;  %v9937_v39 = vld [vmem:[%s11232_s25 + $0x714] ss:$8 sps:$4 sm:$0xff]  }
 0x2aa   : > { %8268 = vmatprep.subr.bf16.mxu0 %v9850_v63  ;;  %v11819_v63 = vld [vmem:[%s11283_s5 + $0xb8] sm:$0xff] }
 0x2ab   : > { %v9940_v55 = vld [vmem:[%s11232_s25 + $0xf14] ss:$8 sps:$4 sm:$0xff]   ;;  %v8584_v56 = vcombine.high %v11812_v60, %v11819_v63 }
 0x2ac   : > { %7925 = vmatpush1.bf16.msra.mxu1 %v9845_v0  ;;  %v11822_v0 = vld [vmem:[%s11283_s5 + $0x78] sm:$0xff] }
 0x2ad   : > { %8269 = vmatpush1.bf16.msra.mxu0 %v9848_v1  ;;  %7926 = vmatprep.subr.bf16.mxu1 %v9853_v2  ;;  %v11825_v1 = vld [vmem:[%s11283_s5 + $0xf8] sm:$0xff]  ;;  %v9929_v2 = vld [vmem:[%s11232_s25 + $0x700] ss:$8 sps:$4 sm:$0xff]  }
 0x2ae   : > { %8270 = vmatprep.subr.bf16.mxu0 %v9856_v3  ;;  %v9932_v3 = vld [vmem:[%s11232_s25 + $0xf00] ss:$8 sps:$4 sm:$0xff]   ;;  %v8600_v57 = vcombine.high %v11822_v0, %v11825_v1 }
 0x2b0   : > { %7927 = vmatpush1.bf16.msra.mxu1 %v9851_v4  ;;  %v9935_v4 = vld [vmem:[%s11232_s25 + $0x710] ss:$8 sps:$4 sm:$0xff]  }
 0x2b1   : > { %8271 = vmatpush1.bf16.msra.mxu0 %v9854_v5  ;;  %7928 = vmatprep.subr.bf16.mxu1 %v9859_v6  ;;  %v9938_v5 = vld [vmem:[%s11232_s25 + $0xf10] ss:$8 sps:$4 sm:$0xff]   ;;  %v9943_v6 = vld [vmem:[%s11232_s25 + $0x724] ss:$8 sps:$4 sm:$0xff]  }
 0x2b2   : > { %8272 = vmatprep.subr.bf16.mxu0 %v9862_v7  ;;  %v9946_v7 = vld [vmem:[%s11232_s25 + $0xf24] ss:$8 sps:$4 sm:$0xff]  }
 0x2b4   : > { %7929 = vmatpush1.bf16.msra.mxu1 %v9857_v8  ;;  %v9941_v8 = vld [vmem:[%s11232_s25 + $0x720] ss:$8 sps:$4 sm:$0xff]  }
 0x2b5   : > { %8273 = vmatpush1.bf16.msra.mxu0 %v9860_v9  ;;  %7930 = vmatprep.subr.bf16.mxu1 %v9865_v10  ;;  %v9944_v9 = vld [vmem:[%s11232_s25 + $0xf20] ss:$8 sps:$4 sm:$0xff]   ;;  %v9949_v10 = vld [vmem:[%s11232_s25 + $0x734] ss:$8 sps:$4 sm:$0xff]  }
 0x2b6   : > { %8274 = vmatprep.subr.bf16.mxu0 %v9868_v11  ;;  %v9952_v11 = vld [vmem:[%s11232_s25 + $0xf34] ss:$8 sps:$4 sm:$0xff]  }
 0x2b8   : > { %7931 = vmatpush1.bf16.msra.mxu1 %v9863_v12  ;;  %v9947_v12 = vld [vmem:[%s11232_s25 + $0x730] ss:$8 sps:$4 sm:$0xff]  }
 0x2b9   : > { %8275 = vmatpush1.bf16.msra.mxu0 %v9866_v13  ;;  %7932 = vmatprep.subr.bf16.mxu1 %v9871_v14  ;;  %v9950_v13 = vld [vmem:[%s11232_s25 + $0xf30] ss:$8 sps:$4 sm:$0xff]   ;;  %v9955_v14 = vld [vmem:[%s11232_s25 + $0x744] ss:$8 sps:$4 sm:$0xff]  }
 0x2ba   : > { %8276 = vmatprep.subr.bf16.mxu0 %v9874_v15  ;;  %v9958_v15 = vld [vmem:[%s11232_s25 + $0xf44] ss:$8 sps:$4 sm:$0xff]  }
 0x2bc   : > { %7933 = vmatpush1.bf16.msra.mxu1 %v9869_v16  ;;  %v9953_v16 = vld [vmem:[%s11232_s25 + $0x740] ss:$8 sps:$4 sm:$0xff]  }
 0x2bd   : > { %8277 = vmatpush1.bf16.msra.mxu0 %v9872_v17  ;;  %7934 = vmatprep.subr.bf16.mxu1 %v9877_v18  ;;  %v9956_v17 = vld [vmem:[%s11232_s25 + $0xf40] ss:$8 sps:$4 sm:$0xff]   ;;  %v9961_v18 = vld [vmem:[%s11232_s25 + $0x754] ss:$8 sps:$4 sm:$0xff]  }
 0x2be   : > { %8278 = vmatprep.subr.bf16.mxu0 %v9880_v19  ;;  %v9964_v19 = vld [vmem:[%s11232_s25 + $0xf54] ss:$8 sps:$4 sm:$0xff]  }
 0x2c0   : > { %7935 = vmatpush1.bf16.msra.mxu1 %v9875_v20  ;;  %v9959_v20 = vld [vmem:[%s11232_s25 + $0x750] ss:$8 sps:$4 sm:$0xff]  }
 0x2c1   : > { %8279 = vmatpush1.bf16.msra.mxu0 %v9878_v21  ;;  %7936 = vmatprep.subr.bf16.mxu1 %v9883_v22  ;;  %v9962_v21 = vld [vmem:[%s11232_s25 + $0xf50] ss:$8 sps:$4 sm:$0xff]   ;;  %v9967_v22 = vld [vmem:[%s11232_s25 + $0x764] ss:$8 sps:$4 sm:$0xff]  }
 0x2c2   : > { %8280 = vmatprep.subr.bf16.mxu0 %v9886_v23  ;;  %v9970_v23 = vld [vmem:[%s11232_s25 + $0xf64] ss:$8 sps:$4 sm:$0xff]  }
 0x2c4   : > { %7937 = vmatpush1.bf16.msra.mxu1 %v9881_v26  ;;  %v9965_v26 = vld [vmem:[%s11232_s25 + $0x760] ss:$8 sps:$4 sm:$0xff]  }
 0x2c5   : > { %8281 = vmatpush1.bf16.msra.mxu0 %v9884_v27  ;;  %7938 = vmatprep.subr.bf16.mxu1 %v9889_v32  ;;  %v9968_v27 = vld [vmem:[%s11232_s25 + $0xf60] ss:$8 sps:$4 sm:$0xff]   ;;  %v9973_v32 = vld [vmem:[%s11232_s25 + $0x774] ss:$8 sps:$4 sm:$0xff]  }
 0x2c6   : > { %8282 = vmatprep.subr.bf16.mxu0 %v9892_v33  ;;  %v9976_v33 = vld [vmem:[%s11232_s25 + $0xf74] ss:$8 sps:$4 sm:$0xff]  }
 0x2c8   : > { %7939 = vmatpush1.bf16.msra.mxu1 %v9887_v36  ;;  %v9971_v36 = vld [vmem:[%s11232_s25 + $0x770] ss:$8 sps:$4 sm:$0xff]  }
 0x2c9   : > { %8283 = vmatpush1.bf16.msra.mxu0 %v9890_v37  ;;  %7940 = vmatprep.subr.bf16.mxu1 %v9895_v24  ;;  %v9974_v37 = vld [vmem:[%s11232_s25 + $0xf70] ss:$8 sps:$4 sm:$0xff]   ;;  %v9979_v24 = vld [vmem:[%s11232_s25 + $0x784] ss:$8 sps:$4 sm:$0xff]  }
 0x2ca   : > { %8284 = vmatprep.subr.bf16.mxu0 %v9898_v25  ;;  %v9982_v25 = vld [vmem:[%s11232_s25 + $0xf84] ss:$8 sps:$4 sm:$0xff]  }
 0x2cc   : > { %7941 = vmatpush1.bf16.msra.mxu1 %v9893_v29  ;;  %v9977_v29 = vld [vmem:[%s11232_s25 + $0x780] ss:$8 sps:$4 sm:$0xff]  }
 0x2cd   : > { %8285 = vmatpush1.bf16.msra.mxu0 %v9896_v30  ;;  %7942 = vmatprep.subr.bf16.mxu1 %v9901_v40  ;;  %v9980_v30 = vld [vmem:[%s11232_s25 + $0xf80] ss:$8 sps:$4 sm:$0xff]   ;;  %v9985_v40 = vld [vmem:[%s11232_s25 + $0x794] ss:$8 sps:$4 sm:$0xff]  }
 0x2ce   : > { %8286 = vmatprep.subr.bf16.mxu0 %v9904_v41  ;;  %v9988_v41 = vld [vmem:[%s11232_s25 + $0xf94] ss:$8 sps:$4 sm:$0xff]  }
 0x2d0   : > { %7943 = vmatpush1.bf16.msra.mxu1 %v9899_v44  ;;  %v9983_v44 = vld [vmem:[%s11232_s25 + $0x790] ss:$8 sps:$4 sm:$0xff]  }
 0x2d1   : > { %8287 = vmatpush1.bf16.msra.mxu0 %v9902_v45  ;;  %7944 = vmatprep.subr.bf16.mxu1 %v9907_v46  ;;  %v9986_v45 = vld [vmem:[%s11232_s25 + $0xf90] ss:$8 sps:$4 sm:$0xff]   ;;  %v9991_v46 = vld [vmem:[%s11232_s25 + $0x7a4] ss:$8 sps:$4 sm:$0xff]  }
 0x2d2   : > { %8288 = vmatprep.subr.bf16.mxu0 %v9910_v28  ;;  %v9994_v28 = vld [vmem:[%s11232_s25 + $0xfa4] ss:$8 sps:$4 sm:$0xff]  }
 0x2d4   : > { %7945 = vmatpush1.bf16.msra.mxu1 %v9905_v48  ;;  %v9989_v48 = vld [vmem:[%s11232_s25 + $0x7a0] ss:$8 sps:$4 sm:$0xff]  }
 0x2d5   : > { %8289 = vmatpush1.bf16.msra.mxu0 %v9908_v49  ;;  %7946 = vmatprep.subr.bf16.mxu1 %v9913_v50  ;;  %v9992_v49 = vld [vmem:[%s11232_s25 + $0xfa0] ss:$8 sps:$4 sm:$0xff]   ;;  %v9997_v50 = vld [vmem:[%s11232_s25 + $0x7b4] ss:$8 sps:$4 sm:$0xff]  }
 0x2d6   : > { %8290 = vmatprep.subr.bf16.mxu0 %v9916_v51  ;;  %v10000_v51 = vld [vmem:[%s11232_s25 + $0xfb4] ss:$8 sps:$4 sm:$0xff]  }
 0x2d8   : > { %7947 = vmatpush1.bf16.msra.mxu1 %v9911_v52  ;;  %v9995_v52 = vld [vmem:[%s11232_s25 + $0x7b0] ss:$8 sps:$4 sm:$0xff]  }
 0x2d9   : > { %8291 = vmatpush1.bf16.msra.mxu0 %v9914_v53  ;;  %7948 = vmatprep.subr.bf16.mxu1 %v9919_v54  ;;  %v9998_v53 = vld [vmem:[%s11232_s25 + $0xfb0] ss:$8 sps:$4 sm:$0xff]   ;;  %v10003_v54 = vld [vmem:[%s11232_s25 + $0x7c4] ss:$8 sps:$4 sm:$0xff]  }
 0x2da   : > { %8292 = vmatprep.subr.bf16.mxu0 %v9922_v38  ;;  %v10006_v38 = vld [vmem:[%s11232_s25 + $0xfc4] ss:$8 sps:$4 sm:$0xff]  }
 0x2dc   : > { %7949 = vmatpush1.bf16.msra.mxu1 %v9917_v42  ;;  %v10001_v42 = vld [vmem:[%s11232_s25 + $0x7c0] ss:$8 sps:$4 sm:$0xff]  }
 0x2dd   : > { %8293 = vmatpush1.bf16.msra.mxu0 %v9920_v43  ;;  %7950 = vmatprep.subr.bf16.mxu1 %v9925_v58  ;;  %v10004_v43 = vld [vmem:[%s11232_s25 + $0xfc0] ss:$8 sps:$4 sm:$0xff]   ;;  %v10009_v58 = vld [vmem:[%s11232_s25 + $0x7d4] ss:$8 sps:$4 sm:$0xff]  }
 0x2de   : > { %8294 = vmatprep.subr.bf16.mxu0 %v9928_v59  ;;  %v10012_v59 = vld [vmem:[%s11232_s25 + $0xfd4] ss:$8 sps:$4 sm:$0xff]  }
 0x2e0   : > { %7951 = vmatpush1.bf16.msra.mxu1 %v9923_v31  ;;  %v10007_v31 = vld [vmem:[%s11232_s25 + $0x7d0] ss:$8 sps:$4 sm:$0xff]  }
 0x2e1   : > { %8295 = vmatpush1.bf16.msra.mxu0 %v9926_v34  ;;  %7963 = vmatprep.subr.bf16.mxu1 %v9931_v35  ;;  %v10010_v34 = vld [vmem:[%s11232_s25 + $0xfd0] ss:$8 sps:$4 sm:$0xff]   ;;  %v10015_v35 = vld [vmem:[%s11232_s25 + $0x7e4] ss:$8 sps:$4 sm:$0xff]  }
 0x2e2   : > { %8307 = vmatprep.subr.bf16.mxu0 %v9934_v47  ;;  %v10018_v47 = vld [vmem:[%s11232_s25 + $0xfe4] ss:$8 sps:$4 sm:$0xff]  }
 0x2e3   : > { %7953 = vmatmul.mubr.bf16.vlgmr.msra.gmra.mrb[0].mxu1 %v8581_v61  ;;  %v10013_v61 = vld [vmem:[%s11232_s25 + $0x7e0] ss:$8 sps:$4 sm:$0xff]  }
 0x2e4   : > { %8297 = vmatmul.mubr.bf16.vlgmr.msra.gmra.mrb[0].mxu0 %v8597_v62  ;;  %7964 = vmatpush1.bf16.msra.mxu1 %v9929_v2  ;;  %v10016_v62 = vld [vmem:[%s11232_s25 + $0xfe0] ss:$8 sps:$4 sm:$0xff]   ;;  %v10021_v2 = vld [vmem:[%s11232_s25 + $0x7f4] ss:$8 sps:$4 sm:$0xff]  }
 0x2e5   : > { %8308 = vmatpush1.bf16.msra.mxu0 %v9932_v3  ;;  %7965 = vmatprep.subr.bf16.mxu1 %v9937_v39  ;;  %v10024_v3 = vld [vmem:[%s11232_s25 + $0xff4] ss:$8 sps:$4 sm:$0xff]   ;;  %v10019_v39 = vld [vmem:[%s11232_s25 + $0x7f0] ss:$8 sps:$4 sm:$0xff]  }
 0x2e6   : > { %8309 = vmatprep.subr.bf16.mxu0 %v9940_v55  ;;  %7995 = vmatprep.mubr.bf16.mxu1 %v8584_v56  ;;  %v10022_v55 = vld [vmem:[%s11232_s25 + $0xff0] ss:$8 sps:$4 sm:$0xff]   ;;  %v8583_v56 = vcombine.low %v11812_v60, %v11819_v63  ;;  %v4930_v63 = vld [vmem:[%s4383_s10] sm:$0x3]  ;;  %s9116_s25 = sshll.u32 (%p10188_p9), %s8429_s24, 3 }
 0x2e7   : > { %8339 = vmatprep.mubr.bf16.mxu0 %v8600_v57  ;;  %v8599_v57 = vcombine.low %v11822_v0, %v11825_v1  ;;  %s8431_s28 = scalar_lea.vmem (%p10188_p9), %s11949_s3, %s9116_s25 }
 0x2e8   : > { %7966 = vmatpush1.bf16.msra.mxu1 %v9935_v4  ;;  %v4932_v4 = vlaneseq }
 0x2e9   : > { %8310 = vmatpush1.bf16.msra.mxu0 %v9938_v5  ;;  %7967 = vmatprep.subr.bf16.mxu1 %v9943_v6 }
 0x2ea   : > { %8311 = vmatprep.subr.bf16.mxu0 %v9946_v7  ;;  %v4933_v5 = vshrl.u32 %v4932_v4, 7 }
 0x2ec   : > { %7968 = vmatpush1.bf16.msra.mxu1 %v9941_v8  ;;  %v4934_v60 = vsub.s32 0, %v4933_v5  ;;  %v4938_v6 = vsub.s32 1, %v4933_v5 }
 0x2ed   : > { %8312 = vmatpush1.bf16.msra.mxu0 %v9944_v9  ;;  %7969 = vmatprep.subr.bf16.mxu1 %v9949_v10 }
 0x2ee   : > { %8313 = vmatprep.subr.bf16.mxu0 %v9952_v11  ;;  %v4935_v0 = vrot.slane %v4930_v63, %v4934_v60  ;;  %v4939_v1 = vrot.slane %v4930_v63, %v4938_v6 }
 0x2f0   : > { %7970 = vmatpush1.bf16.msra.mxu1 %v9947_v12 }
 0x2f1   : > { %8314 = vmatpush1.bf16.msra.mxu0 %v9950_v13  ;;  %7971 = vmatprep.subr.bf16.mxu1 %v9955_v14 }
 0x2f2   : > { %8315 = vmatprep.subr.bf16.mxu0 %v9958_v15 }
 0x2f4   : > { %7972 = vmatpush1.bf16.msra.mxu1 %v9953_v16 }
 0x2f5   : > { %8316 = vmatpush1.bf16.msra.mxu0 %v9956_v17  ;;  %7973 = vmatprep.subr.bf16.mxu1 %v9961_v18 }
 0x2f6   : > { %8317 = vmatprep.subr.bf16.mxu0 %v9964_v19 }
 0x2f8   : > { %7974 = vmatpush1.bf16.msra.mxu1 %v9959_v20 }
 0x2f9   : > { %8318 = vmatpush1.bf16.msra.mxu0 %v9962_v21  ;;  %7975 = vmatprep.subr.bf16.mxu1 %v9967_v22 }
 0x2fa   : > { %8319 = vmatprep.subr.bf16.mxu0 %v9970_v23 }
 0x2fc   : > { %7976 = vmatpush1.bf16.msra.mxu1 %v9965_v26 }
 0x2fd   : > { %8320 = vmatpush1.bf16.msra.mxu0 %v9968_v27  ;;  %7977 = vmatprep.subr.bf16.mxu1 %v9973_v32 }
 0x2fe   : > { %8321 = vmatprep.subr.bf16.mxu0 %v9976_v33 }
 0x300   : > { %7978 = vmatpush1.bf16.msra.mxu1 %v9971_v36 }
 0x301   : > { %8322 = vmatpush1.bf16.msra.mxu0 %v9974_v37  ;;  %7979 = vmatprep.subr.bf16.mxu1 %v9979_v24 }
 0x302   : > { %8323 = vmatprep.subr.bf16.mxu0 %v9982_v25 }
 0x304   : > { %7980 = vmatpush1.bf16.msra.mxu1 %v9977_v29 }
 0x305   : > { %8324 = vmatpush1.bf16.msra.mxu0 %v9980_v30  ;;  %7981 = vmatprep.subr.bf16.mxu1 %v9985_v40 }
 0x306   : > { %8325 = vmatprep.subr.bf16.mxu0 %v9988_v41 }
 0x308   : > { %7982 = vmatpush1.bf16.msra.mxu1 %v9983_v44 }
 0x309   : > { %8326 = vmatpush1.bf16.msra.mxu0 %v9986_v45  ;;  %7983 = vmatprep.subr.bf16.mxu1 %v9991_v46 }
 0x30a   : > { %8327 = vmatprep.subr.bf16.mxu0 %v9994_v28 }
 0x30c   : > { %7984 = vmatpush1.bf16.msra.mxu1 %v9989_v48 }
 0x30d   : > { %8328 = vmatpush1.bf16.msra.mxu0 %v9992_v49  ;;  %7985 = vmatprep.subr.bf16.mxu1 %v9997_v50 }
 0x30e   : > { %8329 = vmatprep.subr.bf16.mxu0 %v10000_v51 }
 0x310   : > { %7986 = vmatpush1.bf16.msra.mxu1 %v9995_v52 }
 0x311   : > { %8330 = vmatpush1.bf16.msra.mxu0 %v9998_v53  ;;  %7987 = vmatprep.subr.bf16.mxu1 %v10003_v54 }
 0x312   : > { %8331 = vmatprep.subr.bf16.mxu0 %v10006_v38 }
 0x314   : > { %7988 = vmatpush1.bf16.msra.mxu1 %v10001_v42 }
 0x315   : > { %8332 = vmatpush1.bf16.msra.mxu0 %v10004_v43  ;;  %7989 = vmatprep.subr.bf16.mxu1 %v10009_v58 }
 0x316   : > { %8333 = vmatprep.subr.bf16.mxu0 %v10012_v59 }
 0x318   : > { %7990 = vmatpush1.bf16.msra.mxu1 %v10007_v31 }
 0x319   : > { %8334 = vmatpush1.bf16.msra.mxu0 %v10010_v34  ;;  %7991 = vmatprep.subr.bf16.mxu1 %v10015_v35 }
 0x31a   : > { %8335 = vmatprep.subr.bf16.mxu0 %v10018_v47 }
 0x31c   : > { %7992 = vmatpush1.bf16.msra.mxu1 %v10013_v61 }
 0x31d   : > { %8336 = vmatpush1.bf16.msra.mxu0 %v10016_v62  ;;  %7993 = vmatprep.subr.bf16.mxu1 %v10021_v2 }
 0x31e   : > { %8337 = vmatprep.subr.bf16.mxu0 %v10024_v3 }
 0x320   : > { %7994 = vmatpush1.bf16.msra.mxu1 %v10019_v39 }
 0x321   : > { %8338 = vmatpush1.bf16.msra.mxu0 %v10022_v55 }
 0x323   : > { %7996 = vmatmul.mubr.bf16.vlgmr.msra.gmra.mrb[0].mxu1 %v8583_v56 }
 0x324   : > { %8340 = vmatmul.mubr.bf16.vlgmr.msra.gmra.mrb[0].mxu0 %v8599_v57 }
 0x3f6   : > { %v7997_v7 = vpop.f32.mrb[0].mxu1 }
 0x3f7   : > { %v8341_v8 = vpop.f32.mrb[0].mxu0  ;;  %v9121_v9 = vadd.f32 %v7997_v7, %v4935_v0  ;;  %v7999_v10 = vpop.f32.mrb[1].mxu1 }
 0x3f8   : > { %v8343_v11 = vpop.f32.mrb[1].mxu0  ;;  %v9123_v12 = vadd.f32 %v7999_v10, %v4939_v1  ;;  %v8001_v13 = vpop.f32.mrb[2].mxu1 }
 0x3f9   : > { %v8345_v14 = vpop.f32.mrb[2].mxu0  ;;  %v11905_v15 = vadd.f32 %v9121_v9, %v8341_v8  ;;  %v9125_v16 = vadd.f32 %v8001_v13, %v4935_v0  ;;  %v8003_v17 = vpop.f32.mrb[3].mxu1 }
 0x3fa   : > { %v8347_v18 = vpop.f32.mrb[3].mxu0  ;;  %v9124_v19 = vadd.f32 %v9123_v12, %v8343_v11  ;;  %v9127_v20 = vadd.f32 %v8003_v17, %v4939_v1 }
 0x3fb   : > { %v9126_v21 = vadd.f32 %v9125_v16, %v8345_v14  ;;  %v8364_v23 = vmul.f32 %v11905_v15, %v11905_v15 }
 0x3fc   : > { %v9128_v22 = vadd.f32 %v9127_v20, %v8347_v18  ;;  %v8365_v32 = vmul.f32 %v9124_v19, %v9124_v19 }
 0x3fd   : > { %v8350_v26 = vadd.f32 %v9126_v21, %v11905_v15  ;;  %v8366_v27 = vmul.f32 %v9126_v21, %v9126_v21 }
 0x3fe   : > { %v8357_v33 = vadd.f32 %v9128_v22, %v9124_v19  ;;  %v8367_v36 = vmul.f32 %v9128_v22, %v9128_v22 }
 0x3ff   : > { %v8351_v37 = vrot.slane %v8350_v26, 4  ;;  %v8368_v24 = vadd.f32 %v8366_v27, %v8364_v23 }
 0x400   : > { %v8358_v25 = vrot.slane %v8357_v33, 4  ;;  %v8375_v29 = vadd.f32 %v8367_v36, %v8365_v32 }
 0x401   : > { %v8352_v30 = vadd.f32 %v8351_v37, %v8350_v26  ;;  %v8369_v40 = vrot.slane %v8368_v24, 4 }
 0x402   : > { %v8359_v41 = vadd.f32 %v8358_v25, %v8357_v33  ;;  %v8376_v44 = vrot.slane %v8375_v29, 4 }
 0x403   : > { %v8353_v45 = vrot.slane %v8352_v30, 2  ;;  %v8370_v46 = vadd.f32 %v8369_v40, %v8368_v24 }
 0x404   : > { %v8360_v28 = vrot.slane %v8359_v41, 2  ;;  %v8377_v48 = vadd.f32 %v8376_v44, %v8375_v29 }
 0x405   : > { %v8354_v49 = vadd.f32 %v8353_v45, %v8352_v30  ;;  %v8371_v50 = vrot.slane %v8370_v46, 2 }
 0x406   : > { %v8361_v51 = vadd.f32 %v8360_v28, %v8359_v41  ;;  %v8378_v52 = vrot.slane %v8377_v48, 2 }
 0x407   : > { %v8355_v53 = vrot.slane %v8354_v49, 1  ;;  %v8372_v54 = vadd.f32 %v8371_v50, %v8370_v46 }
 0x408   : > { %v8362_v38 = vrot.slane %v8361_v51, 1  ;;  %v8379_v42 = vadd.f32 %v8378_v52, %v8377_v48 }
 0x409   : > { %v8356_v43 = vadd.f32 %v8355_v53, %v8354_v49  ;;  %v8373_v58 = vrot.slane %v8372_v54, 1 }
 0x40a   : > { %v8363_v59 = vadd.f32 %v8362_v38, %v8361_v51  ;;  %v8380_v31 = vrot.slane %v8379_v42, 1 }
 0x40b   : > { %v8374_v34 = vadd.f32 %v8373_v58, %v8372_v54  ;;  %v8382_v35 = vmul.f32 0.0625, %v8356_v43 }
 0x40c   : > { %v8381_v47 = vadd.f32 %v8380_v31, %v8379_v42  ;;  %v8383_v61 = vmul.f32 0.0625, %v8363_v59 }
 0x40d   : > { %v8384_v62 = vmul.f32 0.0625, %v8374_v34  ;;  %v8386_v2 = vmul.f32 %v8382_v35, %v8382_v35  ;;  %v8392_v3 = vsub.f32 %v11905_v15, %v8382_v35  ;;  %v8394_v39 = vsub.f32 %v9126_v21, %v8382_v35 }
 0x40e   : > { %v8385_v55 = vmul.f32 0.0625, %v8381_v47  ;;  %v8387_v56 = vmul.f32 %v8383_v61, %v8383_v61  ;;  %v8393_v57 = vsub.f32 %v9124_v19, %v8383_v61  ;;  %v8395_v4 = vsub.f32 %v9128_v22, %v8383_v61 }
 0x40f   : > { %v8388_v5 = vsub.f32 %v8384_v62, %v8386_v2 }
 0x410   : > { %v8389_v60 = vsub.f32 %v8385_v55, %v8387_v56 }
 0x411   : > { %v8390_v63 = vmax.f32 %v8388_v5, 0.0 }
 0x412   : > { %v8391_v6 = vmax.f32 %v8389_v60, 0.0 }
 0x413   : > { %v8396_v0 = vadd.f32 1e-05, %v8390_v63 }
 0x414   : > { %v8397_v1 = vadd.f32 1e-05, %v8391_v6 }
 0x415   : > { %10025 = vrsqrt.f32 %v8396_v0 }
 0x416   : > { %10027 = vrsqrt.f32 %v8397_v1 }
 0x41f   : > { %v10026_v7 = vpop.eup %10025 }
 0x420   : > { %v10028_v8 = vpop.eup %10027  ;;  %v8400_v9 = vmul.f32 %v10026_v7, %v8392_v3  ;;  %v8402_v10 = vmul.f32 %v10026_v7, %v8394_v39  ;;  %8426 = sbr.rel (!%p10188_p9) target bundleno = 1071 (0x42f), region = 88 }
 0x421   : > { %v8401_v11 = vmul.f32 %v10028_v8, %v8393_v57  ;;  %v8403_v12 = vmul.f32 %v10028_v8, %v8395_v4 }
 0x422   : > { %vm8404_vm0 = vcmp.ge.f32.partialorder %v8400_v9, 0.0  ;;  %vm8406_vm1 = vcmp.ge.f32.partialorder %v8402_v10, 0.0  ;;  %v8408_v13 = vmul.f32 0.2, %v8400_v9  ;;  %v8410_v14 = vmul.f32 0.2, %v8402_v10 }
 0x423   : > { %vm8405_vm2 = vcmp.ge.f32.partialorder %v8401_v11, 0.0  ;;  %vm8407_vm3 = vcmp.ge.f32.partialorder %v8403_v12, 0.0  ;;  %v8409_v15 = vmul.f32 0.2, %v8401_v11  ;;  %v8411_v16 = vmul.f32 0.2, %v8403_v12 }
 0x424   : > { %v8412_v17 = vsel %vm8404_vm0, %v8400_v9, %v8408_v13  ;;  %v8414_v18 = vsel %vm8406_vm1, %v8402_v10, %v8410_v14 }
 0x425   : > { %8416 = vst [vmem:[%s4373_s21] sm:$0xff] %v8412_v17  ;;  %8418 = vst [vmem:[%s4373_s21 + $0x10] sm:$0xff] %v8414_v18  ;;  %v8413_v19 = vsel %vm8405_vm2, %v8401_v11, %v8409_v15  ;;  %v8415_v20 = vsel %vm8407_vm3, %v8403_v12, %v8411_v16 }
 0x426   : > { %8417 = vst [vmem:[%s4373_s21 + $0x8] sm:$0xff] %v8413_v19  ;;  %8419 = vst [vmem:[%s4373_s21 + $0x18] sm:$0xff] %v8415_v20 }
 0x42c   : > { %v8444_v21 = vld [vmem:[%s4373_s21] sm:$0xff]  ;;  %v8448_v23 = vld [vmem:[%s4373_s21 + $0x10] sm:$0xff] }
 0x42d   : > { %v8446_v22 = vld [vmem:[%s4373_s21 + $0x8] sm:$0xff]  ;;  %v8450_v26 = vld [vmem:[%s4373_s21 + $0x18] sm:$0xff]  ;;  %8445 = vst [vmem:[%s8431_s28] sm:$0xff] %v8444_v21  ;;  %8449 = vst [vmem:[%s8431_s28 + $0x20] sm:$0xff] %v8448_v23 }
 0x42e   : > { %8447 = vst [vmem:[%s8431_s28 + $0x8] sm:$0xff] %v8446_v22  ;;  %8451 = vst [vmem:[%s8431_s28 + $0x28] sm:$0xff] %v8450_v26 }
 0x42f PF: > { %s13_s20 = sadd.s32 1, %s10099_s20   ;;  %s11951_s12 = smov %s10071_s13 }
 0x430   : > { %p10_p2 = scmp.ge.s32.totalorder %s13_s20, 6   ;;  %s11952_s13 = smov %s10193_s4 }
 0x431   : > { %s11953_s14 = smov %s10079_s15  ;;  %s11954_s15 = smov %s10182_s27 }
 0x432   : > { %s11955_s16 = smov %s10091_s18  ;;  %s11956_s17 = smov %s10095_s19 }
 0x433   : > { %s11957_s18 = smov %s11960_s22  ;;  %s11958_s19 = smov %s11964_s23 }
 0x434   :  { %12 = sbr.rel (!%p10_p2) target bundleno = 5 (0x5), region = 154 }

</bundles_post_ra>
